<compile_context>
chip_gen: v7x
topology: tpu7x:2x2x1
jax: 0.10.0
libtpu: 0.0.40
codegen_flags: <defaults>
</compile_context>

<pallas_src>
import jax
import jax.numpy as jnp
from jax.experimental import pallas as pl
from jax.experimental.pallas import tpu as pltpu

B = 4             # graphs per call
N = 16            # number of graph nodes per graph
IN_SIZE = 32      # in_size
HIDDEN = 64       # hidden_size (trans_linear_1/2 are Linear(64, 64) => must be 64)
H2 = 2 * HIDDEN   # encoder feature width (128)
NUM_LAYERS = 2    # encoder layers
OUT_SIZE = 4      # out_size
OUT_PAD = 128     # lane-dense padded output width
LN_EPS = 1e-5

GRAPHS_PER_STEP = 2            # 2 graphs per grid step (v7x: one step per TC)
M_STEP = GRAPHS_PER_STEP * N   # matmul rows per step
SRC_CHUNK = 8                  # source-node chunk in the pooled-max aggregation

# rows of the packed small-vector array (all zero-padded to 128 lanes)
ROW_B01, ROW_B2, ROW_BGCN, ROW_GCN_LNG, ROW_GCN_LNB, ROW_WGATE = range(6)
ROW_ENC = 6                            # + 4*l : [bpool, bias, ln_gamma, ln_beta]
ROW_BOUT = ROW_ENC + 4 * NUM_LAYERS    # 14
NUM_VEC_ROWS = ROW_BOUT + 1            # 15


def _layernorm(x, gamma, beta):
    mu = jnp.mean(x, axis=-1, keepdims=True)
    var = jnp.mean((x - mu) ** 2, axis=-1, keepdims=True)
    return (x - mu) * jax.lax.rsqrt(var + LN_EPS) * gamma + beta


def model_kernel(ahat_ref, h_ref,
                 w01_ref, w2_ref, w_gcn_ref,
                 enc_wpool_ref, enc_wsn_ref, w_out_ref, vecs_ref,
                 out_ref):
    Bg = GRAPHS_PER_STEP
    M = M_STEP

    A_hat = ahat_ref[0]                       # [M, M] block-diag normalized adjacency
    h = h_ref[0]                              # [M, IN_SIZE]

    b01 = vecs_ref[ROW_B01:ROW_B01 + 1, :HIDDEN]
    b2 = vecs_ref[ROW_B2:ROW_B2 + 1, :HIDDEN]
    b_gcn = vecs_ref[ROW_BGCN:ROW_BGCN + 1, :HIDDEN]
    gcn_lng = vecs_ref[ROW_GCN_LNG:ROW_GCN_LNG + 1, :HIDDEN]
    gcn_lnb = vecs_ref[ROW_GCN_LNB:ROW_GCN_LNB + 1, :HIDDEN]
    wg = vecs_ref[ROW_WGATE:ROW_WGATE + 1, :HIDDEN]
    b_out = vecs_ref[ROW_BOUT:ROW_BOUT + 1, :]

    # --- trans_in_linear ∘ trans_linear_1 (folded) -> LeakyReLU(0.05) -> trans_linear_2
    h = jnp.dot(h, w01_ref[...], preferred_element_type=jnp.float32) + b01
    h = jnp.where(h > 0, h, 0.05 * h)
    h = jnp.dot(h, w2_ref[...], preferred_element_type=jnp.float32) + b2     # [M, H]

    # --- gcn_layer: GraphConv(norm='both') with norm folded into block-diag A_hat
    agg = jnp.dot(A_hat, h, preferred_element_type=jnp.float32)              # [M, H]
    gcn = jnp.dot(agg, w_gcn_ref[...], preferred_element_type=jnp.float32) + b_gcn
    gcn = _layernorm(gcn, gcn_lng, gcn_lnb)
    loc_h = gcn - h

    # --- GlobalAttentionPooling: per-graph softmax over nodes ([Bg, N, .] views)
    # gate bias is dropped: the per-graph softmax is shift-invariant.
    h3 = h.reshape(Bg, N, HIDDEN)
    gate = jnp.sum(h3 * wg, axis=-1, keepdims=True)                          # [Bg, N, 1]
    gate = gate - jnp.max(gate, axis=1, keepdims=True)
    e = jnp.exp(gate)
    alpha = e / jnp.sum(e, axis=1, keepdims=True)
    pool = jnp.sum(alpha * h3, axis=1, keepdims=True)                        # [Bg, 1, H]
    glo_h = (pool - h3).reshape(M, HIDDEN)

    # --- Z = cat([loc_h, glo_h], dim=1)
    x = jnp.concatenate([loc_h, glo_h], axis=-1)                             # [M, 2H]

    # binary block-diag adjacency for the pooled-max aggregation (hoisted)
    adj = (A_hat > 0.0).astype(jnp.float32)                                  # [M, M]

    # --- Encoder: NUM_LAYERS x (SAGEConv(2H, 2H, 'pool') + LayerNorm + ReLU)
    for l in range(NUM_LAYERS):
        wp = enc_wpool_ref[l]                 # [2H, 2H]
        wsn = enc_wsn_ref[l]                  # [4H, 2H]  (= [W_self; W_neigh])
        base = ROW_ENC + 4 * l
        bp = vecs_ref[base:base + 1, :]
        bb = vecs_ref[base + 1:base + 2, :]
        lg = vecs_ref[base + 2:base + 3, :]
        lb = vecs_ref[base + 3:base + 4, :]

        # pool aggregator: relu(fc_pool(h_src)) then elementwise max over in-neighbors
        p = jnp.maximum(
            jnp.dot(x, wp, preferred_element_type=jnp.float32) + bp, 0.0)    # [M, 2H]

        # p >= 0 and adj is {0,1} block-diagonal, so adj*p followed by max is the
        # exact masked max, and zero-in-degree rows yield 0 (DGL fill value).
        # Chunked over SRC_CHUNK source nodes to cap the live intermediate.
        neigh = None
        for j0 in range(0, M, SRC_CHUNK):
            a_blk = adj[:, j0:j0 + SRC_CHUNK]                                # [M, CS]
            p_blk = p[j0:j0 + SRC_CHUNK, :]                                  # [CS, 2H]
            cand = jnp.max(a_blk[:, :, None] * p_blk[None, :, :], axis=1)    # [M, 2H]
            neigh = cand if neigh is None else jnp.maximum(neigh, cand)

        # fused self + neighbor projection: one K = 4H MXU pass
        xn = jnp.concatenate([x, neigh], axis=-1)                            # [M, 4H]
        rst = jnp.dot(xn, wsn, preferred_element_type=jnp.float32) + bb
        x = jnp.maximum(_layernorm(rst, lg, lb), 0.0)
        # TODO(synk): F.dropout skipped (inference-mode identity).

    # --- out_linear (lane-dense: padded to 128 output columns) ---
    out_ref[0] = jnp.dot(x, w_out_ref[...], preferred_element_type=jnp.float32) + b_out


def build_params(key):
    H = HIDDEN
    ks = list(jax.random.split(key, 20))

    def nrm(k, shape, scale=0.1):
        return (scale * jax.random.normal(k, shape)).astype(jnp.float32)

    return dict(
        w_in=nrm(ks[0], (IN_SIZE, H)),       b_in=nrm(ks[1], (1, H)),
        w1=nrm(ks[2], (64, 64)),             b1=nrm(ks[3], (1, 64)),
        w2=nrm(ks[4], (64, 64)),             b2=nrm(ks[5], (1, 64)),
        w_gcn=nrm(ks[6], (H, H)),            b_gcn=nrm(ks[7], (1, H)),
        ln_gcn_g=jnp.ones((1, H), jnp.float32),
        ln_gcn_b=jnp.zeros((1, H), jnp.float32),
        w_gate=nrm(ks[8], (H, 1)),           b_gate=nrm(ks[9], (1, 1)),
        enc_wpool=nrm(ks[10], (NUM_LAYERS, H2, H2)),
        enc_bpool=nrm(ks[11], (NUM_LAYERS, 1, H2)),
        enc_wself=nrm(ks[12], (NUM_LAYERS, H2, H2)),
        enc_wneigh=nrm(ks[13], (NUM_LAYERS, H2, H2)),
        enc_bias=nrm(ks[14], (NUM_LAYERS, 1, H2)),
        enc_lng=jnp.ones((NUM_LAYERS, 1, H2), jnp.float32),
        enc_lnb=jnp.zeros((NUM_LAYERS, 1, H2), jnp.float32),
        w_out=nrm(ks[15], (H2, OUT_SIZE)),   b_out=nrm(ks[16], (1, OUT_SIZE)),
    )


def fold_params(p):
    """Host-side algebraic folds / packing (outside the kernel)."""
    # trans_in_linear ∘ trans_linear_1 (no nonlinearity between them)
    w01 = p["w_in"] @ p["w1"]                                            # [IN_SIZE, H]
    b01 = p["b_in"] @ p["w1"] + p["b1"]                                  # [1, H]
    # SAGE self/neighbor weights stacked along the contraction dim
    enc_wsn = jnp.concatenate([p["enc_wself"], p["enc_wneigh"]], axis=1)  # [L, 4H, 2H]
    # lane-dense padded output projection
    w_out_pad = jnp.pad(p["w_out"], ((0, 0), (0, OUT_PAD - OUT_SIZE)))    # [2H, 128]

    def row(v):  # zero-pad a [1, k] row vector to [1, 128]
        return jnp.pad(v, ((0, 0), (0, OUT_PAD - v.shape[1])))

    rows = [row(b01), row(p["b2"]), row(p["b_gcn"]),
            row(p["ln_gcn_g"]), row(p["ln_gcn_b"]), row(p["w_gate"].T)]
    for l in range(NUM_LAYERS):
        rows += [p["enc_bpool"][l], p["enc_bias"][l], p["enc_lng"][l], p["enc_lnb"][l]]
    rows.append(row(p["b_out"]))
    vecs = jnp.concatenate(rows, axis=0)                                  # [15, 128]

    return dict(w01=w01, w2=p["w2"], w_gcn=p["w_gcn"],
                enc_wpool=p["enc_wpool"], enc_wsn=enc_wsn,
                w_out=w_out_pad, vecs=vecs)


def model_forward(A, h, params):
    n_graphs = A.shape[0]
    Bg = GRAPHS_PER_STEP
    assert n_graphs % Bg == 0, "batch must be a multiple of GRAPHS_PER_STEP"
    n_steps = n_graphs // Bg
    M = Bg * N

    # GraphConv 'both' normalization (degrees clamped at 1, as DGL does) folded into
    # a per-step block-diagonal A_hat so the GCN aggregation is one flat matmul.
    din = jnp.sum(A, axis=2)                                  # [B, N] in-degree (dst)
    dout = jnp.sum(A, axis=1)                                 # [B, N] out-degree (src)
    A_hat = (A
             * jax.lax.rsqrt(jnp.maximum(din, 1.0))[:, :, None]
             * jax.lax.rsqrt(jnp.maximum(dout, 1.0))[:, None, :])
    eye = jnp.eye(Bg, dtype=jnp.float32)
    A_bd = jnp.einsum("gh,sgij->sgihj", eye,
                      A_hat.reshape(n_steps, Bg, N, N)).reshape(n_steps, M, M)

    h_flat = h.reshape(n_steps, M, IN_SIZE)

    fp = fold_params(params)
    weights = (fp["w01"], fp["w2"], fp["w_gcn"],
               fp["enc_wpool"], fp["enc_wsn"], fp["w_out"], fp["vecs"])

    def _resident(arr):
        nd = arr.ndim
        return pl.BlockSpec(arr.shape, lambda b, _nd=nd: (0,) * _nd)

    in_specs = ([pl.BlockSpec((1, M, M), lambda b: (b, 0, 0)),
                 pl.BlockSpec((1, M, IN_SIZE), lambda b: (b, 0, 0))]
                + [_resident(w) for w in weights])
    out_specs = pl.BlockSpec((1, M, OUT_PAD), lambda b: (b, 0, 0))

    out = pl.pallas_call(
        model_kernel,
        out_shape=jax.ShapeDtypeStruct((n_steps, M, OUT_PAD), jnp.float32),
        grid=(n_steps,),
        in_specs=in_specs,
        out_specs=out_specs,
        compiler_params=pltpu.CompilerParams(
            dimension_semantics=("parallel",)),
    )(A_bd, h_flat, *weights)

    # un-pad the lane-dense output outside the kernel
    return out.reshape(n_graphs, N, OUT_PAD)[..., :OUT_SIZE]


if __name__ == "__main__":
    key = jax.random.PRNGKey(0)
    k_adj, k_h, k_params = jax.random.split(key, 3)

    # deterministic synthetic batch of graphs + node features
    A = (jax.random.uniform(k_adj, (B, N, N)) < 0.3).astype(jnp.float32)  # A[b, dst, src]
    h = jax.random.normal(k_h, (B, N, IN_SIZE), dtype=jnp.float32)
    params = build_params(k_params)

    score = jax.jit(model_forward)(A, h, params)
    jax.block_until_ready(score)
    assert score.shape == (B, N, OUT_SIZE)
    print("KERNEL_OK")
</pallas_src>

<mosaic_0001>
module attributes {stable_mosaic.version = 11 : i64} {
  func.func @model_kernel(%arg0: i32, %arg1: memref<1x32x32xf32, #tpu.memory_space<vmem>>, %arg2: memref<1x32x32xf32, #tpu.memory_space<vmem>>, %arg3: memref<32x64xf32, #tpu.memory_space<vmem>>, %arg4: memref<64x64xf32, #tpu.memory_space<vmem>>, %arg5: memref<64x64xf32, #tpu.memory_space<vmem>>, %arg6: memref<2x128x128xf32, #tpu.memory_space<vmem>>, %arg7: memref<2x256x128xf32, #tpu.memory_space<vmem>>, %arg8: memref<128x128xf32, #tpu.memory_space<vmem>>, %arg9: memref<15x128xf32, #tpu.memory_space<vmem>>, %arg10: memref<1x32x128xf32, #tpu.memory_space<vmem>>) attributes {dimension_semantics = [#tpu.dimension_semantics<parallel>], iteration_bounds = array<i64: 2>, scalar_prefetch = 0 : i64, scratch_operands = 0 : i64, tpu.core_type = #tpu.core_type<tc>, window_params = [{transform_indices = @transform_0, window_bounds = array<i64: 1, 32, 32>}, {transform_indices = @transform_1, window_bounds = array<i64: 1, 32, 32>}, {pipeline_mode = #tpu.pipeline_mode<synchronous>, transform_indices = @transform_2, window_bounds = array<i64: 32, 64>}, {pipeline_mode = #tpu.pipeline_mode<synchronous>, transform_indices = @transform_3, window_bounds = array<i64: 64, 64>}, {pipeline_mode = #tpu.pipeline_mode<synchronous>, transform_indices = @transform_4, window_bounds = array<i64: 64, 64>}, {pipeline_mode = #tpu.pipeline_mode<synchronous>, transform_indices = @transform_5, window_bounds = array<i64: 2, 128, 128>}, {pipeline_mode = #tpu.pipeline_mode<synchronous>, transform_indices = @transform_6, window_bounds = array<i64: 2, 256, 128>}, {pipeline_mode = #tpu.pipeline_mode<synchronous>, transform_indices = @transform_7, window_bounds = array<i64: 128, 128>}, {pipeline_mode = #tpu.pipeline_mode<synchronous>, transform_indices = @transform_8, window_bounds = array<i64: 15, 128>}, {transform_indices = @transform_9, window_bounds = array<i64: 1, 32, 128>}]} {
    %c0 = arith.constant 0 : index
    %c0_0 = arith.constant 0 : index
    %c0_1 = arith.constant 0 : index
    %0 = vector.load %arg1[%c0, %c0_0, %c0_1] : memref<1x32x32xf32, #tpu.memory_space<vmem>>, vector<1x32x32xf32>
    %1 = vector.shape_cast %0 : vector<1x32x32xf32> to vector<32x32xf32>
    %c0_2 = arith.constant 0 : index
    %c0_3 = arith.constant 0 : index
    %c0_4 = arith.constant 0 : index
    %2 = vector.load %arg2[%c0_2, %c0_3, %c0_4] : memref<1x32x32xf32, #tpu.memory_space<vmem>>, vector<1x32x32xf32>
    %3 = vector.shape_cast %2 : vector<1x32x32xf32> to vector<32x32xf32>
    %c0_5 = arith.constant 0 : index
    %c0_6 = arith.constant 0 : index
    %4 = vector.load %arg9[%c0_5, %c0_6] : memref<15x128xf32, #tpu.memory_space<vmem>>, vector<1x64xf32>
    %c1 = arith.constant 1 : index
    %c0_7 = arith.constant 0 : index
    %5 = vector.load %arg9[%c1, %c0_7] : memref<15x128xf32, #tpu.memory_space<vmem>>, vector<1x64xf32>
    %c2 = arith.constant 2 : index
    %c0_8 = arith.constant 0 : index
    %6 = vector.load %arg9[%c2, %c0_8] : memref<15x128xf32, #tpu.memory_space<vmem>>, vector<1x64xf32>
    %c3 = arith.constant 3 : index
    %c0_9 = arith.constant 0 : index
    %7 = vector.load %arg9[%c3, %c0_9] : memref<15x128xf32, #tpu.memory_space<vmem>>, vector<1x64xf32>
    %c4 = arith.constant 4 : index
    %c0_10 = arith.constant 0 : index
    %8 = vector.load %arg9[%c4, %c0_10] : memref<15x128xf32, #tpu.memory_space<vmem>>, vector<1x64xf32>
    %c5 = arith.constant 5 : index
    %c0_11 = arith.constant 0 : index
    %9 = vector.load %arg9[%c5, %c0_11] : memref<15x128xf32, #tpu.memory_space<vmem>>, vector<1x64xf32>
    %c14 = arith.constant 14 : index
    %c0_12 = arith.constant 0 : index
    %10 = vector.load %arg9[%c14, %c0_12] : memref<15x128xf32, #tpu.memory_space<vmem>>, vector<1x128xf32>
    %c0_13 = arith.constant 0 : index
    %c0_14 = arith.constant 0 : index
    %11 = vector.load %arg3[%c0_13, %c0_14] : memref<32x64xf32, #tpu.memory_space<vmem>>, vector<32x64xf32>
    %cst = arith.constant dense<0.000000e+00> : vector<32x64xf32>
    %12 = tpu.matmul %3, %11, %cst {dimension_numbers = #tpu.dot_dimension_numbers<[1], [0], [0], [1], [0, 0, 1, 1], [], []>} : vector<32x32xf32>, vector<32x64xf32>, vector<32x64xf32> -> vector<32x64xf32>
    %13 = vector.broadcast %4 : vector<1x64xf32> to vector<32x64xf32>
    %14 = arith.addf %12, %13 : vector<32x64xf32>
    %cst_15 = arith.constant 0.000000e+00 : f32
    %15 = vector.broadcast %cst_15 : f32 to vector<32x64xf32>
    %16 = arith.cmpf ogt, %14, %15 : vector<32x64xf32>
    %cst_16 = arith.constant 5.000000e-02 : f32
    %17 = vector.broadcast %cst_16 : f32 to vector<32x64xf32>
    %18 = arith.mulf %17, %14 : vector<32x64xf32>
    %19 = arith.select %16, %14, %18 : vector<32x64xi1>, vector<32x64xf32>
    %c0_17 = arith.constant 0 : index
    %c0_18 = arith.constant 0 : index
    %20 = vector.load %arg4[%c0_17, %c0_18] : memref<64x64xf32, #tpu.memory_space<vmem>>, vector<64x64xf32>
    %cst_19 = arith.constant dense<0.000000e+00> : vector<32x64xf32>
    %21 = tpu.matmul %19, %20, %cst_19 {dimension_numbers = #tpu.dot_dimension_numbers<[1], [0], [0], [1], [0, 0, 1, 1], [], []>} : vector<32x64xf32>, vector<64x64xf32>, vector<32x64xf32> -> vector<32x64xf32>
    %22 = vector.broadcast %5 : vector<1x64xf32> to vector<32x64xf32>
    %23 = arith.addf %21, %22 : vector<32x64xf32>
    %cst_20 = arith.constant dense<0.000000e+00> : vector<32x64xf32>
    %24 = tpu.matmul %1, %23, %cst_20 {dimension_numbers = #tpu.dot_dimension_numbers<[1], [0], [0], [1], [0, 0, 1, 1], [], []>} : vector<32x32xf32>, vector<32x64xf32>, vector<32x64xf32> -> vector<32x64xf32>
    %c0_21 = arith.constant 0 : index
    %c0_22 = arith.constant 0 : index
    %25 = vector.load %arg5[%c0_21, %c0_22] : memref<64x64xf32, #tpu.memory_space<vmem>>, vector<64x64xf32>
    %cst_23 = arith.constant dense<0.000000e+00> : vector<32x64xf32>
    %26 = tpu.matmul %24, %25, %cst_23 {dimension_numbers = #tpu.dot_dimension_numbers<[1], [0], [0], [1], [0, 0, 1, 1], [], []>} : vector<32x64xf32>, vector<64x64xf32>, vector<32x64xf32> -> vector<32x64xf32>
    %27 = vector.broadcast %6 : vector<1x64xf32> to vector<32x64xf32>
    %28 = arith.addf %26, %27 : vector<32x64xf32>
    %cst_24 = arith.constant dense<0.000000e+00> : vector<32xf32>
    %29 = vector.multi_reduction <add>, %28, %cst_24 [1] : vector<32x64xf32> to vector<32xf32>
    %30 = vector.shape_cast %29 : vector<32xf32> to vector<32x1xf32>
    %cst_25 = arith.constant 6.400000e+01 : f32
    %31 = vector.broadcast %cst_25 : f32 to vector<32x1xf32>
    %32 = arith.divf %30, %31 : vector<32x1xf32>
    %33 = vector.broadcast %32 : vector<32x1xf32> to vector<32x64xf32>
    %34 = arith.subf %28, %33 : vector<32x64xf32>
    %35 = arith.mulf %34, %34 : vector<32x64xf32>
    %cst_26 = arith.constant dense<0.000000e+00> : vector<32xf32>
    %36 = vector.multi_reduction <add>, %35, %cst_26 [1] : vector<32x64xf32> to vector<32xf32>
    %37 = vector.shape_cast %36 : vector<32xf32> to vector<32x1xf32>
    %cst_27 = arith.constant 6.400000e+01 : f32
    %38 = vector.broadcast %cst_27 : f32 to vector<32x1xf32>
    %39 = arith.divf %37, %38 : vector<32x1xf32>
    %40 = vector.broadcast %32 : vector<32x1xf32> to vector<32x64xf32>
    %41 = arith.subf %28, %40 : vector<32x64xf32>
    %cst_28 = arith.constant 9.99999974E-6 : f32
    %42 = vector.broadcast %cst_28 : f32 to vector<32x1xf32>
    %43 = arith.addf %39, %42 : vector<32x1xf32>
    %44 = math.rsqrt %43 : vector<32x1xf32>
    %45 = vector.broadcast %44 : vector<32x1xf32> to vector<32x64xf32>
    %46 = arith.mulf %41, %45 : vector<32x64xf32>
    %47 = vector.broadcast %7 : vector<1x64xf32> to vector<32x64xf32>
    %48 = arith.mulf %46, %47 : vector<32x64xf32>
    %49 = vector.broadcast %8 : vector<1x64xf32> to vector<32x64xf32>
    %50 = arith.addf %48, %49 : vector<32x64xf32>
    %51 = arith.subf %50, %23 : vector<32x64xf32>
    %52 = vector.shape_cast %23 : vector<32x64xf32> to vector<2x16x64xf32>
    %53 = vector.shape_cast %9 : vector<1x64xf32> to vector<1x1x64xf32>
    %54 = vector.broadcast %53 : vector<1x1x64xf32> to vector<2x16x64xf32>
    %55 = arith.mulf %52, %54 : vector<2x16x64xf32>
    %cst_29 = arith.constant dense<0.000000e+00> : vector<2x16xf32>
    %56 = vector.multi_reduction <add>, %55, %cst_29 [2] : vector<2x16x64xf32> to vector<2x16xf32>
    %57 = vector.shape_cast %56 : vector<2x16xf32> to vector<2x16x1xf32>
    %cst_30 = arith.constant dense<0xFF800000> : vector<2x1xf32>
    %58 = vector.multi_reduction <maximumf>, %57, %cst_30 [1] : vector<2x16x1xf32> to vector<2x1xf32>
    %59 = vector.shape_cast %58 : vector<2x1xf32> to vector<2x1x1xf32>
    %60 = vector.broadcast %59 : vector<2x1x1xf32> to vector<2x16x1xf32>
    %61 = arith.subf %57, %60 : vector<2x16x1xf32>
    %62 = math.exp %61 : vector<2x16x1xf32>
    %cst_31 = arith.constant dense<0.000000e+00> : vector<2x1xf32>
    %63 = vector.multi_reduction <add>, %62, %cst_31 [1] : vector<2x16x1xf32> to vector<2x1xf32>
    %64 = vector.shape_cast %63 : vector<2x1xf32> to vector<2x1x1xf32>
    %65 = vector.broadcast %64 : vector<2x1x1xf32> to vector<2x16x1xf32>
    %66 = arith.divf %62, %65 : vector<2x16x1xf32>
    %67 = vector.broadcast %66 : vector<2x16x1xf32> to vector<2x16x64xf32>
    %68 = arith.mulf %67, %52 : vector<2x16x64xf32>
    %cst_32 = arith.constant dense<0.000000e+00> : vector<2x64xf32>
    %69 = vector.multi_reduction <add>, %68, %cst_32 [1] : vector<2x16x64xf32> to vector<2x64xf32>
    %70 = vector.shape_cast %69 : vector<2x64xf32> to vector<2x1x64xf32>
    %71 = vector.broadcast %70 : vector<2x1x64xf32> to vector<2x16x64xf32>
    %72 = arith.subf %71, %52 : vector<2x16x64xf32>
    %73 = vector.shape_cast %72 : vector<2x16x64xf32> to vector<32x64xf32>
    %74 = tpu.concatenate %51, %73 in 1 : vector<32x64xf32>, vector<32x64xf32> -> vector<32x128xf32>
    %cst_33 = arith.constant 0.000000e+00 : f32
    %75 = vector.broadcast %cst_33 : f32 to vector<32x32xf32>
    %76 = arith.cmpf ogt, %1, %75 : vector<32x32xf32>
    %77 = arith.extui %76 : vector<32x32xi1> to vector<32x32xi32>
    %78 = arith.sitofp %77 : vector<32x32xi32> to vector<32x32xf32>
    %c0_34 = arith.constant 0 : index
    %c0_35 = arith.constant 0 : index
    %c0_36 = arith.constant 0 : index
    %79 = vector.load %arg6[%c0_34, %c0_35, %c0_36] : memref<2x128x128xf32, #tpu.memory_space<vmem>>, vector<1x128x128xf32>
    %80 = vector.shape_cast %79 : vector<1x128x128xf32> to vector<128x128xf32>
    %c0_37 = arith.constant 0 : index
    %c0_38 = arith.constant 0 : index
    %c0_39 = arith.constant 0 : index
    %81 = vector.load %arg7[%c0_37, %c0_38, %c0_39] : memref<2x256x128xf32, #tpu.memory_space<vmem>>, vector<1x256x128xf32>
    %82 = vector.shape_cast %81 : vector<1x256x128xf32> to vector<256x128xf32>
    %c6 = arith.constant 6 : index
    %c0_40 = arith.constant 0 : index
    %83 = vector.load %arg9[%c6, %c0_40] : memref<15x128xf32, #tpu.memory_space<vmem>>, vector<1x128xf32>
    %c7 = arith.constant 7 : index
    %c0_41 = arith.constant 0 : index
    %84 = vector.load %arg9[%c7, %c0_41] : memref<15x128xf32, #tpu.memory_space<vmem>>, vector<1x128xf32>
    %c8 = arith.constant 8 : index
    %c0_42 = arith.constant 0 : index
    %85 = vector.load %arg9[%c8, %c0_42] : memref<15x128xf32, #tpu.memory_space<vmem>>, vector<1x128xf32>
    %c9 = arith.constant 9 : index
    %c0_43 = arith.constant 0 : index
    %86 = vector.load %arg9[%c9, %c0_43] : memref<15x128xf32, #tpu.memory_space<vmem>>, vector<1x128xf32>
    %cst_44 = arith.constant dense<0.000000e+00> : vector<32x128xf32>
    %87 = tpu.matmul %74, %80, %cst_44 {dimension_numbers = #tpu.dot_dimension_numbers<[1], [0], [0], [1], [0, 0, 1, 1], [], []>} : vector<32x128xf32>, vector<128x128xf32>, vector<32x128xf32> -> vector<32x128xf32>
    %88 = vector.broadcast %83 : vector<1x128xf32> to vector<32x128xf32>
    %89 = arith.addf %87, %88 : vector<32x128xf32>
    %cst_45 = arith.constant 0.000000e+00 : f32
    %90 = vector.broadcast %cst_45 : f32 to vector<32x128xf32>
    %91 = arith.maximumf %89, %90 : vector<32x128xf32>
    %92 = vector.extract_strided_slice %78 {offsets = [0, 0], sizes = [32, 8], strides = [1, 1]} : vector<32x32xf32> to vector<32x8xf32>
    %93 = vector.extract_strided_slice %91 {offsets = [0, 0], sizes = [8, 128], strides = [1, 1]} : vector<32x128xf32> to vector<8x128xf32>
    %94 = vector.shape_cast %92 : vector<32x8xf32> to vector<32x8x1xf32>
    %95 = vector.shape_cast %93 : vector<8x128xf32> to vector<1x8x128xf32>
    %96 = vector.broadcast %94 : vector<32x8x1xf32> to vector<32x8x128xf32>
    %97 = vector.broadcast %95 : vector<1x8x128xf32> to vector<32x8x128xf32>
    %98 = arith.mulf %96, %97 : vector<32x8x128xf32>
    %cst_46 = arith.constant dense<0xFF800000> : vector<32x128xf32>
    %99 = vector.multi_reduction <maximumf>, %98, %cst_46 [1] : vector<32x8x128xf32> to vector<32x128xf32>
    %100 = vector.extract_strided_slice %78 {offsets = [0, 8], sizes = [32, 8], strides = [1, 1]} : vector<32x32xf32> to vector<32x8xf32>
    %101 = vector.extract_strided_slice %91 {offsets = [8, 0], sizes = [8, 128], strides = [1, 1]} : vector<32x128xf32> to vector<8x128xf32>
    %102 = vector.shape_cast %100 : vector<32x8xf32> to vector<32x8x1xf32>
    %103 = vector.shape_cast %101 : vector<8x128xf32> to vector<1x8x128xf32>
    %104 = vector.broadcast %102 : vector<32x8x1xf32> to vector<32x8x128xf32>
    %105 = vector.broadcast %103 : vector<1x8x128xf32> to vector<32x8x128xf32>
    %106 = arith.mulf %104, %105 : vector<32x8x128xf32>
    %cst_47 = arith.constant dense<0xFF800000> : vector<32x128xf32>
    %107 = vector.multi_reduction <maximumf>, %106, %cst_47 [1] : vector<32x8x128xf32> to vector<32x128xf32>
    %108 = arith.maximumf %99, %107 : vector<32x128xf32>
    %109 = vector.extract_strided_slice %78 {offsets = [0, 16], sizes = [32, 8], strides = [1, 1]} : vector<32x32xf32> to vector<32x8xf32>
    %110 = vector.extract_strided_slice %91 {offsets = [16, 0], sizes = [8, 128], strides = [1, 1]} : vector<32x128xf32> to vector<8x128xf32>
    %111 = vector.shape_cast %109 : vector<32x8xf32> to vector<32x8x1xf32>
    %112 = vector.shape_cast %110 : vector<8x128xf32> to vector<1x8x128xf32>
    %113 = vector.broadcast %111 : vector<32x8x1xf32> to vector<32x8x128xf32>
    %114 = vector.broadcast %112 : vector<1x8x128xf32> to vector<32x8x128xf32>
    %115 = arith.mulf %113, %114 : vector<32x8x128xf32>
    %cst_48 = arith.constant dense<0xFF800000> : vector<32x128xf32>
    %116 = vector.multi_reduction <maximumf>, %115, %cst_48 [1] : vector<32x8x128xf32> to vector<32x128xf32>
    %117 = arith.maximumf %108, %116 : vector<32x128xf32>
    %118 = vector.extract_strided_slice %78 {offsets = [0, 24], sizes = [32, 8], strides = [1, 1]} : vector<32x32xf32> to vector<32x8xf32>
    %119 = vector.extract_strided_slice %91 {offsets = [24, 0], sizes = [8, 128], strides = [1, 1]} : vector<32x128xf32> to vector<8x128xf32>
    %120 = vector.shape_cast %118 : vector<32x8xf32> to vector<32x8x1xf32>
    %121 = vector.shape_cast %119 : vector<8x128xf32> to vector<1x8x128xf32>
    %122 = vector.broadcast %120 : vector<32x8x1xf32> to vector<32x8x128xf32>
    %123 = vector.broadcast %121 : vector<1x8x128xf32> to vector<32x8x128xf32>
    %124 = arith.mulf %122, %123 : vector<32x8x128xf32>
    %cst_49 = arith.constant dense<0xFF800000> : vector<32x128xf32>
    %125 = vector.multi_reduction <maximumf>, %124, %cst_49 [1] : vector<32x8x128xf32> to vector<32x128xf32>
    %126 = arith.maximumf %117, %125 : vector<32x128xf32>
    %127 = tpu.concatenate %74, %126 in 1 : vector<32x128xf32>, vector<32x128xf32> -> vector<32x256xf32>
    %cst_50 = arith.constant dense<0.000000e+00> : vector<32x128xf32>
    %128 = tpu.matmul %127, %82, %cst_50 {dimension_numbers = #tpu.dot_dimension_numbers<[1], [0], [0], [1], [0, 0, 1, 1], [], []>} : vector<32x256xf32>, vector<256x128xf32>, vector<32x128xf32> -> vector<32x128xf32>
    %129 = vector.broadcast %84 : vector<1x128xf32> to vector<32x128xf32>
    %130 = arith.addf %128, %129 : vector<32x128xf32>
    %cst_51 = arith.constant dense<0.000000e+00> : vector<32xf32>
    %131 = vector.multi_reduction <add>, %130, %cst_51 [1] : vector<32x128xf32> to vector<32xf32>
    %132 = vector.shape_cast %131 : vector<32xf32> to vector<32x1xf32>
    %cst_52 = arith.constant 1.280000e+02 : f32
    %133 = vector.broadcast %cst_52 : f32 to vector<32x1xf32>
    %134 = arith.divf %132, %133 : vector<32x1xf32>
    %135 = vector.broadcast %134 : vector<32x1xf32> to vector<32x128xf32>
    %136 = arith.subf %130, %135 : vector<32x128xf32>
    %137 = arith.mulf %136, %136 : vector<32x128xf32>
    %cst_53 = arith.constant dense<0.000000e+00> : vector<32xf32>
    %138 = vector.multi_reduction <add>, %137, %cst_53 [1] : vector<32x128xf32> to vector<32xf32>
    %139 = vector.shape_cast %138 : vector<32xf32> to vector<32x1xf32>
    %cst_54 = arith.constant 1.280000e+02 : f32
    %140 = vector.broadcast %cst_54 : f32 to vector<32x1xf32>
    %141 = arith.divf %139, %140 : vector<32x1xf32>
    %142 = vector.broadcast %134 : vector<32x1xf32> to vector<32x128xf32>
    %143 = arith.subf %130, %142 : vector<32x128xf32>
    %cst_55 = arith.constant 9.99999974E-6 : f32
    %144 = vector.broadcast %cst_55 : f32 to vector<32x1xf32>
    %145 = arith.addf %141, %144 : vector<32x1xf32>
    %146 = math.rsqrt %145 : vector<32x1xf32>
    %147 = vector.broadcast %146 : vector<32x1xf32> to vector<32x128xf32>
    %148 = arith.mulf %143, %147 : vector<32x128xf32>
    %149 = vector.broadcast %85 : vector<1x128xf32> to vector<32x128xf32>
    %150 = arith.mulf %148, %149 : vector<32x128xf32>
    %151 = vector.broadcast %86 : vector<1x128xf32> to vector<32x128xf32>
    %152 = arith.addf %150, %151 : vector<32x128xf32>
    %cst_56 = arith.constant 0.000000e+00 : f32
    %153 = vector.broadcast %cst_56 : f32 to vector<32x128xf32>
    %154 = arith.maximumf %152, %153 : vector<32x128xf32>
    %c1_57 = arith.constant 1 : index
    %c0_58 = arith.constant 0 : index
    %c0_59 = arith.constant 0 : index
    %155 = vector.load %arg6[%c1_57, %c0_58, %c0_59] : memref<2x128x128xf32, #tpu.memory_space<vmem>>, vector<1x128x128xf32>
    %156 = vector.shape_cast %155 : vector<1x128x128xf32> to vector<128x128xf32>
    %c1_60 = arith.constant 1 : index
    %c0_61 = arith.constant 0 : index
    %c0_62 = arith.constant 0 : index
    %157 = vector.load %arg7[%c1_60, %c0_61, %c0_62] : memref<2x256x128xf32, #tpu.memory_space<vmem>>, vector<1x256x128xf32>
    %158 = vector.shape_cast %157 : vector<1x256x128xf32> to vector<256x128xf32>
    %c10 = arith.constant 10 : index
    %c0_63 = arith.constant 0 : index
    %159 = vector.load %arg9[%c10, %c0_63] : memref<15x128xf32, #tpu.memory_space<vmem>>, vector<1x128xf32>
    %c11 = arith.constant 11 : index
    %c0_64 = arith.constant 0 : index
    %160 = vector.load %arg9[%c11, %c0_64] : memref<15x128xf32, #tpu.memory_space<vmem>>, vector<1x128xf32>
    %c12 = arith.constant 12 : index
    %c0_65 = arith.constant 0 : index
    %161 = vector.load %arg9[%c12, %c0_65] : memref<15x128xf32, #tpu.memory_space<vmem>>, vector<1x128xf32>
    %c13 = arith.constant 13 : index
    %c0_66 = arith.constant 0 : index
    %162 = vector.load %arg9[%c13, %c0_66] : memref<15x128xf32, #tpu.memory_space<vmem>>, vector<1x128xf32>
    %cst_67 = arith.constant dense<0.000000e+00> : vector<32x128xf32>
    %163 = tpu.matmul %154, %156, %cst_67 {dimension_numbers = #tpu.dot_dimension_numbers<[1], [0], [0], [1], [0, 0, 1, 1], [], []>} : vector<32x128xf32>, vector<128x128xf32>, vector<32x128xf32> -> vector<32x128xf32>
    %164 = vector.broadcast %159 : vector<1x128xf32> to vector<32x128xf32>
    %165 = arith.addf %163, %164 : vector<32x128xf32>
    %cst_68 = arith.constant 0.000000e+00 : f32
    %166 = vector.broadcast %cst_68 : f32 to vector<32x128xf32>
    %167 = arith.maximumf %165, %166 : vector<32x128xf32>
    %168 = vector.extract_strided_slice %78 {offsets = [0, 0], sizes = [32, 8], strides = [1, 1]} : vector<32x32xf32> to vector<32x8xf32>
    %169 = vector.extract_strided_slice %167 {offsets = [0, 0], sizes = [8, 128], strides = [1, 1]} : vector<32x128xf32> to vector<8x128xf32>
    %170 = vector.shape_cast %168 : vector<32x8xf32> to vector<32x8x1xf32>
    %171 = vector.shape_cast %169 : vector<8x128xf32> to vector<1x8x128xf32>
    %172 = vector.broadcast %170 : vector<32x8x1xf32> to vector<32x8x128xf32>
    %173 = vector.broadcast %171 : vector<1x8x128xf32> to vector<32x8x128xf32>
    %174 = arith.mulf %172, %173 : vector<32x8x128xf32>
    %cst_69 = arith.constant dense<0xFF800000> : vector<32x128xf32>
    %175 = vector.multi_reduction <maximumf>, %174, %cst_69 [1] : vector<32x8x128xf32> to vector<32x128xf32>
    %176 = vector.extract_strided_slice %78 {offsets = [0, 8], sizes = [32, 8], strides = [1, 1]} : vector<32x32xf32> to vector<32x8xf32>
    %177 = vector.extract_strided_slice %167 {offsets = [8, 0], sizes = [8, 128], strides = [1, 1]} : vector<32x128xf32> to vector<8x128xf32>
    %178 = vector.shape_cast %176 : vector<32x8xf32> to vector<32x8x1xf32>
    %179 = vector.shape_cast %177 : vector<8x128xf32> to vector<1x8x128xf32>
    %180 = vector.broadcast %178 : vector<32x8x1xf32> to vector<32x8x128xf32>
    %181 = vector.broadcast %179 : vector<1x8x128xf32> to vector<32x8x128xf32>
    %182 = arith.mulf %180, %181 : vector<32x8x128xf32>
    %cst_70 = arith.constant dense<0xFF800000> : vector<32x128xf32>
    %183 = vector.multi_reduction <maximumf>, %182, %cst_70 [1] : vector<32x8x128xf32> to vector<32x128xf32>
    %184 = arith.maximumf %175, %183 : vector<32x128xf32>
    %185 = vector.extract_strided_slice %78 {offsets = [0, 16], sizes = [32, 8], strides = [1, 1]} : vector<32x32xf32> to vector<32x8xf32>
    %186 = vector.extract_strided_slice %167 {offsets = [16, 0], sizes = [8, 128], strides = [1, 1]} : vector<32x128xf32> to vector<8x128xf32>
    %187 = vector.shape_cast %185 : vector<32x8xf32> to vector<32x8x1xf32>
    %188 = vector.shape_cast %186 : vector<8x128xf32> to vector<1x8x128xf32>
    %189 = vector.broadcast %187 : vector<32x8x1xf32> to vector<32x8x128xf32>
    %190 = vector.broadcast %188 : vector<1x8x128xf32> to vector<32x8x128xf32>
    %191 = arith.mulf %189, %190 : vector<32x8x128xf32>
    %cst_71 = arith.constant dense<0xFF800000> : vector<32x128xf32>
    %192 = vector.multi_reduction <maximumf>, %191, %cst_71 [1] : vector<32x8x128xf32> to vector<32x128xf32>
    %193 = arith.maximumf %184, %192 : vector<32x128xf32>
    %194 = vector.extract_strided_slice %78 {offsets = [0, 24], sizes = [32, 8], strides = [1, 1]} : vector<32x32xf32> to vector<32x8xf32>
    %195 = vector.extract_strided_slice %167 {offsets = [24, 0], sizes = [8, 128], strides = [1, 1]} : vector<32x128xf32> to vector<8x128xf32>
    %196 = vector.shape_cast %194 : vector<32x8xf32> to vector<32x8x1xf32>
    %197 = vector.shape_cast %195 : vector<8x128xf32> to vector<1x8x128xf32>
    %198 = vector.broadcast %196 : vector<32x8x1xf32> to vector<32x8x128xf32>
    %199 = vector.broadcast %197 : vector<1x8x128xf32> to vector<32x8x128xf32>
    %200 = arith.mulf %198, %199 : vector<32x8x128xf32>
    %cst_72 = arith.constant dense<0xFF800000> : vector<32x128xf32>
    %201 = vector.multi_reduction <maximumf>, %200, %cst_72 [1] : vector<32x8x128xf32> to vector<32x128xf32>
    %202 = arith.maximumf %193, %201 : vector<32x128xf32>
    %203 = tpu.concatenate %154, %202 in 1 : vector<32x128xf32>, vector<32x128xf32> -> vector<32x256xf32>
    %cst_73 = arith.constant dense<0.000000e+00> : vector<32x128xf32>
    %204 = tpu.matmul %203, %158, %cst_73 {dimension_numbers = #tpu.dot_dimension_numbers<[1], [0], [0], [1], [0, 0, 1, 1], [], []>} : vector<32x256xf32>, vector<256x128xf32>, vector<32x128xf32> -> vector<32x128xf32>
    %205 = vector.broadcast %160 : vector<1x128xf32> to vector<32x128xf32>
    %206 = arith.addf %204, %205 : vector<32x128xf32>
    %cst_74 = arith.constant dense<0.000000e+00> : vector<32xf32>
    %207 = vector.multi_reduction <add>, %206, %cst_74 [1] : vector<32x128xf32> to vector<32xf32>
    %208 = vector.shape_cast %207 : vector<32xf32> to vector<32x1xf32>
    %cst_75 = arith.constant 1.280000e+02 : f32
    %209 = vector.broadcast %cst_75 : f32 to vector<32x1xf32>
    %210 = arith.divf %208, %209 : vector<32x1xf32>
    %211 = vector.broadcast %210 : vector<32x1xf32> to vector<32x128xf32>
    %212 = arith.subf %206, %211 : vector<32x128xf32>
    %213 = arith.mulf %212, %212 : vector<32x128xf32>
    %cst_76 = arith.constant dense<0.000000e+00> : vector<32xf32>
    %214 = vector.multi_reduction <add>, %213, %cst_76 [1] : vector<32x128xf32> to vector<32xf32>
    %215 = vector.shape_cast %214 : vector<32xf32> to vector<32x1xf32>
    %cst_77 = arith.constant 1.280000e+02 : f32
    %216 = vector.broadcast %cst_77 : f32 to vector<32x1xf32>
    %217 = arith.divf %215, %216 : vector<32x1xf32>
    %218 = vector.broadcast %210 : vector<32x1xf32> to vector<32x128xf32>
    %219 = arith.subf %206, %218 : vector<32x128xf32>
    %cst_78 = arith.constant 9.99999974E-6 : f32
    %220 = vector.broadcast %cst_78 : f32 to vector<32x1xf32>
    %221 = arith.addf %217, %220 : vector<32x1xf32>
    %222 = math.rsqrt %221 : vector<32x1xf32>
    %223 = vector.broadcast %222 : vector<32x1xf32> to vector<32x128xf32>
    %224 = arith.mulf %219, %223 : vector<32x128xf32>
    %225 = vector.broadcast %161 : vector<1x128xf32> to vector<32x128xf32>
    %226 = arith.mulf %224, %225 : vector<32x128xf32>
    %227 = vector.broadcast %162 : vector<1x128xf32> to vector<32x128xf32>
    %228 = arith.addf %226, %227 : vector<32x128xf32>
    %cst_79 = arith.constant 0.000000e+00 : f32
    %229 = vector.broadcast %cst_79 : f32 to vector<32x128xf32>
    %230 = arith.maximumf %228, %229 : vector<32x128xf32>
    %c0_80 = arith.constant 0 : index
    %c0_81 = arith.constant 0 : index
    %231 = vector.load %arg8[%c0_80, %c0_81] : memref<128x128xf32, #tpu.memory_space<vmem>>, vector<128x128xf32>
    %cst_82 = arith.constant dense<0.000000e+00> : vector<32x128xf32>
    %232 = tpu.matmul %230, %231, %cst_82 {dimension_numbers = #tpu.dot_dimension_numbers<[1], [0], [0], [1], [0, 0, 1, 1], [], []>} : vector<32x128xf32>, vector<128x128xf32>, vector<32x128xf32> -> vector<32x128xf32>
    %233 = vector.broadcast %10 : vector<1x128xf32> to vector<32x128xf32>
    %234 = arith.addf %232, %233 : vector<32x128xf32>
    %c0_83 = arith.constant 0 : index
    %c0_84 = arith.constant 0 : index
    %c0_85 = arith.constant 0 : index
    %235 = vector.load %arg10[%c0_83, %c0_84, %c0_85] : memref<1x32x128xf32, #tpu.memory_space<vmem>>, vector<1x32x128xf32>
    %236 = vector.shape_cast %235 : vector<1x32x128xf32> to vector<32x128xf32>
    %237 = vector.shape_cast %234 : vector<32x128xf32> to vector<1x32x128xf32>
    tpu.vector_store %arg10[%c0_83, %c0_84, %c0_85], %237 {strides = array<i32>} : memref<1x32x128xf32, #tpu.memory_space<vmem>>, vector<1x32x128xf32>,
    return
  }
  func.func @transform_0(%arg0: i32) -> (i32, i32, i32) {
    %c0_i32 = arith.constant 0 : i32
    %c0_i32_0 = arith.constant 0 : i32
    %c0_i32_1 = arith.constant 0 : i32
    return %arg0, %c0_i32, %c0_i32_0 : i32, i32, i32
  }
  func.func @transform_1(%arg0: i32) -> (i32, i32, i32) {
    %c0_i32 = arith.constant 0 : i32
    %c0_i32_0 = arith.constant 0 : i32
    %c0_i32_1 = arith.constant 0 : i32
    return %arg0, %c0_i32, %c0_i32_0 : i32, i32, i32
  }
  func.func @transform_2(%arg0: i32) -> (i32, i32) {
    %c0_i32 = arith.constant 0 : i32
    %c0_i32_0 = arith.constant 0 : i32
    %c0_i32_1 = arith.constant 0 : i32
    return %c0_i32, %c0_i32_0 : i32, i32
  }
  func.func @transform_3(%arg0: i32) -> (i32, i32) {
    %c0_i32 = arith.constant 0 : i32
    %c0_i32_0 = arith.constant 0 : i32
    %c0_i32_1 = arith.constant 0 : i32
    return %c0_i32, %c0_i32_0 : i32, i32
  }
  func.func @transform_4(%arg0: i32) -> (i32, i32) {
    %c0_i32 = arith.constant 0 : i32
    %c0_i32_0 = arith.constant 0 : i32
    %c0_i32_1 = arith.constant 0 : i32
    return %c0_i32, %c0_i32_0 : i32, i32
  }
  func.func @transform_5(%arg0: i32) -> (i32, i32, i32) {
    %c0_i32 = arith.constant 0 : i32
    %c0_i32_0 = arith.constant 0 : i32
    %c0_i32_1 = arith.constant 0 : i32
    %c0_i32_2 = arith.constant 0 : i32
    return %c0_i32, %c0_i32_0, %c0_i32_1 : i32, i32, i32
  }
  func.func @transform_6(%arg0: i32) -> (i32, i32, i32) {
    %c0_i32 = arith.constant 0 : i32
    %c0_i32_0 = arith.constant 0 : i32
    %c0_i32_1 = arith.constant 0 : i32
    %c0_i32_2 = arith.constant 0 : i32
    return %c0_i32, %c0_i32_0, %c0_i32_1 : i32, i32, i32
  }
  func.func @transform_7(%arg0: i32) -> (i32, i32) {
    %c0_i32 = arith.constant 0 : i32
    %c0_i32_0 = arith.constant 0 : i32
    %c0_i32_1 = arith.constant 0 : i32
    return %c0_i32, %c0_i32_0 : i32, i32
  }
  func.func @transform_8(%arg0: i32) -> (i32, i32) {
    %c0_i32 = arith.constant 0 : i32
    %c0_i32_0 = arith.constant 0 : i32
    %c0_i32_1 = arith.constant 0 : i32
    return %c0_i32, %c0_i32_0 : i32, i32
  }
  func.func @transform_9(%arg0: i32) -> (i32, i32, i32) {
    %c0_i32 = arith.constant 0 : i32
    %c0_i32_0 = arith.constant 0 : i32
    %c0_i32_1 = arith.constant 0 : i32
    return %arg0, %c0_i32, %c0_i32_0 : i32, i32, i32
  }
}

</mosaic_0001>

<bundles_post_ra>
// kernel: model_forward.1
= control target key start
LH: loop header
LB: loop body
LE: loop exit
PB: predicated region body
PF: predicated region fallthrough
CT: control target
= control target key end

     0   :  { %s5300_s30 = smov 0   ;;  %s9939_s0 = inlined_call_operand.vmem [shape: f32[2,32,32], index: 0, kind: input, shape index: {}]   ;;  %s9940_s1 = inlined_call_operand.vmem [shape: f32[2,32,32], index: 1, kind: input, shape index: {}]   ;;  %s9941_s2 = inlined_call_operand.vmem [shape: f32[32,64], index: 2, kind: input, shape index: {}]   ;;  %s9942_s3 = inlined_call_operand.vmem [shape: f32[64,64], index: 3, kind: input, shape index: {}]   ;;  %s9943_s4 = inlined_call_operand.vmem [shape: f32[64,64], index: 4, kind: input, shape index: {}]   ;;  %s9944_s5 = inlined_call_operand.vmem [shape: f32[2,128,128], index: 5, kind: input, shape index: {}]   ;;  %s9945_s6 = inlined_call_operand.vmem [shape: f32[2,256,128], index: 6, kind: input, shape index: {}]   ;;  %s9946_s7 = inlined_call_operand.vmem [shape: f32[128,128], index: 7, kind: input, shape index: {}]   ;;  %s9947_s8 = inlined_call_operand.vmem [shape: f32[15,128], index: 8, kind: input, shape index: {}]   ;;  %s9948_s9 = inlined_call_operand.vmem [shape: f32[2,32,128], index: 9, kind: output, shape index: {}]  }
   0x1 LB: > { %s4501_s10 = sadd.s32 4294967295, %s5246_s30   ;;  %p4505_p0 = scmp.ge.s32.totalorder %s5246_s30, 1  ;;  %s5246_s30 = sphi %s5300_s30, %s19_s30  }
   0x2   : > { %p297_p1 = scmp.lt.s32.totalorder %s5246_s30, 3 }
   0x4   : > { %p298_p2 = pnand %p4505_p0, %p297_p1 }
   0x6   : > { %301 = sbr.rel (%p298_p2) target bundleno = 3508 (0xdb4), region = 56 }
   0xd   : > { %v368_v0 = vld [vmem:[%s9941_s2] sm:$0xff]  ;;  %v369_v1 = vld [vmem:[%s9941_s2 + $0x8] sm:$0xff]  ;;  %v370_v2 = vld [vmem:[%s9941_s2 + $0x10] sm:$0xff]  ;;  %p338_p3 = scmp.lt.s32.totalorder %s4501_s10, 1  ;;  %vm376_vm0 = vcmask 261120   ;;  %vm498_vm3 = vcmask 523264  }
   0xe   : > { %v4974_v3 = vpack.c.bf16 %v369_v1, %v368_v0  ;;  %v371_v4 = vld [vmem:[%s9941_s2 + $0x18] sm:$0xff]  ;;  %v486_v5 = vld [vmem:[%s9942_s3] sm:$0xff]  ;;  %v487_v6 = vld [vmem:[%s9942_s3 + $0x8] sm:$0xff]  ;;  %s5249_s28 = smov 64   ;;  %vm2776_vm10 = vcmask 1041409   ;;  %vm2778_vm11 = vcmask 1042434  }
   0xf   : > { %v4978_v7 = vpack.c.bf16 %v371_v4, %v370_v2  ;;  %s11775_s10 = smov (!%p338_p3, %s4501_s10), 1  ;;  %v4982_v8 = vpack.c.bf16 %v487_v6, %v486_v5  ;;  %v488_v9 = vld [vmem:[%s9942_s3 + $0x10] sm:$0xff]  ;;  %v489_v10 = vld [vmem:[%s9942_s3 + $0x18] sm:$0xff]  ;;  %v490_v16 = vld [vmem:[%s9942_s3 + $0x20] sm:$0xff]  ;;  %vm2780_vm12 = vcmask 1043459   ;;  %vm2782_vm13 = vcmask 1044484  }
  0x10   : > { %4975 = vmatprep.subr.bf16.mxu0 %v4974_v3  ;;  %v4986_v11 = vpack.c.bf16 %v489_v10, %v488_v9  ;;  %s5332_s27 = sshll.u32 %s11775_s10, 5  ;;  %v491_v17 = vld [vmem:[%s9942_s3 + $0x28] sm:$0xff]  ;;  %v492_v19 = vld [vmem:[%s9942_s3 + $0x30] sm:$0xff]  ;;  %v493_v20 = vld [vmem:[%s9942_s3 + $0x38] sm:$0xff]  ;;  %vm2784_vm14 = vcmask 1045509   ;;  %vm2786_vm15 = vcmask 1046534  }
  0x11   : > { %4977 = vmatpush3.bf16.msra.mxu0 %v4974_v3  ;;  %4983 = vmatprep.subr.bf16.mxu1 %v4982_v8  ;;  %s347_s11 = scalar_lea.vmem %s9940_s1, %s5332_s27  ;;  %v4990_v18 = vpack.c.bf16 %v491_v17, %v490_v16  ;;  %v4994_v21 = vpack.c.bf16 %v493_v20, %v492_v19  ;;  %v4512_v22 = vld [vmem:[%s9947_s8] ss:$0 sm:$0xff]  ;;  %s5365_s23 = scalar_lea.vmem %s9939_s0, %s5332_s27  ;;  %v4517_v40 = vld [vmem:[%s9947_s8 + $0x1] ss:$0 sm:$0xff]  ;;  %v4533_v44 = vld [vmem:[%s9947_s8 + $0x5] ss:$0 sm:$0xff] }
  0x12   : > { %4979 = vmatprep.subr.bf16.mxu0 %v4978_v7  ;;  %4985 = vmatpush3.bf16.msra.mxu1 %v4982_v8  ;;  %v357_v12 = vld [vmem:[%s347_s11] sm:$0xff]  ;;  %v358_v13 = vld [vmem:[%s347_s11 + $0x8] sm:$0xff]  ;;  %v359_v14 = vld [vmem:[%s347_s11 + $0x10] sm:$0xff]  ;;  %s352_s14 = scalar_lea.vmem %s9948_s9, %s5332_s27 }
  0x13   : > { %4987 = vmatprep.subr.bf16.mxu1 %v4986_v11  ;;  %4796 = vmatprep.mubr.msk.f32.mxu0 %vm376_vm0, %v357_v12  ;;  %v360_v15 = vld [vmem:[%s347_s11 + $0x18] sm:$0xff]  ;;  %v5368_v39 = vld [vmem:[%s5365_s23] sm:$0xff]  ;;  %v5398_v59 = vld [vmem:[%s5365_s23 + $0x8] sm:$0xff] }
  0x14   : > { %v5401_v60 = vld [vmem:[%s5365_s23 + $0x10] sm:$0xff]  ;;  %v5409_v62 = vld [vmem:[%s5365_s23 + $0x18] sm:$0xff]  ;;  %v693_v63 = vld [vmem:[%s9943_s4] sm:$0xff]  ;;  %vm987_vm6 = vcmp.gt.f32.partialorder %v5368_v39, 0.0  ;;  %vm988_vm7 = vcmp.gt.f32.partialorder %v5398_v59, 0.0 }
  0x15   : > { %4981 = vmatpush3.bf16.msra.mxu0 %v4978_v7  ;;  %v694_v0 = vld [vmem:[%s9943_s4 + $0x8] sm:$0xff]  ;;  %v695_v2 = vld [vmem:[%s9943_s4 + $0x10] sm:$0xff]  ;;  %v696_v3 = vld [vmem:[%s9943_s4 + $0x18] sm:$0xff]  ;;  %vm989_vm8 = vcmp.gt.f32.partialorder %v5401_v60, 0.0  ;;  %vm990_vm9 = vcmp.gt.f32.partialorder %v5409_v62, 0.0 }
  0x16   : > { %4989 = vmatpush3.bf16.msra.mxu1 %v4986_v11  ;;  %v5006_v1 = vpack.c.bf16 %v694_v0, %v693_v63  ;;  %v697_v4 = vld [vmem:[%s9943_s4 + $0x20] sm:$0xff]  ;;  %v5010_v5 = vpack.c.bf16 %v696_v3, %v695_v2  ;;  %v698_v6 = vld [vmem:[%s9943_s4 + $0x28] sm:$0xff]  ;;  %v699_v8 = vld [vmem:[%s9943_s4 + $0x30] sm:$0xff] }
  0x17   : > { %4991 = vmatprep.subr.bf16.mxu1 %v4990_v18  ;;  %v5014_v7 = vpack.c.bf16 %v698_v6, %v697_v4  ;;  %v700_v9 = vld [vmem:[%s9943_s4 + $0x38] sm:$0xff] }
  0x18   : > { %4797 = vmatmul.mubr.msk.f32.vlgmr.msra.gmra.mrb[0].mxu0 %vm376_vm0, %v358_v13  ;;  %v5018_v10 = vpack.c.bf16 %v700_v9, %v699_v8 }
  0x19   : > { %4799 = vmatprep.mubr.msk.f32.mxu0 %vm376_vm0, %v359_v14 }
  0x1a   : > { %4993 = vmatpush3.bf16.msra.mxu1 %v4990_v18 }
  0x1b   : > { %4995 = vmatprep.subr.bf16.mxu1 %v4994_v21 }
  0x1c   : > { %4800 = vmatmul.mubr.msk.f32.gmra.mrb[2].mxu0 %vm376_vm0, %v360_v15 }
  0x1d   : > { %4832 = vmatprep.mubr.msk.f32.mxu0 %vm376_vm0, %v5368_v39 }
  0x1e   : > { %4997 = vmatpush3.bf16.msra.mxu1 %v4994_v21 }
  0xeb   : > { %v4798_v23 = vpop.f32.mrb[0].mxu0 }
  0xec   : > { %v461_v24 = vadd.f32 %v4798_v23, %v4512_v22  ;;  %v455_v25 = vpop.f32.mrb[1].mxu0 }
  0xed   : > { %v456_v26 = vadd.f32 %v4512_v22, %v455_v25 }
  0xee   : > { %v479_v27 = vmul.f32 0.05, %v461_v24  ;;  %vm475_vm1 = vcmp.gt.f32.partialorder %v461_v24, 0.0 }
  0xef   : > { %v4801_v28 = vpop.f32.mrb[2].mxu0  ;;  %vm474_vm2 = vcmp.gt.f32.partialorder %v456_v26, 0.0  ;;  %v478_v29 = vmul.f32 0.05, %v456_v26 }
  0xf0   : > { %v471_v30 = vadd.f32 %v4801_v28, %v4512_v22  ;;  %v465_v31 = vpop.f32.mrb[3].mxu0  ;;  %v483_v35 = vsel %vm475_vm1, %v461_v24, %v479_v27 }
  0xf1   : > { %v466_v32 = vadd.f32 %v4512_v22, %v465_v31  ;;  %v482_v33 = vsel %vm474_vm2, %v456_v26, %v478_v29 }
  0xf2   : > { %v481_v34 = vmul.f32 0.05, %v471_v30  ;;  %4818 = vmatprep.mubr.msk.f32.mxu1 %vm498_vm3, %v482_v33  ;;  %vm477_vm4 = vcmp.gt.f32.partialorder %v471_v30, 0.0 }
  0xf3   : > { %vm476_vm5 = vcmp.gt.f32.partialorder %v466_v32, 0.0  ;;  %v480_v36 = vmul.f32 0.05, %v466_v32  ;;  %4819 = vmatmul.mubr.msk.f32.vlgmr.msra.gmra.mrb[0].mxu1 %vm498_vm3, %v483_v35 }
  0xf4   : > { %v485_v38 = vsel %vm477_vm4, %v471_v30, %v481_v34 }
  0xf5   : > { %v484_v37 = vsel %vm476_vm5, %v466_v32, %v480_v36 }
  0xf6   : > { %4821 = vmatprep.mubr.msk.f32.mxu1 %vm498_vm3, %v484_v37 }
  0xf7   : > { %4822 = vmatmul.mubr.msk.f32.gmra.mrb[2].mxu1 %vm498_vm3, %v485_v38 }
 0x1c6   : > { %v4820_v41 = vpop.f32.mrb[0].mxu1 }
 0x1c7   : > { %v5375_v42 = vadd.f32 %v4820_v41, %v4517_v40  ;;  %v577_v43 = vpop.f32.mrb[1].mxu1 }
 0x1c8   : > { %v5380_v45 = vadd.f32 %v4517_v40, %v577_v43 }
 0x1c9   : > { %v880_v53 = vmul.f32 %v4533_v44, %v5375_v42 }
 0x1ca   : > { %v4823_v46 = vpop.f32.mrb[2].mxu1  ;;  %v4998_v47 = vpack.c.bf16 %v5375_v42, %v5380_v45  ;;  %v879_v48 = vmul.f32 %v4533_v44, %v5380_v45 }
 0x1cb   : > { %v5385_v49 = vadd.f32 %v4823_v46, %v4517_v40  ;;  %v587_v50 = vpop.f32.mrb[3].mxu1  ;;  %v886_v57 = vsel %vm498_vm3, %v880_v53, 0.0 }
 0x1cc   : > { %v5387_v51 = vadd.f32 %v4517_v40, %v587_v50  ;;  %4999 = vmatprep.subr.bf16.mxu0 %v4998_v47  ;;  %v883_v52 = vsel %vm498_vm3, %v879_v48, 0.0 }
 0x1cd   : > { %884 = vadd.xlane.f32.xlu0 %v883_v52  ;;  %5001 = vmatpush3.bf16.msra.mxu0 %v4998_v47  ;;  %v882_v58 = vmul.f32 %v4533_v44, %v5385_v49 }
 0x1ce   : > { %v5002_v54 = vpack.c.bf16 %v5385_v49, %v5387_v51  ;;  %v881_v55 = vmul.f32 %v4533_v44, %v5387_v51 }
 0x1cf   : > { %v892_v61 = vsel %vm498_vm3, %v882_v58, 0.0 }
 0x1d0   : > { %5003 = vmatprep.subr.bf16.mxu0 %v5002_v54  ;;  %v889_v56 = vsel %vm498_vm3, %v881_v55, 0.0 }
 0x1d1   : > { %890 = vadd.xlane.f32.xlu1 %v889_v56  ;;  %887 = vadd.xlane.f32.xlu0 %v886_v57 }
 0x1d2   : > { %5005 = vmatpush3.bf16.msra.mxu0 %v5002_v54 }
 0x1d3   : > { %5007 = vmatprep.subr.bf16.mxu0 %v5006_v1 }
 0x1d5   : > { %4833 = vmatmul.mubr.msk.f32.vlgmr.msra.gmra.mrb[4].mxu0 %vm376_vm0, %v5398_v59  ;;  %893 = vadd.xlane.f32.xlu1 %v892_v61 }
 0x1d6   : > { %4835 = vmatprep.mubr.msk.f32.mxu0 %vm376_vm0, %v5401_v60  ;;  %5009 = vmatpush3.bf16.msra.mxu0 %v5006_v1 }
 0x1d7   : > { %5011 = vmatprep.subr.bf16.mxu0 %v5010_v5 }
 0x1d9   : > { %4836 = vmatmul.mubr.msk.f32.gmra.mrb[6].mxu0 %vm376_vm0, %v5409_v62  ;;  %v4531_v62 = vld [vmem:[%s9947_s8 + $0x3] ss:$0 sm:$0xff]  ;;  %vm2788_vm0 = vcmask 1047559  }
 0x1da   : > { %5013 = vmatpush3.bf16.msra.mxu0 %v5010_v5 }
 0x1db   : > { %5015 = vmatprep.subr.bf16.mxu0 %v5014_v7 }
 0x1de   : > { %5017 = vmatpush3.bf16.msra.mxu0 %v5014_v7 }
 0x1df   : > { %5019 = vmatprep.subr.bf16.mxu0 %v5018_v10 }
 0x1e2   : > { %5021 = vmatpush3.bf16.msra.mxu0 %v5018_v10 }
 0x25a   : > { %v885_v16 = vpop.xlane.xlu0 %884 }
 0x25e   : > { %v891_v15 = vpop.xlane.xlu1 %890  ;;  %v888_v19 = vpop.xlane.xlu0 %887 }
 0x25f   : > { %v895_v21 = vmax.f32 %v885_v16, %v888_v19 }
 0x261   : > { %v896_v23 = vrot.slane %v895_v21, 4 }
 0x262   : > { %v894_v17 = vpop.xlane.xlu1 %893 }
 0x263   : > { %v902_v18 = vmax.f32 %v891_v15, %v894_v17  ;;  %v897_v25 = vmax.f32 %v895_v21, %v896_v23 }
 0x265   : > { %v903_v20 = vrot.slane %v902_v18, 4  ;;  %v898_v27 = vrot.slane %v897_v25, 2 }
 0x267   : > { %v904_v22 = vmax.f32 %v902_v18, %v903_v20  ;;  %v899_v29 = vmax.f32 %v897_v25, %v898_v27  ;;  %v4526_v20 = vld [vmem:[%s9947_s8 + $0x2] ss:$0 sm:$0xff] }
 0x269   : > { %v905_v24 = vrot.slane %v904_v22, 2  ;;  %v900_v31 = vrot.slane %v899_v29, 1 }
 0x26b   : > { %v906_v26 = vmax.f32 %v904_v22, %v905_v24  ;;  %v901_v34 = vmax.f32 %v899_v29, %v900_v31 }
 0x26d   : > { %v907_v28 = vrot.slane %v906_v26, 1  ;;  %v909_v37 = vsub.f32 %v885_v16, %v901_v34  ;;  %v910_v38 = vsub.f32 %v888_v19, %v901_v34 }
 0x26f   : > { %v908_v30 = vmax.f32 %v906_v26, %v907_v28  ;;  %v913_v40 = vmul.f32 1.442695, %v909_v37  ;;  %v915_v41 = vmul.f32 1.442695, %v910_v38 }
 0x271   : > { %v911_v32 = vsub.f32 %v891_v15, %v908_v30  ;;  %v912_v33 = vsub.f32 %v894_v17, %v908_v30 }
 0x273   : > { %v917_v35 = vmul.f32 1.442695, %v911_v32  ;;  %v919_v36 = vmul.f32 1.442695, %v912_v33 }
 0x275   : > { %5202 = vpow2.f32 %v917_v35 }
 0x276   : > { %5204 = vpow2.f32 %v919_v36 }
 0x277   : > { %5206 = vpow2.f32 %v913_v40 }
 0x278   : > { %5208 = vpow2.f32 %v915_v41 }
 0x27f   : > { %v5203_v43 = vpop.eup %5202 }
 0x280   : > { %v5205_v44 = vpop.eup %5204 }
 0x281   : > { %v928_v46 = vadd.f32 %v5205_v44, %v5203_v43  ;;  %v5207_v47 = vpop.eup %5206 }
 0x282   : > { %v5209_v48 = vpop.eup %5208 }
 0x283   : > { %v929_v50 = vrot.slane %v928_v46, 4  ;;  %v921_v52 = vadd.f32 %v5209_v48, %v5207_v47 }
 0x285   : > { %v930_v53 = vadd.f32 %v929_v50, %v928_v46  ;;  %v922_v54 = vrot.slane %v921_v52, 4 }
 0x287   : > { %v931_v55 = vrot.slane %v930_v53, 2  ;;  %v923_v56 = vadd.f32 %v922_v54, %v921_v52  ;;  %v5248_v54 = vmov 0.0  }
 0x289   : > { %v932_v57 = vadd.f32 %v931_v55, %v930_v53  ;;  %v924_v58 = vrot.slane %v923_v56, 2  ;;  %v5465_v55 = vsel %vm987_vm6, 1.0, %v5248_v54 }
 0x28b   : > { %v933_v61 = vrot.slane %v932_v57, 1  ;;  %v925_v63 = vadd.f32 %v924_v58, %v923_v56 }
 0x28d   : > { %v934_v0 = vadd.f32 %v933_v61, %v932_v57  ;;  %v926_v1 = vrot.slane %v925_v63, 1 }
 0x28f   : > { %5210 = vrcp.f32 %v934_v0  ;;  %v927_v2 = vadd.f32 %v926_v1, %v925_v63 }
 0x291   : > { %5212 = vrcp.f32 %v927_v2 }
 0x299   : > { %v5211_v3 = vpop.eup %5210 }
 0x29a   : > { %v940_v4 = vmul.f32 %v5211_v3, %v5205_v44  ;;  %v939_v5 = vmul.f32 %v5211_v3, %v5203_v43  ;;  %v1144_v43 = vlaneseq }
 0x29b   : > { %v5213_v6 = vpop.eup %5212 }
 0x29c   : > { %v943_v7 = vmul.f32 %v939_v5, %v5387_v51  ;;  %v944_v8 = vmul.f32 %v940_v4, %v5385_v49  ;;  %v937_v9 = vmul.f32 %v5213_v6, %v5209_v48  ;;  %v936_v10 = vmul.f32 %v5213_v6, %v5207_v47  ;;  %v999_v6 = vld [vmem:[%s9944_s5] sm:$0xff] }
 0x29d   : > { %v5456_v47 = vshrl.u32 %v1144_v43, 7  ;;  %v1009_v43 = vld [vmem:[%s9944_s5 + $0x50] sm:$0xff] }
 0x29f   : > { %v5462_v53 = vsub.s32 0, %v5456_v47  ;;  %v5474_v61 = vsub.s32 1, %v5456_v47 }
 0x2a1   : > { %v5471_v39 = vrot.slane %v5465_v55, %v5462_v53  ;;  %v5479_v0 = vrot.slane %v5465_v55, %v5474_v61 }
 0x2a8   : > { %v4834_v11 = vpop.f32.mrb[4].mxu0 }
 0x2a9   : > { %v674_v12 = vpop.f32.mrb[5].mxu0 }
 0x2aa   : > { %4854 = vmatprep.mubr.msk.f32.mxu0 %vm498_vm3, %v674_v12  ;;  %v955_v12 = vsel %vm498_vm3, %v944_v8, 0.0 }
 0x2ab   : > { %4855 = vmatmul.mubr.msk.f32.vlgmr.msra.gmra.mrb[8].mxu0 %vm498_vm3, %v4834_v11  ;;  %v954_v11 = vsel %vm498_vm3, %v943_v7, 0.0  ;;  %v1000_v7 = vld [vmem:[%s9944_s5 + $0x8] sm:$0xff] }
 0x2ac   : > { %v4837_v13 = vpop.f32.mrb[6].mxu0  ;;  %v956_v15 = vadd.f32 %v955_v12, %v954_v11 }
 0x2ad   : > { %v684_v14 = vpop.f32.mrb[7].mxu0 }
 0x2ae   : > { %4857 = vmatprep.mubr.msk.f32.mxu0 %vm498_vm3, %v684_v14  ;;  %v942_v14 = vmul.f32 %v937_v9, %v5375_v42  ;;  %v957_v18 = vrot.slane %v956_v15, 4 }
 0x2af   : > { %4858 = vmatmul.mubr.msk.f32.gmra.mrb[10].mxu0 %vm498_vm3, %v4837_v13  ;;  %v941_v13 = vmul.f32 %v936_v10, %v5380_v45  ;;  %v5022_v10 = vpack.c.bf16 %v1000_v7, %v999_v6  ;;  %v5591_v7 = vsub.s32 6, %v5456_v47 }
 0x2b0   : > { %v946_v17 = vsel %vm498_vm3, %v942_v14, 0.0  ;;  %v958_v21 = vadd.f32 %v957_v18, %v956_v15  ;;  %v1001_v18 = vld [vmem:[%s9944_s5 + $0x10] sm:$0xff] }
 0x2b1   : > { %v945_v16 = vsel %vm498_vm3, %v941_v13, 0.0  ;;  %5023 = vmatprep.subr.bf16.mxu1 %v5022_v10 }
 0x2b2   : > { %v947_v19 = vadd.f32 %v946_v17, %v945_v16  ;;  %v959_v28 = vrot.slane %v958_v21, 2  ;;  %5025 = vmatpush3.bf16.msra.mxu1 %v5022_v10 }
 0x2b4   : > { %v948_v25 = vrot.slane %v947_v19, 4  ;;  %v960_v36 = vadd.f32 %v959_v28, %v958_v21  ;;  %v1003_v28 = vld [vmem:[%s9944_s5 + $0x20] sm:$0xff] }
 0x2b6   : > { %v949_v33 = vadd.f32 %v948_v25, %v947_v19  ;;  %v961_v40 = vrot.slane %v960_v36, 1  ;;  %v1002_v19 = vld [vmem:[%s9944_s5 + $0x18] sm:$0xff] }
 0x2b8   : > { %v950_v38 = vrot.slane %v949_v33, 2  ;;  %v962_v44 = vadd.f32 %v961_v40, %v960_v36 }
 0x2ba   : > { %v951_v41 = vadd.f32 %v950_v38, %v949_v33  ;;  %v965_v48 = vsub.f32 %v962_v44, %v5387_v51  ;;  %v966_v50 = vsub.f32 %v962_v44, %v5385_v49  ;;  %v1005_v33 = vld [vmem:[%s9944_s5 + $0x30] sm:$0xff]  ;;  %v1008_v38 = vld [vmem:[%s9944_s5 + $0x48] sm:$0xff]  ;;  %v1010_v44 = vld [vmem:[%s9944_s5 + $0x58] sm:$0xff] }
 0x2bc   : > { %v952_v46 = vrot.slane %v951_v41, 1  ;;  %v5197_v56 = vpack.i.bf16 %v966_v50, %v965_v48  ;;  %v5560_v50 = vsub.s32 5, %v5456_v47 }
 0x2be   : > { %v953_v52 = vadd.f32 %v952_v46, %v951_v41  ;;  %v5548_v41 = vsub.s32 4, %v5456_v47  ;;  %v5042_v46 = vpack.c.bf16 %v1010_v44, %v1009_v43 }
 0x2c0   : > { %v963_v57 = vsub.f32 %v953_v52, %v5380_v45  ;;  %v964_v58 = vsub.f32 %v953_v52, %v5375_v42  ;;  %v1175_v48 = vrot.slane %v5465_v55, %v5548_v41  ;;  %v1011_v52 = vld [vmem:[%s9944_s5 + $0x60] sm:$0xff] }
 0x2c2   : > { %v5192_v63 = vpack.i.bf16 %v964_v58, %v963_v57  ;;  %v1182_v58 = vrot.slane %v5465_v55, %v5560_v50 }
 0x37e   : > { %v4856_v22 = vpop.f32.mrb[8].mxu0 }
 0x37f   : > { %v789_v23 = vadd.f32 %v4856_v22, %v4526_v20  ;;  %v783_v24 = vpop.f32.mrb[9].mxu0  ;;  %v5026_v22 = vpack.c.bf16 %v1002_v19, %v1001_v18 }
 0x380   : > { %v784_v26 = vadd.f32 %v4526_v20, %v783_v24 }
 0x381   : > { %v805_v27 = vsel %vm498_vm3, %v789_v23, 0.0  ;;  %5027 = vmatprep.subr.bf16.mxu1 %v5026_v22 }
 0x382   : > { %806 = vadd.xlane.f32.xlu1 %v805_v27  ;;  %v4859_v29 = vpop.f32.mrb[10].mxu0  ;;  %v802_v30 = vsel %vm498_vm3, %v784_v26, 0.0  ;;  %5029 = vmatpush3.bf16.msra.mxu1 %v5026_v22  ;;  %v5517_v27 = vsub.s32 2, %v5456_v47 }
 0x383   : > { %v799_v31 = vadd.f32 %v4859_v29, %v4526_v20  ;;  %v793_v32 = vpop.f32.mrb[11].mxu0  ;;  %803 = vadd.xlane.f32.xlu0 %v802_v30  ;;  %v1004_v29 = vld [vmem:[%s9944_s5 + $0x28] sm:$0xff] }
 0x384   : > { %v794_v34 = vadd.f32 %v4526_v20, %v793_v32  ;;  %v5030_v30 = vpack.c.bf16 %v1004_v29, %v1003_v28  ;;  %v5528_v32 = vsub.s32 3, %v5456_v47 }
 0x385   : > { %v811_v35 = vsel %vm498_vm3, %v799_v31, 0.0 }
 0x386   : > { %812 = vadd.xlane.f32.xlu1 %v811_v35  ;;  %v808_v37 = vsel %vm498_vm3, %v794_v34, 0.0  ;;  %5031 = vmatprep.subr.bf16.mxu1 %v5030_v30  ;;  %v5538_v36 = vrot.slane %v5465_v55, %v5528_v32 }
 0x387   : > { %809 = vadd.xlane.f32.xlu0 %v808_v37  ;;  %5033 = vmatpush3.bf16.msra.mxu1 %v5030_v30  ;;  %v1007_v37 = vld [vmem:[%s9944_s5 + $0x40] sm:$0xff] }
 0x388   : > { %v5038_v40 = vpack.c.bf16 %v1008_v38, %v1007_v37 }
 0x397   : > { %5198 = vrot.lane.b32.xlu1 %v5197_v56, %s5249_s28  ;;  %v1012_v56 = vld [vmem:[%s9944_s5 + $0x68] sm:$0xff] }
 0x398   : > { %v5046_v57 = vpack.c.bf16 %v1012_v56, %v1011_v52  ;;  %v5702_v52 = vsel %vm990_vm9, 1.0, %v5248_v54 }
 0x39b   : > { %1149 = vbcast.lane.b32.xlu1 %v5471_v39, 256 }
 0x39d   : > { %5193 = vrot.lane.b32.xlu0 %v5192_v63, %s5249_s28  ;;  %v1013_v63 = vld [vmem:[%s9944_s5 + $0x70] sm:$0xff] }
 0x39f   : > { %1156 = vbcast.lane.b32.xlu1 %v5479_v0, 256 }
 0x3a1   : > { %1594 = vbcast.lane.b32.xlu0 %v5471_v39, 264 }
 0x3a3   : > { %1598 = vbcast.lane.b32.xlu1 %v5479_v0, 264 }
 0x40f   : > { %v807_v1 = vpop.xlane.xlu1 %806 }
 0x410   : > { %v816_v2 = vmul.f32 0.015625, %v807_v1  ;;  %v804_v3 = vpop.xlane.xlu0 %803  ;;  %v1014_v1 = vld [vmem:[%s9944_s5 + $0x78] sm:$0xff] }
 0x411   : > { %v815_v4 = vmul.f32 0.015625, %v804_v3  ;;  %v5050_v59 = vpack.c.bf16 %v1014_v1, %v1013_v63 }
 0x412   : > { %v5484_v5 = vsub.f32 %v789_v23, %v816_v2  ;;  %v5579_v2 = vsel %vm988_vm7, 1.0, %v5248_v54 }
 0x413   : > { %v5492_v8 = vsub.f32 %v784_v26, %v815_v4  ;;  %v813_v9 = vpop.xlane.xlu1 %812  ;;  %v1210_v3 = vrot.slane %v5579_v2, %v5474_v61  ;;  %v1203_v4 = vrot.slane %v5579_v2, %v5462_v53  ;;  %v1217_v6 = vrot.slane %v5579_v2, %v5517_v27 }
 0x414   : > { %v818_v11 = vmul.f32 0.015625, %v813_v9  ;;  %v810_v12 = vpop.xlane.xlu0 %809  ;;  %v824_v13 = vmul.f32 %v5484_v5, %v5484_v5  ;;  %v1189_v9 = vrot.slane %v5465_v55, %v5591_v7  ;;  %v5598_v10 = vrot.slane %v5579_v2, %v5528_v32 }
 0x415   : > { %v817_v14 = vmul.f32 0.015625, %v810_v12  ;;  %v823_v15 = vmul.f32 %v5492_v8, %v5492_v8 }
 0x416   : > { %v5498_v16 = vsub.f32 %v799_v31, %v818_v11  ;;  %v830_v17 = vsel %vm498_vm3, %v824_v13, 0.0  ;;  %v1161_v31 = vrot.slane %v5465_v55, %v5517_v27  ;;  %v5623_v11 = vsel %vm989_vm8, 1.0, %v5248_v54 }
 0x417   : > { %v5507_v20 = vsub.f32 %v794_v34, %v817_v14  ;;  %831 = vadd.xlane.f32.xlu1 %v830_v17  ;;  %v827_v21 = vsel %vm498_vm3, %v823_v15, 0.0  ;;  %v1006_v34 = vld [vmem:[%s9944_s5 + $0x38] sm:$0xff]  ;;  %v5629_v12 = vrot.slane %v5623_v11, %v5474_v61  ;;  %v5634_v60 = vrot.slane %v5623_v11, %v5462_v53  ;;  %v5651_v15 = vpop.permute.xlu1 %5198 }
 0x418   : > { %828 = vadd.xlane.f32.xlu0 %v827_v21  ;;  %v826_v23 = vmul.f32 %v5498_v16, %v5498_v16  ;;  %v5034_v35 = vpack.c.bf16 %v1006_v34, %v1005_v33  ;;  %v5643_v13 = vrot.slane %v5623_v11, %v5517_v27  ;;  %v5649_v14 = vrot.slane %v5579_v2, %v5591_v7  ;;  %v5667_v21 = vpop.permute.xlu0 %5193 }
 0x419   : > { %v825_v24 = vmul.f32 %v5507_v20, %v5507_v20  ;;  %v5671_v22 = vrot.slane %v5623_v11, %v5528_v32  ;;  %v5684_v34 = vrot.slane %v5623_v11, %v5548_v41  ;;  %v5716_v54 = vrot.slane %v5702_v52, %v5474_v61 }
 0x41a   : > { %v836_v25 = vsel %vm498_vm3, %v826_v23, 0.0  ;;  %5035 = vmatprep.subr.bf16.mxu1 %v5034_v35 }
 0x41b   : > { %837 = vadd.xlane.f32.xlu1 %v836_v25  ;;  %v833_v26 = vsel %vm498_vm3, %v825_v24, 0.0  ;;  %5037 = vmatpush3.bf16.msra.mxu1 %v5034_v35  ;;  %v5655_v17 = vpop.permute.xlu1 %1149 }
 0x41c   : > { %834 = vadd.xlane.f32.xlu0 %v833_v26  ;;  %5039 = vmatprep.subr.bf16.mxu1 %v5038_v40  ;;  %10418 = vst [vmem:[#allocation2_spill] sm:$0xff] %v5655_v17  ;;  %v5676_v24 = vpop.permute.xlu0 %1594 }
 0x41d   : > { %10421 = vst [vmem:[#allocation5_spill] sm:$0xff] %v5676_v24 }
 0x41f   : > { %5041 = vmatpush3.bf16.msra.mxu1 %v5038_v40  ;;  %v5663_v19 = vpop.permute.xlu1 %1156 }
 0x420   : > { %5043 = vmatprep.subr.bf16.mxu1 %v5042_v46  ;;  %10419 = vst [vmem:[#allocation3_spill] sm:$0xff] %v5663_v19 }
 0x423   : > { %5045 = vmatpush3.bf16.msra.mxu1 %v5042_v46  ;;  %v5673_v23 = vpop.permute.xlu1 %1598 }
 0x424   : > { %5047 = vmatprep.subr.bf16.mxu1 %v5046_v57  ;;  %10420 = vst [vmem:[#allocation4_spill] sm:$0xff] %v5673_v23 }
 0x427   : > { %5049 = vmatpush3.bf16.msra.mxu1 %v5046_v57 }
 0x428   : > { %5051 = vmatprep.subr.bf16.mxu1 %v5050_v59 }
 0x42b   : > { %5053 = vmatpush3.bf16.msra.mxu1 %v5050_v59  ;;  %v4532_v59 = vld [vmem:[%s9947_s8 + $0x4] ss:$0 sm:$0xff] }
 0x42c   : > { %1602 = vbcast.lane.b32.xlu1 %v1161_v31, 264 }
 0x430   : > { %1606 = vbcast.lane.b32.xlu1 %v5538_v36, 264 }
 0x432   : > { %1163 = vbcast.lane.b32.xlu0 %v1161_v31, 256 }
 0x434   : > { %1982 = vbcast.lane.b32.xlu1 %v5479_v0, 272 }
 0x436   : > { %1170 = vbcast.lane.b32.xlu0 %v5538_v36, 256 }
 0x438   : > { %1610 = vbcast.lane.b32.xlu1 %v1175_v48, 264 }
 0x43a   : > { %1978 = vbcast.lane.b32.xlu0 %v5471_v39, 272 }
 0x43c   : > { %1184 = vbcast.lane.b32.xlu1 %v1182_v58, 256 }
 0x43e   : > { %1177 = vbcast.lane.b32.xlu0 %v1175_v48, 256 }
 0x440   : > { %1212 = vbcast.lane.b32.xlu1 %v1210_v3, 256 }
 0x442   : > { %1986 = vbcast.lane.b32.xlu0 %v1161_v31, 272 }
 0x444   : > { %1626 = vbcast.lane.b32.xlu1 %v1203_v4, 264 }
 0x446   : > { %1205 = vbcast.lane.b32.xlu0 %v1203_v4, 256 }
 0x448   : > { %1990 = vbcast.lane.b32.xlu1 %v5538_v36, 272 }
 0x44a   : > { %1614 = vbcast.lane.b32.xlu0 %v1182_v58, 264 }
 0x44c   : > { %2366 = vbcast.lane.b32.xlu1 %v5479_v0, 280  ;;  %v5601_v0 = vsub.s32 7, %v5456_v47  ;;  %v5614_v47 = vrot.slane %v5579_v2, %v5548_v41 }
 0x44e   : > { %1630 = vbcast.lane.b32.xlu0 %v1210_v3, 264  ;;  %v5659_v18 = vrot.slane %v5579_v2, %v5601_v0 }
 0x450   : > { %1219 = vbcast.lane.b32.xlu1 %v1217_v6, 256 }
 0x452   : > { %2362 = vbcast.lane.b32.xlu0 %v5471_v39, 280  ;;  %v5606_v39 = vrot.slane %v5465_v55, %v5601_v0  ;;  %v5620_v55 = vrot.slane %v5579_v2, %v5560_v50 }
 0x454   : > { %1634 = vbcast.lane.b32.xlu1 %v1217_v6, 264 }
 0x456   : > { %1191 = vbcast.lane.b32.xlu0 %v1189_v9, 256 }
 0x458   : > { %2370 = vbcast.lane.b32.xlu1 %v1161_v31, 280 }
 0x45a   : > { %1618 = vbcast.lane.b32.xlu0 %v1189_v9, 264 }
 0x45c   : > { %1226 = vbcast.lane.b32.xlu1 %v5598_v10, 256 }
 0x45e   : > { %1994 = vbcast.lane.b32.xlu0 %v1175_v48, 272 }
 0x460   : > { %1638 = vbcast.lane.b32.xlu1 %v5598_v10, 264 }
 0x462   : > { %1198 = vbcast.lane.b32.xlu0 %v5606_v39, 256 }
 0x464   : > { %2010 = vbcast.lane.b32.xlu1 %v1203_v4, 272 }
 0x466   : > { %1622 = vbcast.lane.b32.xlu0 %v5606_v39, 264 }
 0x468   : > { %2374 = vbcast.lane.b32.xlu1 %v5538_v36, 280 }
 0x46a   : > { %1998 = vbcast.lane.b32.xlu0 %v1182_v58, 272 }
 0x46c   : > { %1642 = vbcast.lane.b32.xlu1 %v5614_v47, 264 }
 0x46e   : > { %2014 = vbcast.lane.b32.xlu0 %v1210_v3, 272 }
 0x470   : > { %2018 = vbcast.lane.b32.xlu1 %v1217_v6, 272 }
 0x472   : > { %1233 = vbcast.lane.b32.xlu0 %v5614_v47, 256 }
 0x474   : > { %1240 = vbcast.lane.b32.xlu1 %v5620_v55, 256 }
 0x476   : > { %2002 = vbcast.lane.b32.xlu0 %v1189_v9, 272 }
 0x478   : > { %1268 = vbcast.lane.b32.xlu1 %v5629_v12, 256 }
 0x47a   : > { %2378 = vbcast.lane.b32.xlu0 %v1175_v48, 280  ;;  %v5699_v48 = vrot.slane %v5623_v11, %v5560_v50 }
 0x47c   : > { %1658 = vbcast.lane.b32.xlu1 %v5634_v60, 264 }
 0x47e   : > { %1261 = vbcast.lane.b32.xlu0 %v5634_v60, 256 }
 0x480   : > { %2006 = vbcast.lane.b32.xlu1 %v5606_v39, 272 }
 0x482   : > { %1646 = vbcast.lane.b32.xlu0 %v5620_v55, 264 }
 0x484   : > { %2382 = vbcast.lane.b32.xlu1 %v1182_v58, 280 }
 0x486   : > { %1662 = vbcast.lane.b32.xlu0 %v5629_v12, 264 }
 0x488   : > { %2398 = vbcast.lane.b32.xlu1 %v1210_v3, 280 }
 0x48a   : > { %2022 = vbcast.lane.b32.xlu0 %v5598_v10, 272 }
 0x48c   : > { %1275 = vbcast.lane.b32.xlu1 %v5643_v13, 256 }
 0x48e   : > { %2394 = vbcast.lane.b32.xlu0 %v1203_v4, 280 }
 0x490   : > { %1666 = vbcast.lane.b32.xlu1 %v5643_v13, 264 }
 0x492   : > { %1247 = vbcast.lane.b32.xlu0 %v5649_v14, 256 }
 0x494   : > { %2386 = vbcast.lane.b32.xlu1 %v1189_v9, 280 }
 0x496   : > { %1650 = vbcast.lane.b32.xlu0 %v5649_v14, 264 }
 0x498   : > { %1254 = vbcast.lane.b32.xlu1 %v5659_v18, 256 }
 0x49a   : > { %2026 = vbcast.lane.b32.xlu0 %v5614_v47, 272 }
 0x49c   : > { %1654 = vbcast.lane.b32.xlu1 %v5659_v18, 264 }
 0x49e   : > { %2402 = vbcast.lane.b32.xlu0 %v1217_v6, 280 }
 0x4a0   : > { %2030 = vbcast.lane.b32.xlu1 %v5620_v55, 272 }
 0x4a2   : > { %1282 = vbcast.lane.b32.xlu0 %v5671_v22, 256 }
 0x4a4   : > { %v832_v25 = vpop.xlane.xlu1 %831  ;;  %2046 = vbcast.lane.b32.xlu1 %v5629_v12, 272 }
 0x4a5   : > { %v840_v26 = vmul.f32 0.015625, %v832_v25  ;;  %v829_v28 = vpop.xlane.xlu0 %828 }
 0x4a6   : > { %v839_v29 = vmul.f32 0.015625, %v829_v28  ;;  %1670 = vbcast.lane.b32.xlu0 %v5671_v22, 264 }
 0x4a7   : > { %v844_v30 = vadd.f32 1e-05, %v840_v26 }
 0x4a8   : > { %v843_v31 = vadd.f32 1e-05, %v839_v29  ;;  %v838_v33 = vpop.xlane.xlu1 %837  ;;  %2406 = vbcast.lane.b32.xlu1 %v5598_v10, 280 }
 0x4a9   : > { %5214 = vrsqrt.f32 %v844_v30  ;;  %v842_v35 = vmul.f32 0.015625, %v838_v33  ;;  %v835_v36 = vpop.xlane.xlu0 %834  ;;  %v5736_v30 = vrot.slane %v5702_v52, %v5462_v53 }
 0x4aa   : > { %5216 = vrsqrt.f32 %v843_v31  ;;  %v841_v37 = vmul.f32 0.015625, %v835_v36  ;;  %2042 = vbcast.lane.b32.xlu0 %v5634_v60, 272  ;;  %v5195_v31 = vunpack.i.l.bf16 %v5667_v21 }
 0x4ab   : > { %v846_v38 = vadd.f32 1e-05, %v842_v35  ;;  %v5196_v35 = vunpack.i.h.bf16 %v5667_v21  ;;  %v5200_v21 = vunpack.i.l.bf16 %v5651_v15 }
 0x4ac   : > { %v845_v40 = vadd.f32 1e-05, %v841_v37  ;;  %v5687_v43 = vpop.permute.xlu1 %1602  ;;  %1674 = vbcast.lane.b32.xlu1 %v5684_v34, 264 }
 0x4ad   : > { %10422 = vst [vmem:[#allocation6_spill] sm:$0xff] %v5687_v43  ;;  %5218 = vrsqrt.f32 %v846_v38  ;;  %v5690_v44 = vpop.permute.xlu0 %1163 }
 0x4ae   : > { %10423 = vst [vmem:[#allocation7_spill] sm:$0xff] %v5690_v44  ;;  %5220 = vrsqrt.f32 %v845_v40  ;;  %2390 = vbcast.lane.b32.xlu0 %v5606_v39, 280  ;;  %v5201_v40 = vunpack.i.h.bf16 %v5651_v15 }
 0x4b0   : > { %v5694_v46 = vpop.permute.xlu1 %1606  ;;  %2050 = vbcast.lane.b32.xlu1 %v5643_v13, 272 }
 0x4b1   : > { %10424 = vst [vmem:[#allocation8_spill] sm:$0xff] %v5694_v46  ;;  %v5704_v56 = vpop.permute.xlu0 %1170 }
 0x4b2   : > { %10425 = vst [vmem:[#allocation9_spill] sm:$0xff] %v5704_v56  ;;  %1289 = vbcast.lane.b32.xlu0 %v5684_v34, 256 }
 0x4b3   : > { %v5215_v57 = vpop.eup %5214 }
 0x4b4   : > { %v5217_v58 = vpop.eup %5216  ;;  %v852_v63 = vmul.f32 %v5215_v57, %v5484_v5  ;;  %v5711_v1 = vpop.permute.xlu1 %1982  ;;  %1296 = vbcast.lane.b32.xlu1 %v5699_v48, 256 }
 0x4b5   : > { %10426 = vst [vmem:[#allocation10_spill] sm:$0xff] %v5711_v1  ;;  %v5718_v2 = vpop.permute.xlu0 %1978  ;;  %v851_v3 = vmul.f32 %v5217_v58, %v5492_v8 }
 0x4b6   : > { %10427 = vst [vmem:[#allocation11_spill] sm:$0xff] %v5718_v2  ;;  %2034 = vbcast.lane.b32.xlu0 %v5649_v14, 272  ;;  %v860_v4 = vmul.f32 %v4531_v62, %v852_v63 }
 0x4b7   : > { %v5219_v5 = vpop.eup %5218  ;;  %v859_v6 = vmul.f32 %v4531_v62, %v851_v3 }
 0x4b8   : > { %v5221_v9 = vpop.eup %5220  ;;  %v5725_v10 = vpop.permute.xlu1 %1610  ;;  %v868_v39 = vadd.f32 %v4532_v59, %v860_v4  ;;  %v854_v61 = vmul.f32 %v5219_v5, %v5498_v16  ;;  %1324 = vbcast.lane.b32.xlu1 %v5716_v54, 256  ;;  %v1301_v5 = vrot.slane %v5623_v11, %v5591_v7 }
 0x4b9   : > { %10428 = vst [vmem:[#allocation12_spill] sm:$0xff] %v5725_v10  ;;  %v5729_v25 = vpop.permute.xlu0 %1177  ;;  %v867_v26 = vadd.f32 %v4532_v59, %v859_v6  ;;  %v853_v28 = vmul.f32 %v5221_v9, %v5507_v20  ;;  %v5807_v9 = vrot.slane %v5623_v11, %v5601_v0  ;;  %v1336_v11 = vrot.slane %v5702_v52, %v5528_v32 }
 0x4ba   : > { %10429 = vst [vmem:[#allocation13_spill] sm:$0xff] %v5729_v25  ;;  %v872_v8 = vsub.f32 %v868_v39, %v5375_v42  ;;  %2410 = vbcast.lane.b32.xlu0 %v5614_v47, 280  ;;  %v862_v29 = vmul.f32 %v4531_v62, %v854_v61  ;;  %v1343_v32 = vrot.slane %v5702_v52, %v5548_v41 }
 0x4bb   : > { %v871_v16 = vsub.f32 %v867_v26, %v5380_v45  ;;  %v861_v33 = vmul.f32 %v4531_v62, %v853_v28 }
 0x4bc   : > { %v5741_v36 = vpop.permute.xlu1 %1184  ;;  %v870_v37 = vadd.f32 %v4532_v59, %v862_v29  ;;  %1690 = vbcast.lane.b32.xlu1 %v5736_v30, 264  ;;  %v5751_v53 = vsel %vm498_vm3, %v872_v8, %v5196_v35 }
 0x4bd   : > { %10430 = vst [vmem:[#allocation14_spill] sm:$0xff] %v5741_v36  ;;  %v5744_v42 = vpop.permute.xlu0 %1986  ;;  %v5747_v20 = vsel %vm498_vm3, %v871_v16, %v5195_v31  ;;  %v869_v47 = vadd.f32 %v4532_v59, %v861_v33  ;;  %10433 = vst [vmem:[#allocation17_spill] sm:$0xff] %v5751_v53  ;;  %v5784_v59 = vrot.slane %v5702_v52, %v5517_v27 }
 0x4be   : > { %10431 = vst [vmem:[#allocation15_spill] sm:$0xff] %v5744_v42  ;;  %10432 = vst [vmem:[#allocation16_spill] sm:$0xff] %v5747_v20  ;;  %4892 = vmatprep.mubr.f32.mxu1 %v5747_v20  ;;  %v874_v45 = vsub.f32 %v870_v37, %v5385_v49  ;;  %1317 = vbcast.lane.b32.xlu0 %v5736_v30, 256  ;;  %v1364_v20 = vrot.slane %v5702_v52, %v5601_v0 }
 0x4bf   : > { %4893 = vmatmul.mubr.f32.vlgmr.msra.gmra.mrb[4].mxu1 %v5751_v53  ;;  %v873_v38 = vsub.f32 %v869_v47, %v5387_v51 }
 0x4c0   : > { %v5759_v57 = vpop.permute.xlu1 %1212  ;;  %2038 = vbcast.lane.b32.xlu1 %v5659_v18, 272  ;;  %v5769_v49 = vsel %vm498_vm3, %v874_v45, %v5201_v40 }
 0x4c1   : > { %10434 = vst [vmem:[#allocation18_spill] sm:$0xff] %v5759_v57  ;;  %v5762_v62 = vpop.permute.xlu0 %1205  ;;  %v5765_v58 = vsel %vm498_vm3, %v873_v38, %v5200_v21  ;;  %10437 = vst [vmem:[#allocation21_spill] sm:$0xff] %v5769_v49 }
 0x4c2   : > { %10435 = vst [vmem:[#allocation19_spill] sm:$0xff] %v5762_v62  ;;  %10436 = vst [vmem:[#allocation20_spill] sm:$0xff] %v5765_v58  ;;  %4895 = vmatprep.mubr.f32.mxu1 %v5765_v58  ;;  %1678 = vbcast.lane.b32.xlu0 %v5699_v48, 264 }
 0x4c3   : > { %4896 = vmatmul.mubr.f32.gmra.mrb[6].mxu1 %v5769_v49  ;;  %v1357_v49 = vrot.slane %v5702_v52, %v5591_v7 }
 0x4c4   : > { %v5773_v51 = vpop.permute.xlu1 %1626  ;;  %2414 = vbcast.lane.b32.xlu1 %v5620_v55, 280 }
 0x4c5   : > { %10438 = vst [vmem:[#allocation22_spill] sm:$0xff] %v5773_v51  ;;  %v5776_v15 = vpop.permute.xlu0 %1614 }
 0x4c6   : > { %10439 = vst [vmem:[#allocation23_spill] sm:$0xff] %v5776_v15  ;;  %1694 = vbcast.lane.b32.xlu0 %v5716_v54, 264 }
 0x4c8   : > { %v5779_v63 = vpop.permute.xlu1 %1990  ;;  %2430 = vbcast.lane.b32.xlu1 %v5629_v12, 280 }
 0x4c9   : > { %10440 = vst [vmem:[#allocation24_spill] sm:$0xff] %v5779_v63  ;;  %v5786_v3 = vpop.permute.xlu0 %1630 }
 0x4ca   : > { %10441 = vst [vmem:[#allocation25_spill] sm:$0xff] %v5786_v3  ;;  %2054 = vbcast.lane.b32.xlu0 %v5671_v22, 272 }
 0x4cc   : > { %v5789_v4 = vpop.permute.xlu1 %2366  ;;  %1331 = vbcast.lane.b32.xlu1 %v5784_v59, 256 }
 0x4cd   : > { %10442 = vst [vmem:[#allocation26_spill] sm:$0xff] %v5789_v4  ;;  %v5792_v55 = vpop.permute.xlu0 %2362 }
 0x4ce   : > { %10443 = vst [vmem:[#allocation27_spill] sm:$0xff] %v5792_v55  ;;  %2426 = vbcast.lane.b32.xlu0 %v5634_v60, 280 }
 0x4d0   : > { %v5797_v12 = vpop.permute.xlu1 %1219  ;;  %1698 = vbcast.lane.b32.xlu1 %v5784_v59, 264 }
 0x4d1   : > { %10444 = vst [vmem:[#allocation28_spill] sm:$0xff] %v5797_v12  ;;  %v5800_v27 = vpop.permute.xlu0 %1191 }
 0x4d2   : > { %10445 = vst [vmem:[#allocation29_spill] sm:$0xff] %v5800_v27  ;;  %1303 = vbcast.lane.b32.xlu0 %v1301_v5, 256 }
 0x4d4   : > { %v5802_v6 = vpop.permute.xlu1 %1634  ;;  %2418 = vbcast.lane.b32.xlu1 %v5649_v14, 280 }
 0x4d5   : > { %10446 = vst [vmem:[#allocation30_spill] sm:$0xff] %v5802_v6  ;;  %v5809_v39 = vpop.permute.xlu0 %1618 }
 0x4d6   : > { %10447 = vst [vmem:[#allocation31_spill] sm:$0xff] %v5809_v39  ;;  %1682 = vbcast.lane.b32.xlu0 %v1301_v5, 264 }
 0x4d8   : > { %v5811_v60 = vpop.permute.xlu1 %2370  ;;  %1310 = vbcast.lane.b32.xlu1 %v5807_v9, 256 }
 0x4d9   : > { %10448 = vst [vmem:[#allocation32_spill] sm:$0xff] %v5811_v60  ;;  %v5814_v61 = vpop.permute.xlu0 %1994 }
 0x4da   : > { %10449 = vst [vmem:[#allocation33_spill] sm:$0xff] %v5814_v61  ;;  %2058 = vbcast.lane.b32.xlu0 %v5684_v34, 272 }
 0x4dc   : > { %v5817_v26 = vpop.permute.xlu1 %1226  ;;  %1686 = vbcast.lane.b32.xlu1 %v5807_v9, 264 }
 0x4dd   : > { %10450 = vst [vmem:[#allocation34_spill] sm:$0xff] %v5817_v26  ;;  %v5820_v14 = vpop.permute.xlu0 %1198 }
 0x4de   : > { %10451 = vst [vmem:[#allocation35_spill] sm:$0xff] %v5820_v14  ;;  %2434 = vbcast.lane.b32.xlu0 %v5643_v13, 280 }
 0x4e0   : > { %v5825_v28 = vpop.permute.xlu1 %1638  ;;  %2062 = vbcast.lane.b32.xlu1 %v5699_v48, 272 }
 0x4e1   : > { %10452 = vst [vmem:[#allocation36_spill] sm:$0xff] %v5825_v28  ;;  %v5828_v8 = vpop.permute.xlu0 %1622 }
 0x4e2   : > { %10453 = vst [vmem:[#allocation37_spill] sm:$0xff] %v5828_v8  ;;  %1338 = vbcast.lane.b32.xlu0 %v1336_v11, 256 }
 0x4e4   : > { %v5830_v29 = vpop.permute.xlu1 %2010  ;;  %2078 = vbcast.lane.b32.xlu1 %v5716_v54, 272 }
 0x4e5   : > { %10454 = vst [vmem:[#allocation38_spill] sm:$0xff] %v5830_v29  ;;  %v5833_v31 = vpop.permute.xlu0 %1998 }
 0x4e6   : > { %10455 = vst [vmem:[#allocation39_spill] sm:$0xff] %v5833_v31  ;;  %1702 = vbcast.lane.b32.xlu0 %v1336_v11, 264 }
 0x4e8   : > { %v5835_v16 = vpop.permute.xlu1 %2374  ;;  %2438 = vbcast.lane.b32.xlu1 %v5671_v22, 280  ;;  %v1350_v22 = vrot.slane %v5702_v52, %v5560_v50 }
 0x4e9   : > { %10456 = vst [vmem:[#allocation40_spill] sm:$0xff] %v5835_v16  ;;  %v5840_v13 = vpop.permute.xlu0 %2014 }
 0x4ea   : > { %10457 = vst [vmem:[#allocation41_spill] sm:$0xff] %v5840_v13  ;;  %2074 = vbcast.lane.b32.xlu0 %v5736_v30, 272 }
 0x4ec   : > { %v5843_v33 = vpop.permute.xlu1 %1642  ;;  %1706 = vbcast.lane.b32.xlu1 %v1343_v32, 264 }
 0x4ed   : > { %10458 = vst [vmem:[#allocation42_spill] sm:$0xff] %v5843_v33  ;;  %v5845_v35 = vpop.permute.xlu0 %1233 }
 0x4ee   : > { %10459 = vst [vmem:[#allocation43_spill] sm:$0xff] %v5845_v35  ;;  %2422 = vbcast.lane.b32.xlu0 %v5659_v18, 280 }
 0x4f0   : > { %v5848_v37 = vpop.permute.xlu1 %2018  ;;  %2082 = vbcast.lane.b32.xlu1 %v5784_v59, 272 }
 0x4f1   : > { %10460 = vst [vmem:[#allocation44_spill] sm:$0xff] %v5848_v37  ;;  %v5853_v47 = vpop.permute.xlu0 %2002 }
 0x4f2   : > { %10461 = vst [vmem:[#allocation45_spill] sm:$0xff] %v5853_v47  ;;  %1345 = vbcast.lane.b32.xlu0 %v1343_v32, 256 }
 0x4f4   : > { %v5855_v41 = vpop.permute.xlu1 %1240  ;;  %1352 = vbcast.lane.b32.xlu1 %v1350_v22, 256 }
 0x4f5   : > { %10462 = vst [vmem:[#allocation46_spill] sm:$0xff] %v5855_v41  ;;  %v5857_v45 = vpop.permute.xlu0 %2378 }
 0x4f6   : > { %10463 = vst [vmem:[#allocation47_spill] sm:$0xff] %v5857_v45  ;;  %2066 = vbcast.lane.b32.xlu0 %v1301_v5, 272 }
 0x4f8   : > { %v5859_v21 = vpop.permute.xlu1 %1268  ;;  %2070 = vbcast.lane.b32.xlu1 %v5807_v9, 272 }
 0x4f9   : > { %10464 = vst [vmem:[#allocation48_spill] sm:$0xff] %v5859_v21  ;;  %v5862_v18 = vpop.permute.xlu0 %1261 }
 0x4fa   : > { %10465 = vst [vmem:[#allocation49_spill] sm:$0xff] %v5862_v18  ;;  %2442 = vbcast.lane.b32.xlu0 %v5684_v34, 280 }
 0x4fc   : > { %v5865_v38 = vpop.permute.xlu1 %1658  ;;  %2446 = vbcast.lane.b32.xlu1 %v5699_v48, 280 }
 0x4fd   : > { %10466 = vst [vmem:[#allocation50_spill] sm:$0xff] %v5865_v38  ;;  %v5868_v50 = vpop.permute.xlu0 %1646 }
 0x4fe   : > { %10467 = vst [vmem:[#allocation51_spill] sm:$0xff] %v5868_v50  ;;  %1710 = vbcast.lane.b32.xlu0 %v1350_v22, 264 }
 0x500   : > { %v5870_v40 = vpop.permute.xlu1 %2006  ;;  %2462 = vbcast.lane.b32.xlu1 %v5716_v54, 280 }
 0x501   : > { %10468 = vst [vmem:[#allocation52_spill] sm:$0xff] %v5870_v40  ;;  %v5875_v58 = vpop.permute.xlu0 %1662 }
 0x502   : > { %10469 = vst [vmem:[#allocation53_spill] sm:$0xff] %v5875_v58  ;;  %2086 = vbcast.lane.b32.xlu0 %v1336_v11, 272 }
 0x504   : > { %v5877_v53 = vpop.permute.xlu1 %2382  ;;  %1714 = vbcast.lane.b32.xlu1 %v1357_v49, 264 }
 0x505   : > { %10470 = vst [vmem:[#allocation54_spill] sm:$0xff] %v5877_v53  ;;  %v5879_v34 = vpop.permute.xlu0 %2022 }
 0x506   : > { %10471 = vst [vmem:[#allocation55_spill] sm:$0xff] %v5879_v34  ;;  %2458 = vbcast.lane.b32.xlu0 %v5736_v30, 280 }
 0x508   : > { %v5882_v48 = vpop.permute.xlu1 %2398  ;;  %2450 = vbcast.lane.b32.xlu1 %v1301_v5, 280 }
 0x509   : > { %10472 = vst [vmem:[#allocation56_spill] sm:$0xff] %v5882_v48  ;;  %v5886_v54 = vpop.permute.xlu0 %2394 }
 0x50a   : > { %10473 = vst [vmem:[#allocation57_spill] sm:$0xff] %v5886_v54  ;;  %1359 = vbcast.lane.b32.xlu0 %v1357_v49, 256 }
 0x50c   : > { %v5888_v7 = vpop.permute.xlu1 %1275  ;;  %1366 = vbcast.lane.b32.xlu1 %v1364_v20, 256 }
 0x50d   : > { %10474 = vst [vmem:[#allocation58_spill] sm:$0xff] %v5888_v7  ;;  %v5890_v37 = vpop.permute.xlu0 %1247 }
 0x50e   : > { %10475 = vst [vmem:[#allocation59_spill] sm:$0xff] %v5890_v37  ;;  %2090 = vbcast.lane.b32.xlu0 %v1343_v32, 272 }
 0x510   : > { %v5892_v13 = vpop.permute.xlu1 %1666  ;;  %2094 = vbcast.lane.b32.xlu1 %v1350_v22, 272 }
 0x511   : > { %10476 = vst [vmem:[#allocation60_spill] sm:$0xff] %v5892_v13  ;;  %v5894_v34 = vpop.permute.xlu0 %1650 }
 0x512   : > { %10477 = vst [vmem:[#allocation61_spill] sm:$0xff] %v5894_v34  ;;  %2466 = vbcast.lane.b32.xlu0 %v5784_v59, 280 }
 0x514   : > { %v5897_v30 = vpop.permute.xlu1 %2386  ;;  %2470 = vbcast.lane.b32.xlu1 %v1336_v11, 280 }
 0x515   : > { %10478 = vst [vmem:[#allocation62_spill] sm:$0xff] %v5897_v30  ;;  %v5899_v0 = vpop.permute.xlu0 %2026 }
 0x516   : > { %10479 = vst [vmem:[#allocation63_spill] sm:$0xff] %v5899_v0  ;;  %1718 = vbcast.lane.b32.xlu0 %v1364_v20, 264 }
 0x518   : > { %v5901_v52 = vpop.permute.xlu1 %1254  ;;  %2474 = vbcast.lane.b32.xlu1 %v1343_v32, 280 }
 0x519   : > { %10480 = vst [vmem:[#allocation64_spill] sm:$0xff] %v5901_v52  ;;  %v5903_v5 = vpop.permute.xlu0 %2402 }
 0x51a   : > { %10481 = vst [vmem:[#allocation65_spill] sm:$0xff] %v5903_v5  ;;  %2454 = vbcast.lane.b32.xlu0 %v5807_v9, 280 }
 0x51c   : > { %v5906_v29 = vpop.permute.xlu1 %1654  ;;  %2478 = vbcast.lane.b32.xlu1 %v1350_v22, 280 }
 0x51d   : > { %10482 = vst [vmem:[#allocation66_spill] sm:$0xff] %v5906_v29  ;;  %v5908_v40 = vpop.permute.xlu0 %1282 }
 0x51e   : > { %10483 = vst [vmem:[#allocation67_spill] sm:$0xff] %v5908_v40  ;;  %2098 = vbcast.lane.b32.xlu0 %v1357_v49, 272 }
 0x520   : > { %v5910_v59 = vpop.permute.xlu1 %2030  ;;  %2486 = vbcast.lane.b32.xlu1 %v1364_v20, 280 }
 0x521   : > { %10484 = vst [vmem:[#allocation68_spill] sm:$0xff] %v5910_v59  ;;  %v5912_v11 = vpop.permute.xlu0 %1670 }
 0x522   : > { %10485 = vst [vmem:[#allocation69_spill] sm:$0xff] %v5912_v11  ;;  %2102 = vbcast.lane.b32.xlu0 %v1364_v20, 272 }
 0x524   : > { %v5914_v0 = vpop.permute.xlu1 %2046 }
 0x525   : > { %10486 = vst [vmem:[#allocation70_spill] sm:$0xff] %v5914_v0  ;;  %v5916_v47 = vpop.permute.xlu0 %2042 }
 0x526   : > { %10487 = vst [vmem:[#allocation71_spill] sm:$0xff] %v5916_v47  ;;  %2482 = vbcast.lane.b32.xlu0 %v1357_v49, 280 }
 0x528   : > { %v5918_v32 = vpop.permute.xlu1 %2406 }
 0x529   : > { %10488 = vst [vmem:[#allocation72_spill] sm:$0xff] %v5918_v32  ;;  %v5920_v9 = vpop.permute.xlu0 %2390 }
 0x52a   : > { %10489 = vst [vmem:[#allocation73_spill] sm:$0xff] %v5920_v9 }
 0x52c   : > { %v5922_v31 = vpop.permute.xlu1 %1674 }
 0x52d   : > { %10490 = vst [vmem:[#allocation74_spill] sm:$0xff] %v5922_v31  ;;  %v5924_v22 = vpop.permute.xlu0 %1289 }
 0x52e   : > { %10491 = vst [vmem:[#allocation75_spill] sm:$0xff] %v5924_v22 }
 0x530   : > { %v5926_v61 = vpop.permute.xlu1 %2050 }
 0x531   : > { %10492 = vst [vmem:[#allocation76_spill] sm:$0xff] %v5926_v61  ;;  %v5928_v59 = vpop.permute.xlu0 %2034 }
 0x532   : > { %10493 = vst [vmem:[#allocation77_spill] sm:$0xff] %v5928_v59 }
 0x534   : > { %v5930_v63 = vpop.permute.xlu1 %1296 }
 0x535   : > { %10494 = vst [vmem:[#allocation78_spill] sm:$0xff] %v5930_v63  ;;  %v5932_v20 = vpop.permute.xlu0 %2410 }
 0x536   : > { %10495 = vst [vmem:[#allocation79_spill] sm:$0xff] %v5932_v20 }
 0x538   : > { %v5934_v0 = vpop.permute.xlu1 %1324 }
 0x539   : > { %10496 = vst [vmem:[#allocation80_spill] sm:$0xff] %v5934_v0  ;;  %v5936_v47 = vpop.permute.xlu0 %1317 }
 0x53a   : > { %10497 = vst [vmem:[#allocation81_spill] sm:$0xff] %v5936_v47 }
 0x53c   : > { %v5938_v49 = vpop.permute.xlu1 %1690 }
 0x53d   : > { %10498 = vst [vmem:[#allocation82_spill] sm:$0xff] %v5938_v49  ;;  %v5940_v42 = vpop.permute.xlu0 %1678 }
 0x53e   : > { %10499 = vst [vmem:[#allocation83_spill] sm:$0xff] %v5940_v42 }
 0x540   : > { %v5942_v1 = vpop.permute.xlu1 %2038 }
 0x541   : > { %10500 = vst [vmem:[#allocation84_spill] sm:$0xff] %v5942_v1  ;;  %v5944_v2 = vpop.permute.xlu0 %1694 }
 0x542   : > { %10501 = vst [vmem:[#allocation85_spill] sm:$0xff] %v5944_v2 }
 0x544   : > { %v5946_v32 = vpop.permute.xlu1 %2414 }
 0x545   : > { %10502 = vst [vmem:[#allocation86_spill] sm:$0xff] %v5946_v32  ;;  %v5948_v61 = vpop.permute.xlu0 %2054 }
 0x546   : > { %10503 = vst [vmem:[#allocation87_spill] sm:$0xff] %v5948_v61 }
 0x548   : > { %v5950_v59 = vpop.permute.xlu1 %2430 }
 0x549   : > { %10504 = vst [vmem:[#allocation88_spill] sm:$0xff] %v5950_v59  ;;  %v5952_v5 = vpop.permute.xlu0 %2426 }
 0x54a   : > { %10505 = vst [vmem:[#allocation89_spill] sm:$0xff] %v5952_v5 }
 0x54c   : > { %v5954_v20 = vpop.permute.xlu1 %1331 }
 0x54d   : > { %10506 = vst [vmem:[#allocation90_spill] sm:$0xff] %v5954_v20  ;;  %v5956_v48 = vpop.permute.xlu0 %1303 }
 0x54e   : > { %10507 = vst [vmem:[#allocation91_spill] sm:$0xff] %v5956_v48 }
 0x550   : > { %v5958_v54 = vpop.permute.xlu1 %1698 }
 0x551   : > { %10508 = vst [vmem:[#allocation92_spill] sm:$0xff] %v5958_v54  ;;  %v5960_v9 = vpop.permute.xlu0 %1682 }
 0x552   : > { %10509 = vst [vmem:[#allocation93_spill] sm:$0xff] %v5960_v9 }
 0x554   : > { %v5962_v30 = vpop.permute.xlu1 %2418 }
 0x555   : > { %10510 = vst [vmem:[#allocation94_spill] sm:$0xff] %v5962_v30  ;;  %v5964_v1 = vpop.permute.xlu0 %2058 }
 0x556   : > { %10511 = vst [vmem:[#allocation95_spill] sm:$0xff] %v5964_v1 }
 0x558   : > { %v5966_v53 = vpop.permute.xlu1 %1310 }
 0x559   : > { %10512 = vst [vmem:[#allocation96_spill] sm:$0xff] %v5966_v53  ;;  %v5968_v32 = vpop.permute.xlu0 %2434 }
 0x55a   : > { %10513 = vst [vmem:[#allocation97_spill] sm:$0xff] %v5968_v32 }
 0x55c   : > { %v5970_v61 = vpop.permute.xlu1 %1686 }
 0x55d   : > { %10514 = vst [vmem:[#allocation98_spill] sm:$0xff] %v5970_v61  ;;  %v5972_v59 = vpop.permute.xlu0 %1338 }
 0x55e   : > { %10515 = vst [vmem:[#allocation99_spill] sm:$0xff] %v5972_v59 }
 0x560   : > { %v5976_v45 = vpop.permute.xlu1 %2062 }
 0x561   : > { %v5974_v5 = vpop.permute.xlu0 %1702  ;;  %10517 = vst [vmem:[#allocation101_spill] sm:$0xff] %v5976_v45 }
 0x562   : > { %10516 = vst [vmem:[#allocation100_spill] sm:$0xff] %v5974_v5 }
 0x564   : > { %v5980_v60 = vpop.permute.xlu1 %2078 }
 0x565   : > { %v5978_v16 = vpop.permute.xlu0 %2074  ;;  %10519 = vst [vmem:[#allocation103_spill] sm:$0xff] %v5980_v60 }
 0x566   : > { %10518 = vst [vmem:[#allocation102_spill] sm:$0xff] %v5978_v16 }
 0x568   : > { %v5986_v1 = vpop.permute.xlu1 %2438 }
 0x569   : > { %v5982_v4 = vpop.permute.xlu0 %2422  ;;  %10522 = vst [vmem:[#allocation106_spill] sm:$0xff] %v5986_v1 }
 0x56a   : > { %10520 = vst [vmem:[#allocation104_spill] sm:$0xff] %v5982_v4 }
 0x56c   : > { %v5990_v32 = vpop.permute.xlu1 %1706 }
 0x56d   : > { %v5984_v30 = vpop.permute.xlu0 %1345  ;;  %10524 = vst [vmem:[#allocation108_spill] sm:$0xff] %v5990_v32 }
 0x56e   : > { %10521 = vst [vmem:[#allocation105_spill] sm:$0xff] %v5984_v30 }
 0x570   : > { %v5996_v0 = vpop.permute.xlu1 %2082 }
 0x571   : > { %v5988_v55 = vpop.permute.xlu0 %2066  ;;  %10527 = vst [vmem:[#allocation111_spill] sm:$0xff] %v5996_v0 }
 0x572   : > { %10523 = vst [vmem:[#allocation107_spill] sm:$0xff] %v5988_v55  ;;  %v6013_v55 = vld [vmem:[%s9947_s8 + $0x6] ss:$0 sm:$0xff] }
 0x573   : > { %10534 = vst [vmem:[#allocation118_spill] sm:$0xff] %v6013_v55 }
 0x574   : > { %v6000_v16 = vpop.permute.xlu1 %1352 }
 0x575   : > { %v5992_v20 = vpop.permute.xlu0 %2442  ;;  %10529 = vst [vmem:[#allocation113_spill] sm:$0xff] %v6000_v16 }
 0x576   : > { %10525 = vst [vmem:[#allocation109_spill] sm:$0xff] %v5992_v20 }
 0x578   : > { %v6004_v4 = vpop.permute.xlu1 %2070 }
 0x579   : > { %v5994_v59 = vpop.permute.xlu0 %1710  ;;  %10531 = vst [vmem:[#allocation115_spill] sm:$0xff] %v6004_v4 }
 0x57a   : > { %10526 = vst [vmem:[#allocation110_spill] sm:$0xff] %v5994_v59 }
 0x57c   : > { %v6008_v1 = vpop.permute.xlu1 %2446 }
 0x57d   : > { %v5998_v45 = vpop.permute.xlu0 %2086  ;;  %10533 = vst [vmem:[#allocation117_spill] sm:$0xff] %v6008_v1 }
 0x57e   : > { %10528 = vst [vmem:[#allocation112_spill] sm:$0xff] %v5998_v45 }
 0x580   : > { %v6017_v47 = vpop.permute.xlu1 %2462 }
 0x581   : > { %v6002_v60 = vpop.permute.xlu0 %2458  ;;  %10536 = vst [vmem:[#allocation120_spill] sm:$0xff] %v6017_v47 }
 0x582   : > { %10530 = vst [vmem:[#allocation114_spill] sm:$0xff] %v6002_v60 }
 0x585   : > { %v6006_v30 = vpop.permute.xlu0 %1359 }
 0x586   : > { %10532 = vst [vmem:[#allocation116_spill] sm:$0xff] %v6006_v30 }
 0x589   : > { %v6015_v20 = vpop.permute.xlu0 %2090 }
 0x58a   : > { %10535 = vst [vmem:[#allocation119_spill] sm:$0xff] %v6015_v20 }
 0x58d   : > { %v6025_v1 = vpop.permute.xlu0 %2466 }
 0x58e   : > { %10538 = vst [vmem:[#allocation122_spill] sm:$0xff] %v6025_v1 }
 0x592   : > { %v4894_v0 = vpop.f32.mrb[4].mxu1 }
 0x593   : > { %v1127_v45 = vadd.f32 %v4894_v0, %v6013_v55  ;;  %v1121_v16 = vpop.f32.mrb[5].mxu1 }
 0x594   : > { %v1122_v60 = vadd.f32 %v6013_v55, %v1121_v16 }
 0x595   : > { %v1141_v4 = vmax.f32 %v1127_v45, 0.0 }
 0x596   : > { %v6021_v53 = vmax.f32 %v1122_v60, 0.0  ;;  %v6023_v30 = vpop.f32.mrb[6].mxu1 }
 0x597   : > { %10537 = vst [vmem:[#allocation121_spill] sm:$0xff] %v6023_v30  ;;  %v6028_v48 = vmul.f32 %v5676_v24, %v1141_v4  ;;  %v6031_v20 = vmul.f32 %v5673_v23, %v1141_v4  ;;  %v6034_v47 = vmul.f32 %v5687_v43, %v1141_v4  ;;  %v6037_v0 = vmul.f32 %v5694_v46, %v1141_v4  ;;  %v6051_v23 = vpop.permute.xlu1 %1714 }
 0x598   : > { %v6040_v16 = vmul.f32 %v5725_v10, %v1141_v4  ;;  %v6043_v60 = vmul.f32 %v5776_v15, %v1141_v4  ;;  %v6046_v45 = vmul.f32 %v5809_v39, %v1141_v4  ;;  %v6049_v24 = vmul.f32 %v5828_v8, %v1141_v4  ;;  %10539 = vst [vmem:[#allocation123_spill] sm:$0xff] %v6051_v23 }
 0x599   : > { %v6054_v43 = vmul.f32 %v5773_v51, %v1141_v4  ;;  %v6057_v46 = vmul.f32 %v5786_v3, %v1141_v4  ;;  %v6060_v10 = vmul.f32 %v5802_v6, %v1141_v4  ;;  %v6063_v15 = vmul.f32 %v5825_v28, %v1141_v4 }
 0x59a   : > { %v6066_v39 = vmul.f32 %v5843_v33, %v1141_v4  ;;  %v6069_v8 = vmul.f32 %v5868_v50, %v1141_v4  ;;  %v6072_v1 = vmul.f32 %v5894_v34, %v1141_v4  ;;  %v6075_v51 = vmul.f32 %v5906_v29, %v1141_v4 }
 0x59b   : > { %v6078_v3 = vmul.f32 %v5865_v38, %v1141_v4  ;;  %v6081_v6 = vmul.f32 %v5875_v58, %v1141_v4  ;;  %v6084_v28 = vmul.f32 %v5892_v13, %v1141_v4  ;;  %v6087_v33 = vmul.f32 %v5912_v11, %v1141_v4  ;;  %v6101_v58 = vpop.permute.xlu0 %1718 }
 0x59c   : > { %v6090_v50 = vmul.f32 %v5922_v31, %v1141_v4  ;;  %v6093_v34 = vmul.f32 %v5940_v42, %v1141_v4  ;;  %v6096_v29 = vmul.f32 %v5960_v9, %v1141_v4  ;;  %v6099_v38 = vmul.f32 %v5970_v61, %v1141_v4  ;;  %10540 = vst [vmem:[#allocation124_spill] sm:$0xff] %v6101_v58 }
 0x59d   : > { %v6104_v13 = vmul.f32 %v5938_v49, %v1141_v4  ;;  %v6107_v11 = vmul.f32 %v5944_v2, %v1141_v4  ;;  %v6110_v31 = vmul.f32 %v5958_v54, %v1141_v4  ;;  %v6113_v42 = vmul.f32 %v5974_v5, %v1141_v4  ;;  %v6127_v2 = vpop.permute.xlu1 %2450 }
 0x59e   : > { %v6116_v9 = vmul.f32 %v5990_v32, %v1141_v4  ;;  %v6119_v61 = vmul.f32 %v5994_v59, %v1141_v4  ;;  %v6122_v30 = vmul.f32 %v6051_v23, %v1141_v4  ;;  %v6125_v49 = vmul.f32 %v6101_v58, %v1141_v4  ;;  %10541 = vst [vmem:[#allocation125_spill] sm:$0xff] %v6127_v2  ;;  %v10554_v58 = vld [vmem:[#allocation91_spill] sm:$0xff]  ;;  %v10556_v32 = vld [vmem:[#allocation96_spill] sm:$0xff] }
 0x59f   : > { %v6131_v54 = vmul.f32 %v5655_v17, %v6021_v53  ;;  %v6135_v5 = vmul.f32 %v5663_v19, %v6021_v53  ;;  %v6139_v59 = vmul.f32 %v5690_v44, %v6021_v53  ;;  %v6143_v23 = vmul.f32 %v5704_v56, %v6021_v53 }
 0x5a0   : > { %v6147_v4 = vmul.f32 %v5729_v25, %v6021_v53  ;;  %v6151_v17 = vmul.f32 %v5741_v36, %v6021_v53  ;;  %v6155_v19 = vmul.f32 %v5800_v27, %v6021_v53  ;;  %v6159_v44 = vmul.f32 %v5820_v14, %v6021_v53 }
 0x5a1   : > { %v6163_v56 = vmul.f32 %v5762_v62, %v6021_v53  ;;  %v6167_v25 = vmul.f32 %v5759_v57, %v6021_v53  ;;  %v6171_v36 = vmul.f32 %v5797_v12, %v6021_v53  ;;  %v6175_v27 = vmul.f32 %v5817_v26, %v6021_v53  ;;  %v6225_v2 = vpop.permute.xlu1 %1366 }
 0x5a2   : > { %v6179_v14 = vmul.f32 %v5845_v35, %v6021_v53  ;;  %v6183_v62 = vmul.f32 %v5855_v41, %v6021_v53  ;;  %v6187_v57 = vmul.f32 %v5890_v37, %v6021_v53  ;;  %v6191_v12 = vmul.f32 %v5901_v52, %v6021_v53  ;;  %10558 = vst [vmem:[#allocation140_spill] sm:$0xff] %v6225_v2 }
 0x5a3   : > { %10542 = vst [vmem:[#allocation126_spill] sm:$0xff] %v6167_v25  ;;  %10543 = vst [vmem:[#allocation127_spill] sm:$0xff] %v6171_v36  ;;  %v6195_v26 = vmul.f32 %v5862_v18, %v6021_v53  ;;  %v6199_v35 = vmul.f32 %v5859_v21, %v6021_v53  ;;  %v6203_v41 = vmul.f32 %v5888_v7, %v6021_v53 }
 0x5a4   : > { %10544 = vst [vmem:[#allocation128_spill] sm:$0xff] %v6175_v27  ;;  %10545 = vst [vmem:[#allocation129_spill] sm:$0xff] %v6179_v14  ;;  %v6207_v37 = vmul.f32 %v5908_v40, %v6021_v53  ;;  %v6211_v52 = vmul.f32 %v5924_v22, %v6021_v53  ;;  %v6215_v18 = vmul.f32 %v5930_v63, %v6021_v53  ;;  %v10559_v40 = vld [vmem:[#allocation81_spill] sm:$0xff]  ;;  %v10561_v22 = vld [vmem:[#allocation80_spill] sm:$0xff] }
 0x5a5   : > { %10546 = vst [vmem:[#allocation130_spill] sm:$0xff] %v6183_v62  ;;  %10547 = vst [vmem:[#allocation131_spill] sm:$0xff] %v6191_v12  ;;  %v6219_v21 = vmul.f32 %v10554_v58, %v6021_v53  ;;  %v6223_v7 = vmul.f32 %v10556_v32, %v6021_v53  ;;  %v6229_v55 = vmul.f32 %v10559_v40, %v6021_v53  ;;  %v10562_v63 = vld [vmem:[#allocation90_spill] sm:$0xff]  ;;  %v10564_v58 = vld [vmem:[#allocation99_spill] sm:$0xff] }
 0x5a6   : > { %10548 = vst [vmem:[#allocation132_spill] sm:$0xff] %v6195_v26  ;;  %10549 = vst [vmem:[#allocation133_spill] sm:$0xff] %v6199_v35  ;;  %v10566_v32 = vld [vmem:[#allocation105_spill] sm:$0xff] }
 0x5a7   : > { %10550 = vst [vmem:[#allocation134_spill] sm:$0xff] %v6203_v41  ;;  %10551 = vst [vmem:[#allocation135_spill] sm:$0xff] %v6207_v37  ;;  %v10568_v37 = vld [vmem:[#allocation113_spill] sm:$0xff] }
 0x5a8   : > { %10552 = vst [vmem:[#allocation136_spill] sm:$0xff] %v6211_v52  ;;  %10553 = vst [vmem:[#allocation137_spill] sm:$0xff] %v6215_v18  ;;  %v6233_v52 = vmul.f32 %v10561_v22, %v6021_v53  ;;  %v6237_v18 = vmul.f32 %v10562_v63, %v6021_v53  ;;  %v6249_v40 = vmul.f32 %v10568_v37, %v6021_v53 }
 0x5a9   : > { %10555 = vst [vmem:[#allocation138_spill] sm:$0xff] %v6219_v21  ;;  %10557 = vst [vmem:[#allocation139_spill] sm:$0xff] %v6223_v7  ;;  %v6241_v21 = vmul.f32 %v10564_v58, %v6021_v53  ;;  %v6245_v7 = vmul.f32 %v10566_v32, %v6021_v53  ;;  %v6257_v63 = vmul.f32 %v6225_v2, %v6021_v53  ;;  %v10586_v58 = vrot.slane %v6037_v0, 4 }
 0x5aa   : > { %10560 = vst [vmem:[#allocation141_spill] sm:$0xff] %v6229_v55  ;;  %10563 = vst [vmem:[#allocation142_spill] sm:$0xff] %v6237_v18  ;;  %v10570_v55 = vld [vmem:[#allocation116_spill] sm:$0xff]  ;;  %v10578_v12 = vmov %v6237_v18  ;;  %v10581_v41 = vmov %v6249_v40  ;;  %v10587_v32 = vrot.slane %v6040_v16, 4 }
 0x5ab   : > { %10565 = vst [vmem:[#allocation143_spill] sm:$0xff] %v6241_v21  ;;  %10567 = vst [vmem:[#allocation144_spill] sm:$0xff] %v6245_v7  ;;  %v6253_v22 = vmul.f32 %v10570_v55, %v6021_v53  ;;  %v10579_v26 = vmov %v6241_v21  ;;  %v10580_v35 = vmov %v6245_v7  ;;  %v10583_v7 = vrot.slane %v6028_v48, 4 }
 0x5ac   : > { %10569 = vst [vmem:[#allocation145_spill] sm:$0xff] %v6249_v40  ;;  %v10584_v40 = vrot.slane %v6031_v20, 4  ;;  %v10585_v53 = vrot.slane %v6034_v47, 4  ;;  %v6341_v21 = vmax.f32 %v6037_v0, %v10586_v58  ;;  %v10591_v0 = vrot.slane %v6054_v43, 4 }
 0x5ad   : > { %10571 = vst [vmem:[#allocation146_spill] sm:$0xff] %v6253_v22  ;;  %v10582_v2 = vmov %v6253_v22  ;;  %v6326_v37 = vmax.f32 %v6028_v48, %v10583_v7  ;;  %v6346_v48 = vmax.f32 %v6040_v16, %v10587_v32  ;;  %v10588_v7 = vrot.slane %v6043_v60, 4 }
 0x5ae   : > { %v6331_v55 = vmax.f32 %v6031_v20, %v10584_v40  ;;  %v6336_v18 = vmax.f32 %v6034_v47, %v10585_v53  ;;  %v10589_v20 = vrot.slane %v6046_v45, 4  ;;  %v10590_v53 = vrot.slane %v6049_v24, 4 }
 0x5af   : > { %v10573_v25 = vld [vmem:[#allocation136_spill] sm:$0xff]  ;;  %v10574_v36 = vld [vmem:[#allocation137_spill] sm:$0xff]  ;;  %v6351_v40 = vmax.f32 %v6043_v60, %v10588_v7  ;;  %v6366_v32 = vmax.f32 %v6054_v43, %v10591_v0  ;;  %v10592_v16 = vrot.slane %v6057_v46, 4  ;;  %v10593_v7 = vrot.slane %v6060_v10, 4 }
 0x5b0   : > { %v10575_v27 = vld [vmem:[#allocation138_spill] sm:$0xff]  ;;  %v10576_v14 = vld [vmem:[#allocation139_spill] sm:$0xff]  ;;  %v6356_v47 = vmax.f32 %v6046_v45, %v10589_v20  ;;  %v6361_v58 = vmax.f32 %v6049_v24, %v10590_v53  ;;  %v10594_v20 = vrot.slane %v6063_v15, 4  ;;  %v10595_v53 = vrot.slane %v6066_v39, 4 }
 0x5b1   : > { %v10577_v62 = vld [vmem:[#allocation141_spill] sm:$0xff]  ;;  %v6371_v60 = vmax.f32 %v6057_v46, %v10592_v16  ;;  %v6376_v45 = vmax.f32 %v6060_v10, %v10593_v7  ;;  %v10596_v0 = vrot.slane %v6069_v8, 4  ;;  %v10597_v16 = vrot.slane %v6072_v1, 4 }
 0x5b2   : > { %v6381_v24 = vmax.f32 %v6063_v15, %v10594_v20  ;;  %v6386_v43 = vmax.f32 %v6066_v39, %v10595_v53  ;;  %v10598_v7 = vrot.slane %v6075_v51, 4  ;;  %v10599_v20 = vrot.slane %v6078_v3, 4 }
 0x5b3   : > { %v6391_v46 = vmax.f32 %v6069_v8, %v10596_v0  ;;  %v6396_v10 = vmax.f32 %v6072_v1, %v10597_v16  ;;  %v10600_v53 = vrot.slane %v6081_v6, 4  ;;  %v10601_v0 = vrot.slane %v6084_v28, 4 }
 0x5b4   : > { %v6401_v15 = vmax.f32 %v6075_v51, %v10598_v7  ;;  %v6406_v39 = vmax.f32 %v6078_v3, %v10599_v20  ;;  %v10602_v16 = vrot.slane %v6087_v33, 4  ;;  %v10603_v7 = vrot.slane %v6090_v50, 4 }
 0x5b5   : > { %v6411_v8 = vmax.f32 %v6081_v6, %v10600_v53  ;;  %v6416_v1 = vmax.f32 %v6084_v28, %v10601_v0  ;;  %v10604_v20 = vrot.slane %v6093_v34, 4  ;;  %v10605_v53 = vrot.slane %v6096_v29, 4 }
 0x5b6   : > { %v6421_v51 = vmax.f32 %v6087_v33, %v10602_v16  ;;  %v6426_v3 = vmax.f32 %v6090_v50, %v10603_v7  ;;  %v10607_v0 = vrot.slane %v6099_v38, 4  ;;  %v10608_v16 = vrot.slane %v6104_v13, 4 }
 0x5b7   : > { %v6431_v6 = vmax.f32 %v6093_v34, %v10604_v20  ;;  %v6436_v28 = vmax.f32 %v6096_v29, %v10605_v53  ;;  %v10609_v7 = vrot.slane %v6107_v11, 4  ;;  %v10610_v20 = vrot.slane %v6110_v31, 4 }
 0x5b8   : > { %v6441_v33 = vmax.f32 %v6099_v38, %v10607_v0  ;;  %v6446_v50 = vmax.f32 %v6104_v13, %v10608_v16  ;;  %v10611_v53 = vrot.slane %v6113_v42, 4  ;;  %v10612_v0 = vrot.slane %v6116_v9, 4 }
 0x5b9   : > { %10606 = vst [vmem:[#allocation136_spill] sm:$0xff] %v6436_v28  ;;  %v6451_v34 = vmax.f32 %v6107_v11, %v10609_v7  ;;  %v6456_v29 = vmax.f32 %v6110_v31, %v10610_v20  ;;  %v10614_v16 = vrot.slane %v6119_v61, 4  ;;  %v10616_v7 = vrot.slane %v6122_v30, 4 }
 0x5ba   : > { %v6461_v38 = vmax.f32 %v6113_v42, %v10611_v53  ;;  %v6466_v13 = vmax.f32 %v6116_v9, %v10612_v0  ;;  %v10618_v20 = vrot.slane %v6125_v49, 4  ;;  %v6483_v53 = vpop.f32.mrb[7].mxu1  ;;  %v10621_v9 = vrot.slane %v6131_v54, 4 }
 0x5bb   : > { %v6471_v11 = vmax.f32 %v6119_v61, %v10614_v16  ;;  %v6476_v31 = vmax.f32 %v6122_v30, %v10616_v7  ;;  %10620 = vst [vmem:[#allocation142_spill] sm:$0xff] %v6483_v53  ;;  %v10622_v61 = vrot.slane %v6135_v5, 4  ;;  %v10624_v30 = vrot.slane %v6139_v59, 4 }
 0x5bc   : > { %10613 = vst [vmem:[#allocation137_spill] sm:$0xff] %v6466_v13  ;;  %v6481_v42 = vmax.f32 %v6125_v49, %v10618_v20  ;;  %v6488_v0 = vmax.f32 %v6131_v54, %v10621_v9  ;;  %v10626_v49 = vrot.slane %v6143_v23, 4  ;;  %v10628_v22 = vrot.slane %v6147_v4, 4 }
 0x5bd   : > { %10615 = vst [vmem:[#allocation138_spill] sm:$0xff] %v6471_v11  ;;  %10617 = vst [vmem:[#allocation139_spill] sm:$0xff] %v6476_v31  ;;  %v6493_v16 = vmax.f32 %v6135_v5, %v10622_v61  ;;  %v6498_v7 = vmax.f32 %v6139_v59, %v10624_v30  ;;  %v10630_v9 = vrot.slane %v6151_v17, 4  ;;  %v10632_v61 = vrot.slane %v6155_v19, 4 }
 0x5be   : > { %10619 = vst [vmem:[#allocation141_spill] sm:$0xff] %v6481_v42  ;;  %v6503_v20 = vmax.f32 %v6143_v23, %v10626_v49  ;;  %v6508_v54 = vmax.f32 %v6147_v4, %v10628_v22  ;;  %v10634_v30 = vrot.slane %v6159_v44, 4  ;;  %v10636_v49 = vrot.slane %v6163_v56, 4  ;;  %v10638_v4 = vld [vmem:[#allocation126_spill] sm:$0xff] }
 0x5bf   : > { %10623 = vst [vmem:[#allocation143_spill] sm:$0xff] %v6493_v16  ;;  %10625 = vst [vmem:[#allocation144_spill] sm:$0xff] %v6498_v7  ;;  %v6513_v5 = vmax.f32 %v6151_v17, %v10630_v9  ;;  %v6518_v59 = vmax.f32 %v6155_v19, %v10632_v61  ;;  %v10639_v53 = vrot.slane %v10638_v4, 4  ;;  %v10640_v9 = vld [vmem:[#allocation127_spill] sm:$0xff]  ;;  %v10643_v61 = vld [vmem:[#allocation128_spill] sm:$0xff]  ;;  %v10695_v13 = vrot.slane %v6331_v55, 2 }
 0x5c0   : > { %10627 = vst [vmem:[#allocation145_spill] sm:$0xff] %v6503_v20  ;;  %10629 = vst [vmem:[#allocation146_spill] sm:$0xff] %v6508_v54  ;;  %v6523_v23 = vmax.f32 %v6159_v44, %v10634_v30  ;;  %v6528_v22 = vmax.f32 %v6163_v56, %v10636_v49  ;;  %v10646_v30 = vld [vmem:[#allocation129_spill] sm:$0xff]  ;;  %v10649_v49 = vld [vmem:[#allocation130_spill] sm:$0xff]  ;;  %v10696_v42 = vrot.slane %v6336_v18, 2 }
 0x5c1   : > { %10631 = vst [vmem:[#allocation147_spill] sm:$0xff] %v6513_v5  ;;  %10633 = vst [vmem:[#allocation148_spill] sm:$0xff] %v6518_v59  ;;  %v6533_v17 = vmax.f32 %v10638_v4, %v10639_v53  ;;  %v10641_v5 = vrot.slane %v10640_v9, 4  ;;  %v10644_v59 = vrot.slane %v10643_v61, 4  ;;  %v10652_v4 = vrot.slane %v6187_v57, 4 }
 0x5c2   : > { %10635 = vst [vmem:[#allocation149_spill] sm:$0xff] %v6523_v23  ;;  %10637 = vst [vmem:[#allocation150_spill] sm:$0xff] %v6528_v22  ;;  %v10647_v23 = vrot.slane %v10646_v30, 4  ;;  %v10650_v22 = vrot.slane %v10649_v49, 4  ;;  %v6721_v11 = vmax.f32 %v6331_v55, %v10695_v13  ;;  %v10700_v13 = vrot.slane %v6356_v47, 2 }
 0x5c3   : > { %v6538_v19 = vmax.f32 %v10640_v9, %v10641_v5  ;;  %v6543_v44 = vmax.f32 %v10643_v61, %v10644_v59  ;;  %v6558_v5 = vmax.f32 %v6187_v57, %v10652_v4  ;;  %v10654_v9 = vld [vmem:[#allocation131_spill] sm:$0xff]  ;;  %v10656_v61 = vld [vmem:[#allocation132_spill] sm:$0xff] }
 0x5c4   : > { %v6548_v56 = vmax.f32 %v10646_v30, %v10647_v23  ;;  %v6553_v53 = vmax.f32 %v10649_v49, %v10650_v22  ;;  %v10658_v30 = vld [vmem:[#allocation133_spill] sm:$0xff]  ;;  %v10661_v49 = vld [vmem:[#allocation134_spill] sm:$0xff]  ;;  %v10663_v4 = vld [vmem:[#allocation135_spill] sm:$0xff] }
 0x5c5   : > { %10642 = vst [vmem:[#allocation126_spill] sm:$0xff] %v6538_v19  ;;  %10645 = vst [vmem:[#allocation127_spill] sm:$0xff] %v6543_v44  ;;  %v10655_v19 = vrot.slane %v10654_v9, 4  ;;  %v10657_v44 = vrot.slane %v10656_v61, 4 }
 0x5c6   : > { %10648 = vst [vmem:[#allocation128_spill] sm:$0xff] %v6548_v56  ;;  %10651 = vst [vmem:[#allocation129_spill] sm:$0xff] %v6553_v53  ;;  %v10659_v56 = vrot.slane %v10658_v30, 4  ;;  %v10662_v53 = vrot.slane %v10661_v49, 4 }
 0x5c7   : > { %10653 = vst [vmem:[#allocation130_spill] sm:$0xff] %v6558_v5  ;;  %v6563_v59 = vmax.f32 %v10654_v9, %v10655_v19  ;;  %v6568_v23 = vmax.f32 %v10656_v61, %v10657_v44  ;;  %v10664_v5 = vrot.slane %v10663_v4, 4  ;;  %v10666_v9 = vrot.slane %v10573_v25, 4 }
 0x5c8   : > { %v6573_v22 = vmax.f32 %v10658_v30, %v10659_v56  ;;  %v6578_v57 = vmax.f32 %v10661_v49, %v10662_v53  ;;  %v10667_v61 = vrot.slane %v10574_v36, 4  ;;  %v10668_v30 = vrot.slane %v10575_v27, 4 }
 0x5c9   : > { %v6583_v19 = vmax.f32 %v10663_v4, %v10664_v5  ;;  %v6588_v44 = vmax.f32 %v10573_v25, %v10666_v9  ;;  %v10669_v49 = vrot.slane %v10576_v14, 4  ;;  %v10670_v4 = vrot.slane %v10577_v62, 4  ;;  %v10686_v31 = vld [vmem:[#allocation150_spill] sm:$0xff] }
 0x5ca   : > { %10660 = vst [vmem:[#allocation131_spill] sm:$0xff] %v6573_v22  ;;  %v6593_v56 = vmax.f32 %v10574_v36, %v10667_v61  ;;  %v6598_v53 = vmax.f32 %v10575_v27, %v10668_v30  ;;  %v10671_v9 = vrot.slane %v6233_v52, 4  ;;  %v10672_v61 = vrot.slane %v10578_v12, 4 }
 0x5cb   : > { %10665 = vst [vmem:[#allocation132_spill] sm:$0xff] %v6583_v19  ;;  %v6603_v5 = vmax.f32 %v10576_v14, %v10669_v49  ;;  %v6608_v25 = vmax.f32 %v10577_v62, %v10670_v4  ;;  %v10673_v30 = vrot.slane %v10579_v26, 4  ;;  %v10674_v49 = vrot.slane %v10580_v35, 4 }
 0x5cc   : > { %v6613_v36 = vmax.f32 %v6233_v52, %v10671_v9  ;;  %v6618_v27 = vmax.f32 %v10578_v12, %v10672_v61  ;;  %v10676_v4 = vrot.slane %v10581_v41, 4  ;;  %v10677_v9 = vrot.slane %v10582_v2, 4  ;;  %v10688_v16 = vld [vmem:[#allocation127_spill] sm:$0xff] }
 0x5cd   : > { %v6623_v14 = vmax.f32 %v10579_v26, %v10673_v30  ;;  %v6628_v62 = vmax.f32 %v10580_v35, %v10674_v49  ;;  %v10679_v61 = vrot.slane %v6257_v63, 4  ;;  %v10680_v30 = vld [vmem:[#allocation118_spill] sm:$0xff]  ;;  %v10681_v49 = vld [vmem:[#allocation121_spill] sm:$0xff]  ;;  %v10689_v7 = vld [vmem:[#allocation128_spill] sm:$0xff] }
 0x5ce   : > { %v6633_v52 = vmax.f32 %v10581_v41, %v10676_v4  ;;  %v6638_v12 = vmax.f32 %v10582_v2, %v10677_v9  ;;  %v1137_v28 = vadd.f32 %v10681_v49, %v10680_v30  ;;  %v10685_v35 = vld [vmem:[#allocation149_spill] sm:$0xff]  ;;  %v10691_v54 = vld [vmem:[#allocation130_spill] sm:$0xff]  ;;  %v10694_v2 = vrot.slane %v6326_v37, 2 }
 0x5cf   : > { %10675 = vst [vmem:[#allocation133_spill] sm:$0xff] %v6628_v62  ;;  %v6643_v26 = vmax.f32 %v6257_v63, %v10679_v61  ;;  %v10683_v63 = vld [vmem:[#allocation148_spill] sm:$0xff]  ;;  %v10687_v62 = vld [vmem:[#allocation126_spill] sm:$0xff]  ;;  %v10690_v20 = vld [vmem:[#allocation129_spill] sm:$0xff]  ;;  %v6726_v30 = vmax.f32 %v6336_v18, %v10696_v42  ;;  %v10697_v49 = vrot.slane %v6341_v21, 2  ;;  %v10698_v4 = vrot.slane %v6346_v48, 2 }
 0x5d0   : > { %10678 = vst [vmem:[#allocation134_spill] sm:$0xff] %v6638_v12  ;;  %v10682_v12 = vld [vmem:[#allocation147_spill] sm:$0xff]  ;;  %v6686_v61 = vmax.f32 %v1137_v28, 0.0  ;;  %v6716_v9 = vmax.f32 %v6326_v37, %v10694_v2  ;;  %v10699_v2 = vrot.slane %v6351_v40, 2  ;;  %v6746_v18 = vmax.f32 %v6356_v47, %v10700_v13 }
 0x5d1   : > { %v6731_v41 = vmax.f32 %v6341_v21, %v10697_v49  ;;  %v6736_v37 = vmax.f32 %v6346_v48, %v10698_v4  ;;  %v10701_v42 = vrot.slane %v6361_v58, 2  ;;  %v10702_v49 = vrot.slane %v6366_v32, 2 }
 0x5d2   : > { %10684 = vst [vmem:[#allocation135_spill] sm:$0xff] %v6686_v61  ;;  %v6741_v55 = vmax.f32 %v6351_v40, %v10699_v2  ;;  %v10703_v4 = vrot.slane %v6371_v60, 2  ;;  %v10704_v2 = vrot.slane %v6376_v45, 2  ;;  %v10705_v13 = vrot.slane %v6381_v24, 2 }
 0x5d3   : > { %v6751_v21 = vmax.f32 %v6361_v58, %v10701_v42  ;;  %v6756_v48 = vmax.f32 %v6366_v32, %v10702_v49  ;;  %v10706_v42 = vrot.slane %v6386_v43, 2  ;;  %v10707_v49 = vrot.slane %v6391_v46, 2 }
 0x5d4   : > { %v6761_v40 = vmax.f32 %v6371_v60, %v10703_v4  ;;  %v6766_v47 = vmax.f32 %v6376_v45, %v10704_v2  ;;  %v6771_v58 = vmax.f32 %v6381_v24, %v10705_v13  ;;  %v10708_v4 = vrot.slane %v6396_v10, 2 }
 0x5d5   : > { %v6776_v32 = vmax.f32 %v6386_v43, %v10706_v42  ;;  %v6781_v60 = vmax.f32 %v6391_v46, %v10707_v49  ;;  %v10709_v2 = vrot.slane %v6401_v15, 2  ;;  %v10710_v13 = vrot.slane %v6406_v39, 2 }
 0x5d6   : > { %v10692_v22 = vld [vmem:[#allocation133_spill] sm:$0xff]  ;;  %v6786_v45 = vmax.f32 %v6396_v10, %v10708_v4  ;;  %v10711_v42 = vrot.slane %v6411_v8, 2  ;;  %v10713_v49 = vrot.slane %v6416_v1, 2  ;;  %v10715_v4 = vrot.slane %v6421_v51, 2 }
 0x5d7   : > { %v10693_v19 = vld [vmem:[#allocation134_spill] sm:$0xff]  ;;  %v6791_v24 = vmax.f32 %v6401_v15, %v10709_v2  ;;  %v6796_v43 = vmax.f32 %v6406_v39, %v10710_v13  ;;  %v10717_v2 = vrot.slane %v6426_v3, 2  ;;  %v10719_v13 = vrot.slane %v6431_v6, 2 }
 0x5d8   : > { %v6801_v46 = vmax.f32 %v6411_v8, %v10711_v42  ;;  %v6806_v10 = vmax.f32 %v6416_v1, %v10713_v49  ;;  %v6811_v15 = vmax.f32 %v6421_v51, %v10715_v4  ;;  %v10721_v42 = vld [vmem:[#allocation136_spill] sm:$0xff]  ;;  %v10724_v49 = vrot.slane %v6441_v33, 2 }
 0x5d9   : > { %v6816_v39 = vmax.f32 %v6426_v3, %v10717_v2  ;;  %v6821_v8 = vmax.f32 %v6431_v6, %v10719_v13  ;;  %v10722_v28 = vrot.slane %v10721_v42, 2  ;;  %v10726_v4 = vrot.slane %v6446_v50, 2 }
 0x5da   : > { %10712 = vst [vmem:[#allocation118_spill] sm:$0xff] %v6801_v46  ;;  %10714 = vst [vmem:[#allocation121_spill] sm:$0xff] %v6806_v10  ;;  %v6831_v51 = vmax.f32 %v6441_v33, %v10724_v49  ;;  %v10728_v2 = vrot.slane %v6451_v34, 2  ;;  %v10730_v13 = vrot.slane %v6456_v29, 2  ;;  %v10734_v49 = vld [vmem:[#allocation137_spill] sm:$0xff] }
 0x5db   : > { %10716 = vst [vmem:[#allocation147_spill] sm:$0xff] %v6811_v15  ;;  %10718 = vst [vmem:[#allocation148_spill] sm:$0xff] %v6816_v39  ;;  %v6826_v1 = vmax.f32 %v10721_v42, %v10722_v28  ;;  %v6836_v3 = vmax.f32 %v6446_v50, %v10726_v4  ;;  %v10732_v42 = vrot.slane %v6461_v38, 2  ;;  %v10737_v4 = vld [vmem:[#allocation138_spill] sm:$0xff] }
 0x5dc   : > { %10720 = vst [vmem:[#allocation149_spill] sm:$0xff] %v6821_v8  ;;  %10725 = vst [vmem:[#allocation126_spill] sm:$0xff] %v6831_v51  ;;  %v6841_v6 = vmax.f32 %v6451_v34, %v10728_v2  ;;  %v6846_v28 = vmax.f32 %v6456_v29, %v10730_v13  ;;  %v10735_v51 = vrot.slane %v10734_v49, 2  ;;  %v6863_v2 = vpop.permute.xlu1 %2094 }
 0x5dd   : > { %10723 = vst [vmem:[#allocation150_spill] sm:$0xff] %v6826_v1  ;;  %10727 = vst [vmem:[#allocation127_spill] sm:$0xff] %v6836_v3  ;;  %v6851_v33 = vmax.f32 %v6461_v38, %v10732_v42  ;;  %v10738_v3 = vrot.slane %v10737_v4, 2 }
 0x5de   : > { %10729 = vst [vmem:[#allocation128_spill] sm:$0xff] %v6841_v6  ;;  %10731 = vst [vmem:[#allocation129_spill] sm:$0xff] %v6846_v28  ;;  %v6856_v50 = vmax.f32 %v10734_v49, %v10735_v51  ;;  %v10741_v6 = vld [vmem:[#allocation139_spill] sm:$0xff]  ;;  %v10744_v28 = vld [vmem:[#allocation141_spill] sm:$0xff] }
 0x5df   : > { %10733 = vst [vmem:[#allocation130_spill] sm:$0xff] %v6851_v33  ;;  %v6861_v34 = vmax.f32 %v10737_v4, %v10738_v3  ;;  %10740 = vst [vmem:[#allocation136_spill] sm:$0xff] %v6863_v2  ;;  %v10742_v29 = vrot.slane %v10741_v6, 2  ;;  %v10745_v38 = vrot.slane %v10744_v28, 2  ;;  %v10747_v51 = vld [vmem:[#allocation27_spill] sm:$0xff]  ;;  %v10751_v4 = vld [vmem:[#allocation32_spill] sm:$0xff] }
 0x5e0   : > { %10736 = vst [vmem:[#allocation133_spill] sm:$0xff] %v6856_v50  ;;  %v6877_v49 = vmul.f32 %v10747_v51, %v6686_v61  ;;  %v10749_v50 = vld [vmem:[#allocation26_spill] sm:$0xff]  ;;  %v6885_v2 = vmul.f32 %v10751_v4, %v6686_v61 }
 0x5e1   : > { %10739 = vst [vmem:[#allocation134_spill] sm:$0xff] %v6861_v34  ;;  %v6868_v13 = vmax.f32 %v10741_v6, %v10742_v29  ;;  %v6873_v42 = vmax.f32 %v10744_v28, %v10745_v38  ;;  %v6881_v3 = vmul.f32 %v10749_v50, %v6686_v61  ;;  %v10753_v6 = vld [vmem:[#allocation40_spill] sm:$0xff]  ;;  %v10757_v38 = vld [vmem:[#allocation54_spill] sm:$0xff] }
 0x5e2   : > { %10748 = vst [vmem:[#allocation139_spill] sm:$0xff] %v6877_v49  ;;  %10752 = vst [vmem:[#allocation151_spill] sm:$0xff] %v6885_v2  ;;  %v6889_v29 = vmul.f32 %v10753_v6, %v6686_v61  ;;  %v6897_v51 = vmul.f32 %v10757_v38, %v6686_v61  ;;  %v10759_v49 = vld [vmem:[#allocation62_spill] sm:$0xff]  ;;  %v10763_v2 = vld [vmem:[#allocation57_spill] sm:$0xff] }
 0x5e3   : > { %10743 = vst [vmem:[#allocation137_spill] sm:$0xff] %v6868_v13  ;;  %10746 = vst [vmem:[#allocation138_spill] sm:$0xff] %v6873_v42  ;;  %v10755_v13 = vld [vmem:[#allocation47_spill] sm:$0xff]  ;;  %v6901_v50 = vmul.f32 %v10759_v49, %v6686_v61  ;;  %v6909_v6 = vmul.f32 %v10763_v2, %v6686_v61 }
 0x5e4   : > { %10750 = vst [vmem:[#allocation141_spill] sm:$0xff] %v6881_v3  ;;  %10754 = vst [vmem:[#allocation152_spill] sm:$0xff] %v6889_v29  ;;  %v6893_v28 = vmul.f32 %v10755_v13, %v6686_v61  ;;  %v10761_v3 = vld [vmem:[#allocation73_spill] sm:$0xff]  ;;  %v10765_v29 = vld [vmem:[#allocation56_spill] sm:$0xff] }
 0x5e5   : > { %10758 = vst [vmem:[#allocation154_spill] sm:$0xff] %v6897_v51  ;;  %10760 = vst [vmem:[#allocation155_spill] sm:$0xff] %v6901_v50  ;;  %v6905_v4 = vmul.f32 %v10761_v3, %v6686_v61  ;;  %v6913_v13 = vmul.f32 %v10765_v29, %v6686_v61  ;;  %v10769_v51 = vld [vmem:[#allocation72_spill] sm:$0xff]  ;;  %v10771_v50 = vld [vmem:[#allocation79_spill] sm:$0xff] }
 0x5e6   : > { %10756 = vst [vmem:[#allocation153_spill] sm:$0xff] %v6893_v28  ;;  %10764 = vst [vmem:[#allocation157_spill] sm:$0xff] %v6909_v6  ;;  %v10767_v28 = vld [vmem:[#allocation65_spill] sm:$0xff]  ;;  %v6921_v49 = vmul.f32 %v10769_v51, %v6686_v61  ;;  %v6925_v3 = vmul.f32 %v10771_v50, %v6686_v61  ;;  %v10775_v6 = vld [vmem:[#allocation94_spill] sm:$0xff] }
 0x5e7   : > { %10762 = vst [vmem:[#allocation156_spill] sm:$0xff] %v6905_v4  ;;  %10766 = vst [vmem:[#allocation158_spill] sm:$0xff] %v6913_v13  ;;  %v6917_v38 = vmul.f32 %v10767_v28, %v6686_v61  ;;  %v10773_v4 = vld [vmem:[#allocation86_spill] sm:$0xff]  ;;  %v6933_v29 = vmul.f32 %v10775_v6, %v6686_v61  ;;  %v10777_v13 = vld [vmem:[#allocation104_spill] sm:$0xff] }
 0x5e8   : > { %10770 = vst [vmem:[#allocation160_spill] sm:$0xff] %v6921_v49  ;;  %10772 = vst [vmem:[#allocation161_spill] sm:$0xff] %v6925_v3  ;;  %v6929_v2 = vmul.f32 %v10773_v4, %v6686_v61  ;;  %v6937_v28 = vmul.f32 %v10777_v13, %v6686_v61  ;;  %v10781_v49 = vld [vmem:[#allocation88_spill] sm:$0xff]  ;;  %v6947_v3 = vpop.permute.xlu0 %2454  ;;  %v10784_v4 = vld [vmem:[#allocation97_spill] sm:$0xff] }
 0x5e9   : > { %10768 = vst [vmem:[#allocation159_spill] sm:$0xff] %v6917_v38  ;;  %10776 = vst [vmem:[#allocation163_spill] sm:$0xff] %v6933_v29  ;;  %v10779_v38 = vld [vmem:[#allocation89_spill] sm:$0xff]  ;;  %v6945_v50 = vmul.f32 %v10781_v49, %v6686_v61  ;;  %v10786_v6 = vld [vmem:[#allocation106_spill] sm:$0xff]  ;;  %v6965_v49 = vpop.permute.xlu1 %2470 }
 0x5ea   : > { %10774 = vst [vmem:[#allocation162_spill] sm:$0xff] %v6929_v2  ;;  %10778 = vst [vmem:[#allocation164_spill] sm:$0xff] %v6937_v28  ;;  %v6941_v51 = vmul.f32 %v10779_v38, %v6686_v61  ;;  %v6951_v2 = vmul.f32 %v10784_v4, %v6686_v61  ;;  %v6955_v29 = vmul.f32 %v10786_v6, %v6686_v61  ;;  %v10788_v13 = vld [vmem:[#allocation109_spill] sm:$0xff]  ;;  %v10796_v6 = vld [vmem:[#allocation114_spill] sm:$0xff] }
 0x5eb   : > { %10782 = vst [vmem:[#allocation166_spill] sm:$0xff] %v6945_v50  ;;  %10783 = vst [vmem:[#allocation167_spill] sm:$0xff] %v6947_v3  ;;  %v6959_v28 = vmul.f32 %v10788_v13, %v6686_v61  ;;  %v10790_v38 = vld [vmem:[#allocation117_spill] sm:$0xff]  ;;  %v6973_v4 = vmul.f32 %v6947_v3, %v6686_v61  ;;  %v10798_v13 = vld [vmem:[#allocation120_spill] sm:$0xff] }
 0x5ec   : > { %10780 = vst [vmem:[#allocation165_spill] sm:$0xff] %v6941_v51  ;;  %10785 = vst [vmem:[#allocation168_spill] sm:$0xff] %v6951_v2  ;;  %v6963_v51 = vmul.f32 %v10790_v38, %v6686_v61  ;;  %v10793_v50 = vld [vmem:[#allocation125_spill] sm:$0xff]  ;;  %v10800_v38 = vld [vmem:[#allocation122_spill] sm:$0xff] }
 0x5ed   : > { %10787 = vst [vmem:[#allocation169_spill] sm:$0xff] %v6955_v29  ;;  %10789 = vst [vmem:[#allocation170_spill] sm:$0xff] %v6959_v28  ;;  %v6969_v42 = vmul.f32 %v10793_v50, %v6686_v61  ;;  %v6977_v29 = vmul.f32 %v10796_v6, %v6686_v61  ;;  %v6981_v28 = vmul.f32 %v10798_v13, %v6686_v61 }
 0x5ee   : > { %10791 = vst [vmem:[#allocation171_spill] sm:$0xff] %v6963_v51  ;;  %10792 = vst [vmem:[#allocation172_spill] sm:$0xff] %v6965_v49  ;;  %v6985_v51 = vmul.f32 %v10800_v38, %v6686_v61  ;;  %v6989_v50 = vmul.f32 %v6965_v49, %v6686_v61  ;;  %v10812_v61 = vrot.slane %v10682_v12, 2 }
 0x5ef   : > { %10794 = vst [vmem:[#allocation173_spill] sm:$0xff] %v6969_v42  ;;  %10795 = vst [vmem:[#allocation174_spill] sm:$0xff] %v6973_v4  ;;  %v10803_v42 = vrot.slane %v6488_v0, 2  ;;  %v10804_v4 = vld [vmem:[#allocation143_spill] sm:$0xff] }
 0x5f0   : > { %10797 = vst [vmem:[#allocation175_spill] sm:$0xff] %v6977_v29  ;;  %10799 = vst [vmem:[#allocation176_spill] sm:$0xff] %v6981_v28  ;;  %v10805_v2 = vrot.slane %v10804_v4, 2  ;;  %v10806_v29 = vld [vmem:[#allocation144_spill] sm:$0xff]  ;;  %v10808_v28 = vld [vmem:[#allocation145_spill] sm:$0xff] }
 0x5f1   : > { %10801 = vst [vmem:[#allocation177_spill] sm:$0xff] %v6985_v51  ;;  %10802 = vst [vmem:[#allocation178_spill] sm:$0xff] %v6989_v50  ;;  %v1403_v3 = vmax.f32 %v6488_v0, %v10803_v42  ;;  %v10807_v34 = vrot.slane %v10806_v29, 2  ;;  %v10809_v33 = vrot.slane %v10808_v28, 2  ;;  %v10810_v51 = vld [vmem:[#allocation146_spill] sm:$0xff]  ;;  %v1433_v0 = vmax.f32 %v10682_v12, %v10812_v61 }
 0x5f2   : > { %v1409_v6 = vmax.f32 %v10804_v4, %v10805_v2  ;;  %v10811_v1 = vrot.slane %v10810_v51, 2  ;;  %v10813_v2 = vrot.slane %v10683_v63, 2 }
 0x5f3   : > { %v1415_v13 = vmax.f32 %v10806_v29, %v10807_v34  ;;  %v1421_v38 = vmax.f32 %v10808_v28, %v10809_v33  ;;  %v1404_v42 = vrot.slane %v1403_v3, 1  ;;  %v10814_v34 = vrot.slane %v10685_v35, 2 }
 0x5f4   : > { %v1427_v49 = vmax.f32 %v10810_v51, %v10811_v1  ;;  %v1410_v50 = vrot.slane %v1409_v6, 1  ;;  %v1439_v4 = vmax.f32 %v10683_v63, %v10813_v2  ;;  %v1434_v39 = vrot.slane %v1433_v0, 1 }
 0x5f5   : > { %v1445_v29 = vmax.f32 %v10685_v35, %v10814_v34  ;;  %v1416_v8 = vrot.slane %v1415_v13, 1  ;;  %v1422_v33 = vrot.slane %v1421_v38, 1  ;;  %v7015_v15 = vmax.f32 %v1403_v3, %v1404_v42 }
 0x5f6   : > { %v1428_v28 = vrot.slane %v1427_v49, 1  ;;  %v7017_v1 = vmax.f32 %v1409_v6, %v1410_v50  ;;  %v1440_v51 = vrot.slane %v1439_v4, 1  ;;  %v7025_v63 = vmax.f32 %v1433_v0, %v1434_v39 }
 0x5f7   : > { %v1446_v12 = vrot.slane %v1445_v29, 1  ;;  %v7019_v61 = vmax.f32 %v1415_v13, %v1416_v8  ;;  %v7021_v10 = vmax.f32 %v1421_v38, %v1422_v33  ;;  %v10819_v34 = vrot.slane %v10686_v31, 2 }
 0x5f8   : > { %v7023_v46 = vmax.f32 %v1427_v49, %v1428_v28  ;;  %10816 = vst [vmem:[#allocation144_spill] sm:$0xff] %v7025_v63  ;;  %v7027_v2 = vmax.f32 %v1439_v4, %v1440_v51  ;;  %v10820_v50 = vrot.slane %v6533_v17, 2  ;;  %v10821_v8 = vrot.slane %v10687_v62, 2 }
 0x5f9   : > { %v7029_v35 = vmax.f32 %v1445_v29, %v1446_v12  ;;  %v1451_v3 = vmax.f32 %v10686_v31, %v10819_v34  ;;  %v10822_v49 = vrot.slane %v10688_v16, 2  ;;  %v10823_v38 = vrot.slane %v10689_v7, 2 }
 0x5fa   : > { %10815 = vst [vmem:[#allocation143_spill] sm:$0xff] %v7023_v46  ;;  %10817 = vst [vmem:[#allocation145_spill] sm:$0xff] %v7027_v2  ;;  %v1457_v6 = vmax.f32 %v6533_v17, %v10820_v50  ;;  %v1463_v13 = vmax.f32 %v10687_v62, %v10821_v8  ;;  %v10824_v42 = vrot.slane %v10690_v20, 2  ;;  %v10825_v17 = vrot.slane %v10691_v54, 2  ;;  %v10925_v2 = vld [vmem:[#allocation139_spill] sm:$0xff] }
 0x5fb   : > { %10818 = vst [vmem:[#allocation146_spill] sm:$0xff] %v7029_v35  ;;  %v1469_v39 = vmax.f32 %v10688_v16, %v10822_v49  ;;  %v1475_v0 = vmax.f32 %v10689_v7, %v10823_v38  ;;  %v1452_v4 = vrot.slane %v1451_v3, 1  ;;  %v10826_v62 = vrot.slane %v6563_v59, 2 }
 0x5fc   : > { %v1481_v31 = vmax.f32 %v10690_v20, %v10824_v42  ;;  %v1458_v29 = vrot.slane %v1457_v6, 1  ;;  %v1487_v33 = vmax.f32 %v10691_v54, %v10825_v17  ;;  %v1464_v51 = vrot.slane %v1463_v13, 1 }
 0x5fd   : > { %v1493_v28 = vmax.f32 %v6563_v59, %v10826_v62  ;;  %v1470_v16 = vrot.slane %v1469_v39, 1  ;;  %v1476_v12 = vrot.slane %v1475_v0, 1  ;;  %v7055_v50 = vmax.f32 %v1451_v3, %v1452_v4 }
 0x5fe   : > { %v1482_v34 = vrot.slane %v1481_v31, 1  ;;  %v7057_v7 = vmax.f32 %v1457_v6, %v1458_v29  ;;  %v1488_v8 = vrot.slane %v1487_v33, 1  ;;  %v7059_v49 = vmax.f32 %v1463_v13, %v1464_v51  ;;  %v10836_v6 = vld [vmem:[#allocation131_spill] sm:$0xff] }
 0x5ff   : > { %10827 = vst [vmem:[#allocation179_spill] sm:$0xff] %v7055_v50  ;;  %v1494_v20 = vrot.slane %v1493_v28, 1  ;;  %v7061_v38 = vmax.f32 %v1469_v39, %v1470_v16  ;;  %v7063_v42 = vmax.f32 %v1475_v0, %v1476_v12  ;;  %v10835_v62 = vrot.slane %v6568_v23, 2  ;;  %v10839_v0 = vld [vmem:[#allocation132_spill] sm:$0xff] }
 0x600   : > { %10828 = vst [vmem:[#allocation180_spill] sm:$0xff] %v7057_v7  ;;  %10829 = vst [vmem:[#allocation181_spill] sm:$0xff] %v7059_v49  ;;  %v7065_v54 = vmax.f32 %v1481_v31, %v1482_v34  ;;  %v7067_v17 = vmax.f32 %v1487_v33, %v1488_v8  ;;  %v10837_v4 = vrot.slane %v10836_v6, 2  ;;  %v10838_v13 = vrot.slane %v6578_v57, 2 }
 0x601   : > { %10830 = vst [vmem:[#allocation182_spill] sm:$0xff] %v7061_v38  ;;  %10831 = vst [vmem:[#allocation183_spill] sm:$0xff] %v7063_v42  ;;  %v7069_v59 = vmax.f32 %v1493_v28, %v1494_v20  ;;  %v1499_v3 = vmax.f32 %v6568_v23, %v10835_v62  ;;  %v10840_v51 = vrot.slane %v10839_v0, 2  ;;  %v10841_v33 = vrot.slane %v6588_v44, 2 }
 0x602   : > { %10832 = vst [vmem:[#allocation184_spill] sm:$0xff] %v7065_v54  ;;  %10833 = vst [vmem:[#allocation185_spill] sm:$0xff] %v7067_v17  ;;  %v1505_v29 = vmax.f32 %v10836_v6, %v10837_v4  ;;  %v1511_v39 = vmax.f32 %v6578_v57, %v10838_v13  ;;  %v10842_v16 = vrot.slane %v6593_v56, 2  ;;  %v10843_v8 = vrot.slane %v6598_v53, 2 }
 0x603   : > { %10834 = vst [vmem:[#allocation186_spill] sm:$0xff] %v7069_v59  ;;  %v1517_v31 = vmax.f32 %v10839_v0, %v10840_v51  ;;  %v1523_v28 = vmax.f32 %v6588_v44, %v10841_v33  ;;  %v1500_v12 = vrot.slane %v1499_v3, 1  ;;  %v10844_v57 = vrot.slane %v6603_v5, 2 }
 0x604   : > { %v1529_v23 = vmax.f32 %v6593_v56, %v10842_v16  ;;  %v1506_v34 = vrot.slane %v1505_v29, 1  ;;  %v1535_v20 = vmax.f32 %v6598_v53, %v10843_v8  ;;  %v1512_v6 = vrot.slane %v1511_v39, 1 }
 0x605   : > { %v1541_v62 = vmax.f32 %v6603_v5, %v10844_v57  ;;  %v1518_v4 = vrot.slane %v1517_v31, 1  ;;  %v1524_v13 = vrot.slane %v1523_v28, 1  ;;  %v7095_v51 = vmax.f32 %v1499_v3, %v1500_v12 }
 0x606   : > { %v1530_v0 = vrot.slane %v1529_v23, 1  ;;  %v7097_v44 = vmax.f32 %v1505_v29, %v1506_v34  ;;  %v1536_v33 = vrot.slane %v1535_v20, 1  ;;  %v7099_v16 = vmax.f32 %v1511_v39, %v1512_v6 }
 0x607   : > { %10845 = vst [vmem:[#allocation131_spill] sm:$0xff] %v7095_v51  ;;  %v1542_v56 = vrot.slane %v1541_v62, 1  ;;  %v7101_v35 = vmax.f32 %v1517_v31, %v1518_v4  ;;  %v7103_v59 = vmax.f32 %v1523_v28, %v1524_v13  ;;  %v10853_v57 = vrot.slane %v6608_v25, 2 }
 0x608   : > { %10846 = vst [vmem:[#allocation132_spill] sm:$0xff] %v7097_v44  ;;  %10847 = vst [vmem:[#allocation187_spill] sm:$0xff] %v7099_v16  ;;  %v7105_v53 = vmax.f32 %v1529_v23, %v1530_v0  ;;  %v7107_v8 = vmax.f32 %v1535_v20, %v1536_v33  ;;  %v10854_v29 = vrot.slane %v6613_v36, 2  ;;  %v10855_v39 = vrot.slane %v6618_v27, 2  ;;  %v11013_v16 = vld [vmem:[#allocation112_spill] sm:$0xff] }
 0x609   : > { %10848 = vst [vmem:[#allocation188_spill] sm:$0xff] %v7101_v35  ;;  %10849 = vst [vmem:[#allocation189_spill] sm:$0xff] %v7103_v59  ;;  %v7109_v5 = vmax.f32 %v1541_v62, %v1542_v56  ;;  %v1547_v3 = vmax.f32 %v6608_v25, %v10853_v57  ;;  %v10856_v28 = vrot.slane %v6623_v14, 2  ;;  %v10857_v34 = vrot.slane %v10692_v22, 2  ;;  %v11015_v44 = vld [vmem:[#allocation136_spill] sm:$0xff] }
 0x60a   : > { %10850 = vst [vmem:[#allocation190_spill] sm:$0xff] %v7105_v53  ;;  %10851 = vst [vmem:[#allocation191_spill] sm:$0xff] %v7107_v8  ;;  %v1553_v12 = vmax.f32 %v6613_v36, %v10854_v29  ;;  %v1559_v31 = vmax.f32 %v6618_v27, %v10855_v39  ;;  %v10858_v62 = vrot.slane %v6633_v52, 2  ;;  %v10859_v36 = vrot.slane %v10693_v19, 2 }
 0x60b   : > { %10852 = vst [vmem:[#allocation192_spill] sm:$0xff] %v7109_v5  ;;  %v1565_v23 = vmax.f32 %v6623_v14, %v10856_v28  ;;  %v1571_v20 = vmax.f32 %v10692_v22, %v10857_v34  ;;  %v1548_v6 = vrot.slane %v1547_v3, 1  ;;  %v10860_v27 = vrot.slane %v6643_v26, 2 }
 0x60c   : > { %v1577_v25 = vmax.f32 %v6633_v52, %v10858_v62  ;;  %v1554_v4 = vrot.slane %v1553_v12, 1  ;;  %v1583_v13 = vmax.f32 %v10693_v19, %v10859_v36  ;;  %v1560_v33 = vrot.slane %v1559_v31, 1 }
 0x60d   : > { %v1589_v0 = vmax.f32 %v6643_v26, %v10860_v27  ;;  %v1566_v14 = vrot.slane %v1565_v23, 1  ;;  %v1572_v56 = vrot.slane %v1571_v20, 1  ;;  %v7135_v29 = vmax.f32 %v1547_v3, %v1548_v6 }
 0x60e   : > { %v1578_v57 = vrot.slane %v1577_v25, 1  ;;  %v7137_v22 = vmax.f32 %v1553_v12, %v1554_v4  ;;  %v1584_v39 = vrot.slane %v1583_v13, 1  ;;  %v7139_v28 = vmax.f32 %v1559_v31, %v1560_v33 }
 0x60f   : > { %10861 = vst [vmem:[#allocation193_spill] sm:$0xff] %v7135_v29  ;;  %v1590_v52 = vrot.slane %v1589_v0, 1  ;;  %v7141_v34 = vmax.f32 %v1565_v23, %v1566_v14  ;;  %v7143_v62 = vmax.f32 %v1571_v20, %v1572_v56  ;;  %v1756_v27 = vrot.slane %v6716_v9, 1 }
 0x610   : > { %10862 = vst [vmem:[#allocation194_spill] sm:$0xff] %v7137_v22  ;;  %10863 = vst [vmem:[#allocation195_spill] sm:$0xff] %v7139_v28  ;;  %v7145_v19 = vmax.f32 %v1577_v25, %v1578_v57  ;;  %v7147_v36 = vmax.f32 %v1583_v13, %v1584_v39  ;;  %v1762_v3 = vrot.slane %v6721_v11, 1  ;;  %v1768_v12 = vrot.slane %v6726_v30, 1  ;;  %v10901_v28 = vld [vmem:[#allocation133_spill] sm:$0xff] }
 0x611   : > { %10864 = vst [vmem:[#allocation196_spill] sm:$0xff] %v7141_v34  ;;  %10865 = vst [vmem:[#allocation197_spill] sm:$0xff] %v7143_v62  ;;  %v7149_v26 = vmax.f32 %v1589_v0, %v1590_v52  ;;  %v1774_v6 = vrot.slane %v6731_v41, 1  ;;  %v1780_v31 = vrot.slane %v6736_v37, 1  ;;  %v1786_v23 = vrot.slane %v6741_v55, 1  ;;  %v10898_v62 = vld [vmem:[#allocation128_spill] sm:$0xff] }
 0x612   : > { %10866 = vst [vmem:[#allocation198_spill] sm:$0xff] %v7145_v19  ;;  %10867 = vst [vmem:[#allocation199_spill] sm:$0xff] %v7147_v36  ;;  %v7158_v20 = vmax.f32 %v6716_v9, %v1756_v27  ;;  %v7161_v25 = vmax.f32 %v6721_v11, %v1762_v3  ;;  %v1792_v4 = vrot.slane %v6746_v18, 1  ;;  %v1798_v13 = vrot.slane %v6751_v21, 1 }
 0x613   : > { %10868 = vst [vmem:[#allocation200_spill] sm:$0xff] %v7149_v26  ;;  %v7166_v0 = vmax.f32 %v6726_v30, %v1768_v12  ;;  %v7169_v33 = vmax.f32 %v6731_v41, %v1774_v6  ;;  %v7172_v14 = vmax.f32 %v6736_v37, %v1780_v31  ;;  %v7175_v56 = vmax.f32 %v6741_v55, %v1786_v23 }
 0x614   : > { %v7178_v9 = vmax.f32 %v6746_v18, %v1792_v4  ;;  %v7181_v11 = vmax.f32 %v6751_v21, %v1798_v13  ;;  %v1804_v57 = vrot.slane %v6756_v48, 1  ;;  %v1810_v30 = vrot.slane %v6761_v40, 1  ;;  %v10882_v4 = vld [vmem:[#allocation118_spill] sm:$0xff]  ;;  %v10883_v13 = vld [vmem:[#allocation121_spill] sm:$0xff] }
 0x615   : > { %10869 = vst [vmem:[#allocation201_spill] sm:$0xff] %v7169_v33  ;;  %10870 = vst [vmem:[#allocation202_spill] sm:$0xff] %v7172_v14  ;;  %v1816_v39 = vrot.slane %v6766_v47, 1  ;;  %v1822_v41 = vrot.slane %v6771_v58, 1  ;;  %v1828_v37 = vrot.slane %v6776_v32, 1  ;;  %v1834_v52 = vrot.slane %v6781_v60, 1 }
 0x616   : > { %10871 = vst [vmem:[#allocation203_spill] sm:$0xff] %v7175_v56  ;;  %10872 = vst [vmem:[#allocation204_spill] sm:$0xff] %v7178_v9  ;;  %v7190_v55 = vmax.f32 %v6756_v48, %v1804_v57  ;;  %v7193_v18 = vmax.f32 %v6761_v40, %v1810_v30  ;;  %v1840_v21 = vrot.slane %v6786_v45, 1  ;;  %v1846_v27 = vrot.slane %v6791_v24, 1 }
 0x617   : > { %10873 = vst [vmem:[#allocation205_spill] sm:$0xff] %v7181_v11  ;;  %v7198_v3 = vmax.f32 %v6766_v47, %v1816_v39  ;;  %v7201_v12 = vmax.f32 %v6771_v58, %v1822_v41  ;;  %v7204_v6 = vmax.f32 %v6776_v32, %v1828_v37  ;;  %v7207_v31 = vmax.f32 %v6781_v60, %v1834_v52  ;;  %v10884_v58 = vld [vmem:[#allocation147_spill] sm:$0xff]  ;;  %v10885_v39 = vld [vmem:[#allocation148_spill] sm:$0xff]  ;;  %v10886_v41 = vld [vmem:[#allocation149_spill] sm:$0xff] }
 0x618   : > { %10874 = vst [vmem:[#allocation206_spill] sm:$0xff] %v7190_v55  ;;  %10875 = vst [vmem:[#allocation207_spill] sm:$0xff] %v7193_v18  ;;  %v7210_v48 = vmax.f32 %v6786_v45, %v1840_v21  ;;  %v7213_v40 = vmax.f32 %v6791_v24, %v1846_v27  ;;  %v1852_v23 = vrot.slane %v6796_v43, 1  ;;  %v1858_v47 = vrot.slane %v10882_v4, 1  ;;  %v10889_v24 = vld [vmem:[#allocation150_spill] sm:$0xff] }
 0x619   : > { %10876 = vst [vmem:[#allocation208_spill] sm:$0xff] %v7198_v3  ;;  %10877 = vst [vmem:[#allocation209_spill] sm:$0xff] %v7201_v12  ;;  %v1864_v57 = vrot.slane %v10883_v13, 1  ;;  %v1870_v30 = vrot.slane %v10884_v58, 1  ;;  %v1876_v32 = vrot.slane %v10885_v39, 1  ;;  %v1882_v37 = vrot.slane %v10886_v41, 1 }
 0x61a   : > { %10878 = vst [vmem:[#allocation210_spill] sm:$0xff] %v7204_v6  ;;  %10879 = vst [vmem:[#allocation211_spill] sm:$0xff] %v7207_v31  ;;  %v7222_v60 = vmax.f32 %v6796_v43, %v1852_v23  ;;  %v7225_v45 = vmax.f32 %v10882_v4, %v1858_v47  ;;  %v1888_v52 = vrot.slane %v10889_v24, 1  ;;  %v10890_v21 = vld [vmem:[#allocation126_spill] sm:$0xff]  ;;  %v10897_v4 = vld [vmem:[#allocation127_spill] sm:$0xff] }
 0x61b   : > { %10880 = vst [vmem:[#allocation212_spill] sm:$0xff] %v7210_v48  ;;  %10881 = vst [vmem:[#allocation213_spill] sm:$0xff] %v7213_v40  ;;  %v1894_v27 = vrot.slane %v10890_v21, 1  ;;  %v7230_v11 = vmax.f32 %v10883_v13, %v1864_v57  ;;  %v7233_v26 = vmax.f32 %v10884_v58, %v1870_v30  ;;  %v7236_v36 = vmax.f32 %v10885_v39, %v1876_v32  ;;  %v10899_v57 = vld [vmem:[#allocation129_spill] sm:$0xff]  ;;  %v10900_v58 = vld [vmem:[#allocation130_spill] sm:$0xff] }
 0x61c   : > { %10887 = vst [vmem:[#allocation118_spill] sm:$0xff] %v7222_v60  ;;  %10888 = vst [vmem:[#allocation121_spill] sm:$0xff] %v7225_v45  ;;  %v7239_v19 = vmax.f32 %v10886_v41, %v1882_v37  ;;  %v7242_v43 = vmax.f32 %v10889_v24, %v1888_v52  ;;  %v1900_v47 = vrot.slane %v10897_v4, 1  ;;  %v1906_v13 = vrot.slane %v10898_v62, 1  ;;  %v10902_v32 = vld [vmem:[#allocation134_spill] sm:$0xff]  ;;  %v10905_v24 = vld [vmem:[#allocation137_spill] sm:$0xff] }
 0x61d   : > { %10891 = vst [vmem:[#allocation147_spill] sm:$0xff] %v7230_v11  ;;  %10892 = vst [vmem:[#allocation148_spill] sm:$0xff] %v7233_v26  ;;  %v7245_v23 = vmax.f32 %v10890_v21, %v1894_v27  ;;  %v1912_v34 = vrot.slane %v10899_v57, 1  ;;  %v1918_v30 = vrot.slane %v10900_v58, 1  ;;  %v1924_v39 = vrot.slane %v10901_v28, 1  ;;  %v10906_v21 = vld [vmem:[#allocation138_spill] sm:$0xff] }
 0x61e   : > { %10893 = vst [vmem:[#allocation149_spill] sm:$0xff] %v7236_v36  ;;  %10894 = vst [vmem:[#allocation150_spill] sm:$0xff] %v7239_v19  ;;  %v1930_v22 = vrot.slane %v10902_v32, 1  ;;  %v7254_v41 = vmax.f32 %v10897_v4, %v1900_v47  ;;  %v7257_v37 = vmax.f32 %v10898_v62, %v1906_v13  ;;  %v1936_v52 = vrot.slane %v10905_v24, 1  ;;  %v10927_v47 = vld [vmem:[#allocation151_spill] sm:$0xff] }
 0x61f   : > { %10895 = vst [vmem:[#allocation126_spill] sm:$0xff] %v7242_v43  ;;  %10896 = vst [vmem:[#allocation214_spill] sm:$0xff] %v7245_v23  ;;  %v1942_v27 = vrot.slane %v10906_v21, 1  ;;  %v7262_v29 = vmax.f32 %v10899_v57, %v1912_v34  ;;  %v7265_v5 = vmax.f32 %v10900_v58, %v1918_v30  ;;  %v7268_v23 = vmax.f32 %v10901_v28, %v1924_v39  ;;  %v10930_v58 = vld [vmem:[#allocation154_spill] sm:$0xff]  ;;  %v11014_v45 = vld [vmem:[#allocation119_spill] sm:$0xff] }
 0x620   : > { %10903 = vst [vmem:[#allocation127_spill] sm:$0xff] %v7254_v41  ;;  %10904 = vst [vmem:[#allocation128_spill] sm:$0xff] %v7257_v37  ;;  %v7271_v8 = vmax.f32 %v10902_v32, %v1930_v22  ;;  %v7274_v4 = vmax.f32 %v10905_v24, %v1936_v52  ;;  %v2520_v34 = vrot.slane %v10925_v2, 4  ;;  %v10926_v37 = vld [vmem:[#allocation141_spill] sm:$0xff]  ;;  %v10928_v52 = vld [vmem:[#allocation152_spill] sm:$0xff] }
 0x621   : > { %10907 = vst [vmem:[#allocation129_spill] sm:$0xff] %v7262_v29  ;;  %10908 = vst [vmem:[#allocation130_spill] sm:$0xff] %v7265_v5  ;;  %v7277_v62 = vmax.f32 %v10906_v21, %v1942_v27  ;;  %v2526_v24 = vrot.slane %v10926_v37, 4  ;;  %v2532_v29 = vrot.slane %v10927_v47, 4  ;;  %v2538_v40 = vrot.slane %v10928_v52, 4  ;;  %v10929_v5 = vld [vmem:[#allocation153_spill] sm:$0xff] }
 0x622   : > { %10909 = vst [vmem:[#allocation133_spill] sm:$0xff] %v7268_v23  ;;  %10910 = vst [vmem:[#allocation134_spill] sm:$0xff] %v7271_v8  ;;  %v2544_v21 = vrot.slane %v10929_v5, 4  ;;  %v2550_v23 = vrot.slane %v10930_v58, 4  ;;  %v10931_v27 = vld [vmem:[#allocation155_spill] sm:$0xff]  ;;  %v2521_v8 = vmax.f32 %v10925_v2, %v2520_v34 }
 0x623   : > { %10911 = vst [vmem:[#allocation137_spill] sm:$0xff] %v7274_v4  ;;  %10912 = vst [vmem:[#allocation138_spill] sm:$0xff] %v7277_v62  ;;  %v2556_v9 = vrot.slane %v10931_v27, 4  ;;  %v2527_v22 = vmax.f32 %v10926_v37, %v2526_v24  ;;  %v2533_v39 = vmax.f32 %v10927_v47, %v2532_v29  ;;  %v10932_v62 = vld [vmem:[#allocation156_spill] sm:$0xff]  ;;  %v2539_v4 = vmax.f32 %v10928_v52, %v2538_v40 }
 0x624   : > { %v2562_v13 = vrot.slane %v10932_v62, 4  ;;  %v2545_v28 = vmax.f32 %v10929_v5, %v2544_v21  ;;  %v2551_v57 = vmax.f32 %v10930_v58, %v2550_v23  ;;  %v2522_v32 = vrot.slane %v2521_v8, 2 }
 0x625   : > { %v2557_v41 = vmax.f32 %v10931_v27, %v2556_v9  ;;  %v2528_v43 = vrot.slane %v2527_v22, 2  ;;  %v2534_v30 = vrot.slane %v2533_v39, 2  ;;  %v2540_v2 = vrot.slane %v2539_v4, 2 }
 0x626   : > { %v2563_v19 = vmax.f32 %v10932_v62, %v2562_v13  ;;  %v2546_v34 = vrot.slane %v2545_v28, 2  ;;  %v2552_v37 = vrot.slane %v2551_v57, 2  ;;  %v2523_v29 = vmax.f32 %v2521_v8, %v2522_v32  ;;  %v10943_v32 = vld [vmem:[#allocation159_spill] sm:$0xff] }
 0x627   : > { %v2558_v24 = vrot.slane %v2557_v41, 2  ;;  %v2529_v47 = vmax.f32 %v2527_v22, %v2528_v43  ;;  %v2535_v53 = vmax.f32 %v2533_v39, %v2534_v30  ;;  %v2541_v40 = vmax.f32 %v2539_v4, %v2540_v2  ;;  %v10942_v30 = vld [vmem:[#allocation158_spill] sm:$0xff] }
 0x628   : > { %v2564_v36 = vrot.slane %v2563_v19, 2  ;;  %v2547_v52 = vmax.f32 %v2545_v28, %v2546_v34  ;;  %v2553_v5 = vmax.f32 %v2551_v57, %v2552_v37  ;;  %v2524_v23 = vrot.slane %v2523_v29, 1  ;;  %v10944_v34 = vld [vmem:[#allocation160_spill] sm:$0xff]  ;;  %v10945_v37 = vld [vmem:[#allocation161_spill] sm:$0xff] }
 0x629   : > { %v2559_v21 = vmax.f32 %v2557_v41, %v2558_v24  ;;  %v2530_v58 = vrot.slane %v2529_v47, 1  ;;  %v2536_v9 = vrot.slane %v2535_v53, 1  ;;  %v2542_v59 = vrot.slane %v2541_v40, 1 }
 0x62a   : > { %v2565_v27 = vmax.f32 %v2563_v19, %v2564_v36  ;;  %v2548_v26 = vrot.slane %v2547_v52, 1  ;;  %v2554_v35 = vrot.slane %v2553_v5, 1  ;;  %v7357_v13 = vmax.f32 %v2523_v29, %v2524_v23  ;;  %v10941_v36 = vld [vmem:[#allocation157_spill] sm:$0xff] }
 0x62b   : > { %v2560_v62 = vrot.slane %v2559_v21, 1  ;;  %v7359_v11 = vmax.f32 %v2529_v47, %v2530_v58  ;;  %v7361_v8 = vmax.f32 %v2535_v53, %v2536_v9  ;;  %v7363_v22 = vmax.f32 %v2541_v40, %v2542_v59  ;;  %v10946_v59 = vld [vmem:[#allocation162_spill] sm:$0xff] }
 0x62c   : > { %10933 = vst [vmem:[#allocation139_spill] sm:$0xff] %v7357_v13  ;;  %v2566_v43 = vrot.slane %v2565_v27, 1  ;;  %v7365_v4 = vmax.f32 %v2547_v52, %v2548_v26  ;;  %v7367_v41 = vmax.f32 %v2553_v5, %v2554_v35  ;;  %v2568_v57 = vrot.slane %v10941_v36, 4  ;;  %v10947_v26 = vld [vmem:[#allocation163_spill] sm:$0xff]  ;;  %v10948_v5 = vld [vmem:[#allocation164_spill] sm:$0xff] }
 0x62d   : > { %10934 = vst [vmem:[#allocation141_spill] sm:$0xff] %v7359_v11  ;;  %10935 = vst [vmem:[#allocation151_spill] sm:$0xff] %v7361_v8  ;;  %v7369_v28 = vmax.f32 %v2559_v21, %v2560_v62  ;;  %v2574_v39 = vrot.slane %v10942_v30, 4  ;;  %v2580_v2 = vrot.slane %v10943_v32, 4  ;;  %v2586_v53 = vrot.slane %v10944_v34, 4 }
 0x62e   : > { %10936 = vst [vmem:[#allocation152_spill] sm:$0xff] %v7363_v22  ;;  %10937 = vst [vmem:[#allocation153_spill] sm:$0xff] %v7365_v4  ;;  %v7371_v19 = vmax.f32 %v2565_v27, %v2566_v43  ;;  %v2592_v24 = vrot.slane %v10945_v37, 4  ;;  %v2598_v29 = vrot.slane %v10946_v59, 4  ;;  %v2604_v47 = vrot.slane %v10947_v26, 4 }
 0x62f   : > { %10938 = vst [vmem:[#allocation154_spill] sm:$0xff] %v7367_v41  ;;  %10939 = vst [vmem:[#allocation155_spill] sm:$0xff] %v7369_v28  ;;  %v2569_v35 = vmax.f32 %v10941_v36, %v2568_v57  ;;  %v2575_v40 = vmax.f32 %v10942_v30, %v2574_v39  ;;  %v2581_v52 = vmax.f32 %v10943_v32, %v2580_v2  ;;  %v2610_v21 = vrot.slane %v10948_v5, 4 }
 0x630   : > { %10940 = vst [vmem:[#allocation156_spill] sm:$0xff] %v7371_v19  ;;  %v2587_v23 = vmax.f32 %v10944_v34, %v2586_v53  ;;  %v2593_v58 = vmax.f32 %v10945_v37, %v2592_v24  ;;  %v2599_v9 = vmax.f32 %v10946_v59, %v2598_v29  ;;  %v2605_v27 = vmax.f32 %v10947_v26, %v2604_v47 }
 0x631   : > { %v2570_v62 = vrot.slane %v2569_v35, 2  ;;  %v2576_v43 = vrot.slane %v2575_v40, 2  ;;  %v2582_v19 = vrot.slane %v2581_v52, 2  ;;  %v2611_v28 = vmax.f32 %v10948_v5, %v2610_v21 }
 0x632   : > { %v2588_v36 = vrot.slane %v2587_v23, 2  ;;  %v2594_v57 = vrot.slane %v2593_v58, 2  ;;  %v2600_v30 = vrot.slane %v2599_v9, 2  ;;  %v2606_v39 = vrot.slane %v2605_v27, 2 }
 0x633   : > { %v2571_v32 = vmax.f32 %v2569_v35, %v2570_v62  ;;  %v2577_v2 = vmax.f32 %v2575_v40, %v2576_v43  ;;  %v2583_v41 = vmax.f32 %v2581_v52, %v2582_v19  ;;  %v2612_v4 = vrot.slane %v2611_v28, 2  ;;  %v10959_v43 = vld [vmem:[#allocation168_spill] sm:$0xff] }
 0x634   : > { %v2589_v34 = vmax.f32 %v2587_v23, %v2588_v36  ;;  %v2595_v53 = vmax.f32 %v2593_v58, %v2594_v57  ;;  %v2601_v37 = vmax.f32 %v2599_v9, %v2600_v30  ;;  %v2607_v24 = vmax.f32 %v2605_v27, %v2606_v39  ;;  %v10958_v27 = vld [vmem:[#allocation166_spill] sm:$0xff]  ;;  %v10960_v57 = vld [vmem:[#allocation169_spill] sm:$0xff] }
 0x635   : > { %v2572_v59 = vrot.slane %v2571_v32, 1  ;;  %v2578_v29 = vrot.slane %v2577_v2, 1  ;;  %v2584_v26 = vrot.slane %v2583_v41, 1  ;;  %v2613_v47 = vmax.f32 %v2611_v28, %v2612_v4  ;;  %v10957_v28 = vld [vmem:[#allocation165_spill] sm:$0xff]  ;;  %v10961_v30 = vld [vmem:[#allocation170_spill] sm:$0xff] }
 0x636   : > { %v2590_v22 = vrot.slane %v2589_v34, 1  ;;  %v2596_v8 = vrot.slane %v2595_v53, 1  ;;  %v2602_v11 = vrot.slane %v2601_v37, 1  ;;  %v2608_v5 = vrot.slane %v2607_v24, 1 }
 0x637   : > { %v7389_v21 = vmax.f32 %v2571_v32, %v2572_v59  ;;  %v7391_v13 = vmax.f32 %v2577_v2, %v2578_v29  ;;  %v7393_v35 = vmax.f32 %v2583_v41, %v2584_v26  ;;  %v2614_v19 = vrot.slane %v2613_v47, 1 }
 0x638   : > { %v7395_v40 = vmax.f32 %v2589_v34, %v2590_v22  ;;  %v7397_v52 = vmax.f32 %v2595_v53, %v2596_v8  ;;  %v7399_v23 = vmax.f32 %v2601_v37, %v2602_v11  ;;  %v7401_v58 = vmax.f32 %v2607_v24, %v2608_v5  ;;  %v10962_v22 = vld [vmem:[#allocation171_spill] sm:$0xff]  ;;  %v10963_v8 = vld [vmem:[#allocation173_spill] sm:$0xff]  ;;  %v10964_v37 = vld [vmem:[#allocation174_spill] sm:$0xff] }
 0x639   : > { %10949 = vst [vmem:[#allocation157_spill] sm:$0xff] %v7389_v21  ;;  %10950 = vst [vmem:[#allocation158_spill] sm:$0xff] %v7391_v13  ;;  %v7403_v4 = vmax.f32 %v2613_v47, %v2614_v19  ;;  %v2616_v9 = vrot.slane %v10957_v28, 4  ;;  %v2622_v62 = vrot.slane %v10958_v27, 4  ;;  %v2628_v36 = vrot.slane %v10959_v43, 4  ;;  %v11012_v21 = vld [vmem:[#allocation111_spill] sm:$0xff] }
 0x63a   : > { %10951 = vst [vmem:[#allocation159_spill] sm:$0xff] %v7393_v35  ;;  %10952 = vst [vmem:[#allocation160_spill] sm:$0xff] %v7395_v40  ;;  %v2634_v41 = vrot.slane %v10960_v57, 4  ;;  %v2640_v39 = vrot.slane %v10961_v30, 4  ;;  %v2646_v32 = vrot.slane %v10962_v22, 4  ;;  %v2652_v2 = vrot.slane %v10963_v8, 4 }
 0x63b   : > { %10953 = vst [vmem:[#allocation161_spill] sm:$0xff] %v7397_v52  ;;  %10954 = vst [vmem:[#allocation162_spill] sm:$0xff] %v7399_v23  ;;  %v2617_v11 = vmax.f32 %v10957_v28, %v2616_v9  ;;  %v2623_v34 = vmax.f32 %v10958_v27, %v2622_v62  ;;  %v2629_v53 = vmax.f32 %v10959_v43, %v2628_v36  ;;  %v2658_v24 = vrot.slane %v10964_v37, 4 }
 0x63c   : > { %10955 = vst [vmem:[#allocation163_spill] sm:$0xff] %v7401_v58  ;;  %10956 = vst [vmem:[#allocation164_spill] sm:$0xff] %v7403_v4  ;;  %v2635_v59 = vmax.f32 %v10960_v57, %v2634_v41  ;;  %v2641_v29 = vmax.f32 %v10961_v30, %v2640_v39  ;;  %v2647_v26 = vmax.f32 %v10962_v22, %v2646_v32 }
 0x63d   : > { %v2653_v47 = vmax.f32 %v10963_v8, %v2652_v2  ;;  %v2618_v5 = vrot.slane %v2617_v11, 2  ;;  %v2624_v19 = vrot.slane %v2623_v34, 2  ;;  %v2630_v4 = vrot.slane %v2629_v53, 2 }
 0x63e   : > { %v2659_v58 = vmax.f32 %v10964_v37, %v2658_v24  ;;  %v2636_v28 = vrot.slane %v2635_v59, 2  ;;  %v2642_v9 = vrot.slane %v2641_v29, 2  ;;  %v2648_v27 = vrot.slane %v2647_v26, 2  ;;  %v1031_v37 = vld [vmem:[%s9945_s6 + $0x80] sm:$0xff] }
 0x63f   : > { %v2654_v62 = vrot.slane %v2653_v47, 2  ;;  %v2619_v43 = vmax.f32 %v2617_v11, %v2618_v5  ;;  %v2625_v36 = vmax.f32 %v2623_v34, %v2624_v19  ;;  %v2631_v23 = vmax.f32 %v2629_v53, %v2630_v4  ;;  %v1032_v4 = vld [vmem:[%s9945_s6 + $0x88] sm:$0xff] }
 0x640   : > { %v2660_v52 = vrot.slane %v2659_v58, 2  ;;  %v2637_v57 = vmax.f32 %v2635_v59, %v2636_v28  ;;  %v2643_v41 = vmax.f32 %v2641_v29, %v2642_v9  ;;  %v2649_v30 = vmax.f32 %v2647_v26, %v2648_v27  ;;  %v10973_v28 = vld [vmem:[#allocation175_spill] sm:$0xff]  ;;  %v10974_v27 = vld [vmem:[#allocation176_spill] sm:$0xff] }
 0x641   : > { %v2655_v39 = vmax.f32 %v2653_v47, %v2654_v62  ;;  %v2620_v22 = vrot.slane %v2619_v43, 1  ;;  %v2626_v32 = vrot.slane %v2625_v36, 1  ;;  %v2632_v8 = vrot.slane %v2631_v23, 1 }
 0x642   : > { %v2661_v2 = vmax.f32 %v2659_v58, %v2660_v52  ;;  %v2638_v24 = vrot.slane %v2637_v57, 1  ;;  %v2644_v40 = vrot.slane %v2643_v41, 1  ;;  %v2650_v35 = vrot.slane %v2649_v30, 1  ;;  %v1015_v52 = vld [vmem:[%s9945_s6] sm:$0xff]  ;;  %v1016_v58 = vld [vmem:[%s9945_s6 + $0x8] sm:$0xff] }
 0x643   : > { %v2656_v13 = vrot.slane %v2655_v39, 1  ;;  %v7427_v11 = vmax.f32 %v2619_v43, %v2620_v22  ;;  %v7429_v34 = vmax.f32 %v2625_v36, %v2626_v32  ;;  %v7431_v53 = vmax.f32 %v2631_v23, %v2632_v8  ;;  %v1033_v23 = vld [vmem:[%s9945_s6 + $0x90] sm:$0xff]  ;;  %v10975_v43 = vld [vmem:[#allocation177_spill] sm:$0xff]  ;;  %v10977_v22 = vld [vmem:[#allocation142_spill] sm:$0xff] }
 0x644   : > { %v2662_v59 = vrot.slane %v2661_v2, 1  ;;  %v7439_v29 = vmax.f32 %v2637_v57, %v2638_v24  ;;  %v7441_v26 = vmax.f32 %v2643_v41, %v2644_v40  ;;  %v7443_v47 = vmax.f32 %v2649_v30, %v2650_v35  ;;  %v1034_v40 = vld [vmem:[%s9945_s6 + $0x98] sm:$0xff]  ;;  %v10976_v57 = vld [vmem:[#allocation178_spill] sm:$0xff] }
 0x645   : > { %10965 = vst [vmem:[#allocation165_spill] sm:$0xff] %v7427_v11  ;;  %10966 = vst [vmem:[#allocation166_spill] sm:$0xff] %v7429_v34  ;;  %v7445_v5 = vmax.f32 %v2655_v39, %v2656_v13  ;;  %v2664_v9 = vrot.slane %v10973_v28, 4  ;;  %v2670_v62 = vrot.slane %v10974_v27, 4  ;;  %v2676_v36 = vrot.slane %v10975_v43, 4  ;;  %v1017_v13 = vld [vmem:[%s9945_s6 + $0x10] sm:$0xff] }
 0x646   : > { %10967 = vst [vmem:[#allocation168_spill] sm:$0xff] %v7431_v53  ;;  %10968 = vst [vmem:[#allocation169_spill] sm:$0xff] %v7439_v29  ;;  %v7450_v19 = vmax.f32 %v2661_v2, %v2662_v59  ;;  %v1018_v35 = vld [vmem:[%s9945_s6 + $0x18] sm:$0xff]  ;;  %v2682_v41 = vrot.slane %v10976_v57, 4  ;;  %v5054_v30 = vpack.c.bf16 %v1032_v4, %v1031_v37  ;;  %v5238_v39 = vld [vmem:[%s9947_s8 + $0x6] ss:$0 sm:$0xff]  ;;  %v5056_v8 = vpack.c.bf16 %v1016_v58, %v1015_v52  ;;  %v7469_v2 = vpop.permute.xlu1 %2474 }
 0x647   : > { %10969 = vst [vmem:[#allocation170_spill] sm:$0xff] %v7441_v26  ;;  %10970 = vst [vmem:[#allocation171_spill] sm:$0xff] %v7443_v47  ;;  %v1132_v32 = vadd.f32 %v5238_v39, %v10977_v22  ;;  %v2665_v24 = vmax.f32 %v10973_v28, %v2664_v9  ;;  %v2671_v59 = vmax.f32 %v10974_v27, %v2670_v62  ;;  %v10982_v27 = vld [vmem:[#allocation11_spill] sm:$0xff]  ;;  %v10999_v53 = vld [vmem:[#allocation68_spill] sm:$0xff] }
 0x648   : > { %10971 = vst [vmem:[#allocation173_spill] sm:$0xff] %v7445_v5  ;;  %10972 = vst [vmem:[#allocation174_spill] sm:$0xff] %v7450_v19  ;;  %v2677_v19 = vmax.f32 %v10975_v43, %v2676_v36  ;;  %v10979_v5 = vld [vmem:[#allocation135_spill] sm:$0xff]  ;;  %v2683_v37 = vmax.f32 %v10976_v57, %v2682_v41  ;;  %5055 = vmatprep.subr.bf16.mxu0 %v5054_v30  ;;  %v5058_v26 = vpack.c.bf16 %v1034_v40, %v1033_v23  ;;  %v10983_v43 = vld [vmem:[#allocation10_spill] sm:$0xff] }
 0x649   : > { %10978 = vst [vmem:[#allocation175_spill] sm:$0xff] %v7469_v2  ;;  %v7476_v47 = vmul.f32 %v7469_v2, %v10979_v5  ;;  %v7479_v4 = vmax.f32 %v1132_v32, 0.0  ;;  %v5060_v39 = vpack.c.bf16 %v1018_v35, %v1017_v13  ;;  %v2666_v52 = vrot.slane %v2665_v24, 2  ;;  %5057 = vmatpush3.bf16.msra.mxu0 %v5056_v8  ;;  %v10984_v57 = vld [vmem:[#allocation15_spill] sm:$0xff]  ;;  %v10985_v13 = vld [vmem:[#allocation24_spill] sm:$0xff]  ;;  %v10986_v8 = vld [vmem:[#allocation33_spill] sm:$0xff] }
 0x64a   : > { %v2672_v58 = vrot.slane %v2671_v59, 2  ;;  %v2678_v22 = vrot.slane %v2677_v19, 2  ;;  %v2684_v9 = vrot.slane %v2683_v37, 2  ;;  %5059 = vmatprep.subr.bf16.mxu0 %v5058_v26  ;;  %v10987_v2 = vld [vmem:[#allocation39_spill] sm:$0xff]  ;;  %v10988_v5 = vld [vmem:[#allocation45_spill] sm:$0xff]  ;;  %v10989_v26 = vld [vmem:[#allocation52_spill] sm:$0xff] }
 0x64b   : > { %10980 = vst [vmem:[#allocation176_spill] sm:$0xff] %v7476_v47  ;;  %10981 = vst [vmem:[#allocation177_spill] sm:$0xff] %v7479_v4  ;;  %v2104_v62 = vmul.f32 %v10982_v27, %v7479_v4  ;;  %v2105_v36 = vmul.f32 %v10983_v43, %v7479_v4  ;;  %v2106_v41 = vmul.f32 %v10984_v57, %v7479_v4  ;;  %v11010_v34 = vld [vmem:[#allocation102_spill] sm:$0xff]  ;;  %v11011_v11 = vld [vmem:[#allocation103_spill] sm:$0xff] }
 0x64c   : > { %v2667_v30 = vmax.f32 %v2665_v24, %v2666_v52  ;;  %v2673_v23 = vmax.f32 %v2671_v59, %v2672_v58  ;;  %v2679_v40 = vmax.f32 %v2677_v19, %v2678_v22  ;;  %v2107_v35 = vmul.f32 %v10985_v13, %v7479_v4  ;;  %v10990_v59 = vld [vmem:[#allocation38_spill] sm:$0xff]  ;;  %v10991_v52 = vld [vmem:[#allocation41_spill] sm:$0xff]  ;;  %v10992_v22 = vld [vmem:[#allocation44_spill] sm:$0xff] }
 0x64d   : > { %v2685_v32 = vmax.f32 %v2683_v37, %v2684_v9  ;;  %v2108_v28 = vmul.f32 %v10986_v8, %v7479_v4  ;;  %v2109_v27 = vmul.f32 %v10987_v2, %v7479_v4  ;;  %v2110_v43 = vmul.f32 %v10988_v5, %v7479_v4  ;;  %5061 = vmatpush3.bf16.msra.mxu0 %v5060_v39  ;;  %v10996_v39 = vld [vmem:[#allocation55_spill] sm:$0xff] }
 0x64e   : > { %v2668_v47 = vrot.slane %v2667_v30, 1  ;;  %v2674_v29 = vrot.slane %v2673_v23, 1  ;;  %v2680_v57 = vrot.slane %v2679_v40, 1  ;;  %v2111_v24 = vmul.f32 %v10989_v26, %v7479_v4  ;;  %v10998_v13 = vld [vmem:[#allocation63_spill] sm:$0xff] }
 0x64f   : > { %v2686_v19 = vrot.slane %v2685_v32, 1  ;;  %v7500_v37 = vmul.f32 %v10990_v59, %v7479_v4  ;;  %v7504_v58 = vmul.f32 %v10991_v52, %v7479_v4  ;;  %v7508_v9 = vmul.f32 %v10992_v22, %v7479_v4 }
 0x650   : > { %v7510_v5 = vmax.f32 %v2667_v30, %v2668_v47  ;;  %v7512_v2 = vmax.f32 %v2673_v23, %v2674_v29  ;;  %v7514_v8 = vmax.f32 %v2679_v40, %v2680_v57  ;;  %v7518_v26 = vmul.f32 %v10996_v39, %v7479_v4  ;;  %v11000_v47 = vld [vmem:[#allocation77_spill] sm:$0xff]  ;;  %v11001_v57 = vld [vmem:[#allocation84_spill] sm:$0xff]  ;;  %v11002_v23 = vld [vmem:[#allocation71_spill] sm:$0xff] }
 0x651   : > { %v7520_v59 = vmax.f32 %v2685_v32, %v2686_v19  ;;  %v7524_v52 = vmul.f32 %v10998_v13, %v7479_v4  ;;  %v7528_v22 = vmul.f32 %v10999_v53, %v7479_v4  ;;  %v7532_v29 = vmul.f32 %v11000_v47, %v7479_v4  ;;  %v11003_v32 = vld [vmem:[#allocation70_spill] sm:$0xff]  ;;  %v11004_v13 = vld [vmem:[#allocation76_spill] sm:$0xff]  ;;  %v11005_v39 = vld [vmem:[#allocation87_spill] sm:$0xff] }
 0x652   : > { %10993 = vst [vmem:[#allocation178_spill] sm:$0xff] %v7510_v5  ;;  %10994 = vst [vmem:[#allocation142_spill] sm:$0xff] %v7512_v2  ;;  %v7536_v30 = vmul.f32 %v11001_v57, %v7479_v4  ;;  %v7540_v40 = vmul.f32 %v11002_v23, %v7479_v4  ;;  %v7544_v19 = vmul.f32 %v11003_v32, %v7479_v4  ;;  %v11008_v2 = vld [vmem:[#allocation107_spill] sm:$0xff]  ;;  %v2136_v60 = vrot.slane %v2104_v62, 4 }
 0x653   : > { %10995 = vst [vmem:[#allocation215_spill] sm:$0xff] %v7514_v8  ;;  %10997 = vst [vmem:[#allocation216_spill] sm:$0xff] %v7520_v59  ;;  %v7548_v53 = vmul.f32 %v11004_v13, %v7479_v4  ;;  %v7552_v47 = vmul.f32 %v11005_v39, %v7479_v4  ;;  %v11006_v59 = vld [vmem:[#allocation95_spill] sm:$0xff]  ;;  %v11007_v8 = vld [vmem:[#allocation101_spill] sm:$0xff]  ;;  %v7564_v32 = vmul.f32 %v11008_v2, %v7479_v4  ;;  %v2142_v51 = vrot.slane %v2105_v36, 4 }
 0x654   : > { %v7556_v57 = vmul.f32 %v11006_v59, %v7479_v4  ;;  %v7560_v23 = vmul.f32 %v11007_v8, %v7479_v4  ;;  %v11009_v5 = vld [vmem:[#allocation115_spill] sm:$0xff]  ;;  %v7572_v39 = vmul.f32 %v11010_v34, %v7479_v4  ;;  %v7576_v59 = vmul.f32 %v11011_v11, %v7479_v4 }
 0x655   : > { %v7568_v13 = vmul.f32 %v11009_v5, %v7479_v4  ;;  %v7580_v8 = vmul.f32 %v11012_v21, %v7479_v4  ;;  %v7584_v2 = vmul.f32 %v11013_v16, %v7479_v4  ;;  %v7588_v5 = vmul.f32 %v11014_v45, %v7479_v4 }
 0x656   : > { %v7592_v34 = vmul.f32 %v11015_v44, %v7479_v4  ;;  %v2148_v11 = vrot.slane %v2106_v41, 4  ;;  %v2154_v48 = vrot.slane %v2107_v35, 4  ;;  %v2160_v17 = vrot.slane %v2108_v28, 4 }
 0x657   : > { %v2137_v31 = vmax.f32 %v2104_v62, %v2136_v60  ;;  %v2166_v21 = vrot.slane %v2109_v27, 4  ;;  %v2172_v54 = vrot.slane %v2110_v43, 4  ;;  %v2178_v6 = vrot.slane %v2111_v24, 4 }
 0x658   : > { %v2143_v42 = vmax.f32 %v2105_v36, %v2142_v51  ;;  %v2149_v16 = vmax.f32 %v2106_v41, %v2148_v11  ;;  %v2155_v12 = vmax.f32 %v2107_v35, %v2154_v48  ;;  %v2161_v38 = vmax.f32 %v2108_v28, %v2160_v17 }
 0x659   : > { %v2138_v3 = vrot.slane %v2137_v31, 2  ;;  %v2167_v45 = vmax.f32 %v2109_v27, %v2166_v21  ;;  %v2173_v49 = vmax.f32 %v2110_v43, %v2172_v54  ;;  %v2179_v18 = vmax.f32 %v2111_v24, %v2178_v6 }
 0x65a   : > { %v2144_v7 = vrot.slane %v2143_v42, 2  ;;  %v2150_v44 = vrot.slane %v2149_v16, 2  ;;  %v2156_v4 = vrot.slane %v2155_v12, 2  ;;  %v2162_v55 = vrot.slane %v2161_v38, 2 }
 0x65b   : > { %v2139_v50 = vmax.f32 %v2137_v31, %v2138_v3  ;;  %v2168_v56 = vrot.slane %v2167_v45, 2  ;;  %v2174_v63 = vrot.slane %v2173_v49, 2  ;;  %v2180_v14 = vrot.slane %v2179_v18, 2 }
 0x65c   : > { %v2145_v60 = vmax.f32 %v2143_v42, %v2144_v7  ;;  %v2151_v62 = vmax.f32 %v2149_v16, %v2150_v44  ;;  %v2157_v46 = vmax.f32 %v2155_v12, %v2156_v4  ;;  %v2163_v33 = vmax.f32 %v2161_v38, %v2162_v55 }
 0x65d   : > { %v2140_v51 = vrot.slane %v2139_v50, 1  ;;  %v2169_v11 = vmax.f32 %v2167_v45, %v2168_v56  ;;  %v2175_v48 = vmax.f32 %v2173_v49, %v2174_v63  ;;  %v2181_v17 = vmax.f32 %v2179_v18, %v2180_v14 }
 0x65e   : > { %v2146_v28 = vrot.slane %v2145_v60, 1  ;;  %v2152_v21 = vrot.slane %v2151_v62, 1  ;;  %v2158_v54 = vrot.slane %v2157_v46, 1  ;;  %v2164_v6 = vrot.slane %v2163_v33, 1 }
 0x65f   : > { %v7594_v27 = vmax.f32 %v2139_v50, %v2140_v51  ;;  %v2170_v43 = vrot.slane %v2169_v11, 1  ;;  %v2176_v36 = vrot.slane %v2175_v48, 1  ;;  %v2182_v3 = vrot.slane %v2181_v17, 1 }
 0x660   : > { %v7596_v31 = vmax.f32 %v2145_v60, %v2146_v28  ;;  %v7598_v41 = vmax.f32 %v2151_v62, %v2152_v21  ;;  %v7600_v7 = vmax.f32 %v2157_v46, %v2158_v54  ;;  %v7602_v38 = vmax.f32 %v2163_v33, %v2164_v6 }
 0x661   : > { %v7604_v42 = vmax.f32 %v2169_v11, %v2170_v43  ;;  %v7606_v63 = vmax.f32 %v2175_v48, %v2176_v36  ;;  %v7608_v49 = vmax.f32 %v2181_v17, %v2182_v3  ;;  %v2184_v50 = vrot.slane %v7500_v37, 4 }
 0x662   : > { %v2190_v44 = vrot.slane %v7504_v58, 4  ;;  %v2196_v16 = vrot.slane %v7508_v9, 4  ;;  %v2202_v14 = vrot.slane %v7518_v26, 4  ;;  %v2208_v56 = vrot.slane %v7524_v52, 4 }
 0x663   : > { %v2185_v46 = vmax.f32 %v7500_v37, %v2184_v50  ;;  %v2214_v33 = vrot.slane %v7528_v22, 4  ;;  %v2220_v55 = vrot.slane %v7532_v29, 4  ;;  %v2226_v18 = vrot.slane %v7536_v30, 4 }
 0x664   : > { %v2191_v12 = vmax.f32 %v7504_v58, %v2190_v44  ;;  %v2197_v45 = vmax.f32 %v7508_v9, %v2196_v16  ;;  %v2203_v4 = vmax.f32 %v7518_v26, %v2202_v14  ;;  %v2209_v35 = vmax.f32 %v7524_v52, %v2208_v56 }
 0x665   : > { %v2186_v24 = vrot.slane %v2185_v46, 2  ;;  %v2215_v60 = vmax.f32 %v7528_v22, %v2214_v33  ;;  %v2221_v62 = vmax.f32 %v7532_v29, %v2220_v55  ;;  %v2227_v37 = vmax.f32 %v7536_v30, %v2226_v18 }
 0x666   : > { %v2192_v51 = vrot.slane %v2191_v12, 2  ;;  %v2198_v11 = vrot.slane %v2197_v45, 2  ;;  %v2204_v48 = vrot.slane %v2203_v4, 2  ;;  %v2210_v17 = vrot.slane %v2209_v35, 2 }
 0x667   : > { %v2187_v28 = vmax.f32 %v2185_v46, %v2186_v24  ;;  %v2216_v21 = vrot.slane %v2215_v60, 2  ;;  %v2222_v58 = vrot.slane %v2221_v62, 2  ;;  %v2228_v54 = vrot.slane %v2227_v37, 2 }
 0x668   : > { %v2193_v9 = vmax.f32 %v2191_v12, %v2192_v51  ;;  %v2199_v6 = vmax.f32 %v2197_v45, %v2198_v11  ;;  %v2205_v26 = vmax.f32 %v2203_v4, %v2204_v48  ;;  %v2211_v43 = vmax.f32 %v2209_v35, %v2210_v17 }
 0x669   : > { %v2188_v52 = vrot.slane %v2187_v28, 1  ;;  %v2217_v36 = vmax.f32 %v2215_v60, %v2216_v21  ;;  %v2223_v3 = vmax.f32 %v2221_v62, %v2222_v58  ;;  %v2229_v22 = vmax.f32 %v2227_v37, %v2228_v54 }
 0x66a   : > { %v2194_v50 = vrot.slane %v2193_v9, 1  ;;  %v2200_v29 = vrot.slane %v2199_v6, 1  ;;  %v2206_v44 = vrot.slane %v2205_v26, 1  ;;  %v2212_v30 = vrot.slane %v2211_v43, 1 }
 0x66b   : > { %v7626_v16 = vmax.f32 %v2187_v28, %v2188_v52  ;;  %v2218_v14 = vrot.slane %v2217_v36, 1  ;;  %v2224_v56 = vrot.slane %v2223_v3, 1  ;;  %v2230_v46 = vrot.slane %v2229_v22, 1 }
 0x66c   : > { %v7628_v33 = vmax.f32 %v2193_v9, %v2194_v50  ;;  %v7630_v55 = vmax.f32 %v2199_v6, %v2200_v29  ;;  %v7632_v18 = vmax.f32 %v2205_v26, %v2206_v44  ;;  %v7634_v12 = vmax.f32 %v2211_v43, %v2212_v30 }
 0x66d   : > { %v7636_v45 = vmax.f32 %v2217_v36, %v2218_v14  ;;  %v7638_v4 = vmax.f32 %v2223_v3, %v2224_v56  ;;  %v7640_v35 = vmax.f32 %v2229_v22, %v2230_v46  ;;  %v2232_v24 = vrot.slane %v7540_v40, 4 }
 0x66e   : > { %v2238_v60 = vrot.slane %v7544_v19, 4  ;;  %v2244_v62 = vrot.slane %v7548_v53, 4  ;;  %v2250_v37 = vrot.slane %v7552_v47, 4  ;;  %v2256_v51 = vrot.slane %v7556_v57, 4 }
 0x66f   : > { %v2233_v11 = vmax.f32 %v7540_v40, %v2232_v24  ;;  %v2262_v48 = vrot.slane %v7560_v23, 4  ;;  %v2268_v17 = vrot.slane %v7564_v32, 4  ;;  %v2274_v28 = vrot.slane %v7568_v13, 4 }
 0x670   : > { %v2239_v21 = vmax.f32 %v7544_v19, %v2238_v60  ;;  %v2245_v58 = vmax.f32 %v7548_v53, %v2244_v62  ;;  %v2251_v54 = vmax.f32 %v7552_v47, %v2250_v37  ;;  %v2257_v9 = vmax.f32 %v7556_v57, %v2256_v51 }
 0x671   : > { %v2234_v6 = vrot.slane %v2233_v11, 2  ;;  %v2263_v26 = vmax.f32 %v7560_v23, %v2262_v48  ;;  %v2269_v43 = vmax.f32 %v7564_v32, %v2268_v17  ;;  %v2275_v40 = vmax.f32 %v7568_v13, %v2274_v28 }
 0x672   : > { %v2240_v52 = vrot.slane %v2239_v21, 2  ;;  %v2246_v36 = vrot.slane %v2245_v58, 2  ;;  %v2252_v3 = vrot.slane %v2251_v54, 2  ;;  %v2258_v22 = vrot.slane %v2257_v9, 2 }
 0x673   : > { %v2235_v50 = vmax.f32 %v2233_v11, %v2234_v6  ;;  %v2264_v29 = vrot.slane %v2263_v26, 2  ;;  %v2270_v19 = vrot.slane %v2269_v43, 2  ;;  %v2276_v44 = vrot.slane %v2275_v40, 2 }
 0x674   : > { %v2241_v53 = vmax.f32 %v2239_v21, %v2240_v52  ;;  %v2247_v30 = vmax.f32 %v2245_v58, %v2246_v36  ;;  %v2253_v47 = vmax.f32 %v2251_v54, %v2252_v3  ;;  %v2259_v14 = vmax.f32 %v2257_v9, %v2258_v22 }
 0x675   : > { %v2236_v57 = vrot.slane %v2235_v50, 1  ;;  %v2265_v56 = vmax.f32 %v2263_v26, %v2264_v29  ;;  %v2271_v46 = vmax.f32 %v2269_v43, %v2270_v19  ;;  %v2277_v23 = vmax.f32 %v2275_v40, %v2276_v44 }
 0x676   : > { %v2242_v24 = vrot.slane %v2241_v53, 1  ;;  %v2248_v32 = vrot.slane %v2247_v30, 1  ;;  %v2254_v60 = vrot.slane %v2253_v47, 1  ;;  %v2260_v13 = vrot.slane %v2259_v14, 1 }
 0x677   : > { %v2237_v62 = vmax.f32 %v2235_v50, %v2236_v57  ;;  %v2266_v37 = vrot.slane %v2265_v56, 1  ;;  %v2272_v51 = vrot.slane %v2271_v46, 1  ;;  %v2278_v48 = vrot.slane %v2277_v23, 1 }
 0x678   : > { %v2243_v11 = vmax.f32 %v2241_v53, %v2242_v24  ;;  %v2249_v17 = vmax.f32 %v2247_v30, %v2248_v32  ;;  %v2255_v28 = vmax.f32 %v2253_v47, %v2254_v60  ;;  %v2261_v6 = vmax.f32 %v2259_v14, %v2260_v13 }
 0x679   : > { %v2267_v21 = vmax.f32 %v2265_v56, %v2266_v37  ;;  %v2273_v58 = vmax.f32 %v2271_v46, %v2272_v51  ;;  %v7658_v54 = vmax.f32 %v2277_v23, %v2278_v48  ;;  %v2280_v9 = vrot.slane %v7572_v39, 4  ;;  %v11022_v56 = vld [vmem:[#allocation202_spill] sm:$0xff]  ;;  %v11027_v51 = vld [vmem:[#allocation179_spill] sm:$0xff] }
 0x67a   : > { %v2286_v26 = vrot.slane %v7576_v59, 4  ;;  %v2292_v43 = vrot.slane %v7580_v8, 4  ;;  %v2298_v40 = vrot.slane %v7584_v2, 4  ;;  %v2304_v52 = vrot.slane %v7588_v5, 4  ;;  %v11028_v48 = vld [vmem:[#allocation206_spill] sm:$0xff] }
 0x67b   : > { %v2281_v36 = vmax.f32 %v7572_v39, %v2280_v9  ;;  %v2310_v3 = vrot.slane %v7592_v34, 4  ;;  %v11016_v22 = vmax.f32 %v7015_v15, %v7158_v20  ;;  %v11017_v29 = vmax.f32 %v7017_v1, %v7161_v25  ;;  %v11019_v1 = vld [vmem:[#allocation201_spill] sm:$0xff] }
 0x67c   : > { %v2287_v44 = vmax.f32 %v7576_v59, %v2286_v26  ;;  %v2293_v53 = vmax.f32 %v7580_v8, %v2292_v43  ;;  %v2299_v39 = vmax.f32 %v7584_v2, %v2298_v40  ;;  %v2305_v30 = vmax.f32 %v7588_v5, %v2304_v52  ;;  %v11031_v43 = vld [vmem:[#allocation207_spill] sm:$0xff] }
 0x67d   : > { %v7671_v50 = vmax.f32 %v11016_v22, %v7594_v27  ;;  %v7677_v19 = vmax.f32 %v11017_v29, %v7596_v31  ;;  %v2282_v47 = vrot.slane %v2281_v36, 2  ;;  %v2311_v14 = vmax.f32 %v7592_v34, %v2310_v3  ;;  %v11021_v34 = vld [vmem:[#allocation143_spill] sm:$0xff] }
 0x67e   : > { %v11018_v15 = vmax.f32 %v7019_v61, %v7166_v0  ;;  %v11020_v25 = vmax.f32 %v7021_v10, %v11019_v1  ;;  %v2288_v8 = vrot.slane %v2287_v44, 2  ;;  %v2294_v27 = vrot.slane %v2293_v53, 2  ;;  %v11024_v61 = vld [vmem:[#allocation144_spill] sm:$0xff]  ;;  %v11025_v0 = vld [vmem:[#allocation203_spill] sm:$0xff] }
 0x67f   : > { %v2300_v2 = vrot.slane %v2299_v39, 2  ;;  %v2306_v31 = vrot.slane %v2305_v30, 2  ;;  %v2283_v5 = vmax.f32 %v2281_v36, %v2282_v47  ;;  %v2312_v57 = vrot.slane %v2311_v14, 2 }
 0x680   : > { %v7688_v20 = vmax.f32 %v11018_v15, %v7598_v41  ;;  %v7694_v59 = vmax.f32 %v11020_v25, %v7600_v7  ;;  %v11023_v46 = vmax.f32 %v11021_v34, %v11022_v56  ;;  %v11026_v41 = vmax.f32 %v11024_v61, %v11025_v0 }
 0x681   : > { %v2289_v10 = vmax.f32 %v2287_v44, %v2288_v8  ;;  %v2295_v7 = vmax.f32 %v2293_v53, %v2294_v27  ;;  %v2301_v32 = vmax.f32 %v2299_v39, %v2300_v2  ;;  %v2307_v60 = vmax.f32 %v2305_v30, %v2306_v31  ;;  %v11033_v53 = vld [vmem:[#allocation181_spill] sm:$0xff]  ;;  %v11034_v39 = vld [vmem:[#allocation208_spill] sm:$0xff] }
 0x682   : > { %v7700_v23 = vmax.f32 %v11023_v46, %v7602_v38  ;;  %v7706_v24 = vmax.f32 %v11026_v41, %v7604_v42  ;;  %v2284_v13 = vrot.slane %v2283_v5, 1  ;;  %v2313_v37 = vmax.f32 %v2311_v14, %v2312_v57  ;;  %v11030_v38 = vld [vmem:[#allocation180_spill] sm:$0xff]  ;;  %v11037_v14 = vld [vmem:[#allocation209_spill] sm:$0xff]  ;;  %v11041_v57 = vld [vmem:[#allocation210_spill] sm:$0xff] }
 0x683   : > { %v11029_v9 = vmax.f32 %v11027_v51, %v11028_v48  ;;  %v11032_v40 = vmax.f32 %v11030_v38, %v11031_v43  ;;  %v2290_v36 = vrot.slane %v2289_v10, 1  ;;  %v2296_v42 = vrot.slane %v2295_v7, 1  ;;  %v11044_v46 = vld [vmem:[#allocation211_spill] sm:$0xff]  ;;  %v11047_v41 = vld [vmem:[#allocation212_spill] sm:$0xff]  ;;  %v11053_v48 = vld [vmem:[#allocation121_spill] sm:$0xff] }
 0x684   : > { %v2302_v3 = vrot.slane %v2301_v32, 1  ;;  %v2308_v22 = vrot.slane %v2307_v60, 1  ;;  %v2285_v29 = vmax.f32 %v2283_v5, %v2284_v13  ;;  %v2314_v44 = vrot.slane %v2313_v37, 1  ;;  %v11040_v5 = vld [vmem:[#allocation183_spill] sm:$0xff]  ;;  %v11052_v51 = vld [vmem:[#allocation132_spill] sm:$0xff] }
 0x685   : > { %v7712_v26 = vmax.f32 %v11029_v9, %v7626_v16  ;;  %v2337_v52 = vmax.f32 %v11032_v40, %v7628_v33  ;;  %v11035_v30 = vmax.f32 %v11033_v53, %v11034_v39  ;;  %v11036_v16 = vld [vmem:[#allocation182_spill] sm:$0xff]  ;;  %v7730_v33 = vpop.permute.xlu0 %2098  ;;  %v2291_v25 = vmax.f32 %v2289_v10, %v2290_v36  ;;  %v11055_v38 = vld [vmem:[#allocation187_spill] sm:$0xff] }
 0x686   : > { %v11038_v15 = vmax.f32 %v11036_v16, %v11037_v14  ;;  %11039 = vst [vmem:[#allocation201_spill] sm:$0xff] %v7730_v33  ;;  %v2297_v8 = vmax.f32 %v2295_v7, %v2296_v42  ;;  %v2303_v27 = vmax.f32 %v2301_v32, %v2302_v3  ;;  %v2309_v2 = vmax.f32 %v2307_v60, %v2308_v22  ;;  %v11049_v32 = vld [vmem:[#allocation131_spill] sm:$0xff]  ;;  %v11050_v60 = vld [vmem:[#allocation118_spill] sm:$0xff]  ;;  %v11059_v42 = vld [vmem:[#allocation148_spill] sm:$0xff] }
 0x687   : > { %v7722_v47 = vmax.f32 %v11035_v30, %v7630_v55  ;;  %v2315_v31 = vmax.f32 %v2313_v37, %v2314_v44  ;;  %v11042_v34 = vmax.f32 %v11040_v5, %v11041_v57  ;;  %v11043_v55 = vld [vmem:[#allocation184_spill] sm:$0xff]  ;;  %v11051_v13 = vmax.f32 %v11049_v32, %v11050_v60  ;;  %v11056_v43 = vld [vmem:[#allocation147_spill] sm:$0xff]  ;;  %v11063_v44 = vld [vmem:[#allocation149_spill] sm:$0xff] }
 0x688   : > { %v7728_v1 = vmax.f32 %v11038_v15, %v7632_v18  ;;  %v11045_v61 = vmax.f32 %v11043_v55, %v11044_v46  ;;  %v11046_v18 = vld [vmem:[#allocation185_spill] sm:$0xff]  ;;  %v11057_v40 = vmax.f32 %v11055_v38, %v11056_v43  ;;  %v11067_v30 = vld [vmem:[#allocation150_spill] sm:$0xff] }
 0x689   : > { %v7736_v56 = vmax.f32 %v11042_v34, %v7634_v12  ;;  %v11048_v10 = vmax.f32 %v11046_v18, %v11047_v41  ;;  %v2344_v37 = vmax.f32 %v11051_v13, %v2237_v62  ;;  %v11054_v12 = vmax.f32 %v11052_v51, %v11053_v48  ;;  %v11066_v62 = vld [vmem:[#allocation190_spill] sm:$0xff]  ;;  %v11073_v57 = vld [vmem:[#allocation193_spill] sm:$0xff]  ;;  %v11074_v34 = vld [vmem:[#allocation127_spill] sm:$0xff] }
 0x68a   : > { %v7742_v0 = vmax.f32 %v11045_v61, %v7636_v45  ;;  %v7759_v36 = vmax.f32 %v11057_v40, %v2249_v17  ;;  %v11058_v45 = vld [vmem:[#allocation188_spill] sm:$0xff]  ;;  %v11068_v16 = vmax.f32 %v11066_v62, %v11067_v30  ;;  %v11071_v15 = vld [vmem:[#allocation126_spill] sm:$0xff]  ;;  %v11075_v55 = vmax.f32 %v11073_v57, %v11074_v34  ;;  %v7815_v62 = vpop.permute.xlu0 %2102 }
 0x68b   : > { %v7748_v7 = vmax.f32 %v11048_v10, %v7638_v4  ;;  %v2345_v9 = vmax.f32 %v11054_v12, %v2243_v11  ;;  %v11060_v3 = vmax.f32 %v11058_v45, %v11059_v42  ;;  %v11062_v4 = vld [vmem:[#allocation189_spill] sm:$0xff]  ;;  %v11070_v11 = vld [vmem:[#allocation191_spill] sm:$0xff]  ;;  %v11076_v46 = vld [vmem:[#allocation194_spill] sm:$0xff]  ;;  %11097 = vst [vmem:[#allocation180_spill] sm:$0xff] %v7815_v62 }
 0x68c   : > { %v11064_v53 = vmax.f32 %v11062_v4, %v11063_v44  ;;  %v7774_v14 = vmax.f32 %v11068_v16, %v2267_v21  ;;  %v11072_v5 = vmax.f32 %v11070_v11, %v11071_v15  ;;  %v11077_v61 = vld [vmem:[#allocation128_spill] sm:$0xff]  ;;  %v11080_v10 = vld [vmem:[#allocation129_spill] sm:$0xff]  ;;  %v11084_v13 = vld [vmem:[#allocation130_spill] sm:$0xff] }
 0x68d   : > { %v7764_v22 = vmax.f32 %v11060_v3, %v2255_v28  ;;  %v2352_v28 = vmax.f32 %v11075_v55, %v2285_v29  ;;  %v11078_v18 = vmax.f32 %v11076_v46, %v11077_v61  ;;  %v11083_v21 = vld [vmem:[#allocation196_spill] sm:$0xff]  ;;  %v11088_v12 = vld [vmem:[#allocation133_spill] sm:$0xff]  ;;  %v7802_v29 = vpop.permute.xlu1 %2478  ;;  %v11091_v40 = vld [vmem:[#allocation198_spill] sm:$0xff] }
 0x68e   : > { %v7769_v39 = vmax.f32 %v11064_v53, %v2261_v6  ;;  %11069 = vst [vmem:[#allocation144_spill] sm:$0xff] %v7774_v14  ;;  %v7779_v17 = vmax.f32 %v11072_v5, %v2273_v58  ;;  %v11079_v6 = vld [vmem:[#allocation195_spill] sm:$0xff]  ;;  %v11085_v51 = vmax.f32 %v11083_v21, %v11084_v13  ;;  %v11087_v58 = vld [vmem:[#allocation197_spill] sm:$0xff]  ;;  %11090 = vst [vmem:[#allocation206_spill] sm:$0xff] %v7802_v29 }
 0x68f   : > { %11061 = vst [vmem:[#allocation143_spill] sm:$0xff] %v7764_v22  ;;  %v2353_v41 = vmax.f32 %v11078_v18, %v2291_v25  ;;  %v11081_v32 = vmax.f32 %v11079_v6, %v11080_v10  ;;  %v11089_v38 = vmax.f32 %v11087_v58, %v11088_v12  ;;  %v11092_v45 = vld [vmem:[#allocation134_spill] sm:$0xff]  ;;  %v11094_v3 = vld [vmem:[#allocation139_spill] sm:$0xff]  ;;  %v11095_v4 = vld [vmem:[#allocation141_spill] sm:$0xff] }
 0x690   : > { %11065 = vst [vmem:[#allocation202_spill] sm:$0xff] %v7769_v39  ;;  %v7795_v48 = vmax.f32 %v11085_v51, %v2303_v27  ;;  %v11093_v25 = vmax.f32 %v11091_v40, %v11092_v45  ;;  %v11096_v27 = vld [vmem:[#allocation151_spill] sm:$0xff]  ;;  %v11099_v16 = vld [vmem:[#allocation153_spill] sm:$0xff]  ;;  %v11100_v15 = vld [vmem:[#allocation154_spill] sm:$0xff] }
 0x691   : > { %v7790_v60 = vmax.f32 %v11081_v32, %v2297_v8  ;;  %v7800_v43 = vmax.f32 %v11089_v38, %v2309_v2  ;;  %v11098_v2 = vld [vmem:[#allocation152_spill] sm:$0xff]  ;;  %v11101_v5 = vld [vmem:[#allocation157_spill] sm:$0xff]  ;;  %v11102_v34 = vld [vmem:[#allocation158_spill] sm:$0xff]  ;;  %v7865_v61 = vpop.permute.xlu1 %2486 }
 0x692   : > { %11086 = vst [vmem:[#allocation179_spill] sm:$0xff] %v7795_v48  ;;  %v7807_v42 = vmax.f32 %v11093_v25, %v2315_v31  ;;  %v2720_v57 = vmax.f32 %v7712_v26, %v11101_v5  ;;  %v2721_v55 = vmax.f32 %v2337_v52, %v11102_v34  ;;  %v11103_v46 = vld [vmem:[#allocation159_spill] sm:$0xff]  ;;  %v11104_v18 = vld [vmem:[#allocation160_spill] sm:$0xff]  ;;  %v11105_v10 = vld [vmem:[#allocation161_spill] sm:$0xff] }
 0x693   : > { %11082 = vst [vmem:[#allocation203_spill] sm:$0xff] %v7790_v60  ;;  %v11107_v51 = vld [vmem:[#allocation165_spill] sm:$0xff]  ;;  %v11108_v12 = vld [vmem:[#allocation166_spill] sm:$0xff]  ;;  %v11109_v40 = vld [vmem:[#allocation168_spill] sm:$0xff] }
 0x694   : > { %v2728_v58 = vmax.f32 %v2344_v37, %v11107_v51  ;;  %v2729_v38 = vmax.f32 %v2345_v9, %v11108_v12  ;;  %v1035_v52 = vld [vmem:[%s9945_s6 + $0xa0] sm:$0xff]  ;;  %v1036_v9 = vld [vmem:[%s9945_s6 + $0xa8] sm:$0xff]  ;;  %11117 = vst [vmem:[#allocation207_spill] sm:$0xff] %v7865_v61  ;;  %v1037_v11 = vld [vmem:[%s9945_s6 + $0xb0] sm:$0xff] }
 0x695   : > { %v11113_v6 = vld [vmem:[#allocation178_spill] sm:$0xff]  ;;  %v1020_v12 = vld [vmem:[%s9945_s6 + $0x28] sm:$0xff]  ;;  %v11118_v53 = vld [vmem:[#allocation176_spill] sm:$0xff] }
 0x696   : > { %v2736_v37 = vmax.f32 %v2352_v28, %v11113_v6  ;;  %v1019_v51 = vld [vmem:[%s9945_s6 + $0x20] sm:$0xff]  ;;  %v7863_v6 = vsel %vm2776_vm10, %v2721_v55, %v2720_v57  ;;  %v7871_v30 = vsel %vm2776_vm10, %v2729_v38, %v2728_v58  ;;  %v11120_v31 = vld [vmem:[#allocation177_spill] sm:$0xff]  ;;  %v11121_v28 = vld [vmem:[#allocation135_spill] sm:$0xff]  ;;  %v7880_v55 = vpop.permute.xlu0 %2482 }
 0x697   : > { %v11114_v25 = vld [vmem:[#allocation142_spill] sm:$0xff]  ;;  %v2134_v44 = vmul.f32 %v7730_v33, %v11120_v31  ;;  %v2517_v57 = vmul.f32 %v7802_v29, %v11121_v28  ;;  %11122 = vst [vmem:[#allocation181_spill] sm:$0xff] %v7880_v55  ;;  %v1038_v8 = vld [vmem:[%s9945_s6 + $0xb8] sm:$0xff]  ;;  %v1021_v58 = vld [vmem:[%s9945_s6 + $0x30] sm:$0xff]  ;;  %v5062_v33 = vpack.c.bf16 %v1036_v9, %v1035_v52  ;;  %v5064_v29 = vpack.c.bf16 %v1020_v12, %v1019_v51 }
 0x698   : > { %v2737_v26 = vmax.f32 %v2353_v41, %v11114_v25  ;;  %v11119_v41 = vrot.slane %v11118_v53, 4  ;;  %v1039_v13 = vld [vmem:[%s9945_s6 + $0xc0] sm:$0xff]  ;;  %v2519_v34 = vmul.f32 %v7865_v61, %v11121_v28  ;;  %v1024_v52 = vld [vmem:[%s9945_s6 + $0x48] sm:$0xff]  ;;  %v2518_v9 = vmul.f32 %v7880_v55, %v11121_v28  ;;  %v1042_v39 = vld [vmem:[%s9945_s6 + $0xd8] sm:$0xff] }
 0x699   : > { %v2316_v32 = vrot.slane %v2134_v44, 4  ;;  %v2694_v14 = vrot.slane %v2517_v57, 4  ;;  %5063 = vmatprep.subr.bf16.mxu0 %v5062_v33  ;;  %v5066_v51 = vpack.c.bf16 %v1038_v8, %v1037_v11  ;;  %v1025_v33 = vld [vmem:[%s9945_s6 + $0x50] sm:$0xff]  ;;  %v1026_v8 = vld [vmem:[%s9945_s6 + $0x58] sm:$0xff] }
 0x69a   : > { %v2689_v25 = vmax.f32 %v11118_v53, %v11119_v41  ;;  %v1022_v53 = vld [vmem:[%s9945_s6 + $0x38] sm:$0xff]  ;;  %v7892_v38 = vsel %vm2776_vm10, %v2737_v26, %v2736_v37  ;;  %v2135_v41 = vmul.f32 %v7815_v62, %v11120_v31  ;;  %v1040_v26 = vld [vmem:[%s9945_s6 + $0xc8] sm:$0xff]  ;;  %v1023_v31 = vld [vmem:[%s9945_s6 + $0x40] sm:$0xff]  ;;  %5065 = vmatpush3.bf16.msra.mxu0 %v5064_v29  ;;  %v2706_v5 = vrot.slane %v2519_v34, 4 }
 0x69b   : > { %11123 = vst [vmem:[#allocation208_spill] sm:$0xff] %v7892_v38  ;;  %v5068_v12 = vpack.c.bf16 %v1022_v53, %v1021_v58  ;;  %v1041_v62 = vld [vmem:[%s9945_s6 + $0xd0] sm:$0xff]  ;;  %v2317_v60 = vmax.f32 %v2134_v44, %v2316_v32  ;;  %v2695_v38 = vmax.f32 %v2517_v57, %v2694_v14  ;;  %v2700_v28 = vrot.slane %v2518_v9, 4  ;;  %5067 = vmatprep.subr.bf16.mxu0 %v5066_v51  ;;  %v1043_v14 = vld [vmem:[%s9945_s6 + $0xe0] sm:$0xff]  ;;  %v1044_v58 = vld [vmem:[%s9945_s6 + $0xe8] sm:$0xff] }
 0x69c   : > { %v2690_v48 = vrot.slane %v2689_v25, 2  ;;  %v2322_v37 = vrot.slane %v2135_v41, 4  ;;  %v5072_v44 = vpack.c.bf16 %v1024_v52, %v1023_v31  ;;  %v2707_v57 = vmax.f32 %v2519_v34, %v2706_v5  ;;  %v7933_v53 = vld [vmem:[%s9945_s6 + $0x60] sm:$0xff]  ;;  %v7943_v5 = vld [vmem:[%s9945_s6 + $0xf0] sm:$0xff]  ;;  %v1046_v45 = vld [vmem:[%s9945_s6 + $0xf8] sm:$0xff] }
 0x69d   : > { %v2318_v32 = vrot.slane %v2317_v60, 2  ;;  %v5074_v31 = vpack.c.bf16 %v1042_v39, %v1041_v62  ;;  %v5076_v52 = vpack.c.bf16 %v1026_v8, %v1025_v33  ;;  %v7953_v39 = vld [vmem:[%s9945_s6 + $0x70] sm:$0xff]  ;;  %v7958_v62 = vld [vmem:[%s9945_s6 + $0x78] sm:$0xff] }
 0x69e   : > { %v2691_v61 = vmax.f32 %v2689_v25, %v2690_v48  ;;  %v2323_v11 = vmax.f32 %v2135_v41, %v2322_v37  ;;  %v5070_v48 = vpack.c.bf16 %v1040_v26, %v1039_v13  ;;  %v2696_v25 = vrot.slane %v2695_v38, 2  ;;  %v7938_v13 = vld [vmem:[%s9945_s6 + $0x68] sm:$0xff]  ;;  %5069 = vmatpush3.bf16.msra.mxu0 %v5068_v12  ;;  %v11126_v12 = vld [vmem:[#allocation145_spill] sm:$0xff] }
 0x69f   : > { %v2701_v26 = vmax.f32 %v2518_v9, %v2700_v28  ;;  %v2319_v37 = vmax.f32 %v2317_v60, %v2318_v32  ;;  %v2708_v55 = vrot.slane %v2707_v57, 2  ;;  %v5078_v60 = vpack.c.bf16 %v1044_v58, %v1043_v14  ;;  %v11124_v14 = vld [vmem:[#allocation205_spill] sm:$0xff]  ;;  %v11125_v58 = vld [vmem:[#allocation146_spill] sm:$0xff] }
 0x6a0   : > { %v2692_v29 = vrot.slane %v2691_v61, 1  ;;  %v2324_v41 = vrot.slane %v2323_v11, 2  ;;  %v2697_v51 = vmax.f32 %v2695_v38, %v2696_v25  ;;  %5071 = vmatprep.subr.bf16.mxu0 %v5070_v48  ;;  %v5080_v38 = vpack.c.bf16 %v7938_v13, %v7933_v53 }
 0x6a1   : > { %v2702_v9 = vrot.slane %v2701_v26, 2  ;;  %v2320_v33 = vrot.slane %v2319_v37, 1  ;;  %v2709_v28 = vmax.f32 %v2707_v57, %v2708_v55  ;;  %v5082_v25 = vpack.c.bf16 %v1046_v45, %v7943_v5  ;;  %v11127_v55 = vld [vmem:[#allocation204_spill] sm:$0xff] }
 0x6a2   : > { %v7945_v34 = vmax.f32 %v2691_v61, %v2692_v29  ;;  %v2325_v61 = vmax.f32 %v2323_v11, %v2324_v41  ;;  %v2698_v8 = vrot.slane %v2697_v51, 1  ;;  %v5084_v22 = vpack.c.bf16 %v7958_v62, %v7953_v39  ;;  %5073 = vmatpush3.bf16.msra.mxu0 %v5072_v44  ;;  %v11131_v44 = vld [vmem:[#allocation199_spill] sm:$0xff] }
 0x6a3   : > { %v2703_v32 = vmax.f32 %v2701_v26, %v2702_v9  ;;  %v2321_v11 = vmax.f32 %v2319_v37, %v2320_v33  ;;  %v2710_v48 = vrot.slane %v2709_v28, 1  ;;  %v1951_v53 = vmax.f32 %v11125_v58, %v11124_v14  ;;  %5075 = vmatprep.subr.bf16.mxu0 %v5074_v31 }
 0x6a4   : > { %v2326_v29 = vrot.slane %v2325_v61, 1  ;;  %v2699_v41 = vmax.f32 %v2697_v51, %v2698_v8  ;;  %v11128_v57 = vmax.f32 %v11126_v12, %v11127_v55  ;;  %v11129_v45 = vmax.f32 %v7671_v50, %v11094_v3  ;;  %v11132_v51 = vld [vmem:[#allocation137_spill] sm:$0xff]  ;;  %v11134_v12 = vld [vmem:[#allocation155_spill] sm:$0xff]  ;;  %v11135_v50 = vld [vmem:[#allocation156_spill] sm:$0xff] }
 0x6a5   : > { %v2704_v21 = vrot.slane %v2703_v32, 1  ;;  %v11130_v5 = vmax.f32 %v7677_v19, %v11095_v4  ;;  %v11133_v39 = vmax.f32 %v11131_v44, %v11132_v51  ;;  %v2711_v31 = vmax.f32 %v2709_v28, %v2710_v48 }
 0x6a6   : > { %v2327_v13 = vmax.f32 %v2325_v61, %v2326_v29  ;;  %v2334_v26 = vmax.f32 %v11128_v57, %v7606_v63  ;;  %v2741_v61 = vmax.f32 %v7807_v42, %v2699_v41  ;;  %v2335_v9 = vmax.f32 %v1951_v53, %v7608_v49  ;;  %5077 = vmatpush3.bf16.msra.mxu0 %v5076_v52  ;;  %v11139_v52 = vld [vmem:[#allocation213_spill] sm:$0xff]  ;;  %v11142_v29 = vld [vmem:[#allocation163_spill] sm:$0xff] }
 0x6a7   : > { %v2777_v37 = vsel %vm2776_vm10, %v11130_v5, %v11129_v45  ;;  %v2358_v62 = vmax.f32 %v11133_v39, %v2321_v11  ;;  %v2705_v33 = vmax.f32 %v2703_v32, %v2704_v21  ;;  %v11136_v19 = vmax.f32 %v7688_v20, %v11096_v27  ;;  %5079 = vmatprep.subr.bf16.mxu0 %v5078_v60  ;;  %v11138_v21 = vld [vmem:[#allocation186_spill] sm:$0xff]  ;;  %v11144_v32 = vld [vmem:[#allocation192_spill] sm:$0xff] }
 0x6a8   : > { %v2718_v63 = vmax.f32 %v2334_v26, %v11134_v12  ;;  %v2719_v3 = vmax.f32 %v2335_v9, %v11135_v50  ;;  %v11137_v42 = vmax.f32 %v7694_v59, %v11098_v2  ;;  %v11140_v8 = vmax.f32 %v11138_v21, %v11139_v52  ;;  %v11145_v11 = vld [vmem:[#allocation214_spill] sm:$0xff]  ;;  %v11156_v26 = vld [vmem:[#allocation143_spill] sm:$0xff]  ;;  %v11159_v5 = vld [vmem:[#allocation200_spill] sm:$0xff] }
 0x6a9   : > { %v2779_v4 = vsel %vm2778_vm11, %v11136_v19, %v2777_v37  ;;  %v11141_v20 = vmax.f32 %v7700_v23, %v11099_v16  ;;  %v2726_v60 = vmax.f32 %v7748_v7, %v11142_v29  ;;  %v11143_v59 = vmax.f32 %v7722_v47, %v11103_v46  ;;  %v11148_v16 = vld [vmem:[#allocation164_spill] sm:$0xff]  ;;  %v11150_v47 = vld [vmem:[#allocation173_spill] sm:$0xff]  ;;  %v11160_v37 = vld [vmem:[#allocation138_spill] sm:$0xff] }
 0x6aa   : > { %v2781_v49 = vsel %vm2780_vm12, %v11137_v42, %v2779_v4  ;;  %v2343_v28 = vmax.f32 %v11140_v8, %v7640_v35  ;;  %v11146_v41 = vmax.f32 %v11144_v32, %v11145_v11  ;;  %v11147_v35 = vmax.f32 %v7706_v24, %v11100_v15  ;;  %5081 = vmatpush3.bf16.msra.mxu0 %v5080_v38  ;;  %v11152_v15 = vld [vmem:[#allocation174_spill] sm:$0xff]  ;;  %v11165_v9 = vld [vmem:[#allocation208_spill] sm:$0xff]  ;;  %v11166_v12 = vld [vmem:[#allocation203_spill] sm:$0xff] }
 0x6ab   : > { %v2783_v27 = vsel %vm2782_vm13, %v11141_v20, %v2781_v49  ;;  %v2791_v2 = vsel %vm2778_vm11, %v11143_v59, %v7863_v6  ;;  %v11149_v7 = vmax.f32 %v7728_v1, %v11104_v18  ;;  %v2734_v46 = vmax.f32 %v7779_v17, %v11150_v47  ;;  %5083 = vmatprep.subr.bf16.mxu0 %v5082_v25  ;;  %v11154_v17 = vld [vmem:[#allocation162_spill] sm:$0xff]  ;;  %v11169_v4 = vld [vmem:[#allocation144_spill] sm:$0xff]  ;;  %v11170_v42 = vld [vmem:[#allocation171_spill] sm:$0xff] }
 0x6ac   : > { %v2351_v48 = vmax.f32 %v11146_v41, %v7658_v54  ;;  %v2785_v23 = vsel %vm2784_vm14, %v11147_v35, %v2783_v27  ;;  %v2727_v14 = vmax.f32 %v2343_v28, %v11148_v16  ;;  %v11151_v54 = vmax.f32 %v7736_v56, %v11105_v10  ;;  %v11157_v56 = vld [vmem:[#allocation169_spill] sm:$0xff]  ;;  %v11172_v52 = vld [vmem:[#allocation179_spill] sm:$0xff]  ;;  %v11173_v8 = vld [vmem:[#allocation216_spill] sm:$0xff] }
 0x6ad   : > { %v2792_v58 = vsel %vm2780_vm12, %v11149_v7, %v2791_v2  ;;  %v2787_v6 = vsel %vm2786_vm15, %v2718_v63, %v2785_v23  ;;  %v11153_v55 = vmax.f32 %v7759_v36, %v11109_v40  ;;  %v11155_v38 = vmax.f32 %v7742_v0, %v11154_v17  ;;  %v11163_v40 = vld [vmem:[#allocation170_spill] sm:$0xff]  ;;  %v11167_v63 = vld [vmem:[#allocation215_spill] sm:$0xff]  ;;  %v11177_v32 = vld [vmem:[#allocation17_spill] sm:$0xff] }
 0x6ae   : > { %v2793_v24 = vsel %vm2782_vm13, %v11151_v54, %v2792_v58  ;;  %v2735_v53 = vmax.f32 %v2351_v48, %v11152_v15  ;;  %v2789_v18 = vsel %vm2788_vm0, %v2719_v3, %v2787_v6  ;;  %v11158_v10 = vmax.f32 %v11156_v26, %v11157_v56  ;;  %5085 = vmatpush3.bf16.msra.mxu0 %v5084_v22  ;;  %v11178_v22 = vld [vmem:[#allocation20_spill] sm:$0xff]  ;;  %v4545_v17 = vld [vmem:[%s9944_s5 + $0x98] sm:$0xff] }
 0x6af   : > { %v2798_v1 = vsel %vm2778_vm11, %v11153_v55, %v7871_v30  ;;  %v2794_v57 = vsel %vm2784_vm14, %v11155_v38, %v2793_v24  ;;  %v11161_v44 = vmax.f32 %v11159_v5, %v11160_v37  ;;  %2883 = vmatprep.mubr.f32.mxu0 %v2789_v18  ;;  %v11162_v30 = vld [vmem:[#allocation202_spill] sm:$0xff]  ;;  %v2742_v0 = vmax.f32 %v2358_v62, %v2705_v33  ;;  %v4543_v55 = vld [vmem:[%s9944_s5 + $0x88] sm:$0xff] }
 0x6b0   : > { %v2799_v45 = vsel %vm2780_vm12, %v11158_v10, %v2798_v1  ;;  %v2795_v36 = vsel %vm2786_vm15, %v2726_v60, %v2794_v57  ;;  %v11164_v25 = vmax.f32 %v11162_v30, %v11163_v40  ;;  %v11168_v50 = vmax.f32 %v11166_v12, %v11167_v63  ;;  %v4544_v1 = vld [vmem:[%s9944_s5 + $0x90] sm:$0xff]  ;;  %v4546_v12 = vld [vmem:[%s9944_s5 + $0xa0] sm:$0xff]  ;;  %v4547_v63 = vld [vmem:[%s9944_s5 + $0xa8] sm:$0xff] }
 0x6b1   : > { %v2359_v51 = vmax.f32 %v11161_v44, %v2327_v13  ;;  %v2796_v19 = vsel %vm2788_vm0, %v2727_v14, %v2795_v36  ;;  %v11171_v13 = vmax.f32 %v11169_v4, %v11170_v42  ;;  %v11174_v28 = vmax.f32 %v11172_v52, %v11173_v8  ;;  %v4550_v42 = vld [vmem:[%s9944_s5 + $0xc0] sm:$0xff]  ;;  %v4553_v52 = vld [vmem:[%s9944_s5 + $0xd8] sm:$0xff] }
 0x6b2   : > { %v2800_v39 = vsel %vm2782_vm13, %v11164_v25, %v2799_v45  ;;  %v2805_v3 = vsel %vm2778_vm11, %v11168_v50, %v11165_v9  ;;  %v11175_v33 = vmax.f32 %v7800_v43, %v7945_v34  ;;  %v11179_v43 = vld [vmem:[#allocation21_spill] sm:$0xff]  ;;  %v5090_v38 = vpack.c.bf16 %v4545_v17, %v4544_v1 }
 0x6b3   : > { %v2801_v49 = vsel %vm2784_vm14, %v11171_v13, %v2800_v39  ;;  %v2743_v21 = vmax.f32 %v2359_v51, %v2711_v31  ;;  %v2806_v20 = vsel %vm2780_vm12, %v11174_v28, %v2805_v3  ;;  %v11176_v31 = vld [vmem:[#allocation16_spill] sm:$0xff]  ;;  %v5094_v50 = vpack.c.bf16 %v4547_v63, %v4546_v12  ;;  %v4551_v13 = vld [vmem:[%s9944_s5 + $0xc8] sm:$0xff]  ;;  %v4554_v28 = vld [vmem:[%s9944_s5 + $0xe0] sm:$0xff] }
 0x6b4   : > { %v2802_v62 = vsel %vm2786_vm15, %v2734_v46, %v2801_v49  ;;  %v2807_v27 = vsel %vm2782_vm13, %v11175_v33, %v2806_v20  ;;  %2884 = vmatmul.mubr.f32.vlgmr.msra.gmra.mrb[12].mxu0 %v11176_v31  ;;  %v4548_v3 = vld [vmem:[%s9944_s5 + $0xb0] sm:$0xff]  ;;  %v5102_v49 = vpack.c.bf16 %v4551_v13, %v4550_v42  ;;  %v4555_v20 = vld [vmem:[%s9944_s5 + $0xe8] sm:$0xff] }
 0x6b5   : > { %v2803_v29 = vsel %vm2788_vm0, %v2735_v53, %v2802_v62  ;;  %v2808_v60 = vsel %vm2784_vm14, %v2741_v61, %v2807_v27  ;;  %2888 = vmatprep.mubr.f32.mxu0 %v2796_v19  ;;  %v4539_v61 = vld [vmem:[%s9947_s8 + $0x7] ss:$0 sm:$0xff]  ;;  %v4549_v19 = vld [vmem:[%s9944_s5 + $0xb8] sm:$0xff]  ;;  %v4556_v62 = vld [vmem:[%s9944_s5 + $0xf0] sm:$0xff]  ;;  %v5110_v33 = vpack.c.bf16 %v4555_v20, %v4554_v28 }
 0x6b6   : > { %v2809_v59 = vsel %vm2786_vm15, %v2742_v0, %v2808_v60  ;;  %v4542_v53 = vld [vmem:[%s9944_s5 + $0x80] sm:$0xff]  ;;  %v5098_v4 = vpack.c.bf16 %v4549_v19, %v4548_v3  ;;  %v4557_v27 = vld [vmem:[%s9944_s5 + $0xf8] sm:$0xff]  ;;  %v11187_v63 = vld [vmem:[#allocation8_spill] sm:$0xff] }
 0x6b7   : > { %v2810_v2 = vsel %vm2788_vm0, %v2743_v21, %v2809_v59  ;;  %v5086_v18 = vpack.c.bf16 %v4543_v55, %v4542_v53  ;;  %v4552_v21 = vld [vmem:[%s9944_s5 + $0xd0] sm:$0xff]  ;;  %v11190_v13 = vld [vmem:[#allocation31_spill] sm:$0xff]  ;;  %v11193_v20 = vld [vmem:[#allocation25_spill] sm:$0xff] }
 0x6b8   : > { %2889 = vmatmul.mubr.f32.gmra.mrb[14].mxu0 %v11177_v32  ;;  %v5106_v8 = vpack.c.bf16 %v4553_v52, %v4552_v21  ;;  %v11188_v3 = vld [vmem:[#allocation12_spill] sm:$0xff]  ;;  %v11191_v21 = vld [vmem:[#allocation37_spill] sm:$0xff] }
 0x6b9   : > { %2893 = vmatprep.mubr.f32.mxu0 %v2803_v29  ;;  %5087 = vmatprep.subr.bf16.mxu1 %v5086_v18  ;;  %v5114_v29 = vpack.c.bf16 %v4557_v27, %v4556_v62 }
 0x6ba   : > { %5089 = vmatpush3.bf16.msra.mxu1 %v5086_v18 }
 0x6bb   : > { %5091 = vmatprep.subr.bf16.mxu1 %v5090_v38 }
 0x6bc   : > { %2894 = vmatmul.mubr.f32.gmra.mrb[16].mxu0 %v11178_v22 }
 0x6bd   : > { %2898 = vmatprep.mubr.f32.mxu0 %v2810_v2 }
 0x6be   : > { %5093 = vmatpush3.bf16.msra.mxu1 %v5090_v38 }
 0x6bf   : > { %5095 = vmatprep.subr.bf16.mxu1 %v5094_v50 }
 0x6c0   : > { %2899 = vmatmul.mubr.f32.gmra.mrb[18].mxu0 %v11179_v43 }
 0x6c2   : > { %5097 = vmatpush3.bf16.msra.mxu1 %v5094_v50 }
 0x6c3   : > { %5099 = vmatprep.subr.bf16.mxu1 %v5098_v4 }
 0x6c6   : > { %5101 = vmatpush3.bf16.msra.mxu1 %v5098_v4  ;;  %v11189_v4 = vld [vmem:[#allocation23_spill] sm:$0xff] }
 0x6c7   : > { %5103 = vmatprep.subr.bf16.mxu1 %v5102_v49 }
 0x6ca   : > { %5105 = vmatpush3.bf16.msra.mxu1 %v5102_v49 }
 0x6cb   : > { %5107 = vmatprep.subr.bf16.mxu1 %v5106_v8 }
 0x6ce   : > { %5109 = vmatpush3.bf16.msra.mxu1 %v5106_v8  ;;  %v11192_v8 = vld [vmem:[#allocation22_spill] sm:$0xff] }
 0x6cf   : > { %5111 = vmatprep.subr.bf16.mxu1 %v5110_v33 }
 0x6d2   : > { %5113 = vmatpush3.bf16.msra.mxu1 %v5110_v33  ;;  %v11194_v33 = vld [vmem:[#allocation30_spill] sm:$0xff] }
 0x6d3   : > { %5115 = vmatprep.subr.bf16.mxu1 %v5114_v29 }
 0x6d6   : > { %5117 = vmatpush3.bf16.msra.mxu1 %v5114_v29  ;;  %v11195_v29 = vld [vmem:[#allocation36_spill] sm:$0xff] }
 0x787   : > { %v4692_v34 = vpop.f32.mrb[12].mxu0 }
 0x788   : > { %v4693_v11 = vpop.f32.mrb[13].mxu0 }
 0x789   : > { %v4694_v41 = vadd.f32 %v4693_v11, %v4692_v34 }
 0x78b   : > { %v2886_v48 = vadd.f32 %v4694_v41, %v4539_v61  ;;  %v4695_v35 = vpop.f32.mrb[14].mxu0 }
 0x78c   : > { %v4696_v23 = vpop.f32.mrb[15].mxu0 }
 0x78d   : > { %v4697_v16 = vadd.f32 %v4696_v23, %v4695_v35  ;;  %2904 = vadd.xlane.f32.xlu0 %v2886_v48  ;;  %v4540_v23 = vld [vmem:[%s9947_s8 + $0x8] ss:$0 sm:$0xff] }
 0x78f   : > { %v2891_v14 = vadd.f32 %v4697_v16, %v4539_v61  ;;  %v4698_v7 = vpop.f32.mrb[16].mxu0 }
 0x790   : > { %v4699_v58 = vpop.f32.mrb[17].mxu0 }
 0x791   : > { %v4700_v47 = vadd.f32 %v4699_v58, %v4698_v7  ;;  %2906 = vadd.xlane.f32.xlu1 %v2891_v14 }
 0x793   : > { %v2896_v46 = vadd.f32 %v4700_v47, %v4539_v61  ;;  %v4701_v6 = vpop.f32.mrb[18].mxu0 }
 0x794   : > { %v4702_v54 = vpop.f32.mrb[19].mxu0 }
 0x795   : > { %v4703_v24 = vadd.f32 %v4702_v54, %v4701_v6  ;;  %2908 = vadd.xlane.f32.xlu0 %v2896_v46 }
 0x797   : > { %v2901_v15 = vadd.f32 %v4703_v24, %v4539_v61 }
 0x799   : > { %2910 = vadd.xlane.f32.xlu0 %v2901_v15 }
 0x81a   : > { %v2905_v57 = vpop.xlane.xlu0 %2904 }
 0x81b   : > { %v2913_v26 = vmul.f32 0.0078125, %v2905_v57 }
 0x81d   : > { %v8095_v56 = vsub.f32 %v2886_v48, %v2913_v26 }
 0x81e   : > { %v2907_v10 = vpop.xlane.xlu1 %2906 }
 0x81f   : > { %v2914_v45 = vmul.f32 0.0078125, %v2907_v10  ;;  %v2921_v5 = vmul.f32 %v8095_v56, %v8095_v56 }
 0x821   : > { %v8099_v37 = vsub.f32 %v2891_v14, %v2914_v45  ;;  %2925 = vadd.xlane.f32.xlu0 %v2921_v5  ;;  %v4541_v14 = vld [vmem:[%s9947_s8 + $0x9] ss:$0 sm:$0xff]  ;;  %v8180_v45 = vld [vmem:[%s9947_s8 + $0xa] ss:$0 sm:$0xff] }
 0x822   : > { %v2909_v44 = vpop.xlane.xlu0 %2908 }
 0x823   : > { %v2915_v51 = vmul.f32 0.0078125, %v2909_v44  ;;  %v2922_v36 = vmul.f32 %v8099_v37, %v8099_v37 }
 0x825   : > { %v8103_v30 = vsub.f32 %v2896_v46, %v2915_v51  ;;  %2927 = vadd.xlane.f32.xlu1 %v2922_v36 }
 0x826   : > { %v2911_v40 = vpop.xlane.xlu0 %2910 }
 0x827   : > { %v2916_v25 = vmul.f32 0.0078125, %v2911_v40  ;;  %v2923_v39 = vmul.f32 %v8103_v30, %v8103_v30  ;;  %v11184_v40 = vld [vmem:[#allocation5_spill] sm:$0xff] }
 0x829   : > { %v8107_v0 = vsub.f32 %v2901_v15, %v2916_v25  ;;  %2929 = vadd.xlane.f32.xlu0 %v2923_v39  ;;  %v11185_v39 = vld [vmem:[#allocation4_spill] sm:$0xff] }
 0x82b   : > { %v2924_v9 = vmul.f32 %v8107_v0, %v8107_v0 }
 0x82d   : > { %2931 = vadd.xlane.f32.xlu1 %v2924_v9  ;;  %v11186_v9 = vld [vmem:[#allocation6_spill] sm:$0xff] }
 0x8ae   : > { %v2926_v60 = vpop.xlane.xlu0 %2925 }
 0x8af   : > { %v2933_v59 = vmul.f32 0.0078125, %v2926_v60 }
 0x8b1   : > { %v2937_v31 = vadd.f32 1e-05, %v2933_v59  ;;  %v11196_v59 = vld [vmem:[#allocation42_spill] sm:$0xff] }
 0x8b2   : > { %v2928_v2 = vpop.xlane.xlu1 %2927 }
 0x8b3   : > { %5222 = vrsqrt.f32 %v2937_v31  ;;  %v2934_v32 = vmul.f32 0.0078125, %v2928_v2  ;;  %v11197_v2 = vld [vmem:[#allocation51_spill] sm:$0xff] }
 0x8b5   : > { %v2938_v22 = vadd.f32 1e-05, %v2934_v32 }
 0x8b6   : > { %v2930_v43 = vpop.xlane.xlu0 %2929 }
 0x8b7   : > { %5224 = vrsqrt.f32 %v2938_v22  ;;  %v2935_v34 = vmul.f32 0.0078125, %v2930_v43  ;;  %v11198_v22 = vld [vmem:[#allocation61_spill] sm:$0xff] }
 0x8b9   : > { %v2939_v61 = vadd.f32 1e-05, %v2935_v34  ;;  %v11199_v34 = vld [vmem:[#allocation66_spill] sm:$0xff] }
 0x8ba   : > { %v2932_v11 = vpop.xlane.xlu1 %2931 }
 0x8bb   : > { %5226 = vrsqrt.f32 %v2939_v61  ;;  %v2936_v41 = vmul.f32 0.0078125, %v2932_v11 }
 0x8bd   : > { %v5223_v48 = vpop.eup %5222  ;;  %v2940_v35 = vadd.f32 1e-05, %v2936_v41  ;;  %v11200_v41 = vld [vmem:[#allocation50_spill] sm:$0xff] }
 0x8be   : > { %v2945_v16 = vmul.f32 %v5223_v48, %v8095_v56 }
 0x8bf   : > { %5228 = vrsqrt.f32 %v2940_v35  ;;  %v11201_v35 = vld [vmem:[#allocation53_spill] sm:$0xff] }
 0x8c0   : > { %v2953_v7 = vmul.f32 %v4540_v23, %v2945_v16  ;;  %v11202_v16 = vld [vmem:[#allocation60_spill] sm:$0xff] }
 0x8c1   : > { %v5225_v58 = vpop.eup %5224 }
 0x8c2   : > { %v2946_v47 = vmul.f32 %v5225_v58, %v8099_v37  ;;  %v8155_v46 = vadd.f32 %v4541_v14, %v2953_v7  ;;  %v11203_v7 = vld [vmem:[#allocation69_spill] sm:$0xff] }
 0x8c4   : > { %11180 = vst [vmem:[#allocation182_spill] sm:$0xff] %v8155_v46  ;;  %v10272_v6 = vmax.f32 %v8155_v46, 0.0  ;;  %v2954_v54 = vmul.f32 %v4540_v23, %v2946_v47  ;;  %v11204_v47 = vld [vmem:[#allocation74_spill] sm:$0xff]  ;;  %v11253_v46 = vld [vmem:[#allocation96_spill] sm:$0xff] }
 0x8c5   : > { %v5227_v24 = vpop.eup %5226 }
 0x8c6   : > { %4930 = vmatprep.mubr.f32.mxu1 %v10272_v6  ;;  %v8160_v15 = vadd.f32 %v4541_v14, %v2954_v54  ;;  %v2947_v53 = vmul.f32 %v5227_v24, %v8103_v30  ;;  %v11205_v24 = vld [vmem:[#allocation83_spill] sm:$0xff] }
 0x8c7   : > { %v11245_v6 = vld [vmem:[#allocation67_spill] sm:$0xff] }
 0x8c8   : > { %11181 = vst [vmem:[#allocation209_spill] sm:$0xff] %v8160_v15  ;;  %v10271_v55 = vmax.f32 %v8160_v15, 0.0  ;;  %v2955_v1 = vmul.f32 %v4540_v23, %v2947_v53  ;;  %v11251_v15 = vld [vmem:[#allocation91_spill] sm:$0xff] }
 0x8c9   : > { %v5229_v18 = vpop.eup %5228 }
 0x8ca   : > { %4931 = vmatmul.mubr.f32.vlgmr.msra.gmra.mrb[8].mxu1 %v10271_v55  ;;  %v8166_v17 = vadd.f32 %v4541_v14, %v2955_v1  ;;  %v2948_v38 = vmul.f32 %v5229_v18, %v8107_v0  ;;  %v11206_v1 = vld [vmem:[#allocation93_spill] sm:$0xff]  ;;  %v11243_v55 = vld [vmem:[#allocation58_spill] sm:$0xff] }
 0x8cc   : > { %11182 = vst [vmem:[#allocation183_spill] sm:$0xff] %v8166_v17  ;;  %v10270_v57 = vmax.f32 %v8166_v17, 0.0  ;;  %v2956_v26 = vmul.f32 %v4540_v23, %v2948_v38  ;;  %v11207_v38 = vld [vmem:[#allocation98_spill] sm:$0xff] }
 0x8cd   : > { %v11249_v17 = vld [vmem:[#allocation78_spill] sm:$0xff] }
 0x8ce   : > { %4933 = vmatprep.mubr.f32.mxu1 %v10270_v57  ;;  %v8172_v56 = vadd.f32 %v4541_v14, %v2956_v26  ;;  %v11241_v57 = vld [vmem:[#allocation48_spill] sm:$0xff] }
 0x8d0   : > { %11183 = vst [vmem:[#allocation210_spill] sm:$0xff] %v8172_v56  ;;  %v10269_v10 = vmax.f32 %v8172_v56, 0.0  ;;  %v11247_v56 = vld [vmem:[#allocation75_spill] sm:$0xff] }
 0x8d2   : > { %4934 = vmatmul.mubr.f32.gmra.mrb[10].mxu1 %v10269_v10  ;;  %v11239_v10 = vld [vmem:[#allocation49_spill] sm:$0xff] }
 0x99d   : > { %v4932_v5 = vpop.f32.mrb[8].mxu1 }
 0x99e   : > { %v3099_v37 = vadd.f32 %v4932_v5, %v8180_v45  ;;  %v3093_v44 = vpop.f32.mrb[9].mxu1  ;;  %v11208_v5 = vld [vmem:[#allocation82_spill] sm:$0xff] }
 0x99f   : > { %v3094_v51 = vadd.f32 %v8180_v45, %v3093_v44  ;;  %v11209_v44 = vld [vmem:[#allocation85_spill] sm:$0xff] }
 0x9a0   : > { %v3113_v36 = vmax.f32 %v3099_v37, 0.0 }
 0x9a1   : > { %v8184_v30 = vmax.f32 %v3094_v51, 0.0 }
 0x9a2   : > { %v8187_v25 = vmul.f32 %v3113_v36, %v11184_v40  ;;  %v8190_v0 = vmul.f32 %v3113_v36, %v11185_v39  ;;  %v8193_v12 = vmul.f32 %v3113_v36, %v11186_v9  ;;  %v8196_v50 = vmul.f32 %v3113_v36, %v11187_v63  ;;  %v11210_v40 = vld [vmem:[#allocation92_spill] sm:$0xff] }
 0x9a3   : > { %v8199_v19 = vmul.f32 %v3113_v36, %v11188_v3  ;;  %v8202_v42 = vmul.f32 %v3113_v36, %v11189_v4  ;;  %v8205_v49 = vmul.f32 %v3113_v36, %v11190_v13  ;;  %v8208_v52 = vmul.f32 %v3113_v36, %v11191_v21  ;;  %v11211_v9 = vld [vmem:[#allocation100_spill] sm:$0xff]  ;;  %v11213_v13 = vld [vmem:[#allocation110_spill] sm:$0xff] }
 0x9a4   : > { %v8211_v28 = vmul.f32 %v3113_v36, %v11192_v8  ;;  %v8214_v62 = vmul.f32 %v3113_v36, %v11193_v20  ;;  %v8217_v27 = vmul.f32 %v3113_v36, %v11194_v33  ;;  %v8220_v60 = vmul.f32 %v3113_v36, %v11195_v29  ;;  %v11212_v3 = vld [vmem:[#allocation108_spill] sm:$0xff]  ;;  %v11214_v8 = vld [vmem:[#allocation123_spill] sm:$0xff] }
 0x9a5   : > { %v8223_v31 = vmul.f32 %v3113_v36, %v11196_v59  ;;  %v8226_v32 = vmul.f32 %v3113_v36, %v11197_v2  ;;  %v8229_v43 = vmul.f32 %v3113_v36, %v11198_v22  ;;  %v8232_v61 = vmul.f32 %v3113_v36, %v11199_v34  ;;  %v8234_v11 = vpop.f32.mrb[10].mxu1  ;;  %v11215_v33 = vld [vmem:[#allocation124_spill] sm:$0xff]  ;;  %v11216_v59 = vld [vmem:[#allocation2_spill] sm:$0xff]  ;;  %v11217_v22 = vld [vmem:[#allocation3_spill] sm:$0xff] }
 0x9a6   : > { %v8237_v48 = vmul.f32 %v3113_v36, %v11200_v41  ;;  %v8240_v23 = vmul.f32 %v3113_v36, %v11201_v35  ;;  %v8243_v14 = vmul.f32 %v3113_v36, %v11202_v16  ;;  %v8246_v58 = vmul.f32 %v3113_v36, %v11203_v7  ;;  %v11218_v41 = vld [vmem:[#allocation7_spill] sm:$0xff]  ;;  %v11219_v16 = vld [vmem:[#allocation9_spill] sm:$0xff] }
 0x9a7   : > { %v8249_v54 = vmul.f32 %v3113_v36, %v11204_v47  ;;  %v8252_v53 = vmul.f32 %v3113_v36, %v11205_v24  ;;  %v8255_v18 = vmul.f32 %v3113_v36, %v11206_v1  ;;  %v8258_v26 = vmul.f32 %v3113_v36, %v11207_v38  ;;  %v11220_v47 = vld [vmem:[#allocation13_spill] sm:$0xff]  ;;  %v11221_v24 = vld [vmem:[#allocation14_spill] sm:$0xff] }
 0x9a8   : > { %v8261_v37 = vmul.f32 %v3113_v36, %v11208_v5  ;;  %v8264_v51 = vmul.f32 %v3113_v36, %v11209_v44  ;;  %v8267_v39 = vmul.f32 %v3113_v36, %v11210_v40  ;;  %v8270_v63 = vmul.f32 %v3113_v36, %v11211_v9  ;;  %v11222_v38 = vld [vmem:[#allocation29_spill] sm:$0xff]  ;;  %v11223_v44 = vld [vmem:[#allocation35_spill] sm:$0xff] }
 0x9a9   : > { %v8273_v4 = vmul.f32 %v3113_v36, %v11212_v3  ;;  %v8276_v21 = vmul.f32 %v3113_v36, %v11213_v13  ;;  %v8279_v20 = vmul.f32 %v3113_v36, %v11214_v8  ;;  %v8282_v29 = vmul.f32 %v3113_v36, %v11215_v33  ;;  %v11224_v9 = vld [vmem:[#allocation19_spill] sm:$0xff]  ;;  %v11225_v13 = vld [vmem:[#allocation18_spill] sm:$0xff]  ;;  %v11227_v33 = vld [vmem:[#allocation28_spill] sm:$0xff] }
 0x9aa   : > { %v8286_v2 = vmul.f32 %v8184_v30, %v11216_v59  ;;  %v8290_v34 = vmul.f32 %v8184_v30, %v11217_v22  ;;  %v8294_v35 = vmul.f32 %v8184_v30, %v11218_v41  ;;  %v8298_v7 = vmul.f32 %v8184_v30, %v11219_v16  ;;  %v11229_v22 = vld [vmem:[#allocation34_spill] sm:$0xff]  ;;  %v11231_v16 = vld [vmem:[#allocation43_spill] sm:$0xff] }
 0x9ab   : > { %v8302_v36 = vmul.f32 %v8184_v30, %v11220_v47  ;;  %v8306_v1 = vmul.f32 %v8184_v30, %v11221_v24  ;;  %v8310_v5 = vmul.f32 %v8184_v30, %v11222_v38  ;;  %v8314_v40 = vmul.f32 %v8184_v30, %v11223_v44  ;;  %v11233_v24 = vld [vmem:[#allocation46_spill] sm:$0xff]  ;;  %v11235_v44 = vld [vmem:[#allocation59_spill] sm:$0xff] }
 0x9ac   : > { %v8318_v3 = vmul.f32 %v8184_v30, %v11224_v9  ;;  %v8322_v8 = vmul.f32 %v8184_v30, %v11225_v13  ;;  %v8326_v59 = vmul.f32 %v8184_v30, %v11227_v33  ;;  %v8330_v41 = vmul.f32 %v8184_v30, %v11229_v22  ;;  %v11237_v13 = vld [vmem:[#allocation64_spill] sm:$0xff] }
 0x9ad   : > { %v8334_v47 = vmul.f32 %v8184_v30, %v11231_v16  ;;  %v8338_v38 = vmul.f32 %v8184_v30, %v11233_v24  ;;  %v8342_v9 = vmul.f32 %v8184_v30, %v11235_v44  ;;  %v8346_v33 = vmul.f32 %v8184_v30, %v11237_v13 }
 0x9ae   : > { %11226 = vst [vmem:[#allocation184_spill] sm:$0xff] %v8322_v8  ;;  %11228 = vst [vmem:[#allocation211_spill] sm:$0xff] %v8326_v59  ;;  %v8350_v22 = vmul.f32 %v8184_v30, %v11239_v10  ;;  %v8354_v16 = vmul.f32 %v8184_v30, %v11241_v57  ;;  %v8358_v24 = vmul.f32 %v8184_v30, %v11243_v55 }
 0x9af   : > { %11230 = vst [vmem:[#allocation185_spill] sm:$0xff] %v8330_v41  ;;  %11232 = vst [vmem:[#allocation212_spill] sm:$0xff] %v8334_v47  ;;  %v8362_v44 = vmul.f32 %v8184_v30, %v11245_v6  ;;  %v8366_v13 = vmul.f32 %v8184_v30, %v11247_v56  ;;  %v8370_v10 = vmul.f32 %v8184_v30, %v11249_v17 }
 0x9b0   : > { %11234 = vst [vmem:[#allocation131_spill] sm:$0xff] %v8338_v38  ;;  %11236 = vst [vmem:[#allocation118_spill] sm:$0xff] %v8342_v9  ;;  %v8374_v57 = vmul.f32 %v8184_v30, %v11251_v15  ;;  %v8378_v55 = vmul.f32 %v8184_v30, %v11253_v46 }
 0x9b1   : > { %11238 = vst [vmem:[#allocation132_spill] sm:$0xff] %v8346_v33  ;;  %11240 = vst [vmem:[#allocation121_spill] sm:$0xff] %v8350_v22 }
 0x9b2   : > { %11242 = vst [vmem:[#allocation187_spill] sm:$0xff] %v8354_v16  ;;  %11244 = vst [vmem:[#allocation147_spill] sm:$0xff] %v8358_v24  ;;  %v11255_v24 = vld [vmem:[#allocation81_spill] sm:$0xff] }
 0x9b3   : > { %11246 = vst [vmem:[#allocation188_spill] sm:$0xff] %v8362_v44  ;;  %11248 = vst [vmem:[#allocation148_spill] sm:$0xff] %v8366_v13  ;;  %v8382_v6 = vmul.f32 %v8184_v30, %v11255_v24  ;;  %v11257_v44 = vld [vmem:[#allocation80_spill] sm:$0xff]  ;;  %v11259_v13 = vld [vmem:[#allocation90_spill] sm:$0xff] }
 0x9b4   : > { %11250 = vst [vmem:[#allocation189_spill] sm:$0xff] %v8370_v10  ;;  %11252 = vst [vmem:[#allocation149_spill] sm:$0xff] %v8374_v57  ;;  %v8386_v56 = vmul.f32 %v8184_v30, %v11257_v44  ;;  %v8390_v17 = vmul.f32 %v8184_v30, %v11259_v13  ;;  %v11261_v10 = vld [vmem:[#allocation99_spill] sm:$0xff]  ;;  %v11263_v57 = vld [vmem:[#allocation105_spill] sm:$0xff] }
 0x9b5   : > { %11254 = vst [vmem:[#allocation190_spill] sm:$0xff] %v8378_v55  ;;  %11256 = vst [vmem:[#allocation150_spill] sm:$0xff] %v8382_v6  ;;  %v8394_v15 = vmul.f32 %v8184_v30, %v11261_v10  ;;  %v8398_v46 = vmul.f32 %v8184_v30, %v11263_v57  ;;  %v11265_v55 = vld [vmem:[#allocation113_spill] sm:$0xff]  ;;  %v11267_v6 = vld [vmem:[#allocation116_spill] sm:$0xff]  ;;  %v11285_v10 = vrot.slane %v8193_v12, 4 }
 0x9b6   : > { %11258 = vst [vmem:[#allocation191_spill] sm:$0xff] %v8386_v56  ;;  %11260 = vst [vmem:[#allocation126_spill] sm:$0xff] %v8390_v17  ;;  %v8402_v24 = vmul.f32 %v8184_v30, %v11265_v55  ;;  %v8406_v44 = vmul.f32 %v8184_v30, %v11267_v6  ;;  %v11269_v56 = vld [vmem:[#allocation140_spill] sm:$0xff]  ;;  %v11287_v55 = vrot.slane %v8199_v19, 4 }
 0x9b7   : > { %11262 = vst [vmem:[#allocation193_spill] sm:$0xff] %v8394_v15  ;;  %11264 = vst [vmem:[#allocation127_spill] sm:$0xff] %v8398_v46  ;;  %v8410_v13 = vmul.f32 %v8184_v30, %v11269_v56  ;;  %v3109_v15 = vadd.f32 %v8234_v11, %v8180_v45  ;;  %v11280_v16 = vmov %v8398_v46  ;;  %v8493_v45 = vmax.f32 %v8193_v12, %v11285_v10 }
 0x9b8   : > { %11266 = vst [vmem:[#allocation194_spill] sm:$0xff] %v8402_v24  ;;  %11268 = vst [vmem:[#allocation128_spill] sm:$0xff] %v8406_v44  ;;  %v11281_v57 = vmov %v8402_v24  ;;  %v11282_v17 = vmov %v8406_v44  ;;  %v11283_v24 = vrot.slane %v8187_v25, 4  ;;  %v11284_v44 = vrot.slane %v8190_v0, 4 }
 0x9b9   : > { %v8453_v56 = vmax.f32 %v3109_v15, 0.0  ;;  %v11286_v11 = vrot.slane %v8196_v50, 4  ;;  %v11290_v10 = vrot.slane %v8208_v52, 4 }
 0x9ba   : > { %v11272_v8 = vld [vmem:[#allocation148_spill] sm:$0xff]  ;;  %v8483_v6 = vmax.f32 %v8187_v25, %v11283_v24  ;;  %v8488_v30 = vmax.f32 %v8190_v0, %v11284_v44  ;;  %v8503_v25 = vmax.f32 %v8199_v19, %v11287_v55  ;;  %v11288_v24 = vrot.slane %v8202_v42, 4 }
 0x9bb   : > { %v11273_v59 = vld [vmem:[#allocation189_spill] sm:$0xff]  ;;  %v8498_v46 = vmax.f32 %v8196_v50, %v11286_v11  ;;  %v11289_v44 = vrot.slane %v8205_v49, 4  ;;  %v8518_v50 = vmax.f32 %v8208_v52, %v11290_v10  ;;  %v11291_v11 = vrot.slane %v8211_v28, 4 }
 0x9bc   : > { %v11274_v41 = vld [vmem:[#allocation149_spill] sm:$0xff]  ;;  %v11275_v47 = vld [vmem:[#allocation190_spill] sm:$0xff]  ;;  %v8508_v0 = vmax.f32 %v8202_v42, %v11288_v24  ;;  %v11292_v55 = vrot.slane %v8214_v62, 4  ;;  %v11293_v24 = vrot.slane %v8217_v27, 4  ;;  %v11295_v10 = vrot.slane %v8223_v31, 4 }
 0x9bd   : > { %v11276_v38 = vld [vmem:[#allocation150_spill] sm:$0xff]  ;;  %v11277_v9 = vld [vmem:[#allocation191_spill] sm:$0xff]  ;;  %v8513_v12 = vmax.f32 %v8205_v49, %v11289_v44  ;;  %v8523_v19 = vmax.f32 %v8211_v28, %v11291_v11  ;;  %v11294_v44 = vrot.slane %v8220_v60, 4  ;;  %v11296_v11 = vrot.slane %v8226_v32, 4 }
 0x9be   : > { %v11278_v33 = vld [vmem:[#allocation126_spill] sm:$0xff]  ;;  %v11279_v22 = vld [vmem:[#allocation193_spill] sm:$0xff]  ;;  %v8528_v42 = vmax.f32 %v8214_v62, %v11292_v55  ;;  %v8533_v49 = vmax.f32 %v8217_v27, %v11293_v24  ;;  %v8543_v28 = vmax.f32 %v8223_v31, %v11295_v10  ;;  %v11297_v55 = vrot.slane %v8229_v43, 4 }
 0x9bf   : > { %v8538_v52 = vmax.f32 %v8220_v60, %v11294_v44  ;;  %v8548_v62 = vmax.f32 %v8226_v32, %v11296_v11  ;;  %v11298_v24 = vrot.slane %v8232_v61, 4  ;;  %v11299_v44 = vrot.slane %v8237_v48, 4 }
 0x9c0   : > { %v8553_v27 = vmax.f32 %v8229_v43, %v11297_v55  ;;  %v11300_v10 = vrot.slane %v8240_v23, 4  ;;  %v11301_v11 = vrot.slane %v8243_v14, 4  ;;  %v11302_v55 = vrot.slane %v8246_v58, 4 }
 0x9c1   : > { %v8558_v60 = vmax.f32 %v8232_v61, %v11298_v24  ;;  %v8563_v31 = vmax.f32 %v8237_v48, %v11299_v44  ;;  %v11304_v24 = vrot.slane %v8249_v54, 4  ;;  %v11306_v44 = vrot.slane %v8252_v53, 4 }
 0x9c2   : > { %v8568_v32 = vmax.f32 %v8240_v23, %v11300_v10  ;;  %v8573_v43 = vmax.f32 %v8243_v14, %v11301_v11  ;;  %v8578_v61 = vmax.f32 %v8246_v58, %v11302_v55  ;;  %v11308_v10 = vrot.slane %v8255_v18, 4 }
 0x9c3   : > { %v8583_v48 = vmax.f32 %v8249_v54, %v11304_v24  ;;  %v8588_v23 = vmax.f32 %v8252_v53, %v11306_v44  ;;  %v11310_v11 = vrot.slane %v8258_v26, 4  ;;  %v11312_v55 = vrot.slane %v8261_v37, 4 }
 0x9c4   : > { %11303 = vst [vmem:[#allocation195_spill] sm:$0xff] %v8578_v61  ;;  %v8593_v14 = vmax.f32 %v8255_v18, %v11308_v10  ;;  %v11314_v24 = vrot.slane %v8264_v51, 4  ;;  %v11316_v44 = vrot.slane %v8267_v39, 4  ;;  %v11318_v10 = vrot.slane %v8270_v63, 4 }
 0x9c5   : > { %11305 = vst [vmem:[#allocation129_spill] sm:$0xff] %v8583_v48  ;;  %11307 = vst [vmem:[#allocation196_spill] sm:$0xff] %v8588_v23  ;;  %v8598_v58 = vmax.f32 %v8258_v26, %v11310_v11  ;;  %v8603_v54 = vmax.f32 %v8261_v37, %v11312_v55  ;;  %v11320_v11 = vrot.slane %v8273_v4, 4  ;;  %v11322_v55 = vrot.slane %v8276_v21, 4 }
 0x9c6   : > { %11309 = vst [vmem:[#allocation130_spill] sm:$0xff] %v8593_v14  ;;  %v8608_v53 = vmax.f32 %v8264_v51, %v11314_v24  ;;  %v8613_v18 = vmax.f32 %v8267_v39, %v11316_v44  ;;  %v8618_v26 = vmax.f32 %v8270_v63, %v11318_v10  ;;  %v11324_v24 = vrot.slane %v8279_v20, 4  ;;  %v11328_v10 = vld [vmem:[#allocation27_spill] sm:$0xff] }
 0x9c7   : > { %11311 = vst [vmem:[#allocation197_spill] sm:$0xff] %v8598_v58  ;;  %11313 = vst [vmem:[#allocation133_spill] sm:$0xff] %v8603_v54  ;;  %v8623_v37 = vmax.f32 %v8273_v4, %v11320_v11  ;;  %v8628_v51 = vmax.f32 %v8276_v21, %v11322_v55  ;;  %v11326_v44 = vrot.slane %v8282_v29, 4  ;;  %v8642_v15 = vmul.f32 %v8453_v56, %v11328_v10  ;;  %v11330_v4 = vld [vmem:[#allocation26_spill] sm:$0xff]  ;;  %v11332_v21 = vld [vmem:[#allocation32_spill] sm:$0xff] }
 0x9c8   : > { %11315 = vst [vmem:[#allocation198_spill] sm:$0xff] %v8608_v53  ;;  %11317 = vst [vmem:[#allocation134_spill] sm:$0xff] %v8613_v18  ;;  %v8633_v39 = vmax.f32 %v8279_v20, %v11324_v24  ;;  %v8646_v11 = vmul.f32 %v8453_v56, %v11330_v4  ;;  %v8650_v55 = vmul.f32 %v8453_v56, %v11332_v21  ;;  %v11336_v24 = vld [vmem:[#allocation47_spill] sm:$0xff] }
 0x9c9   : > { %11319 = vst [vmem:[#allocation139_spill] sm:$0xff] %v8618_v26  ;;  %11321 = vst [vmem:[#allocation141_spill] sm:$0xff] %v8623_v37  ;;  %v8638_v63 = vmax.f32 %v8282_v29, %v11326_v44  ;;  %v8658_v29 = vmul.f32 %v8453_v56, %v11336_v24  ;;  %v11338_v44 = vld [vmem:[#allocation54_spill] sm:$0xff] }
 0x9ca   : > { %11323 = vst [vmem:[#allocation151_spill] sm:$0xff] %v8628_v51  ;;  %11325 = vst [vmem:[#allocation152_spill] sm:$0xff] %v8633_v39  ;;  %v11334_v51 = vld [vmem:[#allocation40_spill] sm:$0xff]  ;;  %v8662_v10 = vmul.f32 %v8453_v56, %v11338_v44 }
 0x9cb   : > { %11327 = vst [vmem:[#allocation153_spill] sm:$0xff] %v8638_v63  ;;  %11329 = vst [vmem:[#allocation154_spill] sm:$0xff] %v8642_v15  ;;  %v8654_v20 = vmul.f32 %v8453_v56, %v11334_v51  ;;  %v11340_v15 = vld [vmem:[#allocation62_spill] sm:$0xff]  ;;  %v8792_v63 = vpop.f32.mrb[11].mxu1 }
 0x9cc   : > { %11331 = vst [vmem:[#allocation157_spill] sm:$0xff] %v8646_v11  ;;  %11333 = vst [vmem:[#allocation158_spill] sm:$0xff] %v8650_v55  ;;  %v8666_v4 = vmul.f32 %v8453_v56, %v11340_v15  ;;  %v11342_v11 = vld [vmem:[#allocation73_spill] sm:$0xff] }
 0x9cd   : > { %11335 = vst [vmem:[#allocation159_spill] sm:$0xff] %v8654_v20  ;;  %11337 = vst [vmem:[#allocation160_spill] sm:$0xff] %v8658_v29  ;;  %v8670_v21 = vmul.f32 %v8453_v56, %v11342_v11  ;;  %v11344_v55 = vld [vmem:[#allocation57_spill] sm:$0xff]  ;;  %v11346_v20 = vld [vmem:[#allocation56_spill] sm:$0xff] }
 0x9ce   : > { %11339 = vst [vmem:[#allocation161_spill] sm:$0xff] %v8662_v10  ;;  %11341 = vst [vmem:[#allocation165_spill] sm:$0xff] %v8666_v4  ;;  %v8674_v51 = vmul.f32 %v8453_v56, %v11344_v55  ;;  %v8678_v24 = vmul.f32 %v8453_v56, %v11346_v20  ;;  %v11348_v29 = vld [vmem:[#allocation65_spill] sm:$0xff]  ;;  %v11350_v10 = vld [vmem:[#allocation72_spill] sm:$0xff] }
 0x9cf   : > { %11343 = vst [vmem:[#allocation166_spill] sm:$0xff] %v8670_v21  ;;  %v8682_v44 = vmul.f32 %v8453_v56, %v11348_v29  ;;  %v8686_v15 = vmul.f32 %v8453_v56, %v11350_v10  ;;  %v11352_v4 = vld [vmem:[#allocation79_spill] sm:$0xff]  ;;  %v11354_v21 = vld [vmem:[#allocation86_spill] sm:$0xff]  ;;  %11400 = vst [vmem:[#allocation169_spill] sm:$0xff] %v8792_v63 }
 0x9d0   : > { %11345 = vst [vmem:[#allocation168_spill] sm:$0xff] %v8674_v51  ;;  %11347 = vst [vmem:[#allocation178_spill] sm:$0xff] %v8678_v24  ;;  %v8690_v11 = vmul.f32 %v8453_v56, %v11352_v4  ;;  %v8694_v55 = vmul.f32 %v8453_v56, %v11354_v21  ;;  %v11356_v51 = vld [vmem:[#allocation94_spill] sm:$0xff]  ;;  %v11358_v24 = vld [vmem:[#allocation104_spill] sm:$0xff] }
 0x9d1   : > { %11349 = vst [vmem:[#allocation142_spill] sm:$0xff] %v8682_v44  ;;  %11351 = vst [vmem:[#allocation176_spill] sm:$0xff] %v8686_v15  ;;  %v8698_v20 = vmul.f32 %v8453_v56, %v11356_v51  ;;  %v8702_v29 = vmul.f32 %v8453_v56, %v11358_v24  ;;  %v11360_v44 = vld [vmem:[#allocation89_spill] sm:$0xff]  ;;  %v11362_v15 = vld [vmem:[#allocation88_spill] sm:$0xff] }
 0x9d2   : > { %11353 = vst [vmem:[#allocation177_spill] sm:$0xff] %v8690_v11  ;;  %11355 = vst [vmem:[#allocation135_spill] sm:$0xff] %v8694_v55  ;;  %v8706_v10 = vmul.f32 %v8453_v56, %v11360_v44  ;;  %v8710_v4 = vmul.f32 %v8453_v56, %v11362_v15  ;;  %v11364_v11 = vld [vmem:[#allocation97_spill] sm:$0xff]  ;;  %v11366_v55 = vld [vmem:[#allocation106_spill] sm:$0xff] }
 0x9d3   : > { %11357 = vst [vmem:[#allocation205_spill] sm:$0xff] %v8698_v20  ;;  %11359 = vst [vmem:[#allocation146_spill] sm:$0xff] %v8702_v29  ;;  %v8714_v21 = vmul.f32 %v8453_v56, %v11364_v11  ;;  %v8718_v51 = vmul.f32 %v8453_v56, %v11366_v55  ;;  %v11368_v20 = vld [vmem:[#allocation109_spill] sm:$0xff] }
 0x9d4   : > { %11361 = vst [vmem:[#allocation145_spill] sm:$0xff] %v8706_v10  ;;  %11363 = vst [vmem:[#allocation204_spill] sm:$0xff] %v8710_v4  ;;  %v8722_v24 = vmul.f32 %v8453_v56, %v11368_v20  ;;  %v11370_v29 = vld [vmem:[#allocation117_spill] sm:$0xff]  ;;  %v11374_v4 = vld [vmem:[#allocation167_spill] sm:$0xff] }
 0x9d5   : > { %11365 = vst [vmem:[#allocation199_spill] sm:$0xff] %v8714_v21  ;;  %11367 = vst [vmem:[#allocation137_spill] sm:$0xff] %v8718_v51  ;;  %v8726_v44 = vmul.f32 %v8453_v56, %v11370_v29  ;;  %v11372_v10 = vld [vmem:[#allocation125_spill] sm:$0xff]  ;;  %v8734_v11 = vmul.f32 %v8453_v56, %v11374_v4  ;;  %v11376_v21 = vld [vmem:[#allocation114_spill] sm:$0xff] }
 0x9d6   : > { %11369 = vst [vmem:[#allocation155_spill] sm:$0xff] %v8722_v24  ;;  %v8730_v15 = vmul.f32 %v8453_v56, %v11372_v10  ;;  %v8738_v55 = vmul.f32 %v8453_v56, %v11376_v21  ;;  %v11378_v51 = vld [vmem:[#allocation120_spill] sm:$0xff]  ;;  %v11380_v24 = vld [vmem:[#allocation122_spill] sm:$0xff] }
 0x9d7   : > { %11371 = vst [vmem:[#allocation156_spill] sm:$0xff] %v8726_v44  ;;  %11375 = vst [vmem:[#allocation213_spill] sm:$0xff] %v8734_v11  ;;  %v8742_v20 = vmul.f32 %v8453_v56, %v11378_v51  ;;  %v8746_v29 = vmul.f32 %v8453_v56, %v11380_v24  ;;  %v11382_v44 = vld [vmem:[#allocation172_spill] sm:$0xff]  ;;  %v11386_v11 = vld [vmem:[#allocation206_spill] sm:$0xff] }
 0x9d8   : > { %11373 = vst [vmem:[#allocation186_spill] sm:$0xff] %v8730_v15  ;;  %11377 = vst [vmem:[#allocation163_spill] sm:$0xff] %v8738_v55  ;;  %v8750_v10 = vmul.f32 %v8453_v56, %v11382_v44  ;;  %v11384_v15 = vld [vmem:[#allocation175_spill] sm:$0xff]  ;;  %v8758_v21 = vmul.f32 %v8453_v56, %v11386_v11  ;;  %v11388_v55 = vld [vmem:[#allocation181_spill] sm:$0xff] }
 0x9d9   : > { %11379 = vst [vmem:[#allocation192_spill] sm:$0xff] %v8742_v20  ;;  %11381 = vst [vmem:[#allocation214_spill] sm:$0xff] %v8746_v29  ;;  %v8754_v4 = vmul.f32 %v8453_v56, %v11384_v15  ;;  %v8762_v51 = vmul.f32 %v8453_v56, %v11388_v55  ;;  %v11390_v20 = vld [vmem:[#allocation207_spill] sm:$0xff]  ;;  %v11392_v29 = vrot.slane %v8286_v2, 4 }
 0x9da   : > { %11383 = vst [vmem:[#allocation164_spill] sm:$0xff] %v8750_v10  ;;  %11387 = vst [vmem:[#allocation174_spill] sm:$0xff] %v8758_v21  ;;  %v8766_v24 = vmul.f32 %v8453_v56, %v11390_v20  ;;  %v11393_v10 = vrot.slane %v8290_v34, 4  ;;  %v11395_v21 = vrot.slane %v8298_v7, 4  ;;  %v11397_v20 = vrot.slane %v8306_v1, 4 }
 0x9db   : > { %11385 = vst [vmem:[#allocation173_spill] sm:$0xff] %v8754_v4  ;;  %11389 = vst [vmem:[#allocation162_spill] sm:$0xff] %v8762_v51  ;;  %v3149_v44 = vmax.f32 %v8286_v2, %v11392_v29  ;;  %v11394_v4 = vrot.slane %v8294_v35, 4  ;;  %v11396_v51 = vrot.slane %v8302_v36, 4 }
 0x9dc   : > { %11391 = vst [vmem:[#allocation143_spill] sm:$0xff] %v8766_v24  ;;  %v3155_v15 = vmax.f32 %v8290_v34, %v11393_v10  ;;  %v3167_v55 = vmax.f32 %v8298_v7, %v11395_v21  ;;  %v3179_v2 = vmax.f32 %v8306_v1, %v11397_v20  ;;  %v11398_v34 = vrot.slane %v8310_v5, 4 }
 0x9dd   : > { %v3161_v11 = vmax.f32 %v8294_v35, %v11394_v4  ;;  %v3173_v56 = vmax.f32 %v8302_v36, %v11396_v51  ;;  %v3150_v29 = vrot.slane %v3149_v44, 2  ;;  %v11399_v35 = vrot.slane %v8314_v40, 4 }
 0x9de   : > { %v3156_v24 = vrot.slane %v3155_v15, 2  ;;  %v3185_v10 = vmax.f32 %v8310_v5, %v11398_v34  ;;  %v3168_v21 = vrot.slane %v3167_v55, 2  ;;  %v3180_v36 = vrot.slane %v3179_v2, 2 }
 0x9df   : > { %v3191_v4 = vmax.f32 %v8314_v40, %v11399_v35  ;;  %v3162_v7 = vrot.slane %v3161_v11, 2  ;;  %v3174_v39 = vrot.slane %v3173_v56, 2  ;;  %v3151_v51 = vmax.f32 %v3149_v44, %v3150_v29 }
 0x9e0   : > { %v3157_v37 = vmax.f32 %v3155_v15, %v3156_v24  ;;  %v3186_v26 = vrot.slane %v3185_v10, 2  ;;  %v3169_v18 = vmax.f32 %v3167_v55, %v3168_v21  ;;  %v3181_v54 = vmax.f32 %v3179_v2, %v3180_v36  ;;  %v11418_v36 = vld [vmem:[#allocation131_spill] sm:$0xff] }
 0x9e1   : > { %v3192_v1 = vrot.slane %v3191_v4, 2  ;;  %v3163_v20 = vmax.f32 %v3161_v11, %v3162_v7  ;;  %v3175_v53 = vmax.f32 %v3173_v56, %v3174_v39  ;;  %v3152_v58 = vrot.slane %v3151_v51, 1 }
 0x9e2   : > { %v3158_v5 = vrot.slane %v3157_v37, 1  ;;  %v3187_v34 = vmax.f32 %v3185_v10, %v3186_v26  ;;  %v3170_v40 = vrot.slane %v3169_v18, 1  ;;  %v3182_v63 = vrot.slane %v3181_v54, 1 }
 0x9e3   : > { %v3193_v14 = vmax.f32 %v3191_v4, %v3192_v1  ;;  %v3164_v23 = vrot.slane %v3163_v20, 1  ;;  %v3176_v35 = vrot.slane %v3175_v53, 1  ;;  %v8794_v48 = vmax.f32 %v3151_v51, %v3152_v58 }
 0x9e4   : > { %v8796_v61 = vmax.f32 %v3157_v37, %v3158_v5  ;;  %v3188_v44 = vrot.slane %v3187_v34, 1  ;;  %v8800_v11 = vmax.f32 %v3169_v18, %v3170_v40  ;;  %v8804_v55 = vmax.f32 %v3181_v54, %v3182_v63  ;;  %v11410_v37 = vld [vmem:[#allocation184_spill] sm:$0xff]  ;;  %v11420_v5 = vld [vmem:[#allocation118_spill] sm:$0xff] }
 0x9e5   : > { %11401 = vst [vmem:[#allocation200_spill] sm:$0xff] %v8794_v48  ;;  %v3194_v24 = vrot.slane %v3193_v14, 1  ;;  %v8798_v15 = vmax.f32 %v3163_v20, %v3164_v23  ;;  %v8802_v39 = vmax.f32 %v3175_v53, %v3176_v35  ;;  %v11409_v2 = vrot.slane %v8318_v3, 4  ;;  %v11412_v23 = vld [vmem:[#allocation211_spill] sm:$0xff]  ;;  %v11414_v53 = vld [vmem:[#allocation185_spill] sm:$0xff]  ;;  %v11416_v63 = vld [vmem:[#allocation212_spill] sm:$0xff] }
 0x9e6   : > { %11402 = vst [vmem:[#allocation138_spill] sm:$0xff] %v8796_v61  ;;  %11404 = vst [vmem:[#allocation170_spill] sm:$0xff] %v8800_v11  ;;  %v8806_v26 = vmax.f32 %v3187_v34, %v3188_v44  ;;  %v11411_v29 = vrot.slane %v11410_v37, 4  ;;  %v11413_v4 = vrot.slane %v11412_v23, 4  ;;  %v11415_v7 = vrot.slane %v11414_v53, 4  ;;  %v11422_v35 = vld [vmem:[#allocation132_spill] sm:$0xff] }
 0x9e7   : > { %11403 = vst [vmem:[#allocation202_spill] sm:$0xff] %v8798_v15  ;;  %11405 = vst [vmem:[#allocation208_spill] sm:$0xff] %v8802_v39  ;;  %v8808_v56 = vmax.f32 %v3193_v14, %v3194_v24  ;;  %v3197_v58 = vmax.f32 %v8318_v3, %v11409_v2  ;;  %v11417_v21 = vrot.slane %v11416_v63, 4  ;;  %v11419_v51 = vrot.slane %v11418_v36, 4 }
 0x9e8   : > { %11406 = vst [vmem:[#allocation203_spill] sm:$0xff] %v8804_v55  ;;  %11407 = vst [vmem:[#allocation215_spill] sm:$0xff] %v8806_v26  ;;  %v3203_v10 = vmax.f32 %v11410_v37, %v11411_v29  ;;  %v3209_v18 = vmax.f32 %v11412_v23, %v11413_v4  ;;  %v3215_v54 = vmax.f32 %v11414_v53, %v11415_v7  ;;  %v11421_v34 = vrot.slane %v11420_v5, 4 }
 0x9e9   : > { %11408 = vst [vmem:[#allocation144_spill] sm:$0xff] %v8808_v56  ;;  %v3221_v14 = vmax.f32 %v11416_v63, %v11417_v21  ;;  %v3227_v3 = vmax.f32 %v11418_v36, %v11419_v51  ;;  %v3198_v1 = vrot.slane %v3197_v58, 2  ;;  %v11423_v44 = vrot.slane %v11422_v35, 4 }
 0x9ea   : > { %v3204_v20 = vrot.slane %v3203_v10, 2  ;;  %v3233_v40 = vmax.f32 %v11420_v5, %v11421_v34  ;;  %v3210_v2 = vrot.slane %v3209_v18, 2  ;;  %v3216_v37 = vrot.slane %v3215_v54, 2 }
 0x9eb   : > { %v3239_v24 = vmax.f32 %v11422_v35, %v11423_v44  ;;  %v3222_v29 = vrot.slane %v3221_v14, 2  ;;  %v3228_v23 = vrot.slane %v3227_v3, 2  ;;  %v3199_v4 = vmax.f32 %v3197_v58, %v3198_v1 }
 0x9ec   : > { %v3205_v53 = vmax.f32 %v3203_v10, %v3204_v20  ;;  %v3234_v7 = vrot.slane %v3233_v40, 2  ;;  %v3211_v21 = vmax.f32 %v3209_v18, %v3210_v2  ;;  %v3217_v36 = vmax.f32 %v3215_v54, %v3216_v37 }
 0x9ed   : > { %v3240_v63 = vrot.slane %v3239_v24, 2  ;;  %v3223_v51 = vmax.f32 %v3221_v14, %v3222_v29  ;;  %v3229_v56 = vmax.f32 %v3227_v3, %v3228_v23  ;;  %v3200_v26 = vrot.slane %v3199_v4, 1  ;;  %v11436_v29 = vld [vmem:[#allocation147_spill] sm:$0xff] }
 0x9ee   : > { %v3206_v55 = vrot.slane %v3205_v53, 1  ;;  %v3235_v39 = vmax.f32 %v3233_v40, %v3234_v7  ;;  %v3212_v34 = vrot.slane %v3211_v21, 1  ;;  %v3218_v11 = vrot.slane %v3217_v36, 1  ;;  %v11432_v40 = vld [vmem:[#allocation121_spill] sm:$0xff] }
 0x9ef   : > { %v3241_v5 = vmax.f32 %v3239_v24, %v3240_v63  ;;  %v3224_v15 = vrot.slane %v3223_v51, 1  ;;  %v3230_v35 = vrot.slane %v3229_v56, 1  ;;  %v8834_v44 = vmax.f32 %v3199_v4, %v3200_v26 }
 0x9f0   : > { %v8836_v61 = vmax.f32 %v3205_v53, %v3206_v55  ;;  %v3236_v58 = vrot.slane %v3235_v39, 1  ;;  %v8838_v1 = vmax.f32 %v3211_v21, %v3212_v34  ;;  %v8840_v18 = vmax.f32 %v3217_v36, %v3218_v11  ;;  %v11434_v55 = vld [vmem:[#allocation187_spill] sm:$0xff] }
 0x9f1   : > { %11424 = vst [vmem:[#allocation171_spill] sm:$0xff] %v8834_v44  ;;  %v3242_v10 = vrot.slane %v3241_v5, 1  ;;  %v8842_v54 = vmax.f32 %v3223_v51, %v3224_v15  ;;  %v8844_v14 = vmax.f32 %v3229_v56, %v3230_v35  ;;  %v11433_v24 = vrot.slane %v11432_v40, 4  ;;  %v11438_v15 = vld [vmem:[#allocation188_spill] sm:$0xff] }
 0x9f2   : > { %11425 = vst [vmem:[#allocation179_spill] sm:$0xff] %v8836_v61  ;;  %11426 = vst [vmem:[#allocation216_spill] sm:$0xff] %v8838_v1  ;;  %v8846_v3 = vmax.f32 %v3235_v39, %v3236_v58  ;;  %v11435_v2 = vrot.slane %v11434_v55, 4  ;;  %v11437_v23 = vrot.slane %v11436_v29, 4  ;;  %v11439_v4 = vrot.slane %v11438_v15, 4 }
 0x9f3   : > { %11427 = vst [vmem:[#allocation16_spill] sm:$0xff] %v8840_v18  ;;  %11428 = vst [vmem:[#allocation17_spill] sm:$0xff] %v8842_v54  ;;  %v8848_v20 = vmax.f32 %v3241_v5, %v3242_v10  ;;  %v3245_v26 = vmax.f32 %v11432_v40, %v11433_v24  ;;  %v11440_v39 = vrot.slane %v11272_v8, 4  ;;  %v11441_v7 = vrot.slane %v11273_v59, 4 }
 0x9f4   : > { %11429 = vst [vmem:[#allocation20_spill] sm:$0xff] %v8844_v14  ;;  %11430 = vst [vmem:[#allocation21_spill] sm:$0xff] %v8846_v3  ;;  %v3251_v37 = vmax.f32 %v11434_v55, %v11435_v2  ;;  %v3257_v11 = vmax.f32 %v11436_v29, %v11437_v23  ;;  %v3263_v56 = vmax.f32 %v11438_v15, %v11439_v4  ;;  %v11442_v51 = vrot.slane %v11274_v41, 4 }
 0x9f5   : > { %11431 = vst [vmem:[#allocation5_spill] sm:$0xff] %v8848_v20  ;;  %v3269_v53 = vmax.f32 %v11272_v8, %v11440_v39  ;;  %v3275_v63 = vmax.f32 %v11273_v59, %v11441_v7  ;;  %v3246_v21 = vrot.slane %v3245_v26, 2  ;;  %v11443_v34 = vrot.slane %v11275_v47, 4 }
 0x9f6   : > { %v3252_v36 = vrot.slane %v3251_v37, 2  ;;  %v3281_v5 = vmax.f32 %v11274_v41, %v11442_v51  ;;  %v3258_v58 = vrot.slane %v3257_v11, 2  ;;  %v3264_v10 = vrot.slane %v3263_v56, 2 }
 0x9f7   : > { %v3287_v35 = vmax.f32 %v11275_v47, %v11443_v34  ;;  %v3270_v40 = vrot.slane %v3269_v53, 2  ;;  %v3276_v24 = vrot.slane %v3275_v63, 2  ;;  %v3247_v55 = vmax.f32 %v3245_v26, %v3246_v21 }
 0x9f8   : > { %v3253_v8 = vmax.f32 %v3251_v37, %v3252_v36  ;;  %v3282_v2 = vrot.slane %v3281_v5, 2  ;;  %v3259_v23 = vmax.f32 %v3257_v11, %v3258_v58  ;;  %v3265_v59 = vmax.f32 %v3263_v56, %v3264_v10 }
 0x9f9   : > { %v3288_v29 = vrot.slane %v3287_v35, 2  ;;  %v3271_v15 = vmax.f32 %v3269_v53, %v3270_v40  ;;  %v3277_v4 = vmax.f32 %v3275_v63, %v3276_v24  ;;  %v3248_v39 = vrot.slane %v3247_v55, 1 }
 0x9fa   : > { %v3254_v7 = vrot.slane %v3253_v8, 1  ;;  %v3283_v20 = vmax.f32 %v3281_v5, %v3282_v2  ;;  %v3260_v51 = vrot.slane %v3259_v23, 1  ;;  %v3266_v3 = vrot.slane %v3265_v59, 1 }
 0x9fb   : > { %v3289_v41 = vmax.f32 %v3287_v35, %v3288_v29  ;;  %v3272_v14 = vrot.slane %v3271_v15, 1  ;;  %v3278_v47 = vrot.slane %v3277_v4, 1  ;;  %v8874_v34 = vmax.f32 %v3247_v55, %v3248_v39 }
 0x9fc   : > { %v8876_v54 = vmax.f32 %v3253_v8, %v3254_v7  ;;  %v3284_v26 = vrot.slane %v3283_v20, 1  ;;  %v8878_v21 = vmax.f32 %v3259_v23, %v3260_v51  ;;  %v8880_v11 = vmax.f32 %v3265_v59, %v3266_v3 }
 0x9fd   : > { %11444 = vst [vmem:[#allocation4_spill] sm:$0xff] %v8874_v34  ;;  %v3290_v37 = vrot.slane %v3289_v41, 1  ;;  %v8882_v56 = vmax.f32 %v3271_v15, %v3272_v14  ;;  %v8884_v53 = vmax.f32 %v3277_v4, %v3278_v47  ;;  %v11452_v5 = vrot.slane %v11276_v38, 4  ;;  %v9319_v34 = vld [vmem:[%s9945_s6 + $0x140] sm:$0xff] }
 0x9fe   : > { %11445 = vst [vmem:[#allocation6_spill] sm:$0xff] %v8876_v54  ;;  %11446 = vst [vmem:[#allocation8_spill] sm:$0xff] %v8878_v21  ;;  %v8886_v63 = vmax.f32 %v3283_v20, %v3284_v26  ;;  %v11453_v58 = vrot.slane %v11277_v9, 4  ;;  %v11454_v40 = vrot.slane %v11278_v33, 4  ;;  %v11455_v14 = vrot.slane %v11279_v22, 4 }
 0x9ff   : > { %11447 = vst [vmem:[#allocation12_spill] sm:$0xff] %v8880_v11  ;;  %11448 = vst [vmem:[#allocation23_spill] sm:$0xff] %v8882_v56  ;;  %v8888_v36 = vmax.f32 %v3289_v41, %v3290_v37  ;;  %v3293_v35 = vmax.f32 %v11276_v38, %v11452_v5  ;;  %v11456_v20 = vrot.slane %v11280_v16, 4  ;;  %v11457_v8 = vrot.slane %v11281_v57, 4 }
 0xa00   : > { %11449 = vst [vmem:[#allocation31_spill] sm:$0xff] %v8884_v53  ;;  %11450 = vst [vmem:[#allocation37_spill] sm:$0xff] %v8886_v63  ;;  %v3299_v10 = vmax.f32 %v11277_v9, %v11453_v58  ;;  %v3305_v3 = vmax.f32 %v11278_v33, %v11454_v40  ;;  %v3311_v24 = vmax.f32 %v11279_v22, %v11455_v14  ;;  %v11458_v9 = vrot.slane %v11282_v17, 4 }
 0xa01   : > { %11451 = vst [vmem:[#allocation22_spill] sm:$0xff] %v8888_v36  ;;  %v3317_v55 = vmax.f32 %v11280_v16, %v11456_v20  ;;  %v3323_v38 = vmax.f32 %v11281_v57, %v11457_v8  ;;  %v3294_v2 = vrot.slane %v3293_v35, 2  ;;  %v11459_v33 = vrot.slane %v8410_v13, 4 }
 0xa02   : > { %v3300_v29 = vrot.slane %v3299_v10, 2  ;;  %v3329_v23 = vmax.f32 %v11282_v17, %v11458_v9  ;;  %v3306_v15 = vrot.slane %v3305_v3, 2  ;;  %v3312_v22 = vrot.slane %v3311_v24, 2 }
 0xa03   : > { %v3335_v59 = vmax.f32 %v8410_v13, %v11459_v33  ;;  %v3318_v4 = vrot.slane %v3317_v55, 2  ;;  %v3324_v39 = vrot.slane %v3323_v38, 2  ;;  %v3295_v7 = vmax.f32 %v3293_v35, %v3294_v2 }
 0xa04   : > { %v3301_v16 = vmax.f32 %v3299_v10, %v3300_v29  ;;  %v3330_v41 = vrot.slane %v3329_v23, 2  ;;  %v3307_v47 = vmax.f32 %v3305_v3, %v3306_v15  ;;  %v3313_v57 = vmax.f32 %v3311_v24, %v3312_v22 }
 0xa05   : > { %v3336_v51 = vrot.slane %v3335_v59, 2  ;;  %v3319_v26 = vmax.f32 %v3317_v55, %v3318_v4  ;;  %v3325_v37 = vmax.f32 %v3323_v38, %v3324_v39  ;;  %v3296_v5 = vrot.slane %v3295_v7, 1 }
 0xa06   : > { %v3302_v58 = vrot.slane %v3301_v16, 1  ;;  %v3331_v40 = vmax.f32 %v3329_v23, %v3330_v41  ;;  %v3308_v14 = vrot.slane %v3307_v47, 1  ;;  %v3314_v20 = vrot.slane %v3313_v57, 1 }
 0xa07   : > { %v3337_v17 = vmax.f32 %v3335_v59, %v3336_v51  ;;  %v3320_v8 = vrot.slane %v3319_v26, 1  ;;  %v3326_v13 = vrot.slane %v3325_v37, 1  ;;  %v8914_v9 = vmax.f32 %v3295_v7, %v3296_v5 }
 0xa08   : > { %v8916_v33 = vmax.f32 %v3301_v16, %v3302_v58  ;;  %v3332_v35 = vrot.slane %v3331_v40, 1  ;;  %v8918_v2 = vmax.f32 %v3307_v47, %v3308_v14  ;;  %v8920_v3 = vmax.f32 %v3313_v57, %v3314_v20 }
 0xa09   : > { %11460 = vst [vmem:[#allocation25_spill] sm:$0xff] %v8914_v9  ;;  %v3338_v10 = vrot.slane %v3337_v17, 1  ;;  %v8922_v24 = vmax.f32 %v3319_v26, %v3320_v8  ;;  %v8924_v55 = vmax.f32 %v3325_v37, %v3326_v13  ;;  %v3374_v23 = vrot.slane %v8483_v6, 2 }
 0xa0a   : > { %11461 = vst [vmem:[#allocation30_spill] sm:$0xff] %v8916_v33  ;;  %11462 = vst [vmem:[#allocation36_spill] sm:$0xff] %v8918_v2  ;;  %v8926_v38 = vmax.f32 %v3331_v40, %v3332_v35  ;;  %v3380_v59 = vrot.slane %v8488_v30, 2  ;;  %v3386_v15 = vrot.slane %v8493_v45, 2  ;;  %v3392_v22 = vrot.slane %v8498_v46, 2 }
 0xa0b   : > { %11463 = vst [vmem:[#allocation42_spill] sm:$0xff] %v8920_v3  ;;  %11464 = vst [vmem:[#allocation51_spill] sm:$0xff] %v8922_v24  ;;  %v8928_v29 = vmax.f32 %v3337_v17, %v3338_v10  ;;  %v3398_v4 = vrot.slane %v8503_v25, 2  ;;  %v3404_v39 = vrot.slane %v8508_v0, 2  ;;  %v3375_v7 = vmax.f32 %v8483_v6, %v3374_v23 }
 0xa0c   : > { %11465 = vst [vmem:[#allocation61_spill] sm:$0xff] %v8924_v55  ;;  %11466 = vst [vmem:[#allocation66_spill] sm:$0xff] %v8926_v38  ;;  %v3381_v16 = vmax.f32 %v8488_v30, %v3380_v59  ;;  %v3410_v41 = vrot.slane %v8513_v12, 2  ;;  %v3416_v51 = vrot.slane %v8518_v50, 2  ;;  %v3387_v47 = vmax.f32 %v8493_v45, %v3386_v15 }
 0xa0d   : > { %11467 = vst [vmem:[#allocation50_spill] sm:$0xff] %v8928_v29  ;;  %v3393_v57 = vmax.f32 %v8498_v46, %v3392_v22  ;;  %v3399_v26 = vmax.f32 %v8503_v25, %v3398_v4  ;;  %v3405_v37 = vmax.f32 %v8508_v0, %v3404_v39  ;;  %v3376_v5 = vrot.slane %v3375_v7, 1 }
 0xa0e   : > { %v3382_v58 = vrot.slane %v3381_v16, 1  ;;  %v3411_v40 = vmax.f32 %v8513_v12, %v3410_v41  ;;  %v3417_v6 = vmax.f32 %v8518_v50, %v3416_v51  ;;  %v3388_v17 = vrot.slane %v3387_v47, 1 }
 0xa0f   : > { %v3394_v30 = vrot.slane %v3393_v57, 1  ;;  %v3400_v14 = vrot.slane %v3399_v26, 1  ;;  %v3406_v20 = vrot.slane %v3405_v37, 1  ;;  %v8946_v8 = vmax.f32 %v3375_v7, %v3376_v5 }
 0xa10   : > { %v8948_v13 = vmax.f32 %v3381_v16, %v3382_v58  ;;  %v3412_v45 = vrot.slane %v3411_v40, 1  ;;  %v3418_v46 = vrot.slane %v3417_v6, 1  ;;  %v8950_v35 = vmax.f32 %v3387_v47, %v3388_v17 }
 0xa11   : > { %11468 = vst [vmem:[#allocation53_spill] sm:$0xff] %v8946_v8  ;;  %v8952_v25 = vmax.f32 %v3393_v57, %v3394_v30  ;;  %v8954_v0 = vmax.f32 %v3399_v26, %v3400_v14  ;;  %v8956_v10 = vmax.f32 %v3405_v37, %v3406_v20  ;;  %v3422_v23 = vrot.slane %v8523_v19, 2 }
 0xa12   : > { %11469 = vst [vmem:[#allocation60_spill] sm:$0xff] %v8948_v13  ;;  %11470 = vst [vmem:[#allocation69_spill] sm:$0xff] %v8950_v35  ;;  %v8958_v12 = vmax.f32 %v3411_v40, %v3412_v45  ;;  %v8960_v50 = vmax.f32 %v3417_v6, %v3418_v46  ;;  %v3428_v59 = vrot.slane %v8528_v42, 2  ;;  %v3434_v15 = vrot.slane %v8533_v49, 2 }
 0xa13   : > { %11471 = vst [vmem:[#allocation74_spill] sm:$0xff] %v8952_v25  ;;  %11472 = vst [vmem:[#allocation83_spill] sm:$0xff] %v8954_v0  ;;  %v3440_v22 = vrot.slane %v8538_v52, 2  ;;  %v3446_v4 = vrot.slane %v8543_v28, 2  ;;  %v3452_v39 = vrot.slane %v8548_v62, 2  ;;  %v3423_v7 = vmax.f32 %v8523_v19, %v3422_v23 }
 0xa14   : > { %11473 = vst [vmem:[#allocation93_spill] sm:$0xff] %v8956_v10  ;;  %11474 = vst [vmem:[#allocation98_spill] sm:$0xff] %v8958_v12  ;;  %v3429_v16 = vmax.f32 %v8528_v42, %v3428_v59  ;;  %v3458_v41 = vrot.slane %v8553_v27, 2  ;;  %v3464_v51 = vrot.slane %v8558_v60, 2  ;;  %v3435_v47 = vmax.f32 %v8533_v49, %v3434_v15 }
 0xa15   : > { %11475 = vst [vmem:[#allocation82_spill] sm:$0xff] %v8960_v50  ;;  %v3441_v57 = vmax.f32 %v8538_v52, %v3440_v22  ;;  %v3447_v26 = vmax.f32 %v8543_v28, %v3446_v4  ;;  %v3453_v37 = vmax.f32 %v8548_v62, %v3452_v39  ;;  %v3424_v5 = vrot.slane %v3423_v7, 1  ;;  %v11484_v22 = vld [vmem:[#allocation195_spill] sm:$0xff]  ;;  %v11485_v39 = vld [vmem:[#allocation129_spill] sm:$0xff] }
 0xa16   : > { %v3430_v58 = vrot.slane %v3429_v16, 1  ;;  %v3459_v40 = vmax.f32 %v8553_v27, %v3458_v41  ;;  %v3465_v19 = vmax.f32 %v8558_v60, %v3464_v51  ;;  %v3436_v6 = vrot.slane %v3435_v47, 1 }
 0xa17   : > { %v3442_v42 = vrot.slane %v3441_v57, 1  ;;  %v3448_v17 = vrot.slane %v3447_v26, 1  ;;  %v3454_v30 = vrot.slane %v3453_v37, 1  ;;  %v8978_v14 = vmax.f32 %v3423_v7, %v3424_v5 }
 0xa18   : > { %v8980_v20 = vmax.f32 %v3429_v16, %v3430_v58  ;;  %v3460_v49 = vrot.slane %v3459_v40, 1  ;;  %v3466_v52 = vrot.slane %v3465_v19, 1  ;;  %v8982_v45 = vmax.f32 %v3435_v47, %v3436_v6  ;;  %v11486_v16 = vld [vmem:[#allocation196_spill] sm:$0xff] }
 0xa19   : > { %11476 = vst [vmem:[#allocation85_spill] sm:$0xff] %v8978_v14  ;;  %v8984_v28 = vmax.f32 %v3441_v57, %v3442_v42  ;;  %v8986_v62 = vmax.f32 %v3447_v26, %v3448_v17  ;;  %v8988_v46 = vmax.f32 %v3453_v37, %v3454_v30  ;;  %v3470_v23 = vrot.slane %v8563_v31, 2  ;;  %v11487_v57 = vld [vmem:[#allocation130_spill] sm:$0xff]  ;;  %v11488_v37 = vld [vmem:[#allocation197_spill] sm:$0xff] }
 0xa1a   : > { %11477 = vst [vmem:[#allocation92_spill] sm:$0xff] %v8980_v20  ;;  %11478 = vst [vmem:[#allocation100_spill] sm:$0xff] %v8982_v45  ;;  %v8990_v27 = vmax.f32 %v3459_v40, %v3460_v49  ;;  %v8992_v60 = vmax.f32 %v3465_v19, %v3466_v52  ;;  %v3476_v59 = vrot.slane %v8568_v32, 2  ;;  %v3482_v15 = vrot.slane %v8573_v43, 2 }
 0xa1b   : > { %11479 = vst [vmem:[#allocation108_spill] sm:$0xff] %v8984_v28  ;;  %11480 = vst [vmem:[#allocation110_spill] sm:$0xff] %v8986_v62  ;;  %v3488_v4 = vrot.slane %v11484_v22, 2  ;;  %v3494_v7 = vrot.slane %v11485_v39, 2  ;;  %v3500_v41 = vrot.slane %v11486_v16, 2  ;;  %v3471_v51 = vmax.f32 %v8563_v31, %v3470_v23 }
 0xa1c   : > { %11481 = vst [vmem:[#allocation123_spill] sm:$0xff] %v8988_v46  ;;  %11482 = vst [vmem:[#allocation124_spill] sm:$0xff] %v8990_v27  ;;  %v3477_v47 = vmax.f32 %v8568_v32, %v3476_v59  ;;  %v3506_v26 = vrot.slane %v11487_v57, 2  ;;  %v3512_v5 = vrot.slane %v11488_v37, 2  ;;  %v3483_v58 = vmax.f32 %v8573_v43, %v3482_v15 }
 0xa1d   : > { %11483 = vst [vmem:[#allocation2_spill] sm:$0xff] %v8992_v60  ;;  %v3489_v40 = vmax.f32 %v11484_v22, %v3488_v4  ;;  %v3495_v19 = vmax.f32 %v11485_v39, %v3494_v7  ;;  %v3501_v6 = vmax.f32 %v11486_v16, %v3500_v41  ;;  %v3472_v42 = vrot.slane %v3471_v51, 1 }
 0xa1e   : > { %v3478_v17 = vrot.slane %v3477_v47, 1  ;;  %v3507_v30 = vmax.f32 %v11487_v57, %v3506_v26  ;;  %v3513_v31 = vmax.f32 %v11488_v37, %v3512_v5  ;;  %v3484_v49 = vrot.slane %v3483_v58, 1  ;;  %v11497_v57 = vld [vmem:[#allocation133_spill] sm:$0xff] }
 0xa1f   : > { %v3490_v32 = vrot.slane %v3489_v40, 1  ;;  %v3496_v52 = vrot.slane %v3495_v19, 1  ;;  %v3502_v23 = vrot.slane %v3501_v6, 1  ;;  %v9010_v59 = vmax.f32 %v3471_v51, %v3472_v42  ;;  %v11498_v51 = vld [vmem:[#allocation198_spill] sm:$0xff]  ;;  %v11500_v42 = vld [vmem:[#allocation139_spill] sm:$0xff] }
 0xa20   : > { %v9012_v50 = vmax.f32 %v3477_v47, %v3478_v17  ;;  %v3508_v43 = vrot.slane %v3507_v30, 1  ;;  %v3514_v15 = vrot.slane %v3513_v31, 1  ;;  %v9014_v22 = vmax.f32 %v3483_v58, %v3484_v49  ;;  %v11499_v47 = vld [vmem:[#allocation134_spill] sm:$0xff]  ;;  %v11501_v58 = vld [vmem:[#allocation141_spill] sm:$0xff] }
 0xa21   : > { %11489 = vst [vmem:[#allocation3_spill] sm:$0xff] %v9010_v59  ;;  %v9016_v4 = vmax.f32 %v3489_v40, %v3490_v32  ;;  %v9018_v39 = vmax.f32 %v3495_v19, %v3496_v52  ;;  %v9020_v7 = vmax.f32 %v3501_v6, %v3502_v23  ;;  %v3518_v26 = vrot.slane %v11497_v57, 2  ;;  %v11502_v40 = vld [vmem:[#allocation151_spill] sm:$0xff] }
 0xa22   : > { %11490 = vst [vmem:[#allocation7_spill] sm:$0xff] %v9012_v50  ;;  %11491 = vst [vmem:[#allocation9_spill] sm:$0xff] %v9014_v22  ;;  %v9022_v16 = vmax.f32 %v3507_v30, %v3508_v43  ;;  %v9024_v41 = vmax.f32 %v3513_v31, %v3514_v15  ;;  %v3524_v37 = vrot.slane %v11498_v51, 2  ;;  %v3530_v5 = vrot.slane %v11499_v47, 2  ;;  %v11503_v30 = vld [vmem:[#allocation152_spill] sm:$0xff]  ;;  %v11504_v31 = vld [vmem:[#allocation153_spill] sm:$0xff] }
 0xa23   : > { %11492 = vst [vmem:[#allocation13_spill] sm:$0xff] %v9016_v4  ;;  %11493 = vst [vmem:[#allocation14_spill] sm:$0xff] %v9018_v39  ;;  %v3536_v17 = vrot.slane %v11500_v42, 2  ;;  %v3542_v49 = vrot.slane %v11501_v58, 2  ;;  %v3548_v32 = vrot.slane %v11502_v40, 2  ;;  %v3519_v19 = vmax.f32 %v11497_v57, %v3518_v26  ;;  %v9314_v59 = vld [vmem:[%s9945_s6 + $0x1c8] sm:$0xff] }
 0xa24   : > { %11494 = vst [vmem:[#allocation29_spill] sm:$0xff] %v9020_v7  ;;  %11495 = vst [vmem:[#allocation35_spill] sm:$0xff] %v9022_v16  ;;  %v3525_v6 = vmax.f32 %v11498_v51, %v3524_v37  ;;  %v3554_v52 = vrot.slane %v11503_v30, 2  ;;  %v3560_v23 = vrot.slane %v11504_v31, 2  ;;  %v3531_v43 = vmax.f32 %v11499_v47, %v3530_v5 }
 0xa25   : > { %11496 = vst [vmem:[#allocation19_spill] sm:$0xff] %v9024_v41  ;;  %v3537_v15 = vmax.f32 %v11500_v42, %v3536_v17  ;;  %v3543_v29 = vmax.f32 %v11501_v58, %v3542_v49  ;;  %v3549_v38 = vmax.f32 %v11502_v40, %v3548_v32  ;;  %v3520_v55 = vrot.slane %v3519_v19, 1 }
 0xa26   : > { %v3526_v24 = vrot.slane %v3525_v6, 1  ;;  %v3555_v3 = vmax.f32 %v11503_v30, %v3554_v52  ;;  %v3561_v57 = vmax.f32 %v11504_v31, %v3560_v23  ;;  %v3532_v26 = vrot.slane %v3531_v43, 1  ;;  %v11531_v23 = vld [vmem:[#allocation154_spill] sm:$0xff] }
 0xa27   : > { %v3538_v51 = vrot.slane %v3537_v15, 1  ;;  %v3544_v37 = vrot.slane %v3543_v29, 1  ;;  %v3550_v2 = vrot.slane %v3549_v38, 1  ;;  %v9042_v33 = vmax.f32 %v3519_v19, %v3520_v55  ;;  %v11533_v55 = vld [vmem:[#allocation158_spill] sm:$0xff] }
 0xa28   : > { %v9044_v9 = vmax.f32 %v3525_v6, %v3526_v24  ;;  %v3556_v47 = vrot.slane %v3555_v3, 1  ;;  %v3562_v5 = vrot.slane %v3561_v57, 1  ;;  %v9046_v42 = vmax.f32 %v3531_v43, %v3532_v26 }
 0xa29   : > { %11505 = vst [vmem:[#allocation18_spill] sm:$0xff] %v9042_v33  ;;  %v9048_v17 = vmax.f32 %v3537_v15, %v3538_v51  ;;  %v9050_v58 = vmax.f32 %v3543_v29, %v3544_v37  ;;  %v9052_v49 = vmax.f32 %v3549_v38, %v3550_v2  ;;  %v3884_v19 = vrot.slane %v11531_v23, 4  ;;  %v11536_v15 = vld [vmem:[#allocation161_spill] sm:$0xff] }
 0xa2a   : > { %11506 = vst [vmem:[#allocation28_spill] sm:$0xff] %v9044_v9  ;;  %11507 = vst [vmem:[#allocation34_spill] sm:$0xff] %v9046_v42  ;;  %v9054_v40 = vmax.f32 %v3555_v3, %v3556_v47  ;;  %v9056_v32 = vmax.f32 %v3561_v57, %v3562_v5  ;;  %v11532_v9 = vld [vmem:[#allocation157_spill] sm:$0xff]  ;;  %v3896_v42 = vrot.slane %v11533_v55, 4  ;;  %v11534_v47 = vld [vmem:[#allocation159_spill] sm:$0xff] }
 0xa2b   : > { %11508 = vst [vmem:[#allocation43_spill] sm:$0xff] %v9048_v17  ;;  %11509 = vst [vmem:[#allocation46_spill] sm:$0xff] %v9050_v58  ;;  %v3890_v51 = vrot.slane %v11532_v9, 4  ;;  %v3902_v60 = vrot.slane %v11534_v47, 4  ;;  %v11535_v17 = vld [vmem:[#allocation160_spill] sm:$0xff]  ;;  %v3914_v58 = vrot.slane %v11536_v15, 4 }
 0xa2c   : > { %11510 = vst [vmem:[#allocation59_spill] sm:$0xff] %v9052_v49  ;;  %11511 = vst [vmem:[#allocation64_spill] sm:$0xff] %v9054_v40  ;;  %v3908_v38 = vrot.slane %v11535_v17, 4  ;;  %v11537_v2 = vld [vmem:[#allocation165_spill] sm:$0xff]  ;;  %v3885_v49 = vmax.f32 %v11531_v23, %v3884_v19  ;;  %v3897_v36 = vmax.f32 %v11533_v55, %v3896_v42 }
 0xa2d   : > { %11512 = vst [vmem:[#allocation49_spill] sm:$0xff] %v9056_v32  ;;  %v3920_v12 = vrot.slane %v11537_v2, 4  ;;  %v3891_v41 = vmax.f32 %v11532_v9, %v3890_v51  ;;  %v11538_v32 = vld [vmem:[#allocation166_spill] sm:$0xff]  ;;  %v3903_v40 = vmax.f32 %v11534_v47, %v3902_v60  ;;  %v3915_v31 = vmax.f32 %v11536_v15, %v3914_v58  ;;  %v11617_v37 = vld [vmem:[#allocation101_spill] sm:$0xff] }
 0xa2e   : > { %v3926_v30 = vrot.slane %v11538_v32, 4  ;;  %v3909_v57 = vmax.f32 %v11535_v17, %v3908_v38  ;;  %v3886_v26 = vrot.slane %v3885_v49, 2  ;;  %v3898_v63 = vrot.slane %v3897_v36, 2 }
 0xa2f   : > { %v3921_v33 = vmax.f32 %v11537_v2, %v3920_v12  ;;  %v3892_v16 = vrot.slane %v3891_v41, 2  ;;  %v3904_v19 = vrot.slane %v3903_v40, 2  ;;  %v3916_v9 = vrot.slane %v3915_v31, 2 }
 0xa30   : > { %v3927_v7 = vmax.f32 %v11538_v32, %v3926_v30  ;;  %v3910_v23 = vrot.slane %v3909_v57, 2  ;;  %v3887_v42 = vmax.f32 %v3885_v49, %v3886_v26  ;;  %v3899_v53 = vmax.f32 %v3897_v36, %v3898_v63  ;;  %v11549_v26 = vld [vmem:[#allocation142_spill] sm:$0xff] }
 0xa31   : > { %v3922_v51 = vrot.slane %v3921_v33, 2  ;;  %v3893_v55 = vmax.f32 %v3891_v41, %v3892_v16  ;;  %v3905_v60 = vmax.f32 %v3903_v40, %v3904_v19  ;;  %v3917_v17 = vmax.f32 %v3915_v31, %v3916_v9  ;;  %v11548_v31 = vld [vmem:[#allocation178_spill] sm:$0xff]  ;;  %v11551_v9 = vld [vmem:[#allocation177_spill] sm:$0xff] }
 0xa32   : > { %v3928_v39 = vrot.slane %v3927_v7, 2  ;;  %v3911_v47 = vmax.f32 %v3909_v57, %v3910_v23  ;;  %v3888_v58 = vrot.slane %v3887_v42, 1  ;;  %v3900_v12 = vrot.slane %v3899_v53, 1  ;;  %v11550_v23 = vld [vmem:[#allocation176_spill] sm:$0xff] }
 0xa33   : > { %v3923_v38 = vmax.f32 %v3921_v33, %v3922_v51  ;;  %v3894_v15 = vrot.slane %v3893_v55, 1  ;;  %v3906_v56 = vrot.slane %v3905_v60, 1  ;;  %v3918_v11 = vrot.slane %v3917_v17, 1 }
 0xa34   : > { %v3929_v2 = vmax.f32 %v3927_v7, %v3928_v39  ;;  %v3912_v4 = vrot.slane %v3911_v47, 1  ;;  %v9136_v30 = vmax.f32 %v3887_v42, %v3888_v58  ;;  %v9140_v49 = vmax.f32 %v3899_v53, %v3900_v12  ;;  %v11547_v7 = vld [vmem:[#allocation168_spill] sm:$0xff] }
 0xa35   : > { %v3924_v32 = vrot.slane %v3923_v38, 1  ;;  %v9138_v22 = vmax.f32 %v3893_v55, %v3894_v15  ;;  %v9142_v36 = vmax.f32 %v3905_v60, %v3906_v56  ;;  %v9146_v33 = vmax.f32 %v3917_v17, %v3918_v11  ;;  %v11552_v56 = vld [vmem:[#allocation135_spill] sm:$0xff]  ;;  %v11554_v17 = vld [vmem:[#allocation146_spill] sm:$0xff] }
 0xa36   : > { %11539 = vst [vmem:[#allocation48_spill] sm:$0xff] %v9136_v30  ;;  %11541 = vst [vmem:[#allocation67_spill] sm:$0xff] %v9140_v49  ;;  %v3930_v63 = vrot.slane %v3929_v2, 1  ;;  %v9144_v16 = vmax.f32 %v3911_v47, %v3912_v4  ;;  %v3932_v40 = vrot.slane %v11547_v7, 4  ;;  %v3938_v57 = vrot.slane %v11548_v31, 4  ;;  %v11553_v4 = vld [vmem:[#allocation205_spill] sm:$0xff] }
 0xa37   : > { %11540 = vst [vmem:[#allocation58_spill] sm:$0xff] %v9138_v22  ;;  %11542 = vst [vmem:[#allocation75_spill] sm:$0xff] %v9142_v36  ;;  %v9148_v41 = vmax.f32 %v3923_v38, %v3924_v32  ;;  %v3944_v19 = vrot.slane %v11549_v26, 4  ;;  %v3950_v53 = vrot.slane %v11550_v23, 4  ;;  %v3956_v51 = vrot.slane %v11551_v9, 4 }
 0xa38   : > { %11543 = vst [vmem:[#allocation78_spill] sm:$0xff] %v9144_v16  ;;  %11544 = vst [vmem:[#allocation91_spill] sm:$0xff] %v9146_v33  ;;  %v9150_v39 = vmax.f32 %v3929_v2, %v3930_v63  ;;  %v3962_v42 = vrot.slane %v11552_v56, 4  ;;  %v3968_v55 = vrot.slane %v11553_v4, 4  ;;  %v3933_v11 = vmax.f32 %v11547_v7, %v3932_v40 }
 0xa39   : > { %11545 = vst [vmem:[#allocation96_spill] sm:$0xff] %v9148_v41  ;;  %v3939_v60 = vmax.f32 %v11548_v31, %v3938_v57  ;;  %v3945_v47 = vmax.f32 %v11549_v26, %v3944_v19  ;;  %v3974_v38 = vrot.slane %v11554_v17, 4  ;;  %v3951_v58 = vmax.f32 %v11550_v23, %v3950_v53 }
 0xa3a   : > { %11546 = vst [vmem:[#allocation81_spill] sm:$0xff] %v9150_v39  ;;  %v3957_v15 = vmax.f32 %v11551_v9, %v3956_v51  ;;  %v3963_v12 = vmax.f32 %v11552_v56, %v3962_v42  ;;  %v3969_v2 = vmax.f32 %v11553_v4, %v3968_v55  ;;  %v3934_v32 = vrot.slane %v3933_v11, 2 }
 0xa3b   : > { %v3940_v63 = vrot.slane %v3939_v60, 2  ;;  %v3946_v39 = vrot.slane %v3945_v47, 2  ;;  %v3975_v41 = vmax.f32 %v11554_v17, %v3974_v38  ;;  %v3952_v7 = vrot.slane %v3951_v58, 2 }
 0xa3c   : > { %v3958_v40 = vrot.slane %v3957_v15, 2  ;;  %v3964_v31 = vrot.slane %v3963_v12, 2  ;;  %v3970_v57 = vrot.slane %v3969_v2, 2  ;;  %v3935_v26 = vmax.f32 %v3933_v11, %v3934_v32 }
 0xa3d   : > { %v3941_v19 = vmax.f32 %v3939_v60, %v3940_v63  ;;  %v3947_v33 = vmax.f32 %v3945_v47, %v3946_v39  ;;  %v3976_v16 = vrot.slane %v3975_v41, 2  ;;  %v3953_v23 = vmax.f32 %v3951_v58, %v3952_v7  ;;  %v11565_v63 = vld [vmem:[#allocation199_spill] sm:$0xff] }
 0xa3e   : > { %v3959_v53 = vmax.f32 %v3957_v15, %v3958_v40  ;;  %v3965_v9 = vmax.f32 %v3963_v12, %v3964_v31  ;;  %v3971_v51 = vmax.f32 %v3969_v2, %v3970_v57  ;;  %v3936_v56 = vrot.slane %v3935_v26, 1  ;;  %v11564_v2 = vld [vmem:[#allocation204_spill] sm:$0xff]  ;;  %v11566_v40 = vld [vmem:[#allocation137_spill] sm:$0xff]  ;;  %v11567_v31 = vld [vmem:[#allocation155_spill] sm:$0xff] }
 0xa3f   : > { %v3942_v42 = vrot.slane %v3941_v19, 1  ;;  %v3948_v4 = vrot.slane %v3947_v33, 1  ;;  %v3977_v55 = vmax.f32 %v3975_v41, %v3976_v16  ;;  %v3954_v36 = vrot.slane %v3953_v23, 1  ;;  %v11563_v41 = vld [vmem:[#allocation145_spill] sm:$0xff] }
 0xa40   : > { %v3960_v49 = vrot.slane %v3959_v53, 1  ;;  %v3966_v22 = vrot.slane %v3965_v9, 1  ;;  %v3972_v17 = vrot.slane %v3971_v51, 1  ;;  %v9168_v38 = vmax.f32 %v3935_v26, %v3936_v56 }
 0xa41   : > { %v9170_v30 = vmax.f32 %v3941_v19, %v3942_v42  ;;  %v9172_v11 = vmax.f32 %v3947_v33, %v3948_v4  ;;  %v3978_v39 = vrot.slane %v3977_v55, 1  ;;  %v9174_v60 = vmax.f32 %v3953_v23, %v3954_v36  ;;  %v11568_v36 = vld [vmem:[#allocation156_spill] sm:$0xff] }
 0xa42   : > { %11555 = vst [vmem:[#allocation80_spill] sm:$0xff] %v9168_v38  ;;  %v9176_v47 = vmax.f32 %v3959_v53, %v3960_v49  ;;  %v9178_v58 = vmax.f32 %v3965_v9, %v3966_v22  ;;  %v9180_v15 = vmax.f32 %v3971_v51, %v3972_v17  ;;  %v3980_v12 = vrot.slane %v11563_v41, 4  ;;  %v11569_v49 = vld [vmem:[#allocation186_spill] sm:$0xff]  ;;  %v11570_v9 = vld [vmem:[#allocation213_spill] sm:$0xff] }
 0xa43   : > { %11556 = vst [vmem:[#allocation90_spill] sm:$0xff] %v9170_v30  ;;  %11557 = vst [vmem:[#allocation99_spill] sm:$0xff] %v9172_v11  ;;  %v9182_v16 = vmax.f32 %v3977_v55, %v3978_v39  ;;  %v3986_v32 = vrot.slane %v11564_v2, 4  ;;  %v3992_v7 = vrot.slane %v11565_v63, 4  ;;  %v3998_v33 = vrot.slane %v11566_v40, 4 }
 0xa44   : > { %11558 = vst [vmem:[#allocation105_spill] sm:$0xff] %v9174_v60  ;;  %11559 = vst [vmem:[#allocation113_spill] sm:$0xff] %v9176_v47  ;;  %v4004_v57 = vrot.slane %v11567_v31, 4  ;;  %v4010_v26 = vrot.slane %v11568_v36, 4  ;;  %v4016_v19 = vrot.slane %v11569_v49, 4  ;;  %v3981_v22 = vmax.f32 %v11563_v41, %v3980_v12 }
 0xa45   : > { %11560 = vst [vmem:[#allocation116_spill] sm:$0xff] %v9178_v58  ;;  %11561 = vst [vmem:[#allocation140_spill] sm:$0xff] %v9180_v15  ;;  %v3987_v23 = vmax.f32 %v11564_v2, %v3986_v32  ;;  %v3993_v53 = vmax.f32 %v11565_v63, %v3992_v7  ;;  %v4022_v51 = vrot.slane %v11570_v9, 4  ;;  %v3999_v56 = vmax.f32 %v11566_v40, %v3998_v33 }
 0xa46   : > { %11562 = vst [vmem:[#allocation148_spill] sm:$0xff] %v9182_v16  ;;  %v4005_v42 = vmax.f32 %v11567_v31, %v4004_v57  ;;  %v4011_v4 = vmax.f32 %v11568_v36, %v4010_v26  ;;  %v4017_v55 = vmax.f32 %v11569_v49, %v4016_v19  ;;  %v3982_v17 = vrot.slane %v3981_v22, 2 }
 0xa47   : > { %v3988_v39 = vrot.slane %v3987_v23, 2  ;;  %v3994_v16 = vrot.slane %v3993_v53, 2  ;;  %v4023_v15 = vmax.f32 %v11570_v9, %v4022_v51  ;;  %v4000_v41 = vrot.slane %v3999_v56, 2 }
 0xa48   : > { %v4006_v12 = vrot.slane %v4005_v42, 2  ;;  %v4012_v2 = vrot.slane %v4011_v4, 2  ;;  %v4018_v32 = vrot.slane %v4017_v55, 2  ;;  %v3983_v63 = vmax.f32 %v3981_v22, %v3982_v17 }
 0xa49   : > { %v3989_v7 = vmax.f32 %v3987_v23, %v3988_v39  ;;  %v3995_v58 = vmax.f32 %v3993_v53, %v3994_v16  ;;  %v4024_v47 = vrot.slane %v4023_v15, 2  ;;  %v4001_v40 = vmax.f32 %v3999_v56, %v4000_v41  ;;  %v11581_v39 = vld [vmem:[#allocation214_spill] sm:$0xff] }
 0xa4a   : > { %v4007_v33 = vmax.f32 %v4005_v42, %v4006_v12  ;;  %v4013_v31 = vmax.f32 %v4011_v4, %v4012_v2  ;;  %v4019_v57 = vmax.f32 %v4017_v55, %v4018_v32  ;;  %v3984_v36 = vrot.slane %v3983_v63, 1  ;;  %v11580_v55 = vld [vmem:[#allocation192_spill] sm:$0xff]  ;;  %v11583_v2 = vld [vmem:[#allocation173_spill] sm:$0xff] }
 0xa4b   : > { %v3990_v26 = vrot.slane %v3989_v7, 1  ;;  %v3996_v49 = vrot.slane %v3995_v58, 1  ;;  %v4025_v19 = vmax.f32 %v4023_v15, %v4024_v47  ;;  %v4002_v60 = vrot.slane %v4001_v40, 1  ;;  %v11579_v15 = vld [vmem:[#allocation163_spill] sm:$0xff]  ;;  %v11582_v12 = vld [vmem:[#allocation164_spill] sm:$0xff] }
 0xa4c   : > { %v4008_v11 = vrot.slane %v4007_v33, 1  ;;  %v4014_v30 = vrot.slane %v4013_v31, 1  ;;  %v4020_v9 = vrot.slane %v4019_v57, 1  ;;  %v9200_v51 = vmax.f32 %v3983_v63, %v3984_v36 }
 0xa4d   : > { %v9202_v38 = vmax.f32 %v3989_v7, %v3990_v26  ;;  %v9204_v22 = vmax.f32 %v3995_v58, %v3996_v49  ;;  %v4026_v16 = vrot.slane %v4025_v19, 1  ;;  %v9206_v23 = vmax.f32 %v4001_v40, %v4002_v60  ;;  %v11584_v60 = vld [vmem:[#allocation174_spill] sm:$0xff] }
 0xa4e   : > { %11571 = vst [vmem:[#allocation189_spill] sm:$0xff] %v9200_v51  ;;  %v9208_v53 = vmax.f32 %v4007_v33, %v4008_v11  ;;  %v9210_v56 = vmax.f32 %v4013_v31, %v4014_v30  ;;  %v9212_v42 = vmax.f32 %v4019_v57, %v4020_v9  ;;  %v4028_v4 = vrot.slane %v11579_v15, 4  ;;  %v11585_v11 = vld [vmem:[#allocation162_spill] sm:$0xff]  ;;  %v11586_v31 = vld [vmem:[#allocation143_spill] sm:$0xff] }
 0xa4f   : > { %11572 = vst [vmem:[#allocation149_spill] sm:$0xff] %v9202_v38  ;;  %11573 = vst [vmem:[#allocation190_spill] sm:$0xff] %v9204_v22  ;;  %v9214_v47 = vmax.f32 %v4025_v19, %v4026_v16  ;;  %v4034_v17 = vrot.slane %v11580_v55, 4  ;;  %v4040_v41 = vrot.slane %v11581_v39, 4  ;;  %v4046_v58 = vrot.slane %v11582_v12, 4  ;;  %v9298_v22 = vld [vmem:[%s9945_s6 + $0x138] sm:$0xff] }
 0xa50   : > { %11574 = vst [vmem:[#allocation150_spill] sm:$0xff] %v9206_v23  ;;  %11575 = vst [vmem:[#allocation191_spill] sm:$0xff] %v9208_v53  ;;  %v4052_v32 = vrot.slane %v11583_v2, 4  ;;  %v4058_v63 = vrot.slane %v11584_v60, 4  ;;  %v4064_v7 = vrot.slane %v11585_v11, 4  ;;  %v4029_v30 = vmax.f32 %v11579_v15, %v4028_v4  ;;  %v9293_v23 = vld [vmem:[%s9945_s6 + $0x130] sm:$0xff] }
 0xa51   : > { %11576 = vst [vmem:[#allocation126_spill] sm:$0xff] %v9210_v56  ;;  %11577 = vst [vmem:[#allocation193_spill] sm:$0xff] %v9212_v42  ;;  %v4035_v40 = vmax.f32 %v11580_v55, %v4034_v17  ;;  %v4041_v33 = vmax.f32 %v11581_v39, %v4040_v41  ;;  %v4070_v57 = vrot.slane %v11586_v31, 4  ;;  %v4047_v36 = vmax.f32 %v11582_v12, %v4046_v58  ;;  %v4574_v12 = vld [vmem:[%s9945_s6 + $0x180] sm:$0xff]  ;;  %v4575_v58 = vld [vmem:[%s9945_s6 + $0x188] sm:$0xff] }
 0xa52   : > { %11578 = vst [vmem:[#allocation127_spill] sm:$0xff] %v9214_v47  ;;  %v4053_v26 = vmax.f32 %v11583_v2, %v4052_v32  ;;  %v4059_v49 = vmax.f32 %v11584_v60, %v4058_v63  ;;  %v4065_v19 = vmax.f32 %v11585_v11, %v4064_v7  ;;  %v4030_v9 = vrot.slane %v4029_v30, 2  ;;  %v4558_v11 = vld [vmem:[%s9945_s6 + $0x100] sm:$0xff] }
 0xa53   : > { %v4036_v16 = vrot.slane %v4035_v40, 2  ;;  %v4042_v47 = vrot.slane %v4041_v33, 2  ;;  %v4071_v42 = vmax.f32 %v11586_v31, %v4070_v57  ;;  %v4048_v15 = vrot.slane %v4047_v36, 2  ;;  %v4576_v31 = vld [vmem:[%s9945_s6 + $0x190] sm:$0xff]  ;;  %v4577_v57 = vld [vmem:[%s9945_s6 + $0x198] sm:$0xff]  ;;  %v9303_v38 = vld [vmem:[%s9945_s6 + $0x1c0] sm:$0xff] }
 0xa54   : > { %v4054_v4 = vrot.slane %v4053_v26, 2  ;;  %v4060_v55 = vrot.slane %v4059_v49, 2  ;;  %v4066_v17 = vrot.slane %v4065_v19, 2  ;;  %v4031_v39 = vmax.f32 %v4029_v30, %v4030_v9 }
 0xa55   : > { %v4037_v41 = vmax.f32 %v4035_v40, %v4036_v16  ;;  %v4043_v56 = vmax.f32 %v4041_v33, %v4042_v47  ;;  %v4072_v53 = vrot.slane %v4071_v42, 2  ;;  %v4049_v2 = vmax.f32 %v4047_v36, %v4048_v15  ;;  %v4559_v47 = vld [vmem:[%s9945_s6 + $0x108] sm:$0xff]  ;;  %v9253_v36 = vld [vmem:[%s9945_s6 + $0x110] sm:$0xff] }
 0xa56   : > { %v4055_v32 = vmax.f32 %v4053_v26, %v4054_v4  ;;  %v4061_v60 = vmax.f32 %v4059_v49, %v4060_v55  ;;  %v4067_v63 = vmax.f32 %v4065_v19, %v4066_v17  ;;  %v4032_v7 = vrot.slane %v4031_v39, 1  ;;  %v9258_v26 = vld [vmem:[%s9945_s6 + $0x118] sm:$0xff]  ;;  %v9273_v49 = vld [vmem:[%s9945_s6 + $0x120] sm:$0xff]  ;;  %v9278_v19 = vld [vmem:[%s9945_s6 + $0x128] sm:$0xff] }
 0xa57   : > { %v4038_v30 = vrot.slane %v4037_v41, 1  ;;  %v4044_v40 = vrot.slane %v4043_v56, 1  ;;  %v4073_v33 = vmax.f32 %v4071_v42, %v4072_v53  ;;  %v9263_v53 = vld [vmem:[%s9945_s6 + $0x1a0] sm:$0xff]  ;;  %v9268_v42 = vld [vmem:[%s9945_s6 + $0x1a8] sm:$0xff]  ;;  %v4050_v9 = vrot.slane %v4049_v2, 1  ;;  %v9283_v55 = vld [vmem:[%s9945_s6 + $0x1b0] sm:$0xff] }
 0xa58   : > { %v4056_v16 = vrot.slane %v4055_v32, 1  ;;  %v4062_v15 = vrot.slane %v4061_v60, 1  ;;  %v4068_v4 = vrot.slane %v4067_v63, 1  ;;  %v9288_v17 = vld [vmem:[%s9945_s6 + $0x1b8] sm:$0xff]  ;;  %v9305_v51 = vmax.f32 %v4031_v39, %v4032_v7  ;;  %v9324_v39 = vld [vmem:[%s9945_s6 + $0x148] sm:$0xff] }
 0xa59   : > { %v9307_v21 = vmax.f32 %v4037_v41, %v4038_v30  ;;  %v9309_v50 = vmax.f32 %v4043_v56, %v4044_v40  ;;  %v4074_v54 = vrot.slane %v4073_v33, 1  ;;  %v9326_v41 = vmax.f32 %v4049_v2, %v4050_v9  ;;  %v9337_v40 = vld [vmem:[%s9945_s6 + $0x1d0] sm:$0xff]  ;;  %v11595_v9 = vld [vmem:[#allocation169_spill] sm:$0xff] }
 0xa5a   : > { %11587 = vst [vmem:[#allocation194_spill] sm:$0xff] %v9305_v51  ;;  %v9328_v56 = vmax.f32 %v4055_v32, %v4056_v16  ;;  %v9330_v7 = vmax.f32 %v4061_v60, %v4062_v15  ;;  %v9332_v30 = vmax.f32 %v4067_v63, %v4068_v4  ;;  %v9347_v2 = vld [vmem:[%s9945_s6 + $0x150] sm:$0xff]  ;;  %v5118_v60 = vpack.c.bf16 %v4575_v58, %v4574_v12  ;;  %v5239_v63 = vld [vmem:[%s9947_s8 + $0xa] ss:$0 sm:$0xff]  ;;  %v9358_v4 = vld [vmem:[%s9945_s6 + $0x158] sm:$0xff] }
 0xa5b   : > { %11588 = vst [vmem:[#allocation128_spill] sm:$0xff] %v9307_v21  ;;  %11589 = vst [vmem:[#allocation27_spill] sm:$0xff] %v9309_v50  ;;  %v9342_v50 = vld [vmem:[%s9945_s6 + $0x1d8] sm:$0xff]  ;;  %v9349_v32 = vmax.f32 %v4073_v33, %v4074_v54  ;;  %v3104_v16 = vadd.f32 %v5239_v63, %v11595_v9  ;;  %v5120_v15 = vpack.c.bf16 %v4559_v47, %v4558_v11  ;;  %v9368_v54 = vld [vmem:[%s9945_s6 + $0x1e8] sm:$0xff] }
 0xa5c   : > { %11590 = vst [vmem:[#allocation26_spill] sm:$0xff] %v9326_v41  ;;  %11591 = vst [vmem:[#allocation32_spill] sm:$0xff] %v9328_v56  ;;  %v5122_v12 = vpack.c.bf16 %v4577_v57, %v4576_v31  ;;  %v5124_v58 = vpack.c.bf16 %v9258_v26, %v9253_v36  ;;  %v5126_v11 = vpack.c.bf16 %v9268_v42, %v9263_v53  ;;  %5119 = vmatprep.subr.bf16.mxu0 %v5118_v60  ;;  %v11596_v42 = vld [vmem:[#allocation11_spill] sm:$0xff]  ;;  %v11602_v36 = vld [vmem:[#allocation45_spill] sm:$0xff] }
 0xa5d   : > { %11592 = vst [vmem:[#allocation40_spill] sm:$0xff] %v9330_v7  ;;  %11593 = vst [vmem:[#allocation47_spill] sm:$0xff] %v9332_v30  ;;  %v9363_v30 = vld [vmem:[%s9945_s6 + $0x1e0] sm:$0xff]  ;;  %v5128_v47 = vpack.c.bf16 %v9278_v19, %v9273_v49  ;;  %v3114_v33 = vmax.f32 %v3104_v16, 0.0  ;;  %v5130_v63 = vpack.c.bf16 %v9288_v17, %v9283_v55  ;;  %v5132_v9 = vpack.c.bf16 %v9298_v22, %v9293_v23  ;;  %v11598_v23 = vld [vmem:[#allocation15_spill] sm:$0xff] }
 0xa5e   : > { %11594 = vst [vmem:[#allocation54_spill] sm:$0xff] %v9349_v32  ;;  %5121 = vmatpush3.bf16.msra.mxu0 %v5120_v15  ;;  %v11597_v19 = vld [vmem:[#allocation10_spill] sm:$0xff]  ;;  %v11599_v17 = vld [vmem:[#allocation24_spill] sm:$0xff]  ;;  %v11600_v16 = vld [vmem:[#allocation33_spill] sm:$0xff] }
 0xa5f   : > { %v3596_v49 = vmul.f32 %v3114_v33, %v11596_v42  ;;  %v3597_v22 = vmul.f32 %v3114_v33, %v11597_v19  ;;  %v3598_v55 = vmul.f32 %v3114_v33, %v11598_v23  ;;  %v3599_v60 = vmul.f32 %v3114_v33, %v11599_v17  ;;  %5123 = vmatprep.subr.bf16.mxu0 %v5122_v12  ;;  %v11601_v57 = vld [vmem:[#allocation39_spill] sm:$0xff]  ;;  %v11603_v7 = vld [vmem:[#allocation52_spill] sm:$0xff]  ;;  %v11604_v56 = vld [vmem:[#allocation38_spill] sm:$0xff] }
 0xa60   : > { %v3600_v15 = vmul.f32 %v3114_v33, %v11600_v16  ;;  %v3601_v31 = vmul.f32 %v3114_v33, %v11601_v57  ;;  %v3602_v32 = vmul.f32 %v3114_v33, %v11602_v36  ;;  %v3603_v26 = vmul.f32 %v3114_v33, %v11603_v7  ;;  %v11605_v53 = vld [vmem:[#allocation41_spill] sm:$0xff]  ;;  %v11606_v19 = vld [vmem:[#allocation44_spill] sm:$0xff]  ;;  %v11607_v23 = vld [vmem:[#allocation55_spill] sm:$0xff] }
 0xa61   : > { %v9399_v41 = vmul.f32 %v3114_v33, %v11604_v56  ;;  %v9402_v42 = vmul.f32 %v3114_v33, %v11605_v53  ;;  %v9405_v21 = vmul.f32 %v3114_v33, %v11606_v19  ;;  %v9408_v17 = vmul.f32 %v3114_v33, %v11607_v23  ;;  %v11608_v12 = vld [vmem:[#allocation63_spill] sm:$0xff]  ;;  %v11609_v57 = vld [vmem:[#allocation68_spill] sm:$0xff]  ;;  %v11610_v36 = vld [vmem:[#allocation77_spill] sm:$0xff] }
 0xa62   : > { %v9411_v16 = vmul.f32 %v3114_v33, %v11608_v12  ;;  %v9414_v51 = vmul.f32 %v3114_v33, %v11609_v57  ;;  %v9417_v7 = vmul.f32 %v3114_v33, %v11610_v36  ;;  %v11611_v56 = vld [vmem:[#allocation84_spill] sm:$0xff]  ;;  %5125 = vmatpush3.bf16.msra.mxu0 %v5124_v58  ;;  %v11612_v53 = vld [vmem:[#allocation71_spill] sm:$0xff]  ;;  %v11613_v19 = vld [vmem:[#allocation70_spill] sm:$0xff]  ;;  %v3634_v3 = vrot.slane %v3597_v22, 4 }
 0xa63   : > { %v9420_v27 = vmul.f32 %v3114_v33, %v11611_v56  ;;  %v9423_v43 = vmul.f32 %v3114_v33, %v11612_v53  ;;  %v9426_v46 = vmul.f32 %v3114_v33, %v11613_v19  ;;  %v11614_v23 = vld [vmem:[#allocation76_spill] sm:$0xff]  ;;  %v11615_v12 = vld [vmem:[#allocation87_spill] sm:$0xff]  ;;  %5127 = vmatprep.subr.bf16.mxu0 %v5126_v11  ;;  %v9438_v56 = vmul.f32 %v3114_v33, %v11617_v37  ;;  %v11620_v19 = vld [vmem:[#allocation102_spill] sm:$0xff] }
 0xa64   : > { %v9429_v5 = vmul.f32 %v3114_v33, %v11614_v23  ;;  %v9432_v62 = vmul.f32 %v3114_v33, %v11615_v12  ;;  %v11616_v57 = vld [vmem:[#allocation95_spill] sm:$0xff]  ;;  %v9447_v45 = vmul.f32 %v3114_v33, %v11620_v19  ;;  %v11629_v19 = vld [vmem:[#allocation180_spill] sm:$0xff]  ;;  %v3646_v0 = vrot.slane %v3599_v60, 4 }
 0xa65   : > { %v9435_v36 = vmul.f32 %v3114_v33, %v11616_v57  ;;  %v11618_v58 = vld [vmem:[#allocation107_spill] sm:$0xff]  ;;  %v11623_v57 = vld [vmem:[#allocation112_spill] sm:$0xff]  ;;  %v9468_v10 = vmul.f32 %v3114_v33, %v11629_v19  ;;  %v3658_v29 = vrot.slane %v3601_v31, 4  ;;  %v3664_v25 = vrot.slane %v3602_v32, 4 }
 0xa66   : > { %v9441_v28 = vmul.f32 %v3114_v33, %v11618_v58  ;;  %v11619_v53 = vld [vmem:[#allocation115_spill] sm:$0xff]  ;;  %v9456_v20 = vmul.f32 %v3114_v33, %v11623_v57  ;;  %v11625_v58 = vld [vmem:[#allocation136_spill] sm:$0xff]  ;;  %5129 = vmatpush3.bf16.msra.mxu0 %v5128_v47  ;;  %v3652_v57 = vrot.slane %v3600_v15, 4  ;;  %v3635_v35 = vmax.f32 %v3597_v22, %v3634_v3 }
 0xa67   : > { %v9444_v18 = vmul.f32 %v3114_v33, %v11619_v53  ;;  %v11621_v23 = vld [vmem:[#allocation103_spill] sm:$0xff]  ;;  %v9462_v14 = vmul.f32 %v3114_v33, %v11625_v58  ;;  %v11627_v53 = vld [vmem:[#allocation201_spill] sm:$0xff]  ;;  %11630 = vst [vmem:[#allocation57_spill] sm:$0xff] %v9468_v10  ;;  %5131 = vmatprep.subr.bf16.mxu0 %v5130_v63  ;;  %v3647_v6 = vmax.f32 %v3599_v60, %v3646_v0 }
 0xa68   : > { %v9450_v1 = vmul.f32 %v3114_v33, %v11621_v23  ;;  %v11622_v12 = vld [vmem:[#allocation111_spill] sm:$0xff]  ;;  %v9465_v44 = vmul.f32 %v3114_v33, %v11627_v53  ;;  %v3628_v23 = vrot.slane %v3596_v49, 4  ;;  %v3653_v13 = vmax.f32 %v3600_v15, %v3652_v57 }
 0xa69   : > { %v9453_v11 = vmul.f32 %v3114_v33, %v11622_v12  ;;  %v11624_v37 = vld [vmem:[#allocation119_spill] sm:$0xff]  ;;  %11626 = vst [vmem:[#allocation62_spill] sm:$0xff] %v9462_v14  ;;  %v3640_v12 = vrot.slane %v3598_v55, 4  ;;  %v3659_v53 = vmax.f32 %v3601_v31, %v3658_v29  ;;  %v3665_v24 = vmax.f32 %v3602_v32, %v3664_v25 }
 0xa6a   : > { %v9459_v61 = vmul.f32 %v3114_v33, %v11624_v37  ;;  %11628 = vst [vmem:[#allocation73_spill] sm:$0xff] %v9465_v44  ;;  %v3670_v37 = vrot.slane %v3603_v26, 4  ;;  %v3629_v52 = vmax.f32 %v3596_v49, %v3628_v23  ;;  %5133 = vmatpush3.bf16.msra.mxu0 %v5132_v9  ;;  %v3636_v47 = vrot.slane %v3635_v35, 2 }
 0xa6b   : > { %v3641_v58 = vmax.f32 %v3598_v55, %v3640_v12  ;;  %v3648_v48 = vrot.slane %v3647_v6, 2  ;;  %v11631_v63 = vpack.c.bf16 %v9314_v59, %v9303_v38  ;;  %v3654_v10 = vrot.slane %v3653_v13, 2 }
 0xa6c   : > { %v3671_v8 = vmax.f32 %v3603_v26, %v3670_v37  ;;  %v3630_v33 = vrot.slane %v3629_v52, 2  ;;  %v3660_v44 = vrot.slane %v3659_v53, 2  ;;  %v3666_v14 = vrot.slane %v3665_v24, 2 }
 0xa6d   : > { %v3642_v19 = vrot.slane %v3641_v58, 2  ;;  %5135 = vmatprep.subr.bf16.mxu0 %v11631_v63  ;;  %v3637_v22 = vmax.f32 %v3635_v35, %v3636_v47  ;;  %v3649_v55 = vmax.f32 %v3647_v6, %v3648_v48  ;;  %v3655_v29 = vmax.f32 %v3653_v13, %v3654_v10 }
 0xa6e   : > { %v3672_v49 = vrot.slane %v3671_v8, 2  ;;  %v3631_v3 = vmax.f32 %v3629_v52, %v3630_v33  ;;  %v3661_v25 = vmax.f32 %v3659_v53, %v3660_v44  ;;  %v3667_v32 = vmax.f32 %v3665_v24, %v3666_v14 }
 0xa6f   : > { %v3643_v0 = vmax.f32 %v3641_v58, %v3642_v19  ;;  %v11632_v31 = vpack.c.bf16 %v9324_v39, %v9319_v34  ;;  %v3638_v60 = vrot.slane %v3637_v22, 1  ;;  %v3650_v38 = vrot.slane %v3649_v55, 1 }
 0xa70   : > { %v3673_v9 = vmax.f32 %v3671_v8, %v3672_v49  ;;  %v3632_v26 = vrot.slane %v3631_v3, 1  ;;  %v11633_v15 = vpack.c.bf16 %v9342_v50, %v9337_v40  ;;  %v3656_v52 = vrot.slane %v3655_v29, 1 }
 0xa71   : > { %5137 = vmatpush3.bf16.msra.mxu0 %v11632_v31  ;;  %v3644_v59 = vrot.slane %v3643_v0, 1  ;;  %v3662_v35 = vrot.slane %v3661_v25, 1  ;;  %v3668_v23 = vrot.slane %v3667_v32, 1  ;;  %v9481_v44 = vmax.f32 %v3637_v22, %v3638_v60 }
 0xa72   : > { %5139 = vmatprep.subr.bf16.mxu0 %v11633_v15  ;;  %v3674_v48 = vrot.slane %v3673_v9, 1  ;;  %v9479_v13 = vmax.f32 %v3631_v3, %v3632_v26  ;;  %v9485_v34 = vmax.f32 %v3649_v55, %v3650_v38  ;;  %v9487_v10 = vmax.f32 %v3655_v29, %v3656_v52 }
 0xa73   : > { %v9483_v8 = vmax.f32 %v3643_v0, %v3644_v59  ;;  %v9489_v14 = vmax.f32 %v3661_v25, %v3662_v35  ;;  %v9491_v24 = vmax.f32 %v3667_v32, %v3668_v23  ;;  %v11634_v6 = vpack.c.bf16 %v9358_v4, %v9347_v2 }
 0xa74   : > { %v9493_v50 = vmax.f32 %v3673_v9, %v3674_v48  ;;  %v3676_v39 = vrot.slane %v9399_v41, 4  ;;  %v3682_v40 = vrot.slane %v9402_v42, 4  ;;  %v3688_v12 = vrot.slane %v9405_v21, 4 }
 0xa75   : > { %5141 = vmatpush3.bf16.msra.mxu0 %v11634_v6  ;;  %v3694_v57 = vrot.slane %v9408_v17, 4  ;;  %v11635_v37 = vpack.c.bf16 %v9368_v54, %v9363_v30  ;;  %v3700_v58 = vrot.slane %v9411_v16, 4  ;;  %v3706_v53 = vrot.slane %v9414_v51, 4 }
 0xa76   : > { %v3712_v33 = vrot.slane %v9417_v7, 4  ;;  %v3718_v2 = vrot.slane %v9420_v27, 4  ;;  %v3677_v4 = vmax.f32 %v9399_v41, %v3676_v39  ;;  %v3683_v47 = vmax.f32 %v9402_v42, %v3682_v40 }
 0xa77   : > { %5143 = vmatprep.subr.bf16.mxu0 %v11635_v37  ;;  %v3689_v19 = vmax.f32 %v9405_v21, %v3688_v12  ;;  %v3695_v63 = vmax.f32 %v9408_v17, %v3694_v57  ;;  %v3701_v49 = vmax.f32 %v9411_v16, %v3700_v58  ;;  %v3707_v30 = vmax.f32 %v9414_v51, %v3706_v53 }
 0xa78   : > { %v3713_v54 = vmax.f32 %v9417_v7, %v3712_v33  ;;  %v3719_v3 = vmax.f32 %v9420_v27, %v3718_v2  ;;  %v3678_v22 = vrot.slane %v3677_v4, 2  ;;  %v3684_v0 = vrot.slane %v3683_v47, 2 }
 0xa79   : > { %v3690_v55 = vrot.slane %v3689_v19, 2  ;;  %v3696_v29 = vrot.slane %v3695_v63, 2  ;;  %v3702_v25 = vrot.slane %v3701_v49, 2  ;;  %v3708_v41 = vrot.slane %v3707_v30, 2 }
 0xa7a   : > { %v3714_v32 = vrot.slane %v3713_v54, 2  ;;  %v3720_v42 = vrot.slane %v3719_v3, 2  ;;  %v3679_v9 = vmax.f32 %v3677_v4, %v3678_v22  ;;  %v3685_v21 = vmax.f32 %v3683_v47, %v3684_v0 }
 0xa7b   : > { %v3691_v31 = vmax.f32 %v3689_v19, %v3690_v55  ;;  %v3697_v17 = vmax.f32 %v3695_v63, %v3696_v29  ;;  %v3703_v26 = vmax.f32 %v3701_v49, %v3702_v25  ;;  %v3709_v16 = vmax.f32 %v3707_v30, %v3708_v41 }
 0xa7c   : > { %v3715_v60 = vmax.f32 %v3713_v54, %v3714_v32  ;;  %v3721_v51 = vmax.f32 %v3719_v3, %v3720_v42  ;;  %v3680_v59 = vrot.slane %v3679_v9, 1  ;;  %v3686_v7 = vrot.slane %v3685_v21, 1 }
 0xa7d   : > { %v3692_v38 = vrot.slane %v3691_v31, 1  ;;  %v3698_v27 = vrot.slane %v3697_v17, 1  ;;  %v3704_v15 = vrot.slane %v3703_v26, 1  ;;  %v3710_v52 = vrot.slane %v3709_v16, 1 }
 0xa7e   : > { %v3716_v35 = vrot.slane %v3715_v60, 1  ;;  %v3722_v23 = vrot.slane %v3721_v51, 1  ;;  %v9517_v48 = vmax.f32 %v3679_v9, %v3680_v59  ;;  %v9519_v6 = vmax.f32 %v3685_v21, %v3686_v7 }
 0xa7f   : > { %v9521_v39 = vmax.f32 %v3691_v31, %v3692_v38  ;;  %v9523_v40 = vmax.f32 %v3697_v17, %v3698_v27  ;;  %v9525_v12 = vmax.f32 %v3703_v26, %v3704_v15  ;;  %v9527_v57 = vmax.f32 %v3709_v16, %v3710_v52 }
 0xa80   : > { %v9529_v37 = vmax.f32 %v3715_v60, %v3716_v35  ;;  %v9531_v58 = vmax.f32 %v3721_v51, %v3722_v23  ;;  %v3724_v53 = vrot.slane %v9423_v43, 4  ;;  %v3730_v33 = vrot.slane %v9426_v46, 4 }
 0xa81   : > { %v3736_v2 = vrot.slane %v9429_v5, 4  ;;  %v3742_v4 = vrot.slane %v9432_v62, 4  ;;  %v3748_v47 = vrot.slane %v9435_v36, 4  ;;  %v3754_v19 = vrot.slane %v9438_v56, 4 }
 0xa82   : > { %v3760_v63 = vrot.slane %v9441_v28, 4  ;;  %v3766_v49 = vrot.slane %v9444_v18, 4  ;;  %v3725_v30 = vmax.f32 %v9423_v43, %v3724_v53  ;;  %v3731_v54 = vmax.f32 %v9426_v46, %v3730_v33 }
 0xa83   : > { %v3737_v3 = vmax.f32 %v9429_v5, %v3736_v2  ;;  %v3743_v22 = vmax.f32 %v9432_v62, %v3742_v4  ;;  %v3749_v0 = vmax.f32 %v9435_v36, %v3748_v47  ;;  %v3755_v55 = vmax.f32 %v9438_v56, %v3754_v19 }
 0xa84   : > { %v3761_v29 = vmax.f32 %v9441_v28, %v3760_v63  ;;  %v3767_v25 = vmax.f32 %v9444_v18, %v3766_v49  ;;  %v3726_v41 = vrot.slane %v3725_v30, 2  ;;  %v3732_v32 = vrot.slane %v3731_v54, 2 }
 0xa85   : > { %v3738_v42 = vrot.slane %v3737_v3, 2  ;;  %v3744_v9 = vrot.slane %v3743_v22, 2  ;;  %v3750_v21 = vrot.slane %v3749_v0, 2  ;;  %v3756_v43 = vrot.slane %v3755_v55, 2 }
 0xa86   : > { %v3762_v31 = vrot.slane %v3761_v29, 2  ;;  %v3768_v46 = vrot.slane %v3767_v25, 2  ;;  %v3727_v17 = vmax.f32 %v3725_v30, %v3726_v41  ;;  %v3733_v5 = vmax.f32 %v3731_v54, %v3732_v32 }
 0xa87   : > { %v3739_v26 = vmax.f32 %v3737_v3, %v3738_v42  ;;  %v3745_v62 = vmax.f32 %v3743_v22, %v3744_v9  ;;  %v3751_v16 = vmax.f32 %v3749_v0, %v3750_v21  ;;  %v3757_v36 = vmax.f32 %v3755_v55, %v3756_v43  ;;  %v11636_v3 = vld [vmem:[#allocation62_spill] sm:$0xff]  ;;  %v11637_v0 = vld [vmem:[#allocation73_spill] sm:$0xff] }
 0xa88   : > { %v3763_v60 = vmax.f32 %v3761_v29, %v3762_v31  ;;  %v3769_v56 = vmax.f32 %v3767_v25, %v3768_v46  ;;  %v3728_v51 = vrot.slane %v3727_v17, 1  ;;  %v3734_v28 = vrot.slane %v3733_v5, 1  ;;  %v11638_v29 = vld [vmem:[#allocation57_spill] sm:$0xff] }
 0xa89   : > { %v3740_v59 = vrot.slane %v3739_v26, 1  ;;  %v3746_v18 = vrot.slane %v3745_v62, 1  ;;  %v3752_v7 = vrot.slane %v3751_v16, 1  ;;  %v3758_v38 = vrot.slane %v3757_v36, 1 }
 0xa8a   : > { %v3764_v27 = vrot.slane %v3763_v60, 1  ;;  %v3770_v15 = vrot.slane %v3769_v56, 1  ;;  %v9549_v52 = vmax.f32 %v3727_v17, %v3728_v51  ;;  %v9551_v35 = vmax.f32 %v3733_v5, %v3734_v28 }
 0xa8b   : > { %v9553_v23 = vmax.f32 %v3739_v26, %v3740_v59  ;;  %v9555_v53 = vmax.f32 %v3745_v62, %v3746_v18  ;;  %v9557_v33 = vmax.f32 %v3751_v16, %v3752_v7  ;;  %v9559_v2 = vmax.f32 %v3757_v36, %v3758_v38 }
 0xa8c   : > { %v9561_v4 = vmax.f32 %v3763_v60, %v3764_v27  ;;  %v9563_v47 = vmax.f32 %v3769_v56, %v3770_v15  ;;  %v3772_v19 = vrot.slane %v9447_v45, 4  ;;  %v3778_v63 = vrot.slane %v9450_v1, 4 }
 0xa8d   : > { %v3784_v49 = vrot.slane %v9453_v11, 4  ;;  %v3790_v30 = vrot.slane %v9456_v20, 4  ;;  %v3796_v54 = vrot.slane %v9459_v61, 4  ;;  %v3802_v22 = vrot.slane %v11636_v3, 4 }
 0xa8e   : > { %v3808_v55 = vrot.slane %v11637_v0, 4  ;;  %v3814_v25 = vrot.slane %v11638_v29, 4  ;;  %v3773_v41 = vmax.f32 %v9447_v45, %v3772_v19  ;;  %v3779_v32 = vmax.f32 %v9450_v1, %v3778_v63 }
 0xa8f   : > { %v3785_v42 = vmax.f32 %v9453_v11, %v3784_v49  ;;  %v3791_v9 = vmax.f32 %v9456_v20, %v3790_v30  ;;  %v3797_v21 = vmax.f32 %v9459_v61, %v3796_v54  ;;  %v3803_v43 = vmax.f32 %v11636_v3, %v3802_v22 }
 0xa90   : > { %v3809_v31 = vmax.f32 %v11637_v0, %v3808_v55  ;;  %v3815_v46 = vmax.f32 %v11638_v29, %v3814_v25  ;;  %v3774_v17 = vrot.slane %v3773_v41, 2  ;;  %v3780_v5 = vrot.slane %v3779_v32, 2 }
 0xa91   : > { %v3786_v26 = vrot.slane %v3785_v42, 2  ;;  %v3792_v62 = vrot.slane %v3791_v9, 2  ;;  %v3798_v16 = vrot.slane %v3797_v21, 2  ;;  %v3804_v45 = vrot.slane %v3803_v43, 2 }
 0xa92   : > { %v3810_v36 = vrot.slane %v3809_v31, 2  ;;  %v3816_v1 = vrot.slane %v3815_v46, 2  ;;  %v3775_v60 = vmax.f32 %v3773_v41, %v3774_v17  ;;  %v3781_v11 = vmax.f32 %v3779_v32, %v3780_v5  ;;  %v11639_v41 = vld [vmem:[#allocation200_spill] sm:$0xff]  ;;  %v11640_v32 = vld [vmem:[#allocation53_spill] sm:$0xff]  ;;  %v11645_v17 = vld [vmem:[#allocation202_spill] sm:$0xff] }
 0xa93   : > { %v3787_v56 = vmax.f32 %v3785_v42, %v3786_v26  ;;  %v3793_v20 = vmax.f32 %v3791_v9, %v3792_v62  ;;  %v3799_v51 = vmax.f32 %v3797_v21, %v3798_v16  ;;  %v3805_v61 = vmax.f32 %v3803_v43, %v3804_v45  ;;  %v11642_v21 = vld [vmem:[#allocation138_spill] sm:$0xff]  ;;  %v11643_v43 = vld [vmem:[#allocation60_spill] sm:$0xff]  ;;  %v11646_v5 = vld [vmem:[#allocation69_spill] sm:$0xff] }
 0xa94   : > { %v3811_v28 = vmax.f32 %v3809_v31, %v3810_v36  ;;  %v3817_v59 = vmax.f32 %v3815_v46, %v3816_v1  ;;  %v3776_v18 = vrot.slane %v3775_v60, 1  ;;  %v3782_v7 = vrot.slane %v3781_v11, 1  ;;  %v11648_v16 = vld [vmem:[#allocation170_spill] sm:$0xff] }
 0xa95   : > { %v3788_v38 = vrot.slane %v3787_v56, 1  ;;  %v3794_v27 = vrot.slane %v3793_v20, 1  ;;  %v3800_v15 = vrot.slane %v3799_v51, 1  ;;  %v3806_v19 = vrot.slane %v3805_v61, 1  ;;  %v11649_v45 = vld [vmem:[#allocation74_spill] sm:$0xff] }
 0xa96   : > { %v3812_v63 = vrot.slane %v3811_v28, 1  ;;  %v3818_v49 = vrot.slane %v3817_v59, 1  ;;  %v3777_v30 = vmax.f32 %v3775_v60, %v3776_v18  ;;  %v3783_v54 = vmax.f32 %v3781_v11, %v3782_v7  ;;  %v11652_v60 = vld [vmem:[#allocation83_spill] sm:$0xff]  ;;  %v11661_v7 = vld [vmem:[#allocation92_spill] sm:$0xff] }
 0xa97   : > { %v3789_v3 = vmax.f32 %v3787_v56, %v3788_v38  ;;  %v3795_v22 = vmax.f32 %v3793_v20, %v3794_v27  ;;  %v3801_v0 = vmax.f32 %v3799_v51, %v3800_v15  ;;  %v3807_v55 = vmax.f32 %v3805_v61, %v3806_v19  ;;  %v11655_v20 = vld [vmem:[#allocation93_spill] sm:$0xff]  ;;  %v11663_v15 = vld [vmem:[#allocation216_spill] sm:$0xff] }
 0xa98   : > { %v3813_v29 = vmax.f32 %v3811_v28, %v3812_v63  ;;  %v9581_v25 = vmax.f32 %v3817_v59, %v3818_v49  ;;  %v11641_v42 = vmax.f32 %v11639_v41, %v11640_v32  ;;  %v11644_v31 = vmax.f32 %v11642_v21, %v11643_v43  ;;  %v11658_v28 = vld [vmem:[#allocation85_spill] sm:$0xff]  ;;  %v11666_v49 = vld [vmem:[#allocation16_spill] sm:$0xff] }
 0xa99   : > { %v11647_v26 = vmax.f32 %v11645_v17, %v11646_v5  ;;  %v11650_v36 = vmax.f32 %v11648_v16, %v11649_v45 }
 0xa9a   : > { %v9587_v9 = vmax.f32 %v11641_v42, %v9479_v13  ;;  %v9593_v46 = vmax.f32 %v11644_v31, %v9481_v44  ;;  %v11651_v13 = vld [vmem:[#allocation208_spill] sm:$0xff]  ;;  %v11654_v44 = vld [vmem:[#allocation203_spill] sm:$0xff]  ;;  %v11669_v42 = vld [vmem:[#allocation17_spill] sm:$0xff] }
 0xa9b   : > { %v9599_v62 = vmax.f32 %v11647_v26, %v9483_v8  ;;  %v9605_v1 = vmax.f32 %v11650_v36, %v9485_v34  ;;  %v11653_v11 = vmax.f32 %v11651_v13, %v11652_v60  ;;  %v11656_v51 = vmax.f32 %v11654_v44, %v11655_v20  ;;  %v11657_v8 = vld [vmem:[#allocation171_spill] sm:$0xff]  ;;  %v11676_v26 = vld [vmem:[#allocation124_spill] sm:$0xff] }
 0xa9c   : > { %v11659_v59 = vmax.f32 %v11657_v8, %v11658_v28  ;;  %v11660_v34 = vld [vmem:[#allocation179_spill] sm:$0xff] }
 0xa9d   : > { %v9611_v56 = vmax.f32 %v11653_v11, %v9487_v10  ;;  %v9617_v61 = vmax.f32 %v11656_v51, %v9489_v14  ;;  %v11662_v38 = vmax.f32 %v11660_v34, %v11661_v7  ;;  %v11664_v10 = vld [vmem:[#allocation100_spill] sm:$0xff]  ;;  %v11673_v31 = vld [vmem:[#allocation123_spill] sm:$0xff] }
 0xa9e   : > { %v3828_v18 = vmax.f32 %v11659_v59, %v9517_v48  ;;  %v11665_v19 = vmax.f32 %v11663_v15, %v11664_v10  ;;  %v11667_v14 = vld [vmem:[#allocation108_spill] sm:$0xff]  ;;  %v11670_v48 = vld [vmem:[#allocation110_spill] sm:$0xff]  ;;  %v11679_v36 = vld [vmem:[#allocation3_spill] sm:$0xff] }
 0xa9f   : > { %v3829_v27 = vmax.f32 %v11662_v38, %v9519_v6  ;;  %v11668_v41 = vmax.f32 %v11666_v49, %v11667_v14  ;;  %v11671_v21 = vmax.f32 %v11669_v42, %v11670_v48  ;;  %v11672_v6 = vld [vmem:[#allocation20_spill] sm:$0xff]  ;;  %v11682_v11 = vld [vmem:[#allocation7_spill] sm:$0xff] }
 0xaa0   : > { %v9631_v63 = vmax.f32 %v11665_v19, %v9521_v39  ;;  %v11674_v17 = vmax.f32 %v11672_v6, %v11673_v31  ;;  %v11675_v39 = vld [vmem:[#allocation21_spill] sm:$0xff]  ;;  %v11684_v51 = vld [vmem:[#allocation8_spill] sm:$0xff]  ;;  %v11690_v38 = vld [vmem:[#allocation23_spill] sm:$0xff] }
 0xaa1   : > { %v9637_v32 = vmax.f32 %v11668_v41, %v9523_v40  ;;  %v9643_v43 = vmax.f32 %v11671_v21, %v9525_v12  ;;  %v11677_v16 = vmax.f32 %v11675_v39, %v11676_v26  ;;  %v11678_v40 = vld [vmem:[#allocation4_spill] sm:$0xff]  ;;  %v11681_v12 = vld [vmem:[#allocation6_spill] sm:$0xff]  ;;  %v11694_v19 = vld [vmem:[#allocation29_spill] sm:$0xff] }
 0xaa2   : > { %v9649_v5 = vmax.f32 %v11674_v17, %v9527_v57  ;;  %v11680_v13 = vmax.f32 %v11678_v40, %v11679_v36  ;;  %v11683_v44 = vmax.f32 %v11681_v12, %v11682_v11  ;;  %v11685_v57 = vld [vmem:[#allocation9_spill] sm:$0xff]  ;;  %v11687_v59 = vld [vmem:[#allocation12_spill] sm:$0xff]  ;;  %v11697_v41 = vld [vmem:[#allocation35_spill] sm:$0xff] }
 0xaa3   : > { %v9655_v45 = vmax.f32 %v11677_v16, %v9529_v37  ;;  %v11686_v8 = vmax.f32 %v11684_v51, %v11685_v57  ;;  %v11688_v37 = vld [vmem:[#allocation13_spill] sm:$0xff]  ;;  %v11700_v21 = vld [vmem:[#allocation18_spill] sm:$0xff]  ;;  %v11703_v39 = vld [vmem:[#allocation28_spill] sm:$0xff] }
 0xaa4   : > { %v3836_v60 = vmax.f32 %v11680_v13, %v9549_v52  ;;  %v3837_v20 = vmax.f32 %v11683_v44, %v9551_v35  ;;  %v11689_v34 = vmax.f32 %v11687_v59, %v11688_v37  ;;  %v11691_v52 = vld [vmem:[#allocation14_spill] sm:$0xff]  ;;  %v11693_v35 = vld [vmem:[#allocation31_spill] sm:$0xff]  ;;  %v11705_v16 = vld [vmem:[#allocation36_spill] sm:$0xff] }
 0xaa5   : > { %v9669_v28 = vmax.f32 %v11686_v8, %v9553_v23  ;;  %v11692_v15 = vmax.f32 %v11690_v38, %v11691_v52  ;;  %v11695_v49 = vmax.f32 %v11693_v35, %v11694_v19  ;;  %v11696_v23 = vld [vmem:[#allocation37_spill] sm:$0xff]  ;;  %v11702_v17 = vld [vmem:[#allocation30_spill] sm:$0xff]  ;;  %v11709_v12 = vld [vmem:[#allocation43_spill] sm:$0xff] }
 0xaa6   : > { %v9675_v7 = vmax.f32 %v11689_v34, %v9555_v53  ;;  %v11698_v42 = vmax.f32 %v11696_v23, %v11697_v41  ;;  %v11699_v53 = vld [vmem:[#allocation25_spill] sm:$0xff]  ;;  %v11706_v40 = vld [vmem:[#allocation34_spill] sm:$0xff]  ;;  %v11715_v59 = vld [vmem:[#allocation59_spill] sm:$0xff] }
 0xaa7   : > { %v9681_v10 = vmax.f32 %v11692_v15, %v9557_v33  ;;  %v9687_v14 = vmax.f32 %v11695_v49, %v9559_v2  ;;  %v11701_v6 = vmax.f32 %v11699_v53, %v11700_v21  ;;  %v11704_v33 = vmax.f32 %v11702_v17, %v11703_v39  ;;  %v11708_v2 = vld [vmem:[#allocation42_spill] sm:$0xff]  ;;  %v11718_v38 = vld [vmem:[#allocation64_spill] sm:$0xff]  ;;  %v11722_v49 = vld [vmem:[#allocation67_spill] sm:$0xff] }
 0xaa8   : > { %v9693_v48 = vmax.f32 %v11698_v42, %v9561_v4  ;;  %v11707_v36 = vmax.f32 %v11705_v16, %v11706_v40  ;;  %v11710_v11 = vmax.f32 %v11708_v2, %v11709_v12  ;;  %v11711_v4 = vld [vmem:[#allocation51_spill] sm:$0xff]  ;;  %v11712_v51 = vld [vmem:[#allocation46_spill] sm:$0xff]  ;;  %v11720_v15 = vld [vmem:[#allocation48_spill] sm:$0xff] }
 0xaa9   : > { %v3844_v31 = vmax.f32 %v11701_v6, %v3777_v30  ;;  %v3845_v26 = vmax.f32 %v11704_v33, %v3783_v54  ;;  %v11713_v57 = vmax.f32 %v11711_v4, %v11712_v51  ;;  %v11714_v30 = vld [vmem:[#allocation61_spill] sm:$0xff]  ;;  %v11717_v54 = vld [vmem:[#allocation66_spill] sm:$0xff]  ;;  %v4076_v35 = vmax.f32 %v9587_v9, %v11720_v15  ;;  %v11723_v23 = vld [vmem:[#allocation75_spill] sm:$0xff] }
 0xaaa   : > { %v9704_v13 = vmax.f32 %v11707_v36, %v3789_v3  ;;  %v9709_v44 = vmax.f32 %v11710_v11, %v3795_v22  ;;  %v11716_v37 = vmax.f32 %v11714_v30, %v11715_v59  ;;  %v11719_v52 = vmax.f32 %v11717_v54, %v11718_v38  ;;  %v11721_v22 = vld [vmem:[#allocation58_spill] sm:$0xff]  ;;  %v11725_v53 = vld [vmem:[#allocation91_spill] sm:$0xff]  ;;  %v11739_v30 = vld [vmem:[#allocation128_spill] sm:$0xff] }
 0xaab   : > { %v9714_v8 = vmax.f32 %v11713_v57, %v3801_v0  ;;  %v4077_v19 = vmax.f32 %v9593_v46, %v11721_v22  ;;  %v4078_v0 = vmax.f32 %v9599_v62, %v11722_v49  ;;  %v4079_v41 = vmax.f32 %v9605_v1, %v11723_v23  ;;  %v11724_v42 = vld [vmem:[#allocation78_spill] sm:$0xff]  ;;  %v11728_v9 = vld [vmem:[#allocation99_spill] sm:$0xff]  ;;  %v11729_v46 = vld [vmem:[#allocation105_spill] sm:$0xff] }
 0xaac   : > { %v9719_v34 = vmax.f32 %v11716_v37, %v3807_v55  ;;  %v9724_v3 = vmax.f32 %v11719_v52, %v3813_v29  ;;  %v4080_v55 = vmax.f32 %v9611_v56, %v11724_v42  ;;  %v4081_v21 = vmax.f32 %v9617_v61, %v11725_v53  ;;  %v11726_v29 = vld [vmem:[#allocation80_spill] sm:$0xff]  ;;  %v11727_v17 = vld [vmem:[#allocation90_spill] sm:$0xff]  ;;  %v11730_v62 = vld [vmem:[#allocation113_spill] sm:$0xff] }
 0xaad   : > { %v4084_v6 = vmax.f32 %v3828_v18, %v11726_v29  ;;  %v4085_v39 = vmax.f32 %v3829_v27, %v11727_v17  ;;  %v4086_v33 = vmax.f32 %v9631_v63, %v11728_v9  ;;  %v4087_v16 = vmax.f32 %v9637_v32, %v11729_v46  ;;  %v11731_v1 = vld [vmem:[#allocation116_spill] sm:$0xff]  ;;  %v11732_v56 = vld [vmem:[#allocation189_spill] sm:$0xff]  ;;  %v4570_v61 = vld [vmem:[%s9945_s6 + $0x160] sm:$0xff] }
 0xaae   : > { %v4088_v40 = vmax.f32 %v9643_v43, %v11730_v62  ;;  %v4089_v36 = vmax.f32 %v9649_v5, %v11731_v1  ;;  %v4092_v2 = vmax.f32 %v3836_v60, %v11732_v56  ;;  %v11733_v18 = vld [vmem:[#allocation149_spill] sm:$0xff]  ;;  %v11734_v12 = vld [vmem:[#allocation190_spill] sm:$0xff]  ;;  %v11736_v4 = vld [vmem:[#allocation191_spill] sm:$0xff]  ;;  %v4101_v59 = vmax.f32 %v3845_v26, %v11739_v30 }
 0xaaf   : > { %v4093_v27 = vmax.f32 %v3837_v20, %v11733_v18  ;;  %v4094_v63 = vmax.f32 %v9669_v28, %v11734_v12  ;;  %v11735_v11 = vld [vmem:[#allocation150_spill] sm:$0xff]  ;;  %v4096_v43 = vmax.f32 %v9681_v10, %v11736_v4  ;;  %v4571_v5 = vld [vmem:[%s9945_s6 + $0x168] sm:$0xff]  ;;  %v4588_v60 = vld [vmem:[%s9945_s6 + $0x1f0] sm:$0xff]  ;;  %v4147_v49 = vsel %vm2776_vm10, %v4085_v39, %v4084_v6 }
 0xab0   : > { %v4095_v32 = vmax.f32 %v9675_v7, %v11735_v11  ;;  %v4589_v20 = vld [vmem:[%s9945_s6 + $0x1f8] sm:$0xff]  ;;  %v11737_v51 = vld [vmem:[#allocation126_spill] sm:$0xff]  ;;  %v11740_v10 = vld [vmem:[#allocation27_spill] sm:$0xff]  ;;  %v5144_v42 = vpack.c.bf16 %v4571_v5, %v4570_v61  ;;  %v4140_v56 = vsel %vm2776_vm10, %v4077_v19, %v4076_v35  ;;  %v4148_v12 = vsel %vm2778_vm11, %v4086_v33, %v4147_v49 }
 0xab1   : > { %v4097_v28 = vmax.f32 %v9687_v14, %v11737_v51  ;;  %v11738_v57 = vld [vmem:[#allocation194_spill] sm:$0xff]  ;;  %v4102_v37 = vmax.f32 %v9704_v13, %v11740_v10  ;;  %v4572_v54 = vld [vmem:[%s9945_s6 + $0x170] sm:$0xff]  ;;  %v4573_v38 = vld [vmem:[%s9945_s6 + $0x178] sm:$0xff]  ;;  %v4154_v13 = vsel %vm2776_vm10, %v4093_v27, %v4092_v2  ;;  %v5146_v53 = vpack.c.bf16 %v4589_v20, %v4588_v60 }
 0xab2   : > { %v4100_v7 = vmax.f32 %v3844_v31, %v11738_v57  ;;  %v11741_v52 = vld [vmem:[#allocation26_spill] sm:$0xff]  ;;  %v11742_v22 = vld [vmem:[#allocation32_spill] sm:$0xff]  ;;  %v5148_v29 = vpack.c.bf16 %v4573_v38, %v4572_v54  ;;  %5145 = vmatpush3.bf16.msra.mxu0 %v5144_v42  ;;  %v11749_v6 = vld [vmem:[#allocation5_spill] sm:$0xff]  ;;  %v4149_v19 = vsel %vm2780_vm12, %v4087_v16, %v4148_v12  ;;  %v4155_v54 = vsel %vm2778_vm11, %v4094_v63, %v4154_v13 }
 0xab3   : > { %v4103_v15 = vmax.f32 %v9709_v44, %v11741_v52  ;;  %v4104_v14 = vmax.f32 %v9714_v8, %v11742_v22  ;;  %v11743_v31 = vld [vmem:[#allocation40_spill] sm:$0xff]  ;;  %v11744_v17 = vld [vmem:[#allocation82_spill] sm:$0xff]  ;;  %v11746_v44 = vld [vmem:[#allocation215_spill] sm:$0xff]  ;;  %5147 = vmatprep.subr.bf16.mxu0 %v5146_v53 }
 0xab4   : > { %v4105_v26 = vmax.f32 %v9719_v34, %v11743_v31  ;;  %v4161_v23 = vsel %vm2776_vm10, %v4101_v59, %v4100_v7  ;;  %v11745_v9 = vld [vmem:[#allocation144_spill] sm:$0xff]  ;;  %v11747_v62 = vld [vmem:[#allocation98_spill] sm:$0xff]  ;;  %v4141_v34 = vsel %vm2778_vm11, %v4078_v0, %v4140_v56  ;;  %v11758_v57 = vld [vmem:[#allocation81_spill] sm:$0xff] }
 0xab5   : > { %v3571_v46 = vmax.f32 %v11745_v9, %v11744_v17  ;;  %v11748_v1 = vmax.f32 %v11746_v44, %v11747_v62  ;;  %v11750_v39 = vld [vmem:[#allocation2_spill] sm:$0xff]  ;;  %v11752_v18 = vld [vmem:[#allocation140_spill] sm:$0xff]  ;;  %v4142_v35 = vsel %vm2780_vm12, %v4079_v41, %v4141_v34  ;;  %v11759_v41 = vld [vmem:[#allocation193_spill] sm:$0xff]  ;;  %v4162_v53 = vsel %vm2778_vm11, %v4102_v37, %v4161_v23 }
 0xab6   : > { %v11751_v2 = vmax.f32 %v11749_v6, %v11750_v39  ;;  %v4090_v27 = vmax.f32 %v9655_v45, %v11752_v18  ;;  %v11753_v4 = vld [vmem:[#allocation96_spill] sm:$0xff]  ;;  %v4143_v0 = vsel %vm2782_vm13, %v4080_v55, %v4142_v35  ;;  %v11755_v20 = vld [vmem:[#allocation22_spill] sm:$0xff]  ;;  %v11756_v45 = vld [vmem:[#allocation19_spill] sm:$0xff]  ;;  %v4098_v16 = vmax.f32 %v9693_v48, %v11759_v41  ;;  %5149 = vmatpush3.bf16.msra.mxu0 %v5148_v29 }
 0xab7   : > { %v3826_v8 = vmax.f32 %v11748_v1, %v9491_v24  ;;  %v3827_v11 = vmax.f32 %v3571_v46, %v9493_v50  ;;  %v11754_v5 = vld [vmem:[#allocation148_spill] sm:$0xff]  ;;  %v11757_v51 = vmax.f32 %v11755_v20, %v11756_v45  ;;  %v4144_v50 = vsel %vm2784_vm14, %v4081_v21, %v4143_v0  ;;  %v11762_v52 = vld [vmem:[#allocation49_spill] sm:$0xff]  ;;  %v11764_v49 = vld [vmem:[#allocation47_spill] sm:$0xff] }
 0xab8   : > { %v3835_v61 = vmax.f32 %v11751_v2, %v9531_v58  ;;  %v4150_v58 = vsel %vm2782_vm13, %v4088_v40, %v4149_v19  ;;  %v11760_v40 = vld [vmem:[#allocation127_spill] sm:$0xff]  ;;  %v4156_v21 = vsel %vm2780_vm12, %v4095_v32, %v4155_v54  ;;  %v4106_v42 = vmax.f32 %v9724_v3, %v11764_v49  ;;  %v11765_v63 = vld [vmem:[#allocation182_spill] sm:$0xff]  ;;  %v11768_v23 = vld [vmem:[#allocation209_spill] sm:$0xff] }
 0xab9   : > { %v4082_v24 = vmax.f32 %v3826_v8, %v11753_v4  ;;  %v3843_v33 = vmax.f32 %v11757_v51, %v9563_v47  ;;  %v4083_v7 = vmax.f32 %v3827_v11, %v11758_v57  ;;  %v4151_v30 = vsel %vm2784_vm14, %v4089_v36, %v4150_v58  ;;  %v11761_v36 = vld [vmem:[#allocation50_spill] sm:$0xff]  ;;  %v11770_v62 = vld [vmem:[#allocation183_spill] sm:$0xff]  ;;  %v4327_v58 = vld [vmem:[%s9946_s7 + $0x10] sm:$0xff] }
 0xaba   : > { %v4091_v60 = vmax.f32 %v3835_v61, %v11754_v5  ;;  %v4152_v59 = vsel %vm2786_vm15, %v4090_v27, %v4151_v30  ;;  %v11763_v22 = vmax.f32 %v11761_v36, %v11762_v52  ;;  %v4157_v31 = vsel %vm2782_vm13, %v4096_v43, %v4156_v21  ;;  %v11767_v17 = vld [vmem:[#allocation54_spill] sm:$0xff]  ;;  %v4328_v45 = vld [vmem:[%s9946_s7 + $0x18] sm:$0xff] }
 0xabb   : > { %v4145_v55 = vsel %vm2786_vm15, %v4082_v24, %v4144_v50  ;;  %v4099_v10 = vmax.f32 %v3843_v33, %v11760_v40  ;;  %v11766_v13 = vmax.f32 %v11765_v63, 0.0  ;;  %v4158_v29 = vsel %vm2784_vm14, %v4097_v28, %v4157_v31  ;;  %v4325_v5 = vld [vmem:[%s9946_s7] sm:$0xff]  ;;  %v4331_v31 = vld [vmem:[%s9946_s7 + $0x30] sm:$0xff]  ;;  %v4332_v49 = vld [vmem:[%s9946_s7 + $0x38] sm:$0xff] }
 0xabc   : > { %v4146_v47 = vsel %vm2788_vm0, %v4083_v7, %v4145_v55  ;;  %v4153_v38 = vsel %vm2788_vm0, %v4091_v60, %v4152_v59  ;;  %v3851_v48 = vmax.f32 %v11763_v22, %v9581_v25  ;;  %v4163_v9 = vsel %vm2780_vm12, %v4103_v15, %v4162_v53  ;;  %v11772_v15 = vld [vmem:[#allocation210_spill] sm:$0xff]  ;;  %v4326_v60 = vld [vmem:[%s9946_s7 + $0x8] sm:$0xff] }
 0xabd   : > { %4240 = vmatprep.mubr.f32.mxu0 %v4146_v47  ;;  %v4159_v25 = vsel %vm2786_vm15, %v4098_v16, %v4158_v29  ;;  %v4164_v46 = vsel %vm2782_vm13, %v4104_v14, %v4163_v9  ;;  %v11769_v44 = vmax.f32 %v11768_v23, 0.0  ;;  %v11771_v1 = vmax.f32 %v11770_v62, 0.0  ;;  %v4329_v52 = vld [vmem:[%s9946_s7 + $0x20] sm:$0xff]  ;;  %v4330_v22 = vld [vmem:[%s9946_s7 + $0x28] sm:$0xff] }
 0xabe   : > { %4241 = vmatmul.mubr.f32.vlgmr.msra.gmra.mrb[20].mxu0 %v11766_v13  ;;  %v4107_v32 = vmax.f32 %v3851_v48, %v11767_v17  ;;  %v4160_v43 = vsel %vm2788_vm0, %v4099_v10, %v4159_v25  ;;  %v4165_v3 = vsel %vm2784_vm14, %v4105_v26, %v4164_v46  ;;  %v11773_v8 = vmax.f32 %v11772_v15, 0.0  ;;  %v4591_v26 = vld [vmem:[%s9947_s8 + $0xb] ss:$0 sm:$0xff]  ;;  %v4333_v53 = vld [vmem:[%s9946_s7 + $0x40] sm:$0xff]  ;;  %v4335_v13 = vld [vmem:[%s9946_s7 + $0x50] sm:$0xff] }
 0xabf   : > { %4245 = vmatprep.mubr.f32.mxu0 %v4153_v38  ;;  %v4166_v37 = vsel %vm2786_vm15, %v4106_v42, %v4165_v3  ;;  %v5150_v20 = vpack.c.bf16 %v4326_v60, %v4325_v5  ;;  %v5154_v51 = vpack.c.bf16 %v4328_v45, %v4327_v58  ;;  %v5158_v48 = vpack.c.bf16 %v4330_v22, %v4329_v52  ;;  %v4334_v63 = vld [vmem:[%s9946_s7 + $0x48] sm:$0xff]  ;;  %v4336_v17 = vld [vmem:[%s9946_s7 + $0x58] sm:$0xff]  ;;  %v4337_v9 = vld [vmem:[%s9946_s7 + $0x60] sm:$0xff] }
 0xac0   : > { %v4167_v28 = vsel %vm2788_vm0, %v4107_v32, %v4166_v37  ;;  %v5162_v42 = vpack.c.bf16 %v4332_v49, %v4331_v31  ;;  %v5166_v29 = vpack.c.bf16 %v4334_v63, %v4333_v53  ;;  %v5170_v32 = vpack.c.bf16 %v4336_v17, %v4335_v13  ;;  %v4338_v25 = vld [vmem:[%s9946_s7 + $0x68] sm:$0xff]  ;;  %v4340_v3 = vld [vmem:[%s9946_s7 + $0x78] sm:$0xff] }
 0xac1   : > { %5151 = vmatprep.subr.bf16.mxu1 %v5150_v20  ;;  %v5174_v46 = vpack.c.bf16 %v4338_v25, %v4337_v9 }
 0xac2   : > { %4246 = vmatmul.mubr.f32.gmra.mrb[22].mxu0 %v11769_v44  ;;  %5153 = vmatpush3.bf16.msra.mxu1 %v5150_v20 }
 0xac3   : > { %4250 = vmatprep.mubr.f32.mxu0 %v4160_v43  ;;  %5155 = vmatprep.subr.bf16.mxu1 %v5154_v51  ;;  %v4339_v43 = vld [vmem:[%s9946_s7 + $0x70] sm:$0xff] }
 0xac4   : > { %v5178_v37 = vpack.c.bf16 %v4340_v3, %v4339_v43 }
 0xac6   : > { %4251 = vmatmul.mubr.f32.gmra.mrb[24].mxu0 %v11771_v1  ;;  %5157 = vmatpush3.bf16.msra.mxu1 %v5154_v51 }
 0xac7   : > { %4255 = vmatprep.mubr.f32.mxu0 %v4167_v28  ;;  %5159 = vmatprep.subr.bf16.mxu1 %v5158_v48 }
 0xaca   : > { %4256 = vmatmul.mubr.f32.gmra.mrb[26].mxu0 %v11773_v8  ;;  %5161 = vmatpush3.bf16.msra.mxu1 %v5158_v48 }
 0xacb   : > { %5163 = vmatprep.subr.bf16.mxu1 %v5162_v42 }
 0xace   : > { %5165 = vmatpush3.bf16.msra.mxu1 %v5162_v42 }
 0xacf   : > { %5167 = vmatprep.subr.bf16.mxu1 %v5166_v29 }
 0xad2   : > { %5169 = vmatpush3.bf16.msra.mxu1 %v5166_v29 }
 0xad3   : > { %5171 = vmatprep.subr.bf16.mxu1 %v5170_v32 }
 0xad6   : > { %5173 = vmatpush3.bf16.msra.mxu1 %v5170_v32 }
 0xad7   : > { %5175 = vmatprep.subr.bf16.mxu1 %v5174_v46 }
 0xada   : > { %5177 = vmatpush3.bf16.msra.mxu1 %v5174_v46 }
 0xadb   : > { %5179 = vmatprep.subr.bf16.mxu1 %v5178_v37 }
 0xade   : > { %5181 = vmatpush3.bf16.msra.mxu1 %v5178_v37 }
 0xb91   : > { %v4756_v14 = vpop.f32.mrb[20].mxu0 }
 0xb92   : > { %v4757_v56 = vpop.f32.mrb[21].mxu0 }
 0xb93   : > { %v4758_v34 = vadd.f32 %v4757_v56, %v4756_v14 }
 0xb95   : > { %v4243_v6 = vadd.f32 %v4758_v34, %v4591_v26  ;;  %v4759_v39 = vpop.f32.mrb[22].mxu0 }
 0xb96   : > { %v4760_v2 = vpop.f32.mrb[23].mxu0 }
 0xb97   : > { %v4761_v61 = vadd.f32 %v4760_v2, %v4759_v39  ;;  %4261 = vadd.xlane.f32.xlu0 %v4243_v6  ;;  %v4592_v2 = vld [vmem:[%s9947_s8 + $0xc] ss:$0 sm:$0xff] }
 0xb99   : > { %v4248_v18 = vadd.f32 %v4761_v61, %v4591_v26  ;;  %v4762_v27 = vpop.f32.mrb[24].mxu0 }
 0xb9a   : > { %v4763_v12 = vpop.f32.mrb[25].mxu0 }
 0xb9b   : > { %v4764_v11 = vadd.f32 %v4763_v12, %v4762_v27  ;;  %4263 = vadd.xlane.f32.xlu1 %v4248_v18 }
 0xb9d   : > { %v4253_v4 = vadd.f32 %v4764_v11, %v4591_v26  ;;  %v4765_v24 = vpop.f32.mrb[26].mxu0 }
 0xb9e   : > { %v4766_v35 = vpop.f32.mrb[27].mxu0 }
 0xb9f   : > { %v4767_v19 = vadd.f32 %v4766_v35, %v4765_v24  ;;  %4265 = vadd.xlane.f32.xlu0 %v4253_v4 }
 0xba1   : > { %v4258_v0 = vadd.f32 %v4767_v19, %v4591_v26 }
 0xba3   : > { %4267 = vadd.xlane.f32.xlu1 %v4258_v0 }
 0xc24   : > { %v4262_v33 = vpop.xlane.xlu0 %4261 }
 0xc25   : > { %v4269_v57 = vmul.f32 0.0078125, %v4262_v33 }
 0xc27   : > { %v9867_v7 = vsub.f32 %v4243_v6, %v4269_v57 }
 0xc28   : > { %v4264_v50 = vpop.xlane.xlu1 %4263 }
 0xc29   : > { %v4270_v30 = vmul.f32 0.0078125, %v4264_v50  ;;  %v4277_v41 = vmul.f32 %v9867_v7, %v9867_v7 }
 0xc2b   : > { %v9871_v16 = vsub.f32 %v4248_v18, %v4270_v30  ;;  %4281 = vadd.xlane.f32.xlu0 %v4277_v41  ;;  %v4593_v18 = vld [vmem:[%s9947_s8 + $0xd] ss:$0 sm:$0xff]  ;;  %v4594_v30 = vld [vmem:[%s9947_s8 + $0xe] ss:$0 sm:$0xff] }
 0xc2c   : > { %v4266_v55 = vpop.xlane.xlu0 %4265 }
 0xc2d   : > { %v4271_v59 = vmul.f32 0.0078125, %v4266_v55  ;;  %v4278_v40 = vmul.f32 %v9871_v16, %v9871_v16 }
 0xc2f   : > { %v9875_v10 = vsub.f32 %v4253_v4, %v4271_v59  ;;  %4283 = vadd.xlane.f32.xlu1 %v4278_v40 }
 0xc30   : > { %v4268_v54 = vpop.xlane.xlu1 %4267 }
 0xc31   : > { %v4272_v47 = vmul.f32 0.0078125, %v4268_v54  ;;  %v4279_v38 = vmul.f32 %v9875_v10, %v9875_v10 }
 0xc33   : > { %v9879_v21 = vsub.f32 %v4258_v0, %v4272_v47  ;;  %4285 = vadd.xlane.f32.xlu0 %v4279_v38 }
 0xc35   : > { %v4280_v36 = vmul.f32 %v9879_v21, %v9879_v21 }
 0xc37   : > { %4287 = vadd.xlane.f32.xlu1 %v4280_v36 }
 0xcb8   : > { %v4282_v23 = vpop.xlane.xlu0 %4281 }
 0xcb9   : > { %v4289_v44 = vmul.f32 0.0078125, %v4282_v23 }
 0xcbb   : > { %v4293_v28 = vadd.f32 1e-05, %v4289_v44 }
 0xcbc   : > { %v4284_v62 = vpop.xlane.xlu1 %4283 }
 0xcbd   : > { %5230 = vrsqrt.f32 %v4293_v28  ;;  %v4290_v1 = vmul.f32 0.0078125, %v4284_v62 }
 0xcbf   : > { %v4294_v15 = vadd.f32 1e-05, %v4290_v1 }
 0xcc0   : > { %v4286_v8 = vpop.xlane.xlu0 %4285 }
 0xcc1   : > { %5232 = vrsqrt.f32 %v4294_v15  ;;  %v4291_v14 = vmul.f32 0.0078125, %v4286_v8 }
 0xcc3   : > { %v4295_v26 = vadd.f32 1e-05, %v4291_v14 }
 0xcc4   : > { %v4288_v56 = vpop.xlane.xlu1 %4287 }
 0xcc5   : > { %5234 = vrsqrt.f32 %v4295_v26  ;;  %v4292_v34 = vmul.f32 0.0078125, %v4288_v56 }
 0xcc7   : > { %v5231_v6 = vpop.eup %5230  ;;  %v4296_v39 = vadd.f32 1e-05, %v4292_v34 }
 0xcc8   : > { %v4301_v61 = vmul.f32 %v5231_v6, %v9867_v7 }
 0xcc9   : > { %5236 = vrsqrt.f32 %v4296_v39 }
 0xcca   : > { %v4309_v27 = vmul.f32 %v4592_v2, %v4301_v61 }
 0xccb   : > { %v5233_v12 = vpop.eup %5232 }
 0xccc   : > { %v4302_v11 = vmul.f32 %v5233_v12, %v9871_v16  ;;  %v4317_v4 = vadd.f32 %v4593_v18, %v4309_v27 }
 0xcce   : > { %v4321_v24 = vmax.f32 %v4317_v4, 0.0  ;;  %v4310_v35 = vmul.f32 %v4592_v2, %v4302_v11 }
 0xccf   : > { %v5235_v19 = vpop.eup %5234 }
 0xcd0   : > { %4968 = vmatprep.mubr.f32.mxu1 %v4321_v24  ;;  %v4318_v0 = vadd.f32 %v4593_v18, %v4310_v35  ;;  %v4303_v5 = vmul.f32 %v5235_v19, %v9875_v10 }
 0xcd2   : > { %v4322_v60 = vmax.f32 %v4318_v0, 0.0  ;;  %v4311_v58 = vmul.f32 %v4592_v2, %v4303_v5 }
 0xcd3   : > { %v5237_v20 = vpop.eup %5236 }
 0xcd4   : > { %4969 = vmatmul.mubr.f32.vlgmr.msra.gmra.mrb[12].mxu1 %v4322_v60  ;;  %v4319_v45 = vadd.f32 %v4593_v18, %v4311_v58  ;;  %v4304_v51 = vmul.f32 %v5237_v20, %v9879_v21 }
 0xcd6   : > { %v4323_v33 = vmax.f32 %v4319_v45, 0.0  ;;  %v4312_v57 = vmul.f32 %v4592_v2, %v4304_v51 }
 0xcd8   : > { %4971 = vmatprep.mubr.f32.mxu1 %v4323_v33  ;;  %v4320_v7 = vadd.f32 %v4593_v18, %v4312_v57 }
 0xcda   : > { %v4324_v50 = vmax.f32 %v4320_v7, 0.0 }
 0xcdc   : > { %4972 = vmatmul.mubr.f32.gmra.mrb[14].mxu1 %v4324_v50 }
 0xda7   : > { %v4970_v41 = vpop.f32.mrb[12].mxu1 }
 0xda8   : > { %v4417_v16 = vadd.f32 %v4970_v41, %v4594_v30  ;;  %v4411_v55 = vpop.f32.mrb[13].mxu1 }
 0xda9   : > { %v4412_v59 = vadd.f32 %v4594_v30, %v4411_v55 }
 0xdaa   : > { %4431 = vst [vmem:[%s352_s14 + $0x8] sm:$0xff] %v4417_v16 }
 0xdab   : > { %4430 = vst [vmem:[%s352_s14] sm:$0xff] %v4412_v59 }
 0xdaf   : > { %v4973_v40 = vpop.f32.mrb[14].mxu1 }
 0xdb0   : > { %v4427_v10 = vadd.f32 %v4973_v40, %v4594_v30  ;;  %v4421_v54 = vpop.f32.mrb[15].mxu1 }
 0xdb1   : > { %v4422_v47 = vadd.f32 %v4594_v30, %v4421_v54 }
 0xdb2   : > { %4433 = vst [vmem:[%s352_s14 + $0x18] sm:$0xff] %v4427_v10 }
 0xdb3   : > { %4432 = vst [vmem:[%s352_s14 + $0x10] sm:$0xff] %v4422_v47 }
 0xdb4 PF: > { %s19_s30 = sadd.s32 1, %s5246_s30  }
 0xdb5   : > { %p16_p4 = scmp.ge.s32.totalorder %s19_s30, 4  }
 0xdb7   :  { %18 = sbr.rel (!%p16_p4) target bundleno = 1 (0x1), region = 91 }

</bundles_post_ra>
